<compile_context>
chip_gen: v7x
topology: tpu7x:2x2x1
jax: 0.10.0
libtpu: 0.0.40
codegen_flags: <defaults>
</compile_context>

<pallas_src>
import numpy as np

import jax
import jax.numpy as jnp
from jax import lax
from jax.experimental import pallas as pl
from jax.experimental.pallas import tpu as pltpu

# ---------------- model hyper-parameters (small, consistent with forward) ----
P = 4                       # backbone stand-in patch size (stride-4 conv stem)
C_IN = 3                    # image channels
C_BACKBONE = 64             # backbone.backbone_channel_output (small stand-in)
SPATIAL_DIM = 16            # spatial tokens per frame  (== (16/P)**2)
TEMPORAL_DIM = 4            # number of frames T
TOKEN_DIM = 32              # token embedding dim
NUM_HEADS = 4
HEAD_DIM = TOKEN_DIM // NUM_HEADS
FF_DIM = 64                 # feedforward_dim (small)
NUM_CLASSES = 10
CLS_PAD = 128               # classifier output padded to one full lane tile
LN_EPS = 1e-5
NEG_INF = -1e30             # additive mask value, kept in f32 score space


# ---------------- fused stem + divided-transformer kernel --------------------
def _fused_transformer_kernel(
    patches_ref,                       # (M, P*P*C_IN)  f32
    sp_bias_ref, tm_bias_ref,          # (M, M) f32 additive attention biases
    bb_w_ref, bb_b_ref,                # (P*P*C_IN, C_B) bf16, (1, C_B) f32
    tok_w_ref, tok_b_ref,              # (C_B, D) bf16, (1, D) f32
    wq_ref, wk_ref, wv_ref,            # (2, D, D) bf16   (scale folded into wq)
    bq_ref, bk_ref, bv_ref,            # (2, 1, D) f32    (scale folded into bq)
    wo_ref, bo_ref,                    # (2, D, D) bf16, (2, 1, D) f32
    ln1_g_ref, ln1_b_ref,              # (2, 1, D) f32
    w1_ref, b1_ref,                    # (2, D, FF) bf16, (2, 1, FF) f32
    w2_ref, b2_ref,                    # (2, FF, D) bf16, (2, 1, D) f32
    ln2_g_ref, ln2_b_ref,              # (2, 1, D) f32
    out_ref,                           # (M, D) f32
):
    f32, bf16 = jnp.float32, jnp.bfloat16

    # ---- backbone stand-in (stride-P PxP conv == patch matmul) + relu -------
    feat = jnp.dot(patches_ref[...].astype(bf16), bb_w_ref[...],
                   preferred_element_type=f32)
    feat = jnp.maximum(feat + bb_b_ref[...], 0.0)                    # (M, C_B)
    # ---- LateTemporalTokenizer stand-in: per-position linear projection -----
    x = jnp.dot(feat.astype(bf16), tok_w_ref[...],
                preferred_element_type=f32) + tok_b_ref[...]         # (M, D)

    def layer_norm(h, g, b):
        mu = jnp.mean(h, axis=-1, keepdims=True)
        hc = h - mu
        var = jnp.mean(hc * hc, axis=-1, keepdims=True)
        return hc * lax.rsqrt(var + LN_EPS) * g + b

    def encoder_layer(h, l, bias):
        # Post-norm TransformerEncoderLayer (relu FFN, dropout = identity).
        hb = h.astype(bf16)
        # Fused Q/K/V projections: one (D,D) matmul each (scale pre-folded
        # into wq/bq), bf16 MXU operands, f32 accumulation.
        q = jnp.dot(hb, wq_ref[l], preferred_element_type=f32) + bq_ref[l]
        k = jnp.dot(hb, wk_ref[l], preferred_element_type=f32) + bk_ref[l]
        v = jnp.dot(hb, wv_ref[l], preferred_element_type=f32) + bv_ref[l]
        qb, kb, vb = q.astype(bf16), k.astype(bf16), v.astype(bf16)

        heads = []
        for hd in range(NUM_HEADS):
            lo, hi = hd * HEAD_DIM, (hd + 1) * HEAD_DIM
            # scores: lane-dense (M, M) f32 tile, q_h @ k_h^T (+ block bias)
            s = lax.dot_general(qb[:, lo:hi], kb[:, lo:hi],
                                (((1,), (1,)), ((), ())),
                                preferred_element_type=f32)
            s = s + bias
            s = s - jnp.max(s, axis=-1, keepdims=True)
            p = jnp.exp(s)
            p = p * pl.reciprocal(jnp.sum(p, axis=-1, keepdims=True),
                                  approx=True)
            heads.append(jnp.dot(p.astype(bf16), vb[:, lo:hi],
                                 preferred_element_type=f32))        # (M, Dh)
        # Fused output projection on the concatenated head outputs.
        o = jnp.concatenate(heads, axis=-1)                          # (M, D)
        attn = jnp.dot(o.astype(bf16), wo_ref[l],
                       preferred_element_type=f32) + bo_ref[l]
        h = layer_norm(h + attn, ln1_g_ref[l], ln1_b_ref[l])
        ffn = jnp.maximum(
            jnp.dot(h.astype(bf16), w1_ref[l],
                    preferred_element_type=f32) + b1_ref[l], 0.0)
        ffn = jnp.dot(ffn.astype(bf16), w2_ref[l],
                      preferred_element_type=f32) + b2_ref[l]
        h = layer_norm(h + ffn, ln2_g_ref[l], ln2_b_ref[l])
        return h

    # Each bias is loaded only inside the layer that uses it.
    x = encoder_layer(x, 0, sp_bias_ref[...])   # divided layer 0: spatial attn
    x = encoder_layer(x, 1, tm_bias_ref[...])   # divided layer 1: temporal attn
    out_ref[...] = x.astype(out_ref.dtype)


# ---------------- classifier kernel (lane-dense padded output, bf16 MXU) -----
def _classifier_kernel(x_ref, w_ref, b_ref, o_ref):
    o_ref[...] = (jnp.dot(x_ref[...].astype(jnp.bfloat16), w_ref[...],
                          preferred_element_type=jnp.float32)
                  + b_ref[...]).astype(o_ref.dtype)


# ---------------- full forward pass ------------------------------------------
@jax.jit
def divided_video_transformer_forward(x, params):
    """x: (B, T, 3, H_in, W_in) float32 -> logits (B, NUM_CLASSES)."""
    B, T, C, H_in, W_in = x.shape
    Hp, Wp = H_in // P, W_in // P
    S = Hp * Wp
    M = B * T * S

    # NCHW -> NHWC + patchify in plain JAX glue (tiny at this size).
    # TODO(synk): at real resolutions express this gather through a BlockSpec
    #             index_map so the transpose never materialises in HBM.
    xb = x.reshape(B * T, C, H_in, W_in).transpose(0, 2, 3, 1)
    patches = xb.reshape(B * T, Hp, P, Wp, P, C).transpose(0, 1, 3, 2, 4, 5)
    patches = patches.reshape(M, P * P * C)

    # Additive block-diagonal biases for "divided" attention on the flat
    # (b, t, s)-ordered token slab, built with numpy at trace time (shapes are
    # static under jit) so they are embedded as constants — no runtime cost.
    r = np.arange(M)
    same_bt = (r[:, None] // S) == (r[None, :] // S)          # same (batch, frame)
    per_b = S * T
    same_bs = ((r[:, None] // per_b) == (r[None, :] // per_b)) & \
              ((r[:, None] % S) == (r[None, :] % S))          # same (batch, spatial)
    sp_bias = jnp.asarray(np.where(same_bt, 0.0, NEG_INF), dtype=jnp.float32)
    tm_bias = jnp.asarray(np.where(same_bs, 0.0, NEG_INF), dtype=jnp.float32)

    Lp = params["layers"]
    tokens = pl.pallas_call(
        _fused_transformer_kernel,
        out_shape=jax.ShapeDtypeStruct((M, TOKEN_DIM), jnp.float32),
        compiler_params=pltpu.CompilerParams(
            # explicit budget so the same kernel also fits v7x's smaller VMEM
            vmem_limit_bytes=32 * 1024 * 1024),
    )(patches, sp_bias, tm_bias,
      params["backbone_w"], params["backbone_b"],
      params["tok_w"], params["tok_b"],
      Lp["w_q"], Lp["w_k"], Lp["w_v"],
      Lp["b_q"], Lp["b_k"], Lp["b_v"],
      Lp["w_o"], Lp["b_o"],
      Lp["ln1_g"], Lp["ln1_b"],
      Lp["w1"], Lp["b1"], Lp["w2"], Lp["b2"],
      Lp["ln2_g"], Lp["ln2_b"])                                      # (M, D)

    # flatten(start_dim=1): rows are already (b, t, s)-ordered, row-major, so
    # this matches t.reshape(B, T, S, D).flatten(start_dim=1) and is a free
    # metadata reshape in XLA (same HBM buffer as `tokens`).
    flat = tokens.reshape(B, T * S * TOKEN_DIM)
    logits_padded = pl.pallas_call(
        _classifier_kernel,
        out_shape=jax.ShapeDtypeStruct((B, CLS_PAD), jnp.float32),
    )(flat, params["cls_w"], params["cls_b"])
    return logits_padded[:, :NUM_CLASSES]


# ---------------- deterministic synthetic parameters -------------------------
def init_params(key):
    keys = iter(jax.random.split(key, 64))
    bf16, f32 = jnp.bfloat16, jnp.float32

    def nrm(shape, scale=0.02):
        return (scale * jax.random.normal(next(keys), shape)).astype(f32)

    attn_scale = 1.0 / (HEAD_DIM ** 0.5)

    def layer_params():
        # Fused (D, D) projections == column-stacked per-head weights of
        # nn.MultiheadAttention; the 1/sqrt(head_dim) score scale is folded
        # into w_q / b_q so the kernel never multiplies score tiles.
        return dict(
            w_q=(nrm((TOKEN_DIM, TOKEN_DIM)) * attn_scale).astype(bf16),
            w_k=nrm((TOKEN_DIM, TOKEN_DIM)).astype(bf16),
            w_v=nrm((TOKEN_DIM, TOKEN_DIM)).astype(bf16),
            b_q=nrm((1, TOKEN_DIM)) * attn_scale,
            b_k=nrm((1, TOKEN_DIM)),
            b_v=nrm((1, TOKEN_DIM)),
            w_o=nrm((TOKEN_DIM, TOKEN_DIM)).astype(bf16),
            b_o=nrm((1, TOKEN_DIM)),
            ln1_g=jnp.ones((1, TOKEN_DIM), f32),
            ln1_b=jnp.zeros((1, TOKEN_DIM), f32),
            w1=nrm((TOKEN_DIM, FF_DIM)).astype(bf16),
            b1=nrm((1, FF_DIM)),
            w2=nrm((FF_DIM, TOKEN_DIM)).astype(bf16),
            b2=nrm((1, TOKEN_DIM)),
            ln2_g=jnp.ones((1, TOKEN_DIM), f32),
            ln2_b=jnp.zeros((1, TOKEN_DIM), f32),
        )

    spatial, temporal = layer_params(), layer_params()
    # Stack the two divided-transformer layers along a leading axis so the
    # fused kernel indexes them with a static layer id (fewer refs / DMAs).
    layers = {k: jnp.stack([spatial[k], temporal[k]], axis=0) for k in spatial}

    cls_w = nrm((SPATIAL_DIM * TEMPORAL_DIM * TOKEN_DIM, NUM_CLASSES))
    cls_b = nrm((1, NUM_CLASSES))

    return dict(
        backbone_w=nrm((P * P * C_IN, C_BACKBONE)).astype(bf16),
        backbone_b=nrm((1, C_BACKBONE)),
        tok_w=nrm((C_BACKBONE, TOKEN_DIM)).astype(bf16),
        tok_b=nrm((1, TOKEN_DIM)),
        layers=layers,
        # Lane-dense classifier output: pad 10 -> 128 columns once at init
        # (zeros), bf16 weights; the forward slices the first NUM_CLASSES
        # columns back off in JAX.
        cls_w=jnp.pad(cls_w, ((0, 0), (0, CLS_PAD - NUM_CLASSES))).astype(bf16),
        cls_b=jnp.pad(cls_b, ((0, 0), (0, CLS_PAD - NUM_CLASSES))),
    )


# ---------------- main --------------------------------------------------------
if __name__ == "__main__":
    key = jax.random.PRNGKey(0)
    pkey, xkey = jax.random.split(key)
    params = init_params(pkey)

    B, H_in, W_in = 2, 16, 16
    x = jax.random.normal(xkey, (B, TEMPORAL_DIM, C_IN, H_in, W_in),
                          dtype=jnp.float32)

    logits = divided_video_transformer_forward(x, params)
    logits = jax.block_until_ready(logits)
    assert logits.shape == (B, NUM_CLASSES)
    assert bool(jnp.all(jnp.isfinite(logits)))
    print("KERNEL_OK")
</pallas_src>

<mosaic_0001>
module attributes {stable_mosaic.version = 11 : i64} {
  func.func @_fused_transformer_kernel(%arg0: memref<128x48xf32, #tpu.memory_space<vmem>>, %arg1: memref<128x128xf32, #tpu.memory_space<vmem>>, %arg2: memref<128x128xf32, #tpu.memory_space<vmem>>, %arg3: memref<48x64xbf16, #tpu.memory_space<vmem>>, %arg4: memref<1x64xf32, #tpu.memory_space<vmem>>, %arg5: memref<64x32xbf16, #tpu.memory_space<vmem>>, %arg6: memref<1x32xf32, #tpu.memory_space<vmem>>, %arg7: memref<2x32x32xbf16, #tpu.memory_space<vmem>>, %arg8: memref<2x32x32xbf16, #tpu.memory_space<vmem>>, %arg9: memref<2x32x32xbf16, #tpu.memory_space<vmem>>, %arg10: memref<2x1x32xf32, #tpu.memory_space<vmem>>, %arg11: memref<2x1x32xf32, #tpu.memory_space<vmem>>, %arg12: memref<2x1x32xf32, #tpu.memory_space<vmem>>, %arg13: memref<2x32x32xbf16, #tpu.memory_space<vmem>>, %arg14: memref<2x1x32xf32, #tpu.memory_space<vmem>>, %arg15: memref<2x1x32xf32, #tpu.memory_space<vmem>>, %arg16: memref<2x1x32xf32, #tpu.memory_space<vmem>>, %arg17: memref<2x32x64xbf16, #tpu.memory_space<vmem>>, %arg18: memref<2x1x64xf32, #tpu.memory_space<vmem>>, %arg19: memref<2x64x32xbf16, #tpu.memory_space<vmem>>, %arg20: memref<2x1x32xf32, #tpu.memory_space<vmem>>, %arg21: memref<2x1x32xf32, #tpu.memory_space<vmem>>, %arg22: memref<2x1x32xf32, #tpu.memory_space<vmem>>, %arg23: memref<128x32xf32, #tpu.memory_space<vmem>>) attributes {dimension_semantics = [], scalar_prefetch = 0 : i64, scratch_operands = 0 : i64, tpu.core_type = #tpu.core_type<tc>} {
    %c0 = arith.constant 0 : index
    %c0_0 = arith.constant 0 : index
    %0 = vector.load %arg0[%c0, %c0_0] : memref<128x48xf32, #tpu.memory_space<vmem>>, vector<128x48xf32>
    %1 = arith.truncf %0 : vector<128x48xf32> to vector<128x48xbf16>
    %c0_1 = arith.constant 0 : index
    %c0_2 = arith.constant 0 : index
    %2 = vector.load %arg3[%c0_1, %c0_2] : memref<48x64xbf16, #tpu.memory_space<vmem>>, vector<48x64xbf16>
    %cst = arith.constant dense<0.000000e+00> : vector<128x64xf32>
    %3 = tpu.matmul %1, %2, %cst {dimension_numbers = #tpu.dot_dimension_numbers<[1], [0], [0], [1], [0, 0, 1, 1], [], []>} : vector<128x48xbf16>, vector<48x64xbf16>, vector<128x64xf32> -> vector<128x64xf32>
    %c0_3 = arith.constant 0 : index
    %c0_4 = arith.constant 0 : index
    %4 = vector.load %arg4[%c0_3, %c0_4] : memref<1x64xf32, #tpu.memory_space<vmem>>, vector<1x64xf32>
    %5 = vector.broadcast %4 : vector<1x64xf32> to vector<128x64xf32>
    %6 = arith.addf %3, %5 : vector<128x64xf32>
    %cst_5 = arith.constant 0.000000e+00 : f32
    %7 = vector.broadcast %cst_5 : f32 to vector<128x64xf32>
    %8 = arith.maximumf %6, %7 : vector<128x64xf32>
    %9 = arith.truncf %8 : vector<128x64xf32> to vector<128x64xbf16>
    %c0_6 = arith.constant 0 : index
    %c0_7 = arith.constant 0 : index
    %10 = vector.load %arg5[%c0_6, %c0_7] : memref<64x32xbf16, #tpu.memory_space<vmem>>, vector<64x32xbf16>
    %cst_8 = arith.constant dense<0.000000e+00> : vector<128x32xf32>
    %11 = tpu.matmul %9, %10, %cst_8 {dimension_numbers = #tpu.dot_dimension_numbers<[1], [0], [0], [1], [0, 0, 1, 1], [], []>} : vector<128x64xbf16>, vector<64x32xbf16>, vector<128x32xf32> -> vector<128x32xf32>
    %c0_9 = arith.constant 0 : index
    %c0_10 = arith.constant 0 : index
    %12 = vector.load %arg6[%c0_9, %c0_10] : memref<1x32xf32, #tpu.memory_space<vmem>>, vector<1x32xf32>
    %13 = vector.broadcast %12 : vector<1x32xf32> to vector<128x32xf32>
    %14 = arith.addf %11, %13 : vector<128x32xf32>
    %c0_11 = arith.constant 0 : index
    %c0_12 = arith.constant 0 : index
    %15 = vector.load %arg1[%c0_11, %c0_12] : memref<128x128xf32, #tpu.memory_space<vmem>>, vector<128x128xf32>
    %16 = arith.truncf %14 : vector<128x32xf32> to vector<128x32xbf16>
    %c0_13 = arith.constant 0 : index
    %c0_14 = arith.constant 0 : index
    %c0_15 = arith.constant 0 : index
    %17 = vector.load %arg7[%c0_13, %c0_14, %c0_15] : memref<2x32x32xbf16, #tpu.memory_space<vmem>>, vector<1x32x32xbf16>
    %18 = vector.shape_cast %17 : vector<1x32x32xbf16> to vector<32x32xbf16>
    %cst_16 = arith.constant dense<0.000000e+00> : vector<128x32xf32>
    %19 = tpu.matmul %16, %18, %cst_16 {dimension_numbers = #tpu.dot_dimension_numbers<[1], [0], [0], [1], [0, 0, 1, 1], [], []>} : vector<128x32xbf16>, vector<32x32xbf16>, vector<128x32xf32> -> vector<128x32xf32>
    %c0_17 = arith.constant 0 : index
    %c0_18 = arith.constant 0 : index
    %c0_19 = arith.constant 0 : index
    %20 = vector.load %arg10[%c0_17, %c0_18, %c0_19] : memref<2x1x32xf32, #tpu.memory_space<vmem>>, vector<1x1x32xf32>
    %21 = vector.shape_cast %20 : vector<1x1x32xf32> to vector<1x32xf32>
    %22 = vector.broadcast %21 : vector<1x32xf32> to vector<128x32xf32>
    %23 = arith.addf %19, %22 : vector<128x32xf32>
    %c0_20 = arith.constant 0 : index
    %c0_21 = arith.constant 0 : index
    %c0_22 = arith.constant 0 : index
    %24 = vector.load %arg8[%c0_20, %c0_21, %c0_22] : memref<2x32x32xbf16, #tpu.memory_space<vmem>>, vector<1x32x32xbf16>
    %25 = vector.shape_cast %24 : vector<1x32x32xbf16> to vector<32x32xbf16>
    %cst_23 = arith.constant dense<0.000000e+00> : vector<128x32xf32>
    %26 = tpu.matmul %16, %25, %cst_23 {dimension_numbers = #tpu.dot_dimension_numbers<[1], [0], [0], [1], [0, 0, 1, 1], [], []>} : vector<128x32xbf16>, vector<32x32xbf16>, vector<128x32xf32> -> vector<128x32xf32>
    %c0_24 = arith.constant 0 : index
    %c0_25 = arith.constant 0 : index
    %c0_26 = arith.constant 0 : index
    %27 = vector.load %arg11[%c0_24, %c0_25, %c0_26] : memref<2x1x32xf32, #tpu.memory_space<vmem>>, vector<1x1x32xf32>
    %28 = vector.shape_cast %27 : vector<1x1x32xf32> to vector<1x32xf32>
    %29 = vector.broadcast %28 : vector<1x32xf32> to vector<128x32xf32>
    %30 = arith.addf %26, %29 : vector<128x32xf32>
    %c0_27 = arith.constant 0 : index
    %c0_28 = arith.constant 0 : index
    %c0_29 = arith.constant 0 : index
    %31 = vector.load %arg9[%c0_27, %c0_28, %c0_29] : memref<2x32x32xbf16, #tpu.memory_space<vmem>>, vector<1x32x32xbf16>
    %32 = vector.shape_cast %31 : vector<1x32x32xbf16> to vector<32x32xbf16>
    %cst_30 = arith.constant dense<0.000000e+00> : vector<128x32xf32>
    %33 = tpu.matmul %16, %32, %cst_30 {dimension_numbers = #tpu.dot_dimension_numbers<[1], [0], [0], [1], [0, 0, 1, 1], [], []>} : vector<128x32xbf16>, vector<32x32xbf16>, vector<128x32xf32> -> vector<128x32xf32>
    %c0_31 = arith.constant 0 : index
    %c0_32 = arith.constant 0 : index
    %c0_33 = arith.constant 0 : index
    %34 = vector.load %arg12[%c0_31, %c0_32, %c0_33] : memref<2x1x32xf32, #tpu.memory_space<vmem>>, vector<1x1x32xf32>
    %35 = vector.shape_cast %34 : vector<1x1x32xf32> to vector<1x32xf32>
    %36 = vector.broadcast %35 : vector<1x32xf32> to vector<128x32xf32>
    %37 = arith.addf %33, %36 : vector<128x32xf32>
    %38 = arith.truncf %23 : vector<128x32xf32> to vector<128x32xbf16>
    %39 = arith.truncf %30 : vector<128x32xf32> to vector<128x32xbf16>
    %40 = arith.truncf %37 : vector<128x32xf32> to vector<128x32xbf16>
    %41 = vector.extract_strided_slice %38 {offsets = [0, 0], sizes = [128, 8], strides = [1, 1]} : vector<128x32xbf16> to vector<128x8xbf16>
    %42 = vector.extract_strided_slice %39 {offsets = [0, 0], sizes = [128, 8], strides = [1, 1]} : vector<128x32xbf16> to vector<128x8xbf16>
    %cst_34 = arith.constant dense<0.000000e+00> : vector<128x128xf32>
    %43 = tpu.matmul %41, %42, %cst_34 {dimension_numbers = #tpu.dot_dimension_numbers<[1], [1], [0], [0], [0, 0, 1, 0], [], []>} : vector<128x8xbf16>, vector<128x8xbf16>, vector<128x128xf32> -> vector<128x128xf32>
    %44 = arith.addf %43, %15 : vector<128x128xf32>
    %cst_35 = arith.constant dense<0xFF800000> : vector<128xf32>
    %45 = vector.multi_reduction <maximumf>, %44, %cst_35 [1] : vector<128x128xf32> to vector<128xf32>
    %46 = vector.shape_cast %45 : vector<128xf32> to vector<128x1xf32>
    %47 = vector.broadcast %46 : vector<128x1xf32> to vector<128x128xf32>
    %48 = arith.subf %44, %47 : vector<128x128xf32>
    %49 = math.exp %48 : vector<128x128xf32>
    %cst_36 = arith.constant dense<0.000000e+00> : vector<128xf32>
    %50 = vector.multi_reduction <add>, %49, %cst_36 [1] : vector<128x128xf32> to vector<128xf32>
    %51 = vector.shape_cast %50 : vector<128xf32> to vector<128x1xf32>
    %52 = tpu.reciprocal %51 {approx = true} : vector<128x1xf32> -> vector<128x1xf32>
    %53 = vector.broadcast %52 : vector<128x1xf32> to vector<128x128xf32>
    %54 = arith.mulf %49, %53 : vector<128x128xf32>
    %55 = arith.truncf %54 : vector<128x128xf32> to vector<128x128xbf16>
    %56 = vector.extract_strided_slice %40 {offsets = [0, 0], sizes = [128, 8], strides = [1, 1]} : vector<128x32xbf16> to vector<128x8xbf16>
    %cst_37 = arith.constant dense<0.000000e+00> : vector<128x8xf32>
    %57 = tpu.matmul %55, %56, %cst_37 {dimension_numbers = #tpu.dot_dimension_numbers<[1], [0], [0], [1], [0, 0, 1, 1], [], []>} : vector<128x128xbf16>, vector<128x8xbf16>, vector<128x8xf32> -> vector<128x8xf32>
    %58 = vector.extract_strided_slice %38 {offsets = [0, 8], sizes = [128, 8], strides = [1, 1]} : vector<128x32xbf16> to vector<128x8xbf16>
    %59 = vector.extract_strided_slice %39 {offsets = [0, 8], sizes = [128, 8], strides = [1, 1]} : vector<128x32xbf16> to vector<128x8xbf16>
    %cst_38 = arith.constant dense<0.000000e+00> : vector<128x128xf32>
    %60 = tpu.matmul %58, %59, %cst_38 {dimension_numbers = #tpu.dot_dimension_numbers<[1], [1], [0], [0], [0, 0, 1, 0], [], []>} : vector<128x8xbf16>, vector<128x8xbf16>, vector<128x128xf32> -> vector<128x128xf32>
    %61 = arith.addf %60, %15 : vector<128x128xf32>
    %cst_39 = arith.constant dense<0xFF800000> : vector<128xf32>
    %62 = vector.multi_reduction <maximumf>, %61, %cst_39 [1] : vector<128x128xf32> to vector<128xf32>
    %63 = vector.shape_cast %62 : vector<128xf32> to vector<128x1xf32>
    %64 = vector.broadcast %63 : vector<128x1xf32> to vector<128x128xf32>
    %65 = arith.subf %61, %64 : vector<128x128xf32>
    %66 = math.exp %65 : vector<128x128xf32>
    %cst_40 = arith.constant dense<0.000000e+00> : vector<128xf32>
    %67 = vector.multi_reduction <add>, %66, %cst_40 [1] : vector<128x128xf32> to vector<128xf32>
    %68 = vector.shape_cast %67 : vector<128xf32> to vector<128x1xf32>
    %69 = tpu.reciprocal %68 {approx = true} : vector<128x1xf32> -> vector<128x1xf32>
    %70 = vector.broadcast %69 : vector<128x1xf32> to vector<128x128xf32>
    %71 = arith.mulf %66, %70 : vector<128x128xf32>
    %72 = arith.truncf %71 : vector<128x128xf32> to vector<128x128xbf16>
    %73 = vector.extract_strided_slice %40 {offsets = [0, 8], sizes = [128, 8], strides = [1, 1]} : vector<128x32xbf16> to vector<128x8xbf16>
    %cst_41 = arith.constant dense<0.000000e+00> : vector<128x8xf32>
    %74 = tpu.matmul %72, %73, %cst_41 {dimension_numbers = #tpu.dot_dimension_numbers<[1], [0], [0], [1], [0, 0, 1, 1], [], []>} : vector<128x128xbf16>, vector<128x8xbf16>, vector<128x8xf32> -> vector<128x8xf32>
    %75 = vector.extract_strided_slice %38 {offsets = [0, 16], sizes = [128, 8], strides = [1, 1]} : vector<128x32xbf16> to vector<128x8xbf16>
    %76 = vector.extract_strided_slice %39 {offsets = [0, 16], sizes = [128, 8], strides = [1, 1]} : vector<128x32xbf16> to vector<128x8xbf16>
    %cst_42 = arith.constant dense<0.000000e+00> : vector<128x128xf32>
    %77 = tpu.matmul %75, %76, %cst_42 {dimension_numbers = #tpu.dot_dimension_numbers<[1], [1], [0], [0], [0, 0, 1, 0], [], []>} : vector<128x8xbf16>, vector<128x8xbf16>, vector<128x128xf32> -> vector<128x128xf32>
    %78 = arith.addf %77, %15 : vector<128x128xf32>
    %cst_43 = arith.constant dense<0xFF800000> : vector<128xf32>
    %79 = vector.multi_reduction <maximumf>, %78, %cst_43 [1] : vector<128x128xf32> to vector<128xf32>
    %80 = vector.shape_cast %79 : vector<128xf32> to vector<128x1xf32>
    %81 = vector.broadcast %80 : vector<128x1xf32> to vector<128x128xf32>
    %82 = arith.subf %78, %81 : vector<128x128xf32>
    %83 = math.exp %82 : vector<128x128xf32>
    %cst_44 = arith.constant dense<0.000000e+00> : vector<128xf32>
    %84 = vector.multi_reduction <add>, %83, %cst_44 [1] : vector<128x128xf32> to vector<128xf32>
    %85 = vector.shape_cast %84 : vector<128xf32> to vector<128x1xf32>
    %86 = tpu.reciprocal %85 {approx = true} : vector<128x1xf32> -> vector<128x1xf32>
    %87 = vector.broadcast %86 : vector<128x1xf32> to vector<128x128xf32>
    %88 = arith.mulf %83, %87 : vector<128x128xf32>
    %89 = arith.truncf %88 : vector<128x128xf32> to vector<128x128xbf16>
    %90 = vector.extract_strided_slice %40 {offsets = [0, 16], sizes = [128, 8], strides = [1, 1]} : vector<128x32xbf16> to vector<128x8xbf16>
    %cst_45 = arith.constant dense<0.000000e+00> : vector<128x8xf32>
    %91 = tpu.matmul %89, %90, %cst_45 {dimension_numbers = #tpu.dot_dimension_numbers<[1], [0], [0], [1], [0, 0, 1, 1], [], []>} : vector<128x128xbf16>, vector<128x8xbf16>, vector<128x8xf32> -> vector<128x8xf32>
    %92 = vector.extract_strided_slice %38 {offsets = [0, 24], sizes = [128, 8], strides = [1, 1]} : vector<128x32xbf16> to vector<128x8xbf16>
    %93 = vector.extract_strided_slice %39 {offsets = [0, 24], sizes = [128, 8], strides = [1, 1]} : vector<128x32xbf16> to vector<128x8xbf16>
    %cst_46 = arith.constant dense<0.000000e+00> : vector<128x128xf32>
    %94 = tpu.matmul %92, %93, %cst_46 {dimension_numbers = #tpu.dot_dimension_numbers<[1], [1], [0], [0], [0, 0, 1, 0], [], []>} : vector<128x8xbf16>, vector<128x8xbf16>, vector<128x128xf32> -> vector<128x128xf32>
    %95 = arith.addf %94, %15 : vector<128x128xf32>
    %cst_47 = arith.constant dense<0xFF800000> : vector<128xf32>
    %96 = vector.multi_reduction <maximumf>, %95, %cst_47 [1] : vector<128x128xf32> to vector<128xf32>
    %97 = vector.shape_cast %96 : vector<128xf32> to vector<128x1xf32>
    %98 = vector.broadcast %97 : vector<128x1xf32> to vector<128x128xf32>
    %99 = arith.subf %95, %98 : vector<128x128xf32>
    %100 = math.exp %99 : vector<128x128xf32>
    %cst_48 = arith.constant dense<0.000000e+00> : vector<128xf32>
    %101 = vector.multi_reduction <add>, %100, %cst_48 [1] : vector<128x128xf32> to vector<128xf32>
    %102 = vector.shape_cast %101 : vector<128xf32> to vector<128x1xf32>
    %103 = tpu.reciprocal %102 {approx = true} : vector<128x1xf32> -> vector<128x1xf32>
    %104 = vector.broadcast %103 : vector<128x1xf32> to vector<128x128xf32>
    %105 = arith.mulf %100, %104 : vector<128x128xf32>
    %106 = arith.truncf %105 : vector<128x128xf32> to vector<128x128xbf16>
    %107 = vector.extract_strided_slice %40 {offsets = [0, 24], sizes = [128, 8], strides = [1, 1]} : vector<128x32xbf16> to vector<128x8xbf16>
    %cst_49 = arith.constant dense<0.000000e+00> : vector<128x8xf32>
    %108 = tpu.matmul %106, %107, %cst_49 {dimension_numbers = #tpu.dot_dimension_numbers<[1], [0], [0], [1], [0, 0, 1, 1], [], []>} : vector<128x128xbf16>, vector<128x8xbf16>, vector<128x8xf32> -> vector<128x8xf32>
    %109 = tpu.concatenate %57, %74, %91, %108 in 1 : vector<128x8xf32>, vector<128x8xf32>, vector<128x8xf32>, vector<128x8xf32> -> vector<128x32xf32>
    %110 = arith.truncf %109 : vector<128x32xf32> to vector<128x32xbf16>
    %c0_50 = arith.constant 0 : index
    %c0_51 = arith.constant 0 : index
    %c0_52 = arith.constant 0 : index
    %111 = vector.load %arg13[%c0_50, %c0_51, %c0_52] : memref<2x32x32xbf16, #tpu.memory_space<vmem>>, vector<1x32x32xbf16>
    %112 = vector.shape_cast %111 : vector<1x32x32xbf16> to vector<32x32xbf16>
    %cst_53 = arith.constant dense<0.000000e+00> : vector<128x32xf32>
    %113 = tpu.matmul %110, %112, %cst_53 {dimension_numbers = #tpu.dot_dimension_numbers<[1], [0], [0], [1], [0, 0, 1, 1], [], []>} : vector<128x32xbf16>, vector<32x32xbf16>, vector<128x32xf32> -> vector<128x32xf32>
    %c0_54 = arith.constant 0 : index
    %c0_55 = arith.constant 0 : index
    %c0_56 = arith.constant 0 : index
    %114 = vector.load %arg14[%c0_54, %c0_55, %c0_56] : memref<2x1x32xf32, #tpu.memory_space<vmem>>, vector<1x1x32xf32>
    %115 = vector.shape_cast %114 : vector<1x1x32xf32> to vector<1x32xf32>
    %116 = vector.broadcast %115 : vector<1x32xf32> to vector<128x32xf32>
    %117 = arith.addf %113, %116 : vector<128x32xf32>
    %118 = arith.addf %14, %117 : vector<128x32xf32>
    %c0_57 = arith.constant 0 : index
    %c0_58 = arith.constant 0 : index
    %c0_59 = arith.constant 0 : index
    %119 = vector.load %arg15[%c0_57, %c0_58, %c0_59] : memref<2x1x32xf32, #tpu.memory_space<vmem>>, vector<1x1x32xf32>
    %120 = vector.shape_cast %119 : vector<1x1x32xf32> to vector<1x32xf32>
    %c0_60 = arith.constant 0 : index
    %c0_61 = arith.constant 0 : index
    %c0_62 = arith.constant 0 : index
    %121 = vector.load %arg16[%c0_60, %c0_61, %c0_62] : memref<2x1x32xf32, #tpu.memory_space<vmem>>, vector<1x1x32xf32>
    %122 = vector.shape_cast %121 : vector<1x1x32xf32> to vector<1x32xf32>
    %cst_63 = arith.constant dense<0.000000e+00> : vector<128xf32>
    %123 = vector.multi_reduction <add>, %118, %cst_63 [1] : vector<128x32xf32> to vector<128xf32>
    %124 = vector.shape_cast %123 : vector<128xf32> to vector<128x1xf32>
    %cst_64 = arith.constant 3.200000e+01 : f32
    %125 = vector.broadcast %cst_64 : f32 to vector<128x1xf32>
    %126 = arith.divf %124, %125 : vector<128x1xf32>
    %127 = vector.broadcast %126 : vector<128x1xf32> to vector<128x32xf32>
    %128 = arith.subf %118, %127 : vector<128x32xf32>
    %129 = arith.mulf %128, %128 : vector<128x32xf32>
    %cst_65 = arith.constant dense<0.000000e+00> : vector<128xf32>
    %130 = vector.multi_reduction <add>, %129, %cst_65 [1] : vector<128x32xf32> to vector<128xf32>
    %131 = vector.shape_cast %130 : vector<128xf32> to vector<128x1xf32>
    %cst_66 = arith.constant 3.200000e+01 : f32
    %132 = vector.broadcast %cst_66 : f32 to vector<128x1xf32>
    %133 = arith.divf %131, %132 : vector<128x1xf32>
    %cst_67 = arith.constant 9.99999974E-6 : f32
    %134 = vector.broadcast %cst_67 : f32 to vector<128x1xf32>
    %135 = arith.addf %133, %134 : vector<128x1xf32>
    %136 = math.rsqrt %135 : vector<128x1xf32>
    %137 = vector.broadcast %136 : vector<128x1xf32> to vector<128x32xf32>
    %138 = arith.mulf %128, %137 : vector<128x32xf32>
    %139 = vector.broadcast %120 : vector<1x32xf32> to vector<128x32xf32>
    %140 = arith.mulf %138, %139 : vector<128x32xf32>
    %141 = vector.broadcast %122 : vector<1x32xf32> to vector<128x32xf32>
    %142 = arith.addf %140, %141 : vector<128x32xf32>
    %143 = arith.truncf %142 : vector<128x32xf32> to vector<128x32xbf16>
    %c0_68 = arith.constant 0 : index
    %c0_69 = arith.constant 0 : index
    %c0_70 = arith.constant 0 : index
    %144 = vector.load %arg17[%c0_68, %c0_69, %c0_70] : memref<2x32x64xbf16, #tpu.memory_space<vmem>>, vector<1x32x64xbf16>
    %145 = vector.shape_cast %144 : vector<1x32x64xbf16> to vector<32x64xbf16>
    %cst_71 = arith.constant dense<0.000000e+00> : vector<128x64xf32>
    %146 = tpu.matmul %143, %145, %cst_71 {dimension_numbers = #tpu.dot_dimension_numbers<[1], [0], [0], [1], [0, 0, 1, 1], [], []>} : vector<128x32xbf16>, vector<32x64xbf16>, vector<128x64xf32> -> vector<128x64xf32>
    %c0_72 = arith.constant 0 : index
    %c0_73 = arith.constant 0 : index
    %c0_74 = arith.constant 0 : index
    %147 = vector.load %arg18[%c0_72, %c0_73, %c0_74] : memref<2x1x64xf32, #tpu.memory_space<vmem>>, vector<1x1x64xf32>
    %148 = vector.shape_cast %147 : vector<1x1x64xf32> to vector<1x64xf32>
    %149 = vector.broadcast %148 : vector<1x64xf32> to vector<128x64xf32>
    %150 = arith.addf %146, %149 : vector<128x64xf32>
    %cst_75 = arith.constant 0.000000e+00 : f32
    %151 = vector.broadcast %cst_75 : f32 to vector<128x64xf32>
    %152 = arith.maximumf %150, %151 : vector<128x64xf32>
    %153 = arith.truncf %152 : vector<128x64xf32> to vector<128x64xbf16>
    %c0_76 = arith.constant 0 : index
    %c0_77 = arith.constant 0 : index
    %c0_78 = arith.constant 0 : index
    %154 = vector.load %arg19[%c0_76, %c0_77, %c0_78] : memref<2x64x32xbf16, #tpu.memory_space<vmem>>, vector<1x64x32xbf16>
    %155 = vector.shape_cast %154 : vector<1x64x32xbf16> to vector<64x32xbf16>
    %cst_79 = arith.constant dense<0.000000e+00> : vector<128x32xf32>
    %156 = tpu.matmul %153, %155, %cst_79 {dimension_numbers = #tpu.dot_dimension_numbers<[1], [0], [0], [1], [0, 0, 1, 1], [], []>} : vector<128x64xbf16>, vector<64x32xbf16>, vector<128x32xf32> -> vector<128x32xf32>
    %c0_80 = arith.constant 0 : index
    %c0_81 = arith.constant 0 : index
    %c0_82 = arith.constant 0 : index
    %157 = vector.load %arg20[%c0_80, %c0_81, %c0_82] : memref<2x1x32xf32, #tpu.memory_space<vmem>>, vector<1x1x32xf32>
    %158 = vector.shape_cast %157 : vector<1x1x32xf32> to vector<1x32xf32>
    %159 = vector.broadcast %158 : vector<1x32xf32> to vector<128x32xf32>
    %160 = arith.addf %156, %159 : vector<128x32xf32>
    %161 = arith.addf %142, %160 : vector<128x32xf32>
    %c0_83 = arith.constant 0 : index
    %c0_84 = arith.constant 0 : index
    %c0_85 = arith.constant 0 : index
    %162 = vector.load %arg21[%c0_83, %c0_84, %c0_85] : memref<2x1x32xf32, #tpu.memory_space<vmem>>, vector<1x1x32xf32>
    %163 = vector.shape_cast %162 : vector<1x1x32xf32> to vector<1x32xf32>
    %c0_86 = arith.constant 0 : index
    %c0_87 = arith.constant 0 : index
    %c0_88 = arith.constant 0 : index
    %164 = vector.load %arg22[%c0_86, %c0_87, %c0_88] : memref<2x1x32xf32, #tpu.memory_space<vmem>>, vector<1x1x32xf32>
    %165 = vector.shape_cast %164 : vector<1x1x32xf32> to vector<1x32xf32>
    %cst_89 = arith.constant dense<0.000000e+00> : vector<128xf32>
    %166 = vector.multi_reduction <add>, %161, %cst_89 [1] : vector<128x32xf32> to vector<128xf32>
    %167 = vector.shape_cast %166 : vector<128xf32> to vector<128x1xf32>
    %cst_90 = arith.constant 3.200000e+01 : f32
    %168 = vector.broadcast %cst_90 : f32 to vector<128x1xf32>
    %169 = arith.divf %167, %168 : vector<128x1xf32>
    %170 = vector.broadcast %169 : vector<128x1xf32> to vector<128x32xf32>
    %171 = arith.subf %161, %170 : vector<128x32xf32>
    %172 = arith.mulf %171, %171 : vector<128x32xf32>
    %cst_91 = arith.constant dense<0.000000e+00> : vector<128xf32>
    %173 = vector.multi_reduction <add>, %172, %cst_91 [1] : vector<128x32xf32> to vector<128xf32>
    %174 = vector.shape_cast %173 : vector<128xf32> to vector<128x1xf32>
    %cst_92 = arith.constant 3.200000e+01 : f32
    %175 = vector.broadcast %cst_92 : f32 to vector<128x1xf32>
    %176 = arith.divf %174, %175 : vector<128x1xf32>
    %cst_93 = arith.constant 9.99999974E-6 : f32
    %177 = vector.broadcast %cst_93 : f32 to vector<128x1xf32>
    %178 = arith.addf %176, %177 : vector<128x1xf32>
    %179 = math.rsqrt %178 : vector<128x1xf32>
    %180 = vector.broadcast %179 : vector<128x1xf32> to vector<128x32xf32>
    %181 = arith.mulf %171, %180 : vector<128x32xf32>
    %182 = vector.broadcast %163 : vector<1x32xf32> to vector<128x32xf32>
    %183 = arith.mulf %181, %182 : vector<128x32xf32>
    %184 = vector.broadcast %165 : vector<1x32xf32> to vector<128x32xf32>
    %185 = arith.addf %183, %184 : vector<128x32xf32>
    %c0_94 = arith.constant 0 : index
    %c0_95 = arith.constant 0 : index
    %186 = vector.load %arg2[%c0_94, %c0_95] : memref<128x128xf32, #tpu.memory_space<vmem>>, vector<128x128xf32>
    %187 = arith.truncf %185 : vector<128x32xf32> to vector<128x32xbf16>
    %c1 = arith.constant 1 : index
    %c0_96 = arith.constant 0 : index
    %c0_97 = arith.constant 0 : index
    %188 = vector.load %arg7[%c1, %c0_96, %c0_97] : memref<2x32x32xbf16, #tpu.memory_space<vmem>>, vector<1x32x32xbf16>
    %189 = vector.shape_cast %188 : vector<1x32x32xbf16> to vector<32x32xbf16>
    %cst_98 = arith.constant dense<0.000000e+00> : vector<128x32xf32>
    %190 = tpu.matmul %187, %189, %cst_98 {dimension_numbers = #tpu.dot_dimension_numbers<[1], [0], [0], [1], [0, 0, 1, 1], [], []>} : vector<128x32xbf16>, vector<32x32xbf16>, vector<128x32xf32> -> vector<128x32xf32>
    %c1_99 = arith.constant 1 : index
    %c0_100 = arith.constant 0 : index
    %c0_101 = arith.constant 0 : index
    %191 = vector.load %arg10[%c1_99, %c0_100, %c0_101] : memref<2x1x32xf32, #tpu.memory_space<vmem>>, vector<1x1x32xf32>
    %192 = vector.shape_cast %191 : vector<1x1x32xf32> to vector<1x32xf32>
    %193 = vector.broadcast %192 : vector<1x32xf32> to vector<128x32xf32>
    %194 = arith.addf %190, %193 : vector<128x32xf32>
    %c1_102 = arith.constant 1 : index
    %c0_103 = arith.constant 0 : index
    %c0_104 = arith.constant 0 : index
    %195 = vector.load %arg8[%c1_102, %c0_103, %c0_104] : memref<2x32x32xbf16, #tpu.memory_space<vmem>>, vector<1x32x32xbf16>
    %196 = vector.shape_cast %195 : vector<1x32x32xbf16> to vector<32x32xbf16>
    %cst_105 = arith.constant dense<0.000000e+00> : vector<128x32xf32>
    %197 = tpu.matmul %187, %196, %cst_105 {dimension_numbers = #tpu.dot_dimension_numbers<[1], [0], [0], [1], [0, 0, 1, 1], [], []>} : vector<128x32xbf16>, vector<32x32xbf16>, vector<128x32xf32> -> vector<128x32xf32>
    %c1_106 = arith.constant 1 : index
    %c0_107 = arith.constant 0 : index
    %c0_108 = arith.constant 0 : index
    %198 = vector.load %arg11[%c1_106, %c0_107, %c0_108] : memref<2x1x32xf32, #tpu.memory_space<vmem>>, vector<1x1x32xf32>
    %199 = vector.shape_cast %198 : vector<1x1x32xf32> to vector<1x32xf32>
    %200 = vector.broadcast %199 : vector<1x32xf32> to vector<128x32xf32>
    %201 = arith.addf %197, %200 : vector<128x32xf32>
    %c1_109 = arith.constant 1 : index
    %c0_110 = arith.constant 0 : index
    %c0_111 = arith.constant 0 : index
    %202 = vector.load %arg9[%c1_109, %c0_110, %c0_111] : memref<2x32x32xbf16, #tpu.memory_space<vmem>>, vector<1x32x32xbf16>
    %203 = vector.shape_cast %202 : vector<1x32x32xbf16> to vector<32x32xbf16>
    %cst_112 = arith.constant dense<0.000000e+00> : vector<128x32xf32>
    %204 = tpu.matmul %187, %203, %cst_112 {dimension_numbers = #tpu.dot_dimension_numbers<[1], [0], [0], [1], [0, 0, 1, 1], [], []>} : vector<128x32xbf16>, vector<32x32xbf16>, vector<128x32xf32> -> vector<128x32xf32>
    %c1_113 = arith.constant 1 : index
    %c0_114 = arith.constant 0 : index
    %c0_115 = arith.constant 0 : index
    %205 = vector.load %arg12[%c1_113, %c0_114, %c0_115] : memref<2x1x32xf32, #tpu.memory_space<vmem>>, vector<1x1x32xf32>
    %206 = vector.shape_cast %205 : vector<1x1x32xf32> to vector<1x32xf32>
    %207 = vector.broadcast %206 : vector<1x32xf32> to vector<128x32xf32>
    %208 = arith.addf %204, %207 : vector<128x32xf32>
    %209 = arith.truncf %194 : vector<128x32xf32> to vector<128x32xbf16>
    %210 = arith.truncf %201 : vector<128x32xf32> to vector<128x32xbf16>
    %211 = arith.truncf %208 : vector<128x32xf32> to vector<128x32xbf16>
    %212 = vector.extract_strided_slice %209 {offsets = [0, 0], sizes = [128, 8], strides = [1, 1]} : vector<128x32xbf16> to vector<128x8xbf16>
    %213 = vector.extract_strided_slice %210 {offsets = [0, 0], sizes = [128, 8], strides = [1, 1]} : vector<128x32xbf16> to vector<128x8xbf16>
    %cst_116 = arith.constant dense<0.000000e+00> : vector<128x128xf32>
    %214 = tpu.matmul %212, %213, %cst_116 {dimension_numbers = #tpu.dot_dimension_numbers<[1], [1], [0], [0], [0, 0, 1, 0], [], []>} : vector<128x8xbf16>, vector<128x8xbf16>, vector<128x128xf32> -> vector<128x128xf32>
    %215 = arith.addf %214, %186 : vector<128x128xf32>
    %cst_117 = arith.constant dense<0xFF800000> : vector<128xf32>
    %216 = vector.multi_reduction <maximumf>, %215, %cst_117 [1] : vector<128x128xf32> to vector<128xf32>
    %217 = vector.shape_cast %216 : vector<128xf32> to vector<128x1xf32>
    %218 = vector.broadcast %217 : vector<128x1xf32> to vector<128x128xf32>
    %219 = arith.subf %215, %218 : vector<128x128xf32>
    %220 = math.exp %219 : vector<128x128xf32>
    %cst_118 = arith.constant dense<0.000000e+00> : vector<128xf32>
    %221 = vector.multi_reduction <add>, %220, %cst_118 [1] : vector<128x128xf32> to vector<128xf32>
    %222 = vector.shape_cast %221 : vector<128xf32> to vector<128x1xf32>
    %223 = tpu.reciprocal %222 {approx = true} : vector<128x1xf32> -> vector<128x1xf32>
    %224 = vector.broadcast %223 : vector<128x1xf32> to vector<128x128xf32>
    %225 = arith.mulf %220, %224 : vector<128x128xf32>
    %226 = arith.truncf %225 : vector<128x128xf32> to vector<128x128xbf16>
    %227 = vector.extract_strided_slice %211 {offsets = [0, 0], sizes = [128, 8], strides = [1, 1]} : vector<128x32xbf16> to vector<128x8xbf16>
    %cst_119 = arith.constant dense<0.000000e+00> : vector<128x8xf32>
    %228 = tpu.matmul %226, %227, %cst_119 {dimension_numbers = #tpu.dot_dimension_numbers<[1], [0], [0], [1], [0, 0, 1, 1], [], []>} : vector<128x128xbf16>, vector<128x8xbf16>, vector<128x8xf32> -> vector<128x8xf32>
    %229 = vector.extract_strided_slice %209 {offsets = [0, 8], sizes = [128, 8], strides = [1, 1]} : vector<128x32xbf16> to vector<128x8xbf16>
    %230 = vector.extract_strided_slice %210 {offsets = [0, 8], sizes = [128, 8], strides = [1, 1]} : vector<128x32xbf16> to vector<128x8xbf16>
    %cst_120 = arith.constant dense<0.000000e+00> : vector<128x128xf32>
    %231 = tpu.matmul %229, %230, %cst_120 {dimension_numbers = #tpu.dot_dimension_numbers<[1], [1], [0], [0], [0, 0, 1, 0], [], []>} : vector<128x8xbf16>, vector<128x8xbf16>, vector<128x128xf32> -> vector<128x128xf32>
    %232 = arith.addf %231, %186 : vector<128x128xf32>
    %cst_121 = arith.constant dense<0xFF800000> : vector<128xf32>
    %233 = vector.multi_reduction <maximumf>, %232, %cst_121 [1] : vector<128x128xf32> to vector<128xf32>
    %234 = vector.shape_cast %233 : vector<128xf32> to vector<128x1xf32>
    %235 = vector.broadcast %234 : vector<128x1xf32> to vector<128x128xf32>
    %236 = arith.subf %232, %235 : vector<128x128xf32>
    %237 = math.exp %236 : vector<128x128xf32>
    %cst_122 = arith.constant dense<0.000000e+00> : vector<128xf32>
    %238 = vector.multi_reduction <add>, %237, %cst_122 [1] : vector<128x128xf32> to vector<128xf32>
    %239 = vector.shape_cast %238 : vector<128xf32> to vector<128x1xf32>
    %240 = tpu.reciprocal %239 {approx = true} : vector<128x1xf32> -> vector<128x1xf32>
    %241 = vector.broadcast %240 : vector<128x1xf32> to vector<128x128xf32>
    %242 = arith.mulf %237, %241 : vector<128x128xf32>
    %243 = arith.truncf %242 : vector<128x128xf32> to vector<128x128xbf16>
    %244 = vector.extract_strided_slice %211 {offsets = [0, 8], sizes = [128, 8], strides = [1, 1]} : vector<128x32xbf16> to vector<128x8xbf16>
    %cst_123 = arith.constant dense<0.000000e+00> : vector<128x8xf32>
    %245 = tpu.matmul %243, %244, %cst_123 {dimension_numbers = #tpu.dot_dimension_numbers<[1], [0], [0], [1], [0, 0, 1, 1], [], []>} : vector<128x128xbf16>, vector<128x8xbf16>, vector<128x8xf32> -> vector<128x8xf32>
    %246 = vector.extract_strided_slice %209 {offsets = [0, 16], sizes = [128, 8], strides = [1, 1]} : vector<128x32xbf16> to vector<128x8xbf16>
    %247 = vector.extract_strided_slice %210 {offsets = [0, 16], sizes = [128, 8], strides = [1, 1]} : vector<128x32xbf16> to vector<128x8xbf16>
    %cst_124 = arith.constant dense<0.000000e+00> : vector<128x128xf32>
    %248 = tpu.matmul %246, %247, %cst_124 {dimension_numbers = #tpu.dot_dimension_numbers<[1], [1], [0], [0], [0, 0, 1, 0], [], []>} : vector<128x8xbf16>, vector<128x8xbf16>, vector<128x128xf32> -> vector<128x128xf32>
    %249 = arith.addf %248, %186 : vector<128x128xf32>
    %cst_125 = arith.constant dense<0xFF800000> : vector<128xf32>
    %250 = vector.multi_reduction <maximumf>, %249, %cst_125 [1] : vector<128x128xf32> to vector<128xf32>
    %251 = vector.shape_cast %250 : vector<128xf32> to vector<128x1xf32>
    %252 = vector.broadcast %251 : vector<128x1xf32> to vector<128x128xf32>
    %253 = arith.subf %249, %252 : vector<128x128xf32>
    %254 = math.exp %253 : vector<128x128xf32>
    %cst_126 = arith.constant dense<0.000000e+00> : vector<128xf32>
    %255 = vector.multi_reduction <add>, %254, %cst_126 [1] : vector<128x128xf32> to vector<128xf32>
    %256 = vector.shape_cast %255 : vector<128xf32> to vector<128x1xf32>
    %257 = tpu.reciprocal %256 {approx = true} : vector<128x1xf32> -> vector<128x1xf32>
    %258 = vector.broadcast %257 : vector<128x1xf32> to vector<128x128xf32>
    %259 = arith.mulf %254, %258 : vector<128x128xf32>
    %260 = arith.truncf %259 : vector<128x128xf32> to vector<128x128xbf16>
    %261 = vector.extract_strided_slice %211 {offsets = [0, 16], sizes = [128, 8], strides = [1, 1]} : vector<128x32xbf16> to vector<128x8xbf16>
    %cst_127 = arith.constant dense<0.000000e+00> : vector<128x8xf32>
    %262 = tpu.matmul %260, %261, %cst_127 {dimension_numbers = #tpu.dot_dimension_numbers<[1], [0], [0], [1], [0, 0, 1, 1], [], []>} : vector<128x128xbf16>, vector<128x8xbf16>, vector<128x8xf32> -> vector<128x8xf32>
    %263 = vector.extract_strided_slice %209 {offsets = [0, 24], sizes = [128, 8], strides = [1, 1]} : vector<128x32xbf16> to vector<128x8xbf16>
    %264 = vector.extract_strided_slice %210 {offsets = [0, 24], sizes = [128, 8], strides = [1, 1]} : vector<128x32xbf16> to vector<128x8xbf16>
    %cst_128 = arith.constant dense<0.000000e+00> : vector<128x128xf32>
    %265 = tpu.matmul %263, %264, %cst_128 {dimension_numbers = #tpu.dot_dimension_numbers<[1], [1], [0], [0], [0, 0, 1, 0], [], []>} : vector<128x8xbf16>, vector<128x8xbf16>, vector<128x128xf32> -> vector<128x128xf32>
    %266 = arith.addf %265, %186 : vector<128x128xf32>
    %cst_129 = arith.constant dense<0xFF800000> : vector<128xf32>
    %267 = vector.multi_reduction <maximumf>, %266, %cst_129 [1] : vector<128x128xf32> to vector<128xf32>
    %268 = vector.shape_cast %267 : vector<128xf32> to vector<128x1xf32>
    %269 = vector.broadcast %268 : vector<128x1xf32> to vector<128x128xf32>
    %270 = arith.subf %266, %269 : vector<128x128xf32>
    %271 = math.exp %270 : vector<128x128xf32>
    %cst_130 = arith.constant dense<0.000000e+00> : vector<128xf32>
    %272 = vector.multi_reduction <add>, %271, %cst_130 [1] : vector<128x128xf32> to vector<128xf32>
    %273 = vector.shape_cast %272 : vector<128xf32> to vector<128x1xf32>
    %274 = tpu.reciprocal %273 {approx = true} : vector<128x1xf32> -> vector<128x1xf32>
    %275 = vector.broadcast %274 : vector<128x1xf32> to vector<128x128xf32>
    %276 = arith.mulf %271, %275 : vector<128x128xf32>
    %277 = arith.truncf %276 : vector<128x128xf32> to vector<128x128xbf16>
    %278 = vector.extract_strided_slice %211 {offsets = [0, 24], sizes = [128, 8], strides = [1, 1]} : vector<128x32xbf16> to vector<128x8xbf16>
    %cst_131 = arith.constant dense<0.000000e+00> : vector<128x8xf32>
    %279 = tpu.matmul %277, %278, %cst_131 {dimension_numbers = #tpu.dot_dimension_numbers<[1], [0], [0], [1], [0, 0, 1, 1], [], []>} : vector<128x128xbf16>, vector<128x8xbf16>, vector<128x8xf32> -> vector<128x8xf32>
    %280 = tpu.concatenate %228, %245, %262, %279 in 1 : vector<128x8xf32>, vector<128x8xf32>, vector<128x8xf32>, vector<128x8xf32> -> vector<128x32xf32>
    %281 = arith.truncf %280 : vector<128x32xf32> to vector<128x32xbf16>
    %c1_132 = arith.constant 1 : index
    %c0_133 = arith.constant 0 : index
    %c0_134 = arith.constant 0 : index
    %282 = vector.load %arg13[%c1_132, %c0_133, %c0_134] : memref<2x32x32xbf16, #tpu.memory_space<vmem>>, vector<1x32x32xbf16>
    %283 = vector.shape_cast %282 : vector<1x32x32xbf16> to vector<32x32xbf16>
    %cst_135 = arith.constant dense<0.000000e+00> : vector<128x32xf32>
    %284 = tpu.matmul %281, %283, %cst_135 {dimension_numbers = #tpu.dot_dimension_numbers<[1], [0], [0], [1], [0, 0, 1, 1], [], []>} : vector<128x32xbf16>, vector<32x32xbf16>, vector<128x32xf32> -> vector<128x32xf32>
    %c1_136 = arith.constant 1 : index
    %c0_137 = arith.constant 0 : index
    %c0_138 = arith.constant 0 : index
    %285 = vector.load %arg14[%c1_136, %c0_137, %c0_138] : memref<2x1x32xf32, #tpu.memory_space<vmem>>, vector<1x1x32xf32>
    %286 = vector.shape_cast %285 : vector<1x1x32xf32> to vector<1x32xf32>
    %287 = vector.broadcast %286 : vector<1x32xf32> to vector<128x32xf32>
    %288 = arith.addf %284, %287 : vector<128x32xf32>
    %289 = arith.addf %185, %288 : vector<128x32xf32>
    %c1_139 = arith.constant 1 : index
    %c0_140 = arith.constant 0 : index
    %c0_141 = arith.constant 0 : index
    %290 = vector.load %arg15[%c1_139, %c0_140, %c0_141] : memref<2x1x32xf32, #tpu.memory_space<vmem>>, vector<1x1x32xf32>
    %291 = vector.shape_cast %290 : vector<1x1x32xf32> to vector<1x32xf32>
    %c1_142 = arith.constant 1 : index
    %c0_143 = arith.constant 0 : index
    %c0_144 = arith.constant 0 : index
    %292 = vector.load %arg16[%c1_142, %c0_143, %c0_144] : memref<2x1x32xf32, #tpu.memory_space<vmem>>, vector<1x1x32xf32>
    %293 = vector.shape_cast %292 : vector<1x1x32xf32> to vector<1x32xf32>
    %cst_145 = arith.constant dense<0.000000e+00> : vector<128xf32>
    %294 = vector.multi_reduction <add>, %289, %cst_145 [1] : vector<128x32xf32> to vector<128xf32>
    %295 = vector.shape_cast %294 : vector<128xf32> to vector<128x1xf32>
    %cst_146 = arith.constant 3.200000e+01 : f32
    %296 = vector.broadcast %cst_146 : f32 to vector<128x1xf32>
    %297 = arith.divf %295, %296 : vector<128x1xf32>
    %298 = vector.broadcast %297 : vector<128x1xf32> to vector<128x32xf32>
    %299 = arith.subf %289, %298 : vector<128x32xf32>
    %300 = arith.mulf %299, %299 : vector<128x32xf32>
    %cst_147 = arith.constant dense<0.000000e+00> : vector<128xf32>
    %301 = vector.multi_reduction <add>, %300, %cst_147 [1] : vector<128x32xf32> to vector<128xf32>
    %302 = vector.shape_cast %301 : vector<128xf32> to vector<128x1xf32>
    %cst_148 = arith.constant 3.200000e+01 : f32
    %303 = vector.broadcast %cst_148 : f32 to vector<128x1xf32>
    %304 = arith.divf %302, %303 : vector<128x1xf32>
    %cst_149 = arith.constant 9.99999974E-6 : f32
    %305 = vector.broadcast %cst_149 : f32 to vector<128x1xf32>
    %306 = arith.addf %304, %305 : vector<128x1xf32>
    %307 = math.rsqrt %306 : vector<128x1xf32>
    %308 = vector.broadcast %307 : vector<128x1xf32> to vector<128x32xf32>
    %309 = arith.mulf %299, %308 : vector<128x32xf32>
    %310 = vector.broadcast %291 : vector<1x32xf32> to vector<128x32xf32>
    %311 = arith.mulf %309, %310 : vector<128x32xf32>
    %312 = vector.broadcast %293 : vector<1x32xf32> to vector<128x32xf32>
    %313 = arith.addf %311, %312 : vector<128x32xf32>
    %314 = arith.truncf %313 : vector<128x32xf32> to vector<128x32xbf16>
    %c1_150 = arith.constant 1 : index
    %c0_151 = arith.constant 0 : index
    %c0_152 = arith.constant 0 : index
    %315 = vector.load %arg17[%c1_150, %c0_151, %c0_152] : memref<2x32x64xbf16, #tpu.memory_space<vmem>>, vector<1x32x64xbf16>
    %316 = vector.shape_cast %315 : vector<1x32x64xbf16> to vector<32x64xbf16>
    %cst_153 = arith.constant dense<0.000000e+00> : vector<128x64xf32>
    %317 = tpu.matmul %314, %316, %cst_153 {dimension_numbers = #tpu.dot_dimension_numbers<[1], [0], [0], [1], [0, 0, 1, 1], [], []>} : vector<128x32xbf16>, vector<32x64xbf16>, vector<128x64xf32> -> vector<128x64xf32>
    %c1_154 = arith.constant 1 : index
    %c0_155 = arith.constant 0 : index
    %c0_156 = arith.constant 0 : index
    %318 = vector.load %arg18[%c1_154, %c0_155, %c0_156] : memref<2x1x64xf32, #tpu.memory_space<vmem>>, vector<1x1x64xf32>
    %319 = vector.shape_cast %318 : vector<1x1x64xf32> to vector<1x64xf32>
    %320 = vector.broadcast %319 : vector<1x64xf32> to vector<128x64xf32>
    %321 = arith.addf %317, %320 : vector<128x64xf32>
    %cst_157 = arith.constant 0.000000e+00 : f32
    %322 = vector.broadcast %cst_157 : f32 to vector<128x64xf32>
    %323 = arith.maximumf %321, %322 : vector<128x64xf32>
    %324 = arith.truncf %323 : vector<128x64xf32> to vector<128x64xbf16>
    %c1_158 = arith.constant 1 : index
    %c0_159 = arith.constant 0 : index
    %c0_160 = arith.constant 0 : index
    %325 = vector.load %arg19[%c1_158, %c0_159, %c0_160] : memref<2x64x32xbf16, #tpu.memory_space<vmem>>, vector<1x64x32xbf16>
    %326 = vector.shape_cast %325 : vector<1x64x32xbf16> to vector<64x32xbf16>
    %cst_161 = arith.constant dense<0.000000e+00> : vector<128x32xf32>
    %327 = tpu.matmul %324, %326, %cst_161 {dimension_numbers = #tpu.dot_dimension_numbers<[1], [0], [0], [1], [0, 0, 1, 1], [], []>} : vector<128x64xbf16>, vector<64x32xbf16>, vector<128x32xf32> -> vector<128x32xf32>
    %c1_162 = arith.constant 1 : index
    %c0_163 = arith.constant 0 : index
    %c0_164 = arith.constant 0 : index
    %328 = vector.load %arg20[%c1_162, %c0_163, %c0_164] : memref<2x1x32xf32, #tpu.memory_space<vmem>>, vector<1x1x32xf32>
    %329 = vector.shape_cast %328 : vector<1x1x32xf32> to vector<1x32xf32>
    %330 = vector.broadcast %329 : vector<1x32xf32> to vector<128x32xf32>
    %331 = arith.addf %327, %330 : vector<128x32xf32>
    %332 = arith.addf %313, %331 : vector<128x32xf32>
    %c1_165 = arith.constant 1 : index
    %c0_166 = arith.constant 0 : index
    %c0_167 = arith.constant 0 : index
    %333 = vector.load %arg21[%c1_165, %c0_166, %c0_167] : memref<2x1x32xf32, #tpu.memory_space<vmem>>, vector<1x1x32xf32>
    %334 = vector.shape_cast %333 : vector<1x1x32xf32> to vector<1x32xf32>
    %c1_168 = arith.constant 1 : index
    %c0_169 = arith.constant 0 : index
    %c0_170 = arith.constant 0 : index
    %335 = vector.load %arg22[%c1_168, %c0_169, %c0_170] : memref<2x1x32xf32, #tpu.memory_space<vmem>>, vector<1x1x32xf32>
    %336 = vector.shape_cast %335 : vector<1x1x32xf32> to vector<1x32xf32>
    %cst_171 = arith.constant dense<0.000000e+00> : vector<128xf32>
    %337 = vector.multi_reduction <add>, %332, %cst_171 [1] : vector<128x32xf32> to vector<128xf32>
    %338 = vector.shape_cast %337 : vector<128xf32> to vector<128x1xf32>
    %cst_172 = arith.constant 3.200000e+01 : f32
    %339 = vector.broadcast %cst_172 : f32 to vector<128x1xf32>
    %340 = arith.divf %338, %339 : vector<128x1xf32>
    %341 = vector.broadcast %340 : vector<128x1xf32> to vector<128x32xf32>
    %342 = arith.subf %332, %341 : vector<128x32xf32>
    %343 = arith.mulf %342, %342 : vector<128x32xf32>
    %cst_173 = arith.constant dense<0.000000e+00> : vector<128xf32>
    %344 = vector.multi_reduction <add>, %343, %cst_173 [1] : vector<128x32xf32> to vector<128xf32>
    %345 = vector.shape_cast %344 : vector<128xf32> to vector<128x1xf32>
    %cst_174 = arith.constant 3.200000e+01 : f32
    %346 = vector.broadcast %cst_174 : f32 to vector<128x1xf32>
    %347 = arith.divf %345, %346 : vector<128x1xf32>
    %cst_175 = arith.constant 9.99999974E-6 : f32
    %348 = vector.broadcast %cst_175 : f32 to vector<128x1xf32>
    %349 = arith.addf %347, %348 : vector<128x1xf32>
    %350 = math.rsqrt %349 : vector<128x1xf32>
    %351 = vector.broadcast %350 : vector<128x1xf32> to vector<128x32xf32>
    %352 = arith.mulf %342, %351 : vector<128x32xf32>
    %353 = vector.broadcast %334 : vector<1x32xf32> to vector<128x32xf32>
    %354 = arith.mulf %352, %353 : vector<128x32xf32>
    %355 = vector.broadcast %336 : vector<1x32xf32> to vector<128x32xf32>
    %356 = arith.addf %354, %355 : vector<128x32xf32>
    %c0_176 = arith.constant 0 : index
    %c0_177 = arith.constant 0 : index
    %357 = vector.load %arg23[%c0_176, %c0_177] : memref<128x32xf32, #tpu.memory_space<vmem>>, vector<128x32xf32>
    tpu.vector_store %arg23[%c0_176, %c0_177], %356 {strides = array<i32>} : memref<128x32xf32, #tpu.memory_space<vmem>>, vector<128x32xf32>,
    return
  }
}

module attributes {stable_mosaic.version = 11 : i64} {
  func.func @_classifier_kernel(%arg0: memref<2x2048xf32, #tpu.memory_space<vmem>>, %arg1: memref<2048x128xbf16, #tpu.memory_space<vmem>>, %arg2: memref<1x128xf32, #tpu.memory_space<vmem>>, %arg3: memref<2x128xf32, #tpu.memory_space<vmem>>) attributes {dimension_semantics = [], scalar_prefetch = 0 : i64, scratch_operands = 0 : i64, tpu.core_type = #tpu.core_type<tc>} {
    %c0 = arith.constant 0 : index
    %c0_0 = arith.constant 0 : index
    %0 = vector.load %arg0[%c0, %c0_0] : memref<2x2048xf32, #tpu.memory_space<vmem>>, vector<2x2048xf32>
    %1 = arith.truncf %0 : vector<2x2048xf32> to vector<2x2048xbf16>
    %c0_1 = arith.constant 0 : index
    %c0_2 = arith.constant 0 : index
    %2 = vector.load %arg1[%c0_1, %c0_2] : memref<2048x128xbf16, #tpu.memory_space<vmem>>, vector<2048x128xbf16>
    %cst = arith.constant dense<0.000000e+00> : vector<2x128xf32>
    %3 = tpu.matmul %1, %2, %cst {dimension_numbers = #tpu.dot_dimension_numbers<[1], [0], [0], [1], [0, 0, 1, 1], [], []>} : vector<2x2048xbf16>, vector<2048x128xbf16>, vector<2x128xf32> -> vector<2x128xf32>
    %c0_3 = arith.constant 0 : index
    %c0_4 = arith.constant 0 : index
    %4 = vector.load %arg2[%c0_3, %c0_4] : memref<1x128xf32, #tpu.memory_space<vmem>>, vector<1x128xf32>
    %5 = vector.broadcast %4 : vector<1x128xf32> to vector<2x128xf32>
    %6 = arith.addf %3, %5 : vector<2x128xf32>
    %c0_5 = arith.constant 0 : index
    %c0_6 = arith.constant 0 : index
    %7 = vector.load %arg3[%c0_5, %c0_6] : memref<2x128xf32, #tpu.memory_space<vmem>>, vector<2x128xf32>
    tpu.vector_store %arg3[%c0_5, %c0_6], %6 {strides = array<i32>} : memref<2x128xf32, #tpu.memory_space<vmem>>, vector<2x128xf32>,
    return
  }
}

</mosaic_0001>

<bundles_post_ra>
// kernel: divided_video_transformer_forward.3
= control target key start
LH: loop header
LB: loop body
LE: loop exit
PB: predicated region body
PF: predicated region fallthrough
CT: control target
= control target key end

     0   :  { %v28_v28 = vlaneseq  ;;  %v1953_v36 = vmov 1983009808   ;;  %s2396_s0 = inlined_call_operand.vmem [shape: f32[2,2048], index: 0, kind: input, shape index: {}]   ;;  %s2397_s1 = inlined_call_operand.vmem [shape: bf16[2048,128], index: 1, kind: input, shape index: {}]   ;;  %s2398_s2 = inlined_call_operand.vmem [shape: f32[1,128], index: 2, kind: input, shape index: {}]   ;;  %s2399_s3 = inlined_call_operand.hbm [shape: f32[2,128], index: 3, kind: output, shape index: {}]  }
   0x1   :  { %v1797_v0 = vld [vmem:[%s2397_s1 + $0x40] sm:$0xff]   ;;  %v1801_v4 = vld [vmem:[%s2397_s1 + $0x48] sm:$0xff]   ;;  %v1805_v8 = vld [vmem:[%s2397_s1 + $0x50] sm:$0xff]   ;;  %v26_v37 = vunpack.c.l.s4 %v1953_v36 }
   0x2   :  { %v1798_v1 = vld [vmem:[%s2397_s1 + $0xc0] sm:$0xff]   ;;  %1619 = vmatprep.subr.bf16.mxu0 %v1797_v0  ;;  %v1802_v5 = vld [vmem:[%s2397_s1 + $0xc8] sm:$0xff]   ;;  %v1806_v9 = vld [vmem:[%s2397_s1 + $0xd0] sm:$0xff]   ;;  %v29_v33 = vshrl.u32 %v28_v28, 7 }
   0x3   :  { %v1799_v2 = vld [vmem:[%s2397_s1] sm:$0xff]   ;;  %1641 = vmatprep.subr.bf16.mxu1 %v1798_v1  ;;  %v1803_v6 = vld [vmem:[%s2397_s1 + $0x8] sm:$0xff]   ;;  %v1807_v10 = vld [vmem:[%s2397_s1 + $0x10] sm:$0xff]   ;;  %v27_v39 = vunpack.c.0.s8 %v26_v37 }
   0x4   :  { %v1800_v3 = vld [vmem:[%s2397_s1 + $0x80] sm:$0xff]   ;;  %1620 = vmatpush3.bf16.msra.mxu0 %v1799_v2  ;;  %v1804_v7 = vld [vmem:[%s2397_s1 + $0x88] sm:$0xff]   ;;  %v1808_v11 = vld [vmem:[%s2397_s1 + $0x90] sm:$0xff]  }
   0x5   :  { %1642 = vmatpush3.bf16.msra.mxu1 %v1800_v3  ;;  %1621 = vmatprep.subr.bf16.mxu0 %v1801_v4  ;;  %v1809_v12 = vld [vmem:[%s2397_s1 + $0x58] sm:$0xff]   ;;  %v1813_v16 = vld [vmem:[%s2397_s1 + $0x60] sm:$0xff]   ;;  %v1817_v20 = vld [vmem:[%s2397_s1 + $0x68] sm:$0xff]   ;;  %v2080_v41 = vsub.s32 %v27_v39, %v29_v33 }
   0x6   :  { %1643 = vmatprep.subr.bf16.mxu1 %v1802_v5  ;;  %v1810_v13 = vld [vmem:[%s2397_s1 + $0xd8] sm:$0xff]   ;;  %v1814_v17 = vld [vmem:[%s2397_s1 + $0xe0] sm:$0xff]   ;;  %v1818_v21 = vld [vmem:[%s2397_s1 + $0xe8] sm:$0xff]  }
   0x7   :  { %v1811_v14 = vld [vmem:[%s2397_s1 + $0x18] sm:$0xff]   ;;  %v1815_v18 = vld [vmem:[%s2397_s1 + $0x20] sm:$0xff]   ;;  %v1819_v22 = vld [vmem:[%s2397_s1 + $0x28] sm:$0xff]  }
   0x8   :  { %1622 = vmatpush3.bf16.msra.mxu0 %v1803_v6  ;;  %v1812_v15 = vld [vmem:[%s2397_s1 + $0x98] sm:$0xff]   ;;  %v1816_v19 = vld [vmem:[%s2397_s1 + $0xa0] sm:$0xff]   ;;  %v1820_v23 = vld [vmem:[%s2397_s1 + $0xa8] sm:$0xff]  }
   0x9   :  { %1644 = vmatpush3.bf16.msra.mxu1 %v1804_v7  ;;  %1623 = vmatprep.subr.bf16.mxu0 %v1805_v8  ;;  %v1821_v24 = vld [vmem:[%s2397_s1 + $0x70] sm:$0xff]   ;;  %v1825_v29 = vld [vmem:[%s2397_s1 + $0x78] sm:$0xff]   ;;  %v16_v34 = vld [vmem:[%s2396_s0] sm:$0xff] }
   0xa   :  { %1645 = vmatprep.subr.bf16.mxu1 %v1806_v9  ;;  %v1822_v25 = vld [vmem:[%s2397_s1 + $0xf0] sm:$0xff]   ;;  %v1826_v30 = vld [vmem:[%s2397_s1 + $0xf8] sm:$0xff]   ;;  %v1830_v35 = vld [vmem:[%s2397_s1 + $0x140] sm:$0xff]   ;;  %v24_v40 = vcombine.high %v16_v34, %v16_v34  ;;  %v31_v42 = vrot.slane %v16_v34, %v2080_v41 }
   0xb   :  { %v1823_v26 = vld [vmem:[%s2397_s1 + $0x30] sm:$0xff]   ;;  %v1827_v31 = vld [vmem:[%s2397_s1 + $0x38] sm:$0xff]   ;;  %v1831_v38 = vld [vmem:[%s2397_s1 + $0x1c0] sm:$0xff]  }
   0xc   :  { %1624 = vmatpush3.bf16.msra.mxu0 %v1807_v10  ;;  %v1824_v27 = vld [vmem:[%s2397_s1 + $0xb0] sm:$0xff]   ;;  %v1828_v32 = vld [vmem:[%s2397_s1 + $0xb8] sm:$0xff]   ;;  %v38_v43 = vrot.slane %v24_v40, %v2080_v41  ;;  %v39_v44 = vcombine.high %v31_v42, %v31_v42  ;;  %v1832_v46 = vld [vmem:[%s2397_s1 + $0x100] sm:$0xff]   ;;  %v108_v47 = vpack.c.bf16 %v31_v42, %v31_v42 }
   0xd   :  { %1646 = vmatpush3.bf16.msra.mxu1 %v1808_v11  ;;  %1625 = vmatprep.subr.bf16.mxu0 %v1809_v12  ;;  %v1833_v49 = vld [vmem:[%s2397_s1 + $0x180] sm:$0xff]   ;;  %v1834_v52 = vld [vmem:[%s2397_s1 + $0x148] sm:$0xff]   ;;  %v1838_v56 = vld [vmem:[%s2397_s1 + $0x150] sm:$0xff]  }
   0xe   :  { %1647 = vmatprep.subr.bf16.mxu1 %v1810_v13  ;;  %v40_v45 = vcombine.high %v38_v43, %v38_v43  ;;  %v110_v48 = vpack.c.bf16 %v38_v43, %v38_v43  ;;  %v109_v50 = vpack.c.bf16 %v39_v44, %v39_v44  ;;  %v1835_v53 = vld [vmem:[%s2397_s1 + $0x1c8] sm:$0xff]   ;;  %v1839_v57 = vld [vmem:[%s2397_s1 + $0x1d0] sm:$0xff]   ;;  %v1842_v60 = vld [vmem:[%s2397_s1 + $0x158] sm:$0xff]  }
   0xf   :  { %v1836_v54 = vld [vmem:[%s2397_s1 + $0x108] sm:$0xff]   ;;  %v1840_v58 = vld [vmem:[%s2397_s1 + $0x110] sm:$0xff]   ;;  %v1843_v61 = vld [vmem:[%s2397_s1 + $0x1d8] sm:$0xff]  }
  0x10   :  { %1626 = vmatpush3.bf16.msra.mxu0 %v1811_v14  ;;  %v111_v51 = vpack.c.bf16 %v40_v45, %v40_v45  ;;  %1187 = vmatprep.mubr.bf16.mxu0 %v109_v50  ;;  %v1837_v55 = vld [vmem:[%s2397_s1 + $0x188] sm:$0xff]   ;;  %v1841_v59 = vld [vmem:[%s2397_s1 + $0x190] sm:$0xff]   ;;  %v1844_v62 = vld [vmem:[%s2397_s1 + $0x118] sm:$0xff]  }
  0x11   :  { %1648 = vmatpush3.bf16.msra.mxu1 %v1812_v15  ;;  %1627 = vmatprep.subr.bf16.mxu0 %v1813_v16  ;;  %v1845_v63 = vld [vmem:[%s2397_s1 + $0x198] sm:$0xff]   ;;  %v1846_v0 = vld [vmem:[%s2397_s1 + $0x160] sm:$0xff]   ;;  %v1850_v4 = vld [vmem:[%s2397_s1 + $0x168] sm:$0xff]  }
  0x12   :  { %1649 = vmatprep.subr.bf16.mxu1 %v1814_v17  ;;  %1227 = vmatprep.mubr.bf16.mxu1 %v111_v51  ;;  %v1847_v1 = vld [vmem:[%s2397_s1 + $0x1e0] sm:$0xff]   ;;  %v1851_v5 = vld [vmem:[%s2397_s1 + $0x1e8] sm:$0xff]   ;;  %v1854_v8 = vld [vmem:[%s2397_s1 + $0x170] sm:$0xff]  }
  0x13   :  { %v1848_v2 = vld [vmem:[%s2397_s1 + $0x120] sm:$0xff]   ;;  %v1852_v6 = vld [vmem:[%s2397_s1 + $0x128] sm:$0xff]   ;;  %v1855_v9 = vld [vmem:[%s2397_s1 + $0x1f0] sm:$0xff]  }
  0x14   :  { %1628 = vmatpush3.bf16.msra.mxu0 %v1815_v18  ;;  %v1849_v3 = vld [vmem:[%s2397_s1 + $0x1a0] sm:$0xff]   ;;  %v1853_v7 = vld [vmem:[%s2397_s1 + $0x1a8] sm:$0xff]   ;;  %v1856_v11 = vld [vmem:[%s2397_s1 + $0x130] sm:$0xff]  }
  0x15   :  { %1650 = vmatpush3.bf16.msra.mxu1 %v1816_v19  ;;  %1629 = vmatprep.subr.bf16.mxu0 %v1817_v20  ;;  %v17_v10 = vld [vmem:[%s2396_s0 + $0x8] sm:$0xff]  ;;  %v1857_v14 = vld [vmem:[%s2397_s1 + $0x1b0] sm:$0xff]   ;;  %v1858_v15 = vld [vmem:[%s2397_s1 + $0x178] sm:$0xff]  }
  0x16   :  { %1651 = vmatprep.subr.bf16.mxu1 %v1818_v21  ;;  %v48_v12 = vrot.slane %v17_v10, %v2080_v41  ;;  %v41_v13 = vcombine.high %v17_v10, %v17_v10  ;;  %v1859_v18 = vld [vmem:[%s2397_s1 + $0x1f8] sm:$0xff]   ;;  %v1870_v33 = vld [vmem:[%s2397_s1 + $0x288] sm:$0xff]   ;;  %v1871_v34 = vld [vmem:[%s2397_s1 + $0x250] sm:$0xff]  }
  0x17   :  { %v1860_v19 = vld [vmem:[%s2397_s1 + $0x138] sm:$0xff]   ;;  %v1873_v36 = vld [vmem:[%s2397_s1 + $0x210] sm:$0xff]   ;;  %v1879_v43 = vld [vmem:[%s2397_s1 + $0x260] sm:$0xff]  }
  0x18   :  { %1630 = vmatpush3.bf16.msra.mxu0 %v1819_v22  ;;  %v56_v16 = vcombine.high %v48_v12, %v48_v12  ;;  %v55_v17 = vrot.slane %v41_v13, %v2080_v41  ;;  %v1861_v22 = vld [vmem:[%s2397_s1 + $0x1b8] sm:$0xff]   ;;  %v1874_v37 = vld [vmem:[%s2397_s1 + $0x290] sm:$0xff]   ;;  %v1880_v44 = vld [vmem:[%s2397_s1 + $0x2e0] sm:$0xff]  }
  0x19   :  { %1652 = vmatpush3.bf16.msra.mxu1 %v1820_v23  ;;  %1631 = vmatprep.subr.bf16.mxu0 %v1821_v24  ;;  %v1863_v24 = vld [vmem:[%s2397_s1 + $0x240] sm:$0xff]   ;;  %v1876_v39 = vld [vmem:[%s2397_s1 + $0x2d8] sm:$0xff]   ;;  %v1886_v50 = vld [vmem:[%s2397_s1 + $0x2a8] sm:$0xff]  }
  0x1a   :  { %1653 = vmatprep.subr.bf16.mxu1 %v1822_v25  ;;  %v113_v20 = vpack.c.bf16 %v56_v16, %v56_v16  ;;  %v57_v21 = vcombine.high %v55_v17, %v55_v17  ;;  %v1864_v25 = vld [vmem:[%s2397_s1 + $0x2c0] sm:$0xff]   ;;  %v114_v28 = vpack.c.bf16 %v55_v17, %v55_v17  ;;  %v1877_v40 = vld [vmem:[%s2397_s1 + $0x218] sm:$0xff]   ;;  %v1887_v51 = vld [vmem:[%s2397_s1 + $0x270] sm:$0xff]  }
  0x1b   :  { %v1878_v42 = vld [vmem:[%s2397_s1 + $0x298] sm:$0xff]   ;;  %v1881_v45 = vld [vmem:[%s2397_s1 + $0x220] sm:$0xff]   ;;  %v1901_v10 = vld [vmem:[%s2397_s1 + $0x3c8] sm:$0xff]  }
  0x1c   :  { %1632 = vmatpush3.bf16.msra.mxu0 %v1823_v26  ;;  %v115_v23 = vpack.c.bf16 %v57_v21, %v57_v21  ;;  %v1865_v26 = vld [vmem:[%s2397_s1 + $0x200] sm:$0xff]   ;;  %v1904_v13 = vld [vmem:[%s2397_s1 + $0x350] sm:$0xff]   ;;  %v1908_v17 = vld [vmem:[%s2397_s1 + $0x358] sm:$0xff]  }
  0x1d   :  { %1654 = vmatpush3.bf16.msra.mxu1 %v1824_v27  ;;  %1633 = vmatprep.subr.bf16.mxu0 %v1825_v29  ;;  %v112_v27 = vpack.c.bf16 %v48_v12, %v48_v12  ;;  %v1866_v29 = vld [vmem:[%s2397_s1 + $0x280] sm:$0xff]   ;;  %v1903_v12 = vld [vmem:[%s2397_s1 + $0x388] sm:$0xff]   ;;  %v1907_v16 = vld [vmem:[%s2397_s1 + $0x390] sm:$0xff]  }
  0x1e   :  { %1655 = vmatprep.subr.bf16.mxu1 %v1826_v30  ;;  %v1867_v30 = vld [vmem:[%s2397_s1 + $0x248] sm:$0xff]   ;;  %v1912_v21 = vld [vmem:[%s2397_s1 + $0x360] sm:$0xff]  }
  0x20   :  { %1634 = vmatpush3.bf16.msra.mxu0 %v1827_v31  ;;  %v1868_v31 = vld [vmem:[%s2397_s1 + $0x2c8] sm:$0xff]  }
  0x21   :  { %1656 = vmatpush3.bf16.msra.mxu1 %v1828_v32  ;;  %1663 = vmatprep.subr.bf16.mxu0 %v1830_v35  ;;  %v1869_v32 = vld [vmem:[%s2397_s1 + $0x208] sm:$0xff]   ;;  %v1872_v35 = vld [vmem:[%s2397_s1 + $0x2d0] sm:$0xff]  }
  0x22   :  { %1685 = vmatprep.subr.bf16.mxu1 %v1831_v38  ;;  %v1875_v38 = vld [vmem:[%s2397_s1 + $0x258] sm:$0xff]  }
  0x23   :  { %1188 = vmatmul.mubr.bf16.vlgmr.msra.gmra.mrb[0].mxu0 %v108_v47  ;;  %v1883_v47 = vld [vmem:[%s2397_s1 + $0x268] sm:$0xff]  }
  0x24   :  { %1228 = vmatmul.mubr.bf16.vlgmr.msra.gmra.mrb[0].mxu1 %v110_v48  ;;  %1664 = vmatpush3.bf16.msra.mxu0 %v1832_v46  ;;  %v1882_v46 = vld [vmem:[%s2397_s1 + $0x2a0] sm:$0xff]   ;;  %v1884_v48 = vld [vmem:[%s2397_s1 + $0x2e8] sm:$0xff]  }
  0x25   :  { %1686 = vmatpush3.bf16.msra.mxu1 %v1833_v49  ;;  %1665 = vmatprep.subr.bf16.mxu0 %v1834_v52  ;;  %v1885_v49 = vld [vmem:[%s2397_s1 + $0x228] sm:$0xff]   ;;  %v1888_v52 = vld [vmem:[%s2397_s1 + $0x2f0] sm:$0xff]  }
  0x26   :  { %1687 = vmatprep.subr.bf16.mxu1 %v1835_v53  ;;  %1267 = vmatprep.mubr.bf16.mxu0 %v113_v20  ;;  %v18_v53 = vld [vmem:[%s2396_s0 + $0x10] sm:$0xff]  ;;  %v1911_v20 = vld [vmem:[%s2397_s1 + $0x398] sm:$0xff]  }
  0x27   :  { %1307 = vmatprep.mubr.bf16.mxu1 %v115_v23  ;;  %v1914_v23 = vld [vmem:[%s2397_s1 + $0x320] sm:$0xff]  }
  0x28   :  { %1666 = vmatpush3.bf16.msra.mxu0 %v1836_v54  ;;  %v1889_v54 = vld [vmem:[%s2397_s1 + $0x230] sm:$0xff]  }
  0x29   :  { %1688 = vmatpush3.bf16.msra.mxu1 %v1837_v55  ;;  %1667 = vmatprep.subr.bf16.mxu0 %v1838_v56  ;;  %v65_v55 = vrot.slane %v18_v53, %v2080_v41  ;;  %v58_v56 = vcombine.high %v18_v53, %v18_v53 }
  0x2a   :  { %1689 = vmatprep.subr.bf16.mxu1 %v1839_v57  ;;  %v1890_v57 = vld [vmem:[%s2397_s1 + $0x2b0] sm:$0xff]  }
  0x2c   :  { %1668 = vmatpush3.bf16.msra.mxu0 %v1840_v58  ;;  %v1891_v58 = vld [vmem:[%s2397_s1 + $0x278] sm:$0xff]  }
  0x2d   :  { %1690 = vmatpush3.bf16.msra.mxu1 %v1841_v59  ;;  %1669 = vmatprep.subr.bf16.mxu0 %v1842_v60  ;;  %v73_v59 = vcombine.high %v65_v55, %v65_v55  ;;  %v72_v60 = vrot.slane %v58_v56, %v2080_v41 }
  0x2e   :  { %1691 = vmatprep.subr.bf16.mxu1 %v1843_v61  ;;  %v1892_v61 = vld [vmem:[%s2397_s1 + $0x2f8] sm:$0xff]  }
  0x30   :  { %1670 = vmatpush3.bf16.msra.mxu0 %v1844_v62  ;;  %v1893_v62 = vld [vmem:[%s2397_s1 + $0x238] sm:$0xff]  }
  0x31   :  { %1692 = vmatpush3.bf16.msra.mxu1 %v1845_v63  ;;  %1671 = vmatprep.subr.bf16.mxu0 %v1846_v0  ;;  %v117_v63 = vpack.c.bf16 %v73_v59, %v73_v59  ;;  %v74_v0 = vcombine.high %v72_v60, %v72_v60 }
  0x32   :  { %1693 = vmatprep.subr.bf16.mxu1 %v1847_v1  ;;  %v1894_v1 = vld [vmem:[%s2397_s1 + $0x2b8] sm:$0xff]  }
  0x34   :  { %1672 = vmatpush3.bf16.msra.mxu0 %v1848_v2  ;;  %v119_v2 = vpack.c.bf16 %v74_v0, %v74_v0 }
  0x35   :  { %1694 = vmatpush3.bf16.msra.mxu1 %v1849_v3  ;;  %1673 = vmatprep.subr.bf16.mxu0 %v1850_v4  ;;  %v1896_v3 = vld [vmem:[%s2397_s1 + $0x340] sm:$0xff]  }
  0x36   :  { %1695 = vmatprep.subr.bf16.mxu1 %v1851_v5  ;;  %v1897_v4 = vld [vmem:[%s2397_s1 + $0x3c0] sm:$0xff]  }
  0x37   :  { %v1898_v5 = vld [vmem:[%s2397_s1 + $0x300] sm:$0xff]  }
  0x38   :  { %1674 = vmatpush3.bf16.msra.mxu0 %v1852_v6  ;;  %v116_v6 = vpack.c.bf16 %v65_v55, %v65_v55 }
  0x39   :  { %1696 = vmatpush3.bf16.msra.mxu1 %v1853_v7  ;;  %1675 = vmatprep.subr.bf16.mxu0 %v1854_v8  ;;  %v118_v7 = vpack.c.bf16 %v72_v60, %v72_v60  ;;  %v1899_v8 = vld [vmem:[%s2397_s1 + $0x380] sm:$0xff]  }
  0x3a   :  { %1697 = vmatprep.subr.bf16.mxu1 %v1855_v9  ;;  %v1900_v9 = vld [vmem:[%s2397_s1 + $0x348] sm:$0xff]  }
  0x3c   :  { %1676 = vmatpush3.bf16.msra.mxu0 %v1856_v11  ;;  %v1902_v11 = vld [vmem:[%s2397_s1 + $0x308] sm:$0xff]  }
  0x3d   :  { %1698 = vmatpush3.bf16.msra.mxu1 %v1857_v14  ;;  %1677 = vmatprep.subr.bf16.mxu0 %v1858_v15  ;;  %v1905_v14 = vld [vmem:[%s2397_s1 + $0x3d0] sm:$0xff]  }
  0x3e   :  { %1699 = vmatprep.subr.bf16.mxu1 %v1859_v18  ;;  %v1906_v15 = vld [vmem:[%s2397_s1 + $0x310] sm:$0xff]   ;;  %v1909_v18 = vld [vmem:[%s2397_s1 + $0x3d8] sm:$0xff]  }
  0x40   :  { %1678 = vmatpush3.bf16.msra.mxu0 %v1860_v19  ;;  %v1910_v19 = vld [vmem:[%s2397_s1 + $0x318] sm:$0xff]  }
  0x41   :  { %1700 = vmatpush3.bf16.msra.mxu1 %v1861_v22  ;;  %1707 = vmatprep.subr.bf16.mxu0 %v1863_v24  ;;  %v1913_v22 = vld [vmem:[%s2397_s1 + $0x3e0] sm:$0xff]  }
  0x42   :  { %1729 = vmatprep.subr.bf16.mxu1 %v1864_v25  ;;  %v1915_v24 = vld [vmem:[%s2397_s1 + $0x3a0] sm:$0xff]   ;;  %v1916_v25 = vld [vmem:[%s2397_s1 + $0x368] sm:$0xff]  }
  0x43   :  { %1268 = vmatmul.mubr.bf16.vlgmr.msra.gmra.mrb[4].mxu0 %v112_v27  ;;  %v1918_v27 = vld [vmem:[%s2397_s1 + $0x328] sm:$0xff]  }
  0x44   :  { %1308 = vmatmul.mubr.bf16.vlgmr.msra.gmra.mrb[4].mxu1 %v114_v28  ;;  %1708 = vmatpush3.bf16.msra.mxu0 %v1865_v26  ;;  %v1917_v26 = vld [vmem:[%s2397_s1 + $0x3e8] sm:$0xff]  }
  0x45   :  { %1730 = vmatpush3.bf16.msra.mxu1 %v1866_v29  ;;  %1709 = vmatprep.subr.bf16.mxu0 %v1867_v30  ;;  %v1919_v28 = vld [vmem:[%s2397_s1 + $0x3a8] sm:$0xff]   ;;  %v1920_v29 = vld [vmem:[%s2397_s1 + $0x370] sm:$0xff]  }
  0x46   :  { %1731 = vmatprep.subr.bf16.mxu1 %v1868_v31  ;;  %1347 = vmatprep.mubr.bf16.mxu0 %v117_v63  ;;  %v1921_v30 = vld [vmem:[%s2397_s1 + $0x3f0] sm:$0xff]   ;;  %v19_v31 = vld [vmem:[%s2396_s0 + $0x18] sm:$0xff] }
  0x47   :  { %1387 = vmatprep.mubr.bf16.mxu1 %v119_v2 }
  0x48   :  { %1710 = vmatpush3.bf16.msra.mxu0 %v1869_v32 }
  0x49   :  { %1732 = vmatpush3.bf16.msra.mxu1 %v1870_v33  ;;  %1711 = vmatprep.subr.bf16.mxu0 %v1871_v34 }
  0x4a   :  { %1733 = vmatprep.subr.bf16.mxu1 %v1872_v35 }
  0x4c   :  { %1712 = vmatpush3.bf16.msra.mxu0 %v1873_v36 }
  0x4d   :  { %1734 = vmatpush3.bf16.msra.mxu1 %v1874_v37  ;;  %1713 = vmatprep.subr.bf16.mxu0 %v1875_v38 }
  0x4e   :  { %1735 = vmatprep.subr.bf16.mxu1 %v1876_v39 }
  0x50   :  { %1714 = vmatpush3.bf16.msra.mxu0 %v1877_v40 }
  0x51   :  { %1736 = vmatpush3.bf16.msra.mxu1 %v1878_v42  ;;  %1715 = vmatprep.subr.bf16.mxu0 %v1879_v43 }
  0x52   :  { %1737 = vmatprep.subr.bf16.mxu1 %v1880_v44 }
  0x54   :  { %1716 = vmatpush3.bf16.msra.mxu0 %v1881_v45 }
  0x55   :  { %1738 = vmatpush3.bf16.msra.mxu1 %v1882_v46  ;;  %1717 = vmatprep.subr.bf16.mxu0 %v1883_v47 }
  0x56   :  { %1739 = vmatprep.subr.bf16.mxu1 %v1884_v48 }
  0x58   :  { %1718 = vmatpush3.bf16.msra.mxu0 %v1885_v49 }
  0x59   :  { %1740 = vmatpush3.bf16.msra.mxu1 %v1886_v50  ;;  %1719 = vmatprep.subr.bf16.mxu0 %v1887_v51 }
  0x5a   :  { %1741 = vmatprep.subr.bf16.mxu1 %v1888_v52 }
  0x5c   :  { %1720 = vmatpush3.bf16.msra.mxu0 %v1889_v54 }
  0x5d   :  { %1742 = vmatpush3.bf16.msra.mxu1 %v1890_v57  ;;  %1721 = vmatprep.subr.bf16.mxu0 %v1891_v58 }
  0x5e   :  { %1743 = vmatprep.subr.bf16.mxu1 %v1892_v61 }
  0x60   :  { %1722 = vmatpush3.bf16.msra.mxu0 %v1893_v62 }
  0x61   :  { %1744 = vmatpush3.bf16.msra.mxu1 %v1894_v1  ;;  %1751 = vmatprep.subr.bf16.mxu0 %v1896_v3 }
  0x62   :  { %1773 = vmatprep.subr.bf16.mxu1 %v1897_v4 }
  0x63   :  { %1348 = vmatmul.mubr.bf16.vlgmr.msra.gmra.mrb[8].mxu0 %v116_v6 }
  0x64   :  { %1388 = vmatmul.mubr.bf16.vlgmr.msra.gmra.mrb[8].mxu1 %v118_v7  ;;  %1752 = vmatpush3.bf16.msra.mxu0 %v1898_v5 }
  0x65   :  { %1774 = vmatpush3.bf16.msra.mxu1 %v1899_v8  ;;  %1753 = vmatprep.subr.bf16.mxu0 %v1900_v9 }
  0x66   :  { %1775 = vmatprep.subr.bf16.mxu1 %v1901_v10 }
  0x68   :  { %1754 = vmatpush3.bf16.msra.mxu0 %v1902_v11 }
  0x69   :  { %1776 = vmatpush3.bf16.msra.mxu1 %v1903_v12  ;;  %1755 = vmatprep.subr.bf16.mxu0 %v1904_v13 }
  0x6a   :  { %1777 = vmatprep.subr.bf16.mxu1 %v1905_v14 }
  0x6c   :  { %1756 = vmatpush3.bf16.msra.mxu0 %v1906_v15 }
  0x6d   :  { %1778 = vmatpush3.bf16.msra.mxu1 %v1907_v16  ;;  %1757 = vmatprep.subr.bf16.mxu0 %v1908_v17 }
  0x6e   :  { %1779 = vmatprep.subr.bf16.mxu1 %v1909_v18 }
  0x70   :  { %1758 = vmatpush3.bf16.msra.mxu0 %v1910_v19 }
  0x71   :  { %1780 = vmatpush3.bf16.msra.mxu1 %v1911_v20  ;;  %1759 = vmatprep.subr.bf16.mxu0 %v1912_v21 }
  0x72   :  { %1781 = vmatprep.subr.bf16.mxu1 %v1913_v22 }
  0x74   :  { %1760 = vmatpush3.bf16.msra.mxu0 %v1914_v23 }
  0x75   :  { %1782 = vmatpush3.bf16.msra.mxu1 %v1915_v24  ;;  %1761 = vmatprep.subr.bf16.mxu0 %v1916_v25 }
  0x76   :  { %1783 = vmatprep.subr.bf16.mxu1 %v1917_v26 }
  0x77   :  { %8 = vsyncpa [#allocation3], 0  ;;  %v82_v32 = vrot.slane %v19_v31, %v2080_v41  ;;  %v75_v33 = vcombine.high %v19_v31, %v19_v31  ;;  %v1922_v34 = vld [vmem:[%s2397_s1 + $0x330] sm:$0xff]   ;;  %v1924_v36 = vld [vmem:[%s2397_s1 + $0x378] sm:$0xff]  }
  0x78   :  { %1762 = vmatpush3.bf16.msra.mxu0 %v1918_v27  ;;  %v1923_v35 = vld [vmem:[%s2397_s1 + $0x3b0] sm:$0xff]   ;;  %v1925_v37 = vld [vmem:[%s2397_s1 + $0x3f8] sm:$0xff]   ;;  %v1490_v49 = vld [vmem:[%s2398_s2] ss:$0 sm:$0xff] }
  0x79   :  { %1784 = vmatpush3.bf16.msra.mxu1 %v1919_v28  ;;  %1763 = vmatprep.subr.bf16.mxu0 %v1920_v29  ;;  %v90_v38 = vcombine.high %v82_v32, %v82_v32  ;;  %v89_v39 = vrot.slane %v75_v33, %v2080_v41  ;;  %v1926_v43 = vld [vmem:[%s2397_s1 + $0x338] sm:$0xff]   ;;  %v120_v46 = vpack.c.bf16 %v82_v32, %v82_v32 }
  0x7a   :  { %1785 = vmatprep.subr.bf16.mxu1 %v1921_v30  ;;  %v1927_v44 = vld [vmem:[%s2397_s1 + $0x3b8] sm:$0xff]   ;;  %s1954_s1 = smov [#allocation2]  }
  0x7b   :  { %v121_v40 = vpack.c.bf16 %v90_v38, %v90_v38  ;;  %v91_v42 = vcombine.high %v89_v39, %v89_v39  ;;  %v122_v47 = vpack.c.bf16 %v89_v39, %v89_v39  ;;  %s1482_s2 = sshll.u32 %s1954_s1, 4  ;;  %s1483_s2 = int_to_ptr.vmem [resolvable:$true] %s1482_s2 }
  0x7c   :  { %1764 = vmatpush3.bf16.msra.mxu0 %v1922_v34  ;;  %s1929_s7 = scalar_lea.vmem %s1483_s2, 32  ;;  %p1934_p1 = scmp.lt.s32.totalorder %s1483_s2, %s1483_s2 }
  0x7d   :  { %1786 = vmatpush3.bf16.msra.mxu1 %v1923_v35  ;;  %1765 = vmatprep.subr.bf16.mxu0 %v1924_v36  ;;  %v123_v45 = vpack.c.bf16 %v91_v42, %v91_v42  ;;  %p1930_p0 = scmp.ne.s32.totalorder %s1483_s2, %s1929_s7  ;;  %p1935_p2 = scmp.lt.s32.totalorder %s1929_s7, %s1929_s7 }
  0x7e   :  { %1787 = vmatprep.subr.bf16.mxu1 %v1925_v37  ;;  %1427 = vmatprep.mubr.bf16.mxu0 %v121_v40 }
  0x7f   :  { %1467 = vmatprep.mubr.bf16.mxu1 %v123_v45  ;;  %p1936_p3 = por %p1935_p2, %p1934_p1 }
  0x80   :  { %1766 = vmatpush3.bf16.msra.mxu0 %v1926_v43 }
  0x81   :  { %1788 = vmatpush3.bf16.msra.mxu1 %v1927_v44  ;;  %p1937_p4 = pnand %p1936_p3, %p1930_p0 }
  0x83   :  { %1428 = vmatmul.mubr.bf16.vlgmr.msra.gmra.mrb[12].mxu0 %v120_v46 }
  0x84   :  { %1468 = vmatmul.mubr.bf16.vlgmr.msra.gmra.mrb[12].mxu1 %v122_v47 }
  0xf6   :  { %v1635_v41 = vpop.f32.mrb[0].mxu0 }
  0xf7   :  { %v1657_v48 = vpop.f32.mrb[0].mxu1  ;;  %v1636_v50 = vpop.f32.mrb[1].mxu0 }
  0xf8   :  { %v1658_v51 = vpop.f32.mrb[1].mxu1  ;;  %v1637_v52 = vadd.f32 %v1636_v50, %v1635_v41  ;;  %v1638_v54 = vpop.f32.mrb[2].mxu0 }
  0xf9   :  { %v1659_v53 = vadd.f32 %v1658_v51, %v1657_v48  ;;  %v1660_v55 = vpop.f32.mrb[2].mxu1  ;;  %v1639_v56 = vpop.f32.mrb[3].mxu0 }
  0xfa   :  { %v1661_v57 = vpop.f32.mrb[3].mxu1  ;;  %v1190_v58 = vadd.f32 %v1637_v52, %v1490_v49 }
  0xfc   :  { %v1230_v59 = vadd.f32 %v1659_v53, %v1190_v58 }
 0x116   :  { %v1679_v60 = vpop.f32.mrb[4].mxu0 }
 0x117   :  { %v1701_v61 = vpop.f32.mrb[4].mxu1  ;;  %v1680_v62 = vpop.f32.mrb[5].mxu0 }
 0x118   :  { %v1702_v63 = vpop.f32.mrb[5].mxu1  ;;  %v1681_v0 = vadd.f32 %v1680_v62, %v1679_v60  ;;  %v1682_v2 = vpop.f32.mrb[6].mxu0 }
 0x119   :  { %v1703_v1 = vadd.f32 %v1702_v63, %v1701_v61  ;;  %v1704_v3 = vpop.f32.mrb[6].mxu1  ;;  %v1683_v4 = vpop.f32.mrb[7].mxu0 }
 0x11a   :  { %v1705_v5 = vpop.f32.mrb[7].mxu1  ;;  %v1270_v6 = vadd.f32 %v1681_v0, %v1230_v59 }
 0x11c   :  { %v1310_v7 = vadd.f32 %v1703_v1, %v1270_v6 }
 0x136   :  { %v1723_v8 = vpop.f32.mrb[8].mxu0 }
 0x137   :  { %v1745_v9 = vpop.f32.mrb[8].mxu1  ;;  %v1724_v10 = vpop.f32.mrb[9].mxu0 }
 0x138   :  { %v1746_v11 = vpop.f32.mrb[9].mxu1  ;;  %v1725_v12 = vadd.f32 %v1724_v10, %v1723_v8  ;;  %v1726_v14 = vpop.f32.mrb[10].mxu0 }
 0x139   :  { %v1747_v13 = vadd.f32 %v1746_v11, %v1745_v9  ;;  %v1748_v15 = vpop.f32.mrb[10].mxu1  ;;  %v1727_v16 = vpop.f32.mrb[11].mxu0 }
 0x13a   :  { %v1749_v17 = vpop.f32.mrb[11].mxu1  ;;  %v1350_v18 = vadd.f32 %v1725_v12, %v1310_v7 }
 0x13c   :  { %v1390_v19 = vadd.f32 %v1747_v13, %v1350_v18 }
 0x156   :  { %v1767_v20 = vpop.f32.mrb[12].mxu0 }
 0x157   :  { %v1789_v21 = vpop.f32.mrb[12].mxu1  ;;  %v1768_v22 = vpop.f32.mrb[13].mxu0 }
 0x158   :  { %v1790_v23 = vpop.f32.mrb[13].mxu1  ;;  %v1769_v24 = vadd.f32 %v1768_v22, %v1767_v20  ;;  %v1770_v26 = vpop.f32.mrb[14].mxu0 }
 0x159   :  { %v1791_v25 = vadd.f32 %v1790_v23, %v1789_v21  ;;  %v1792_v27 = vpop.f32.mrb[14].mxu1  ;;  %v1771_v28 = vpop.f32.mrb[15].mxu0 }
 0x15a   :  { %v1793_v29 = vpop.f32.mrb[15].mxu1  ;;  %v1430_v30 = vadd.f32 %v1769_v24, %v1390_v19 }
 0x15c   :  { %v1470_v31 = vadd.f32 %v1791_v25, %v1430_v30 }
 0x15e   :  { %1475 = vst [vmem:[#allocation2] sm:$0x3] %v1470_v31 }
 0x15f   :  { %1940 = shalt.err (!%p1937_p4)
}
 0x160   :  { %s1941_s10 = scalar_lea.hbm %s2399_s3, 32 }
 0x161   :  { %p1942_p5 = scmp.ne.s32.totalorder %s2399_s3, %s1941_s10  ;;  %p1945_p6 = scmp.lt.u32.totalorder %s1941_s10, %s2399_s3 }
 0x163   :  { %p1947_p7 = pnand %p1945_p6, %p1942_p5 }
 0x165   :  { %1950 = shalt.err (!%p1947_p7)
}
 0x166   :  { %1485 = dma.vmem_to_hbm [thread:$0]  %s1483_s2, 32, %s2399_s3, [#allocation3]  }
 0x167   :  { %1951 = dma.done.wait [#allocation3], 32  }
 0x168   :  { %1952 = vsyncadd [#allocation3], 4294967264 }
 0x169   :  { %1489 = vsyncpa [#allocation3], 1 }

// kernel: divided_video_transformer_forward.2
= control target key start
LH: loop header
LB: loop body
LE: loop exit
PB: predicated region body
PF: predicated region fallthrough
CT: control target
= control target key end

     0   :  { %vm130_vm0 = vcmask 392192   ;;  %vm315_vm1 = vcmask 523264   ;;  %vm484_vm2 = vcmask 261120   ;;  %vm870_vm3 = vcmask 64512   ;;  %s9912_s26 = smov 112   ;;  %s14366_s3 = inlined_call_operand.vmem [shape: bf16[48,64], index: 3, kind: input, shape index: {}]   ;;  %s14367_s0 = inlined_call_operand.vmem [shape: f32[128,48], index: 0, kind: input, shape index: {}]   ;;  %s14368_s5 = inlined_call_operand.vmem [shape: bf16[64,32], index: 5, kind: input, shape index: {}]   ;;  %s14369_s8 = inlined_call_operand.vmem [shape: bf16[2,32,32], index: 8, kind: input, shape index: {}]   ;;  %s14370_s4 = inlined_call_operand.vmem [shape: f32[1,64], index: 4, kind: input, shape index: {}]   ;;  %s14371_s7 = inlined_call_operand.vmem [shape: bf16[2,32,32], index: 7, kind: input, shape index: {}]   ;;  %s14372_s9 = inlined_call_operand.vmem [shape: bf16[2,32,32], index: 9, kind: input, shape index: {}]   ;;  %s14373_s6 = inlined_call_operand.vmem [shape: f32[1,32], index: 6, kind: input, shape index: {}]   ;;  %s14374_s10 = inlined_call_operand.vmem [shape: f32[2,1,32], index: 10, kind: input, shape index: {}]   ;;  %s14375_s11 = inlined_call_operand.vmem [shape: f32[2,1,32], index: 11, kind: input, shape index: {}]   ;;  %s14376_s12 = inlined_call_operand.vmem [shape: f32[2,1,32], index: 12, kind: input, shape index: {}]   ;;  %s14377_s1 = inlined_call_operand.vmem [shape: f32[128,128], index: 1, kind: input, shape index: {}]   ;;  %s14378_s13 = inlined_call_operand.vmem [shape: bf16[2,32,32], index: 13, kind: input, shape index: {}]   ;;  %s14379_s14 = inlined_call_operand.vmem [shape: f32[2,1,32], index: 14, kind: input, shape index: {}]   ;;  %s14380_s17 = inlined_call_operand.vmem [shape: bf16[2,32,64], index: 17, kind: input, shape index: {}]   ;;  %s14381_s19 = inlined_call_operand.vmem [shape: bf16[2,64,32], index: 19, kind: input, shape index: {}]   ;;  %s14382_s15 = inlined_call_operand.vmem [shape: f32[2,1,32], index: 15, kind: input, shape index: {}]   ;;  %s14383_s16 = inlined_call_operand.vmem [shape: f32[2,1,32], index: 16, kind: input, shape index: {}]   ;;  %s14384_s18 = inlined_call_operand.vmem [shape: f32[2,1,64], index: 18, kind: input, shape index: {}]   ;;  %s14385_s20 = inlined_call_operand.vmem [shape: f32[2,1,32], index: 20, kind: input, shape index: {}]   ;;  %s14386_s21 = inlined_call_operand.vmem [shape: f32[2,1,32], index: 21, kind: input, shape index: {}]   ;;  %s14387_s22 = inlined_call_operand.vmem [shape: f32[2,1,32], index: 22, kind: input, shape index: {}]   ;;  %s14388_s2 = inlined_call_operand.vmem [shape: f32[128,128], index: 2, kind: input, shape index: {}]   ;;  %s14389_s23 = inlined_call_operand.vmem [shape: f32[128,32], index: 23, kind: output, shape index: {}]  }
   0x1   :  { %14508 = sst [smem:[#allocation56_spill]] %s14366_s3  ;;  %vm2847_vm4 = vcmask 130048   ;;  %vm2864_vm5 = vcmask 195584   ;;  %s14770_s3 = smov 24  }
   0x2   :  { %14509 = sst [smem:[#allocation57_spill]] %s14367_s0  ;;  %s14516_s24 = sld [smem:[#allocation56_spill]] }
   0x3   :  { %14510 = sst [smem:[#allocation58_spill]] %s14368_s5  ;;  %s14517_s5 = sld [smem:[#allocation57_spill]] }
   0x4   :  { %14511 = sst [smem:[#allocation59_spill]] %s14369_s8  ;;  %s9911_s0 = smov 120  }
   0x5   :  { %14512 = sst [smem:[#allocation60_spill]] %s14370_s4  ;;  %s14519_s28 = sld [smem:[#allocation59_spill]] }
   0x6   :  { %14513 = sst [smem:[#allocation61_spill]] %s14371_s7  ;;  %s14520_s8 = sld [smem:[#allocation60_spill]] }
   0x7   :  { %14514 = sst [smem:[#allocation62_spill]] %s14372_s9  ;;  %s14518_s9 = sld [smem:[#allocation58_spill]] }
   0x8   :  { %14515 = sst [smem:[#allocation63_spill]] %s14373_s6  ;;  %v9204_v0 = vld [vmem:[%s14516_s24] sm:$0xff]   ;;  %v9205_v1 = vld [vmem:[%s14516_s24 + $0x8] sm:$0xff]   ;;  %v9206_v4 = vld [vmem:[%s14516_s24 + $0x10] sm:$0xff]   ;;  %s14521_s25 = sld [smem:[#allocation61_spill]] }
   0x9   :  { %8088 = vmatprep.subr.bf16.mxu0 %v9204_v0  ;;  %v75_v2 = vld [vmem:[%s14517_s5] sm:$0xff]  ;;  %v76_v3 = vld [vmem:[%s14517_s5 + $0x8] sm:$0xff]  ;;  %v77_v6 = vld [vmem:[%s14517_s5 + $0x10] sm:$0xff]  ;;  %s14522_s27 = sld [smem:[#allocation62_spill]]  ;;  %s14523_s29 = sld [smem:[#allocation63_spill]] }
   0xa   :  { %8089 = vmatpush3.bf16.msra.mxu0 %v9204_v0  ;;  %v91_v5 = vpack.c.bf16 %v76_v3, %v75_v2  ;;  %v78_v7 = vld [vmem:[%s14517_s5 + $0x18] sm:$0xff]  ;;  %v79_v8 = vld [vmem:[%s14517_s5 + $0x20] sm:$0xff]  ;;  %v80_v9 = vld [vmem:[%s14517_s5 + $0x28] sm:$0xff]  ;;  %s9913_s6 = smov 104   ;;  %s9915_s4 = smov 16  }
   0xb   :  { %8090 = vmatprep.subr.bf16.mxu0 %v9205_v1  ;;  %v92_v11 = vpack.c.bf16 %v78_v7, %v77_v6  ;;  %v93_v13 = vpack.c.bf16 %v80_v9, %v79_v8  ;;  %v81_v14 = vld [vmem:[%s14517_s5 + $0x30] sm:$0xff]  ;;  %v82_v15 = vld [vmem:[%s14517_s5 + $0x38] sm:$0xff]  ;;  %v83_v16 = vld [vmem:[%s14517_s5 + $0x40] sm:$0xff] }
   0xc   :  { %8094 = vmatprep.mubr.msk.bf16.mxu0 %vm130_vm0, %v91_v5  ;;  %v84_v17 = vld [vmem:[%s14517_s5 + $0x48] sm:$0xff]  ;;  %v94_v18 = vpack.c.bf16 %v82_v15, %v81_v14  ;;  %v85_v20 = vld [vmem:[%s14517_s5 + $0x50] sm:$0xff]  ;;  %v86_v21 = vld [vmem:[%s14517_s5 + $0x58] sm:$0xff] }
   0xd   :  { %v9207_v10 = vld [vmem:[%s14518_s9] sm:$0xff]   ;;  %v9208_v12 = vld [vmem:[%s14518_s9 + $0x8] sm:$0xff]   ;;  %v95_v19 = vpack.c.bf16 %v84_v17, %v83_v16  ;;  %v96_v24 = vpack.c.bf16 %v86_v21, %v85_v20  ;;  %v89_v26 = vld [vmem:[%s14517_s5 + $0x70] sm:$0xff] }
   0xe   :  { %8091 = vmatpush3.bf16.msra.mxu0 %v9205_v1  ;;  %8110 = vmatprep.subr.bf16.mxu1 %v9207_v10  ;;  %v87_v22 = vld [vmem:[%s14517_s5 + $0x60] sm:$0xff]  ;;  %v88_v23 = vld [vmem:[%s14517_s5 + $0x68] sm:$0xff]  ;;  %v90_v27 = vld [vmem:[%s14517_s5 + $0x78] sm:$0xff] }
   0xf   :  { %8092 = vmatprep.subr.bf16.mxu0 %v9206_v4  ;;  %8111 = vmatpush3.bf16.msra.mxu1 %v9207_v10  ;;  %v97_v25 = vpack.c.bf16 %v88_v23, %v87_v22  ;;  %v98_v28 = vpack.c.bf16 %v90_v27, %v89_v26  ;;  %v9209_v29 = vld [vmem:[%s14518_s9 + $0x10] sm:$0xff]   ;;  %v9210_v30 = vld [vmem:[%s14518_s9 + $0x18] sm:$0xff]   ;;  %v9211_v31 = vld [vmem:[%s14519_s28] sm:$0xff]  }
  0x10   :  { %8112 = vmatprep.subr.bf16.mxu1 %v9208_v12  ;;  %v10120_v32 = vld [vmem:[%s14520_s8] ss:$0 sm:$0xff]  ;;  %v9212_v50 = vld [vmem:[%s14519_s28 + $0x8] sm:$0xff]  }
  0x11   :  { %v9213_v26 = vld [vmem:[%s14521_s25] sm:$0xff]   ;;  %v9214_v27 = vld [vmem:[%s14521_s25 + $0x8] sm:$0xff]  }
  0x12   :  { %8093 = vmatpush3.bf16.msra.mxu0 %v9206_v4 }
  0x13   :  { %8113 = vmatpush3.bf16.msra.mxu1 %v9208_v12  ;;  %8134 = vmatprep.subr.bf16.mxu0 %v9213_v26 }
  0x14   :  { %8114 = vmatprep.subr.bf16.mxu1 %v9209_v29 }
  0x15   :  { %8095 = vmatmul.mubr.msk.bf16.vlgmr.msra.gmra.mrb[0].mxu0 %vm130_vm0, %v92_v11 }
  0x16   :  { %8098 = vmatprep.mubr.msk.bf16.mxu0 %vm130_vm0, %v93_v13  ;;  %8135 = vmatpush3.bf16.msra.mxu0 %v9213_v26 }
  0x17   :  { %8115 = vmatpush3.bf16.msra.mxu1 %v9209_v29  ;;  %8136 = vmatprep.subr.bf16.mxu0 %v9214_v27 }
  0x18   :  { %8116 = vmatprep.subr.bf16.mxu1 %v9210_v30 }
  0x1a   :  { %8137 = vmatpush3.bf16.msra.mxu0 %v9214_v27 }
  0x1b   :  { %8117 = vmatpush3.bf16.msra.mxu1 %v9210_v30  ;;  %v7426_v30 = vld [vmem:[%s14523_s29] ss:$0 sm:$0xff]  ;;  %s14451_s29 = smov 24  }
  0x1c   :  { %8154 = vmatprep.subr.bf16.mxu1 %v9211_v31 }
  0x1d   :  { %8099 = vmatmul.mubr.msk.bf16.gmra.mrb[4].mxu0 %vm130_vm0, %v94_v18 }
  0x1e   :  { %8102 = vmatprep.mubr.msk.bf16.mxu0 %vm130_vm0, %v95_v19 }
  0x25   :  { %8103 = vmatmul.mubr.msk.bf16.gmra.mrb[8].mxu0 %vm130_vm0, %v96_v24 }
  0x26   :  { %8106 = vmatprep.mubr.msk.bf16.mxu0 %vm130_vm0, %v97_v25 }
  0x2d   :  { %8107 = vmatmul.mubr.msk.bf16.gmra.mrb[12].mxu0 %vm130_vm0, %v98_v28  ;;  %v9215_v28 = vld [vmem:[%s14522_s27] sm:$0xff]  }
  0x2e   :  { %8174 = vmatprep.subr.bf16.mxu0 %v9215_v28 }
  0xe8   :  { %v8096_v33 = vpop.f32.mrb[0].mxu0 }
  0xe9   :  { %v198_v34 = vadd.f32 %v8096_v33, %v10120_v32  ;;  %v189_v35 = vpop.f32.mrb[1].mxu0 }
  0xea   :  { %v190_v36 = vadd.f32 %v10120_v32, %v189_v35  ;;  %v8097_v37 = vpop.f32.mrb[2].mxu0 }
  0xeb   :  { %v201_v38 = vadd.f32 %v8097_v37, %v10120_v32  ;;  %v192_v39 = vpop.f32.mrb[3].mxu0  ;;  %v254_v41 = vmax.f32 %v198_v34, 0.0 }
  0xec   :  { %v193_v40 = vadd.f32 %v10120_v32, %v192_v39  ;;  %v252_v43 = vmax.f32 %v190_v36, 0.0 }
  0xed   :  { %v255_v42 = vmax.f32 %v201_v38, 0.0 }
  0xee   :  { %v253_v44 = vmax.f32 %v193_v40, 0.0  ;;  %v9216_v40 = vld [vmem:[%s14522_s27 + $0x8] sm:$0xff]  }
  0xef   :  { %v269_v45 = vpack.c.bf16 %v255_v42, %v254_v41 }
  0xf0   :  { %v8100_v46 = vpop.f32.mrb[4].mxu0  ;;  %v268_v47 = vpack.c.bf16 %v253_v44, %v252_v43 }
  0xf1   :  { %v214_v48 = vadd.f32 %v8100_v46, %v10120_v32  ;;  %v205_v49 = vpop.f32.mrb[5].mxu0 }
  0xf2   :  { %v206_v51 = vadd.f32 %v10120_v32, %v205_v49  ;;  %v8101_v52 = vpop.f32.mrb[6].mxu0  ;;  %8118 = vmatprep.mubr.msk.bf16.mxu1 %vm315_vm1, %v268_v47 }
  0xf3   :  { %v258_v53 = vmax.f32 %v214_v48, 0.0  ;;  %v217_v54 = vadd.f32 %v8101_v52, %v10120_v32  ;;  %v208_v55 = vpop.f32.mrb[7].mxu0  ;;  %8119 = vmatmul.mubr.msk.bf16.vlgmr.msra.gmra.mrb[0].mxu1 %vm315_vm1, %v269_v45 }
  0xf4   :  { %v256_v56 = vmax.f32 %v206_v51, 0.0  ;;  %v209_v57 = vadd.f32 %v10120_v32, %v208_v55  ;;  %8155 = vmatpush3.bf16.msra.mxu1 %v9211_v31 }
  0xf5   :  { %v259_v58 = vmax.f32 %v217_v54, 0.0  ;;  %8156 = vmatprep.subr.bf16.mxu1 %v9212_v50 }
  0xf6   :  { %v257_v59 = vmax.f32 %v209_v57, 0.0 }
  0xf7   :  { %v271_v60 = vpack.c.bf16 %v259_v58, %v258_v53 }
  0xf8   :  { %v270_v61 = vpack.c.bf16 %v257_v59, %v256_v56  ;;  %v8104_v62 = vpop.f32.mrb[8].mxu0  ;;  %8157 = vmatpush3.bf16.msra.mxu1 %v9212_v50 }
  0xf9   :  { %v230_v63 = vadd.f32 %v8104_v62, %v10120_v32  ;;  %v221_v0 = vpop.f32.mrb[9].mxu0 }
  0xfa   :  { %v222_v1 = vadd.f32 %v10120_v32, %v221_v0  ;;  %v8105_v2 = vpop.f32.mrb[10].mxu0  ;;  %8122 = vmatprep.mubr.msk.bf16.mxu1 %vm315_vm1, %v270_v61 }
  0xfb   :  { %v262_v3 = vmax.f32 %v230_v63, 0.0  ;;  %v233_v4 = vadd.f32 %v8105_v2, %v10120_v32  ;;  %v224_v5 = vpop.f32.mrb[11].mxu0  ;;  %8123 = vmatmul.mubr.msk.bf16.gmra.mrb[4].mxu1 %vm315_vm1, %v271_v60 }
  0xfc   :  { %v260_v6 = vmax.f32 %v222_v1, 0.0  ;;  %v225_v7 = vadd.f32 %v10120_v32, %v224_v5 }
  0xfd   :  { %v263_v8 = vmax.f32 %v233_v4, 0.0 }
  0xfe   :  { %v261_v9 = vmax.f32 %v225_v7, 0.0 }
  0xff   :  { %v273_v10 = vpack.c.bf16 %v263_v8, %v262_v3  ;;  %v10239_v8 = vld [vmem:[%s14374_s10] ss:$0 sm:$0xff] }
 0x100   :  { %v272_v11 = vpack.c.bf16 %v261_v9, %v260_v6  ;;  %v8108_v12 = vpop.f32.mrb[12].mxu0 }
 0x101   :  { %v246_v13 = vadd.f32 %v8108_v12, %v10120_v32  ;;  %v237_v14 = vpop.f32.mrb[13].mxu0 }
 0x102   :  { %v238_v15 = vadd.f32 %v10120_v32, %v237_v14  ;;  %v8109_v16 = vpop.f32.mrb[14].mxu0  ;;  %8126 = vmatprep.mubr.msk.bf16.mxu1 %vm315_vm1, %v272_v11 }
 0x103   :  { %v266_v17 = vmax.f32 %v246_v13, 0.0  ;;  %v249_v18 = vadd.f32 %v8109_v16, %v10120_v32  ;;  %v240_v19 = vpop.f32.mrb[15].mxu0  ;;  %8127 = vmatmul.mubr.msk.bf16.gmra.mrb[8].mxu1 %vm315_vm1, %v273_v10  ;;  %v10244_v10 = vld [vmem:[%s14375_s11] ss:$0 sm:$0xff] }
 0x104   :  { %v264_v20 = vmax.f32 %v238_v15, 0.0  ;;  %v241_v21 = vadd.f32 %v10120_v32, %v240_v19 }
 0x105   :  { %v267_v22 = vmax.f32 %v249_v18, 0.0 }
 0x106   :  { %v265_v23 = vmax.f32 %v241_v21, 0.0 }
 0x107   :  { %v275_v24 = vpack.c.bf16 %v267_v22, %v266_v17 }
 0x108   :  { %v274_v25 = vpack.c.bf16 %v265_v23, %v264_v20 }
 0x10a   :  { %8130 = vmatprep.mubr.msk.bf16.mxu1 %vm315_vm1, %v274_v25 }
 0x10b   :  { %8131 = vmatmul.mubr.msk.bf16.gmra.mrb[12].mxu1 %vm315_vm1, %v275_v24 }
 0x1c6   :  { %v8120_v29 = vpop.f32.mrb[0].mxu1 }
 0x1c7   :  { %v374_v31 = vpop.f32.mrb[1].mxu1  ;;  %v10167_v37 = vadd.f32 %v8120_v29, %v7426_v30 }
 0x1c8   :  { %v8121_v32 = vpop.f32.mrb[2].mxu1  ;;  %v10163_v35 = vadd.f32 %v7426_v30, %v374_v31 }
 0x1c9   :  { %v10161_v33 = vadd.f32 %v8121_v32, %v7426_v30  ;;  %v377_v34 = vpop.f32.mrb[3].mxu1  ;;  %14527 = vst [vmem:[#allocation5_spill] sm:$0xff] %v10167_v37 }
 0x1ca   :  { %14525 = vst [vmem:[#allocation3_spill] sm:$0xff] %v10163_v35  ;;  %v10165_v36 = vadd.f32 %v7426_v30, %v377_v34 }
 0x1cb   :  { %14524 = vst [vmem:[#allocation2_spill] sm:$0xff] %v10161_v33  ;;  %v454_v39 = vpack.c.bf16 %v10161_v33, %v10167_v37 }
 0x1cc   :  { %14526 = vst [vmem:[#allocation4_spill] sm:$0xff] %v10165_v36  ;;  %v453_v38 = vpack.c.bf16 %v10165_v36, %v10163_v35 }
 0x1ce   :  { %v8124_v41 = vpop.f32.mrb[4].mxu1  ;;  %8138 = vmatprep.mubr.msk.bf16.mxu0 %vm484_vm2, %v453_v38  ;;  %8158 = vmatprep.mubr.msk.bf16.mxu1 %vm484_vm2, %v453_v38 }
 0x1cf   :  { %v10178_v42 = vadd.f32 %v8124_v41, %v7426_v30  ;;  %v390_v43 = vpop.f32.mrb[5].mxu1  ;;  %8139 = vmatmul.mubr.msk.bf16.vlgmr.msra.gmra.mrb[16].mxu0 %vm484_vm2, %v454_v39  ;;  %8159 = vmatmul.mubr.msk.bf16.vlgmr.msra.gmra.mrb[16].mxu1 %vm484_vm2, %v454_v39 }
 0x1d0   :  { %v10182_v44 = vadd.f32 %v7426_v30, %v390_v43  ;;  %v8125_v45 = vpop.f32.mrb[6].mxu1  ;;  %8175 = vmatpush3.bf16.msra.mxu0 %v9215_v28 }
 0x1d1   :  { %14528 = vst [vmem:[#allocation6_spill] sm:$0xff] %v10178_v42  ;;  %v10184_v46 = vadd.f32 %v8125_v45, %v7426_v30  ;;  %v393_v47 = vpop.f32.mrb[7].mxu1  ;;  %8176 = vmatprep.subr.bf16.mxu0 %v9216_v40 }
 0x1d2   :  { %14529 = vst [vmem:[#allocation7_spill] sm:$0xff] %v10182_v44  ;;  %v10186_v48 = vadd.f32 %v7426_v30, %v393_v47 }
 0x1d3   :  { %14530 = vst [vmem:[#allocation8_spill] sm:$0xff] %v10184_v46  ;;  %v456_v49 = vpack.c.bf16 %v10184_v46, %v10178_v42 }
 0x1d4   :  { %14531 = vst [vmem:[#allocation9_spill] sm:$0xff] %v10186_v48  ;;  %v455_v50 = vpack.c.bf16 %v10186_v48, %v10182_v44  ;;  %8177 = vmatpush3.bf16.msra.mxu0 %v9216_v40 }
 0x1d6   :  { %v8128_v51 = vpop.f32.mrb[8].mxu1  ;;  %8142 = vmatprep.mubr.msk.bf16.mxu0 %vm484_vm2, %v455_v50  ;;  %8162 = vmatprep.mubr.msk.bf16.mxu1 %vm484_vm2, %v455_v50 }
 0x1d7   :  { %v10194_v52 = vadd.f32 %v8128_v51, %v7426_v30  ;;  %v406_v53 = vpop.f32.mrb[9].mxu1  ;;  %8143 = vmatmul.mubr.msk.bf16.gmra.mrb[20].mxu0 %vm484_vm2, %v456_v49  ;;  %8163 = vmatmul.mubr.msk.bf16.gmra.mrb[20].mxu1 %vm484_vm2, %v456_v49 }
 0x1d8   :  { %v10198_v54 = vadd.f32 %v7426_v30, %v406_v53  ;;  %v8129_v55 = vpop.f32.mrb[10].mxu1 }
 0x1d9   :  { %14532 = vst [vmem:[#allocation10_spill] sm:$0xff] %v10194_v52  ;;  %v10200_v56 = vadd.f32 %v8129_v55, %v7426_v30  ;;  %v409_v57 = vpop.f32.mrb[11].mxu1 }
 0x1da   :  { %14533 = vst [vmem:[#allocation11_spill] sm:$0xff] %v10198_v54  ;;  %v10202_v58 = vadd.f32 %v7426_v30, %v409_v57 }
 0x1db   :  { %14534 = vst [vmem:[#allocation12_spill] sm:$0xff] %v10200_v56  ;;  %v458_v59 = vpack.c.bf16 %v10200_v56, %v10194_v52 }
 0x1dc   :  { %14535 = vst [vmem:[#allocation13_spill] sm:$0xff] %v10202_v58  ;;  %v457_v60 = vpack.c.bf16 %v10202_v58, %v10198_v54 }
 0x1de   :  { %v8132_v61 = vpop.f32.mrb[12].mxu1  ;;  %8146 = vmatprep.mubr.msk.bf16.mxu0 %vm484_vm2, %v457_v60  ;;  %8166 = vmatprep.mubr.msk.bf16.mxu1 %vm484_vm2, %v457_v60 }
 0x1df   :  { %v10210_v62 = vadd.f32 %v8132_v61, %v7426_v30  ;;  %v422_v63 = vpop.f32.mrb[13].mxu1  ;;  %8147 = vmatmul.mubr.msk.bf16.gmra.mrb[24].mxu0 %vm484_vm2, %v458_v59  ;;  %8167 = vmatmul.mubr.msk.bf16.gmra.mrb[24].mxu1 %vm484_vm2, %v458_v59 }
 0x1e0   :  { %v10214_v0 = vadd.f32 %v7426_v30, %v422_v63  ;;  %v8133_v1 = vpop.f32.mrb[14].mxu1 }
 0x1e1   :  { %14536 = vst [vmem:[#allocation14_spill] sm:$0xff] %v10210_v62  ;;  %v10216_v2 = vadd.f32 %v8133_v1, %v7426_v30  ;;  %v425_v3 = vpop.f32.mrb[15].mxu1 }
 0x1e2   :  { %14537 = vst [vmem:[#allocation15_spill] sm:$0xff] %v10214_v0  ;;  %v10218_v4 = vadd.f32 %v7426_v30, %v425_v3 }
 0x1e3   :  { %14538 = vst [vmem:[#allocation16_spill] sm:$0xff] %v10216_v2  ;;  %v460_v5 = vpack.c.bf16 %v10216_v2, %v10210_v62  ;;  %v10497_v62 = vld [vmem:[%s14377_s1 + $0x48] sm:$0xff] }
 0x1e4   :  { %14539 = vst [vmem:[#allocation17_spill] sm:$0xff] %v10218_v4  ;;  %v459_v6 = vpack.c.bf16 %v10218_v4, %v10214_v0  ;;  %14552 = vst [vmem:[#allocation30_spill] sm:$0xff] %v10497_v62  ;;  %v10507_v0 = vld [vmem:[%s14377_s1 + $0x70] sm:$0xff] }
 0x1e5   :  { %14553 = vst [vmem:[#allocation31_spill] sm:$0xff] %v10507_v0 }
 0x1e6   :  { %8150 = vmatprep.mubr.msk.bf16.mxu0 %vm484_vm2, %v459_v6  ;;  %8170 = vmatprep.mubr.msk.bf16.mxu1 %vm484_vm2, %v459_v6 }
 0x1e7   :  { %8151 = vmatmul.mubr.msk.bf16.gmra.mrb[28].mxu0 %vm484_vm2, %v460_v5  ;;  %8171 = vmatmul.mubr.msk.bf16.gmra.mrb[28].mxu1 %vm484_vm2, %v460_v5 }
 0x1e8   :  { %8178 = vmatprep.mubr.msk.bf16.mxu0 %vm484_vm2, %v453_v38 }
 0x1ef   :  { %8179 = vmatmul.mubr.msk.bf16.vlgmr.msra.gmra.mrb[32].mxu0 %vm484_vm2, %v454_v39 }
 0x1f0   :  { %8182 = vmatprep.mubr.msk.bf16.mxu0 %vm484_vm2, %v455_v50 }
 0x1f7   :  { %8183 = vmatmul.mubr.msk.bf16.gmra.mrb[36].mxu0 %vm484_vm2, %v456_v49 }
 0x1f8   :  { %8186 = vmatprep.mubr.msk.bf16.mxu0 %vm484_vm2, %v457_v60 }
 0x1ff   :  { %8187 = vmatmul.mubr.msk.bf16.gmra.mrb[40].mxu0 %vm484_vm2, %v458_v59 }
 0x200   :  { %8190 = vmatprep.mubr.msk.bf16.mxu0 %vm484_vm2, %v459_v6 }
 0x207   :  { %8191 = vmatmul.mubr.msk.bf16.gmra.mrb[44].mxu0 %vm484_vm2, %v460_v5 }
 0x2a2   :  { %v8140_v7 = vpop.f32.mrb[16].mxu0  ;;  %v8160_v9 = vpop.f32.mrb[16].mxu1 }
 0x2a3   :  { %v543_v11 = vpop.f32.mrb[17].mxu0  ;;  %v663_v12 = vpop.f32.mrb[17].mxu1  ;;  %v552_v15 = vadd.f32 %v8140_v7, %v10239_v8  ;;  %v672_v16 = vadd.f32 %v8160_v9, %v10244_v10 }
 0x2a4   :  { %v8141_v13 = vpop.f32.mrb[18].mxu0  ;;  %v8161_v14 = vpop.f32.mrb[18].mxu1  ;;  %v544_v21 = vadd.f32 %v10239_v8, %v543_v11  ;;  %v664_v22 = vadd.f32 %v10244_v10, %v663_v12 }
 0x2a5   :  { %v555_v17 = vadd.f32 %v8141_v13, %v10239_v8  ;;  %v675_v18 = vadd.f32 %v8161_v14, %v10244_v10  ;;  %v546_v19 = vpop.f32.mrb[19].mxu0  ;;  %v666_v20 = vpop.f32.mrb[19].mxu1 }
 0x2a6   :  { %v547_v23 = vadd.f32 %v10239_v8, %v546_v19  ;;  %v667_v24 = vadd.f32 %v10244_v10, %v666_v20 }
 0x2a7   :  { %v10254_v25 = vpack.c.bf16 %v555_v17, %v552_v15  ;;  %v10256_v26 = vpack.c.bf16 %v675_v18, %v672_v16 }
 0x2a8   :  { %v10258_v27 = vpack.c.bf16 %v547_v23, %v544_v21  ;;  %v10260_v28 = vpack.c.bf16 %v667_v24, %v664_v22 }
 0x2a9   :  { %1299 = vrot.lane.b32.xlu1 %v10256_v26, %s9911_s0  ;;  %v899_v63 = vsel %vm870_vm3, %v10256_v26, 0 }
 0x2aa   :  { %v8164_v29 = vpop.f32.mrb[20].mxu1  ;;  %1297 = vrot.lane.b32.xlu0 %v10260_v28, %s9911_s0  ;;  %v8144_v30 = vpop.f32.mrb[20].mxu0  ;;  %8894 = vmatprep.subr.msk.bf16.mxu1 %vm870_vm3, %v10260_v28  ;;  %v896_v31 = vsel %vm870_vm3, %v10260_v28, 0 }
 0x2ab   :  { %v568_v32 = vadd.f32 %v8144_v30, %v10239_v8  ;;  %8210 = vmatprep.mubr.msk.bf16.mxu1 %vm870_vm3, %v10258_v27  ;;  %v559_v34 = vpop.f32.mrb[21].mxu0  ;;  %v679_v38 = vpop.f32.mrb[21].mxu1  ;;  %8195 = vmatpush3.bf16.xpose.msra.mxu1 %v896_v31  ;;  %v688_v43 = vadd.f32 %v8164_v29, %v10244_v10 }
 0x2ac   :  { %v560_v39 = vadd.f32 %v10239_v8, %v559_v34  ;;  %v8145_v40 = vpop.f32.mrb[22].mxu0  ;;  %v8165_v41 = vpop.f32.mrb[22].mxu1  ;;  %8895 = vmatprep.subr.msk.bf16.mxu1 %vm870_vm3, %v10256_v26  ;;  %v680_v51 = vadd.f32 %v10244_v10, %v679_v38 }
 0x2ad   :  { %v571_v45 = vadd.f32 %v8145_v40, %v10239_v8  ;;  %v691_v47 = vadd.f32 %v8165_v41, %v10244_v10  ;;  %v562_v49 = vpop.f32.mrb[23].mxu0  ;;  %v682_v50 = vpop.f32.mrb[23].mxu1 }
 0x2ae   :  { %v563_v53 = vadd.f32 %v10239_v8, %v562_v49  ;;  %v683_v55 = vadd.f32 %v10244_v10, %v682_v50 }
 0x2af   :  { %v10282_v57 = vpack.c.bf16 %v571_v45, %v568_v32  ;;  %v10284_v59 = vpack.c.bf16 %v691_v47, %v688_v43 }
 0x2b0   :  { %v10286_v60 = vpack.c.bf16 %v563_v53, %v560_v39  ;;  %v10288_v61 = vpack.c.bf16 %v683_v55, %v680_v51 }
 0x2b1   :  { %14540 = vst [vmem:[#allocation18_spill] sm:$0xff] %v10284_v59 }
 0x2b2   :  { %14541 = vst [vmem:[#allocation19_spill] sm:$0xff] %v10288_v61  ;;  %v8148_v1 = vpop.f32.mrb[24].mxu0  ;;  %v8168_v3 = vpop.f32.mrb[24].mxu1  ;;  %v902_v29 = vsel %vm870_vm3, %v10288_v61, 0 }
 0x2b3   :  { %8197 = vmatpush3.bf16.xpose.msra.mxu1 %v899_v63  ;;  %v584_v5 = vadd.f32 %v8148_v1, %v10239_v8  ;;  %v704_v6 = vadd.f32 %v8168_v3, %v10244_v10  ;;  %v575_v7 = vpop.f32.mrb[25].mxu0  ;;  %v695_v9 = vpop.f32.mrb[25].mxu1 }
 0x2b4   :  { %8896 = vmatprep.subr.msk.bf16.mxu1 %vm870_vm3, %v10288_v61  ;;  %v576_v11 = vadd.f32 %v10239_v8, %v575_v7  ;;  %v696_v12 = vadd.f32 %v10244_v10, %v695_v9  ;;  %v8149_v13 = vpop.f32.mrb[26].mxu0  ;;  %v8169_v14 = vpop.f32.mrb[26].mxu1  ;;  %v7461_v7 = vld [vmem:[%s14376_s12] ss:$0 sm:$0xff]  ;;  %v905_v9 = vsel %vm870_vm3, %v10284_v59, 0 }
 0x2b5   :  { %v587_v15 = vadd.f32 %v8149_v13, %v10239_v8  ;;  %v707_v16 = vadd.f32 %v8169_v14, %v10244_v10  ;;  %v578_v17 = vpop.f32.mrb[27].mxu0  ;;  %v698_v18 = vpop.f32.mrb[27].mxu1 }
 0x2b6   :  { %v579_v19 = vadd.f32 %v10239_v8, %v578_v17  ;;  %v699_v20 = vadd.f32 %v10244_v10, %v698_v18 }
 0x2b7   :  { %v10302_v21 = vpack.c.bf16 %v587_v15, %v584_v5  ;;  %v10304_v22 = vpack.c.bf16 %v707_v16, %v704_v6 }
 0x2b8   :  { %v10306_v23 = vpack.c.bf16 %v579_v19, %v576_v11  ;;  %v10308_v24 = vpack.c.bf16 %v699_v20, %v696_v12 }
 0x2b9   :  { %14542 = vst [vmem:[#allocation20_spill] sm:$0xff] %v10304_v22 }
 0x2ba   :  { %14543 = vst [vmem:[#allocation21_spill] sm:$0xff] %v10308_v24  ;;  %v8152_v30 = vpop.f32.mrb[28].mxu0  ;;  %v8172_v31 = vpop.f32.mrb[28].mxu1  ;;  %v908_v19 = vsel %vm870_vm3, %v10308_v24, 0 }
 0x2bb   :  { %8199 = vmatpush3.bf16.xpose.msra.mxu1 %v902_v29  ;;  %v600_v32 = vadd.f32 %v8152_v30, %v10239_v8  ;;  %v591_v34 = vpop.f32.mrb[29].mxu0  ;;  %v720_v38 = vadd.f32 %v8172_v31, %v10244_v10  ;;  %v711_v39 = vpop.f32.mrb[29].mxu1 }
 0x2bc   :  { %8897 = vmatprep.subr.msk.bf16.mxu1 %vm870_vm3, %v10284_v59  ;;  %v592_v40 = vadd.f32 %v10239_v8, %v591_v34  ;;  %v8153_v41 = vpop.f32.mrb[30].mxu0  ;;  %v712_v43 = vadd.f32 %v10244_v10, %v711_v39  ;;  %v8173_v45 = vpop.f32.mrb[30].mxu1 }
 0x2bd   :  { %v603_v47 = vadd.f32 %v8153_v41, %v10239_v8  ;;  %v594_v49 = vpop.f32.mrb[31].mxu0  ;;  %v723_v50 = vadd.f32 %v8173_v45, %v10244_v10  ;;  %v714_v51 = vpop.f32.mrb[31].mxu1 }
 0x2be   :  { %v595_v53 = vadd.f32 %v10239_v8, %v594_v49  ;;  %v715_v55 = vadd.f32 %v10244_v10, %v714_v51 }
 0x2bf   :  { %v10322_v63 = vpack.c.bf16 %v603_v47, %v600_v32  ;;  %v10324_v1 = vpack.c.bf16 %v723_v50, %v720_v38 }
 0x2c0   :  { %v10326_v3 = vpack.c.bf16 %v595_v53, %v592_v40  ;;  %v10328_v5 = vpack.c.bf16 %v715_v55, %v712_v43  ;;  %v911_v43 = vsel %vm870_vm3, %v10304_v22, 0 }
 0x2c2   :  { %v8180_v6 = vpop.f32.mrb[32].mxu0 }
 0x2c3   :  { %v783_v11 = vpop.f32.mrb[33].mxu0  ;;  %8201 = vmatpush3.bf16.xpose.msra.mxu1 %v905_v9  ;;  %v792_v10 = vadd.f32 %v8180_v6, %v7461_v7 }
 0x2c4   :  { %v8181_v8 = vpop.f32.mrb[34].mxu0  ;;  %8898 = vmatprep.subr.msk.bf16.mxu1 %vm870_vm3, %v10308_v24  ;;  %v784_v14 = vadd.f32 %v7461_v7, %v783_v11 }
 0x2c5   :  { %v795_v12 = vadd.f32 %v8181_v8, %v7461_v7  ;;  %v786_v13 = vpop.f32.mrb[35].mxu0  ;;  %v914_v8 = vsel %vm870_vm3, %v10328_v5, 0 }
 0x2c6   :  { %v787_v15 = vadd.f32 %v7461_v7, %v786_v13 }
 0x2c7   :  { %v10337_v16 = vpack.c.bf16 %v795_v12, %v792_v10 }
 0x2c8   :  { %v10339_v17 = vpack.c.bf16 %v787_v15, %v784_v14 }
 0x2ca   :  { %v8184_v18 = vpop.f32.mrb[36].mxu0  ;;  %8226 = vmatprep.subr.bf16.mxu0 %v10339_v17 }
 0x2cb   :  { %v799_v20 = vpop.f32.mrb[37].mxu0  ;;  %8203 = vmatpush3.bf16.xpose.msra.mxu1 %v908_v19  ;;  %8227 = vmatpush3.bf16.msra.mxu0 %v10339_v17  ;;  %v808_v30 = vadd.f32 %v8184_v18, %v7461_v7 }
 0x2cc   :  { %v8185_v29 = vpop.f32.mrb[38].mxu0  ;;  %8899 = vmatprep.subr.msk.bf16.mxu1 %vm870_vm3, %v10304_v22  ;;  %8228 = vmatprep.subr.bf16.mxu0 %v10337_v16  ;;  %v800_v34 = vadd.f32 %v7461_v7, %v799_v20 }
 0x2cd   :  { %v811_v31 = vadd.f32 %v8185_v29, %v7461_v7  ;;  %v802_v32 = vpop.f32.mrb[39].mxu0 }
 0x2ce   :  { %v803_v38 = vadd.f32 %v7461_v7, %v802_v32  ;;  %v10409_v32 = vld [vmem:[%s14377_s1] sm:$0xff] }
 0x2cf   :  { %v10348_v39 = vpack.c.bf16 %v811_v31, %v808_v30  ;;  %8229 = vmatpush3.bf16.msra.mxu0 %v10337_v16  ;;  %v917_v30 = vsel %vm870_vm3, %v10324_v1, 0  ;;  %v10404_v31 = vld [vmem:[%s14377_s1 + $0x10] sm:$0xff] }
 0x2d0   :  { %v10351_v40 = vpack.c.bf16 %v803_v38, %v800_v34 }
 0x2d2   :  { %v8188_v41 = vpop.f32.mrb[40].mxu0  ;;  %8230 = vmatprep.subr.bf16.mxu0 %v10351_v40 }
 0x2d3   :  { %v815_v45 = vpop.f32.mrb[41].mxu0  ;;  %8205 = vmatpush3.bf16.xpose.msra.mxu1 %v911_v43  ;;  %8231 = vmatpush3.bf16.msra.mxu0 %v10351_v40  ;;  %v824_v49 = vadd.f32 %v8188_v41, %v7461_v7 }
 0x2d4   :  { %v8189_v47 = vpop.f32.mrb[42].mxu0  ;;  %8900 = vmatprep.subr.msk.bf16.mxu1 %vm870_vm3, %v10328_v5  ;;  %8232 = vmatprep.subr.bf16.mxu0 %v10348_v39  ;;  %v816_v53 = vadd.f32 %v7461_v7, %v815_v45  ;;  %v10420_v45 = vld [vmem:[%s14377_s1 + $0x18] sm:$0xff] }
 0x2d5   :  { %v827_v50 = vadd.f32 %v8189_v47, %v7461_v7  ;;  %v818_v51 = vpop.f32.mrb[43].mxu0 }
 0x2d6   :  { %v819_v55 = vadd.f32 %v7461_v7, %v818_v51 }
 0x2d7   :  { %v10360_v6 = vpack.c.bf16 %v827_v50, %v824_v49  ;;  %8233 = vmatpush3.bf16.msra.mxu0 %v10348_v39  ;;  %v10426_v50 = vld [vmem:[%s14377_s1 + $0x8] sm:$0xff] }
 0x2d8   :  { %v10363_v9 = vpack.c.bf16 %v819_v55, %v816_v53  ;;  %v10438_v55 = vld [vmem:[%s14377_s1 + $0x30] sm:$0xff] }
 0x2d9   :  { %14544 = vst [vmem:[#allocation22_spill] sm:$0xff] %v10360_v6 }
 0x2da   :  { %14545 = vst [vmem:[#allocation23_spill] sm:$0xff] %v10363_v9  ;;  %v8192_v11 = vpop.f32.mrb[44].mxu0  ;;  %8234 = vmatprep.subr.bf16.mxu0 %v10363_v9 }
 0x2db   :  { %v831_v10 = vpop.f32.mrb[45].mxu0  ;;  %8207 = vmatpush3.bf16.xpose.msra.mxu1 %v914_v8  ;;  %8235 = vmatpush3.bf16.msra.mxu0 %v10363_v9  ;;  %v840_v13 = vadd.f32 %v8192_v11, %v7461_v7  ;;  %v10445_v8 = vld [vmem:[%s14377_s1 + $0x38] sm:$0xff] }
 0x2dc   :  { %v8193_v12 = vpop.f32.mrb[46].mxu0  ;;  %8901 = vmatprep.subr.msk.bf16.mxu1 %vm870_vm3, %v10324_v1  ;;  %8236 = vmatprep.subr.bf16.mxu0 %v10360_v6  ;;  %v832_v18 = vadd.f32 %v7461_v7, %v831_v10 }
 0x2dd   :  { %v843_v14 = vadd.f32 %v8193_v12, %v7461_v7  ;;  %v834_v15 = vpop.f32.mrb[47].mxu0 }
 0x2de   :  { %v835_v19 = vadd.f32 %v7461_v7, %v834_v15 }
 0x2df   :  { %v10372_v20 = vpack.c.bf16 %v843_v14, %v840_v13  ;;  %8237 = vmatpush3.bf16.msra.mxu0 %v10360_v6  ;;  %v10453_v14 = vld [vmem:[%s14377_s1 + $0x20] sm:$0xff] }
 0x2e0   :  { %v10375_v29 = vpack.c.bf16 %v835_v19, %v832_v18  ;;  %14548 = vst [vmem:[#allocation26_spill] sm:$0xff] %v10453_v14  ;;  %v10461_v19 = vld [vmem:[%s14377_s1 + $0x28] sm:$0xff] }
 0x2e1   :  { %14546 = vst [vmem:[#allocation24_spill] sm:$0xff] %v10372_v20 }
 0x2e2   :  { %14547 = vst [vmem:[#allocation25_spill] sm:$0xff] %v10375_v29  ;;  %8238 = vmatprep.subr.bf16.mxu0 %v10375_v29 }
 0x2e3   :  { %8209 = vmatpush3.bf16.xpose.msra.mxu1 %v917_v30  ;;  %8239 = vmatpush3.bf16.msra.mxu0 %v10375_v29 }
 0x2e4   :  { %8240 = vmatprep.subr.bf16.mxu0 %v10372_v20 }
 0x2e7   :  { %8241 = vmatpush3.bf16.msra.mxu0 %v10372_v20 }
 0x2ea   :  { %8211 = vmatmul.mubr.msk.bf16.vlgmr.msra.gmra.mrb[32].mxu1 %vm870_vm3, %v10254_v25 }
 0x2eb   :  { %8214 = vmatprep.mubr.msk.bf16.mxu1 %vm870_vm3, %v10286_v60 }
 0x2f2   :  { %8215 = vmatmul.mubr.msk.bf16.gmra.mrb[36].mxu1 %vm870_vm3, %v10282_v57 }
 0x2f3   :  { %8218 = vmatprep.mubr.msk.bf16.mxu1 %vm870_vm3, %v10306_v23 }
 0x2fa   :  { %8219 = vmatmul.mubr.msk.bf16.gmra.mrb[40].mxu1 %vm870_vm3, %v10302_v21 }
 0x2fb   :  { %8222 = vmatprep.mubr.msk.bf16.mxu1 %vm870_vm3, %v10326_v3 }
 0x302   :  { %8223 = vmatmul.mubr.msk.bf16.gmra.mrb[44].mxu1 %vm870_vm3, %v10322_v63 }
 0x31b   :  { %v10549_v44 = vpop.permute.xlu1 %1299 }
 0x31c   :  { %v10397_v7 = vpop.permute.xlu0 %1297 }
 0x31d   :  { %8902 = vmatprep.subr.msk.bf16.mxu0 %vm870_vm3, %v10397_v7 }
 0x3bd   :  { %v8212_v34 = vpop.f32.mrb[32].mxu1 }
 0x3be   :  { %v10412_v38 = vadd.f32 %v8212_v34, %v10404_v31  ;;  %v953_v41 = vpop.f32.mrb[33].mxu1  ;;  %v10471_v34 = vld [vmem:[%s14377_s1 + $0x50] sm:$0xff] }
 0x3bf   :  { %v10415_v43 = vadd.f32 %v953_v41, %v10409_v32  ;;  %v8213_v47 = vpop.f32.mrb[34].mxu1  ;;  %14549 = vst [vmem:[#allocation27_spill] sm:$0xff] %v10471_v34 }
 0x3c0   :  { %1020 = vmax.xlane.f32.xlu1 %v10412_v38  ;;  %v956_v49 = vpop.f32.mrb[35].mxu1  ;;  %v10430_v51 = vadd.f32 %v8213_v47, %v10420_v45 }
 0x3c1   :  { %1016 = vmax.xlane.f32.xlu0 %v10415_v43  ;;  %v10433_v53 = vadd.f32 %v956_v49, %v10426_v50  ;;  %v10480_v49 = vld [vmem:[%s14377_s1 + $0x58] sm:$0xff] }
 0x3c2   :  { %14550 = vst [vmem:[#allocation28_spill] sm:$0xff] %v10480_v49 }
 0x3c4   :  { %1022 = vmax.xlane.f32.xlu1 %v10430_v51 }
 0x3c5   :  { %v8216_v11 = vpop.f32.mrb[36].mxu1  ;;  %1018 = vmax.xlane.f32.xlu0 %v10433_v53 }
 0x3c6   :  { %v10448_v10 = vadd.f32 %v8216_v11, %v10438_v55  ;;  %v969_v12 = vpop.f32.mrb[37].mxu1 }
 0x3c7   :  { %v8217_v13 = vpop.f32.mrb[38].mxu1  ;;  %v10466_v30 = vadd.f32 %v969_v12, %v10453_v14 }
 0x3c8   :  { %v10456_v15 = vadd.f32 %v8217_v13, %v10445_v8  ;;  %v972_v18 = vpop.f32.mrb[39].mxu1 }
 0x3c9   :  { %1028 = vmax.xlane.f32.xlu0 %v10448_v10  ;;  %v10474_v41 = vadd.f32 %v972_v18, %v10461_v19  ;;  %v10489_v18 = vld [vmem:[%s14377_s1 + $0x40] sm:$0xff] }
 0x3ca   :  { %1030 = vmax.xlane.f32.xlu1 %v10456_v15  ;;  %14551 = vst [vmem:[#allocation29_spill] sm:$0xff] %v10489_v18 }
 0x3cd   :  { %v8220_v47 = vpop.f32.mrb[40].mxu1  ;;  %1024 = vmax.xlane.f32.xlu0 %v10466_v30 }
 0x3ce   :  { %v10483_v11 = vadd.f32 %v8220_v47, %v10471_v34  ;;  %v985_v12 = vpop.f32.mrb[41].mxu1  ;;  %1026 = vmax.xlane.f32.xlu1 %v10474_v41 }
 0x3cf   :  { %v8221_v13 = vpop.f32.mrb[42].mxu1  ;;  %v10502_v47 = vadd.f32 %v985_v12, %v10489_v18  ;;  %v10520_v12 = vld [vmem:[%s14377_s1 + $0x60] sm:$0xff] }
 0x3d0   :  { %v10492_v2 = vadd.f32 %v8221_v13, %v10480_v49  ;;  %v988_v4 = vpop.f32.mrb[43].mxu1  ;;  %14554 = vst [vmem:[#allocation32_spill] sm:$0xff] %v10520_v12 }
 0x3d1   :  { %1036 = vmax.xlane.f32.xlu0 %v10483_v11  ;;  %v10510_v13 = vadd.f32 %v988_v4, %v10497_v62 }
 0x3d2   :  { %1038 = vmax.xlane.f32.xlu1 %v10492_v2 }
 0x3d5   :  { %v8224_v56 = vpop.f32.mrb[44].mxu1  ;;  %1032 = vmax.xlane.f32.xlu0 %v10502_v47 }
 0x3d6   :  { %v10514_v58 = vadd.f32 %v8224_v56, %v10507_v0  ;;  %v1001_v52 = vpop.f32.mrb[45].mxu1  ;;  %1034 = vmax.xlane.f32.xlu1 %v10510_v13  ;;  %v10534_v56 = vld [vmem:[%s14377_s1 + $0x78] sm:$0xff] }
 0x3d7   :  { %v8225_v54 = vpop.f32.mrb[46].mxu1  ;;  %v10524_v4 = vadd.f32 %v1001_v52, %v10520_v12  ;;  %14555 = vst [vmem:[#allocation33_spill] sm:$0xff] %v10534_v56  ;;  %v10542_v52 = vld [vmem:[%s14377_s1 + $0x68] sm:$0xff] }
 0x3d8   :  { %v1004_v46 = vpop.f32.mrb[47].mxu1  ;;  %v10537_v48 = vadd.f32 %v8225_v54, %v10534_v56  ;;  %14556 = vst [vmem:[#allocation34_spill] sm:$0xff] %v10542_v52 }
 0x3d9   :  { %1044 = vmax.xlane.f32.xlu0 %v10514_v58  ;;  %v10546_v42 = vadd.f32 %v1004_v46, %v10542_v52 }
 0x3dd   :  { %1040 = vmax.xlane.f32.xlu0 %v10524_v4 }
 0x3e7   :  { %1303 = vrot.lane.b32.xlu1 %v10284_v59, %s9911_s0 }
 0x3f3   :  { %1301 = vrot.lane.b32.xlu0 %v10288_v61, %s9911_s0 }
 0x40b   :  { %1046 = vmax.xlane.f32.xlu1 %v10537_v48 }
 0x40f   :  { %1042 = vmax.xlane.f32.xlu1 %v10546_v42 }
 0x44d   :  { %v1021_v33 = vpop.xlane.xlu1 %1020 }
 0x44e   :  { %v1050_v36 = vsub.f32 %v10412_v38, %v1021_v33  ;;  %v1017_v37 = vpop.xlane.xlu0 %1016 }
 0x44f   :  { %v1048_v54 = vsub.f32 %v10415_v43, %v1017_v37 }
 0x450   :  { %v1068_v35 = vmul.f32 1.442695, %v1050_v36 }
 0x451   :  { %v1064_v56 = vmul.f32 1.442695, %v1048_v54  ;;  %v1023_v61 = vpop.xlane.xlu1 %1022 }
 0x452   :  { %9239 = vpow2.f32 %v1068_v35  ;;  %v1051_v59 = vsub.f32 %v10430_v51, %v1023_v61  ;;  %v1019_v12 = vpop.xlane.xlu0 %1018 }
 0x453   :  { %v1049_v46 = vsub.f32 %v10433_v53, %v1019_v12  ;;  %9241 = vpow2.f32 %v1064_v56 }
 0x454   :  { %v1070_v52 = vmul.f32 1.442695, %v1051_v59 }
 0x455   :  { %v1066_v0 = vmul.f32 1.442695, %v1049_v46 }
 0x456   :  { %9243 = vpow2.f32 %v1070_v52  ;;  %v1029_v37 = vpop.xlane.xlu0 %1028 }
 0x457   :  { %9245 = vpow2.f32 %v1066_v0  ;;  %v1031_v61 = vpop.xlane.xlu1 %1030  ;;  %v1054_v51 = vsub.f32 %v10448_v10, %v1029_v37 }
 0x458   :  { %v1055_v46 = vsub.f32 %v10456_v15, %v1031_v61 }
 0x459   :  { %v1076_v56 = vmul.f32 1.442695, %v1054_v51 }
 0x45a   :  { %v1025_v59 = vpop.xlane.xlu0 %1024  ;;  %v1078_v49 = vmul.f32 1.442695, %v1055_v46 }
 0x45b   :  { %v1027_v43 = vpop.xlane.xlu1 %1026  ;;  %v1052_v53 = vsub.f32 %v10466_v30, %v1025_v59  ;;  %9247 = vpow2.f32 %v1076_v56 }
 0x45c   :  { %v10555_v18 = vpop.eup %9239  ;;  %v1053_v52 = vsub.f32 %v10474_v41, %v1027_v43 }
 0x45d   :  { %1100 = vadd.xlane.f32.xlu0 %v10555_v18  ;;  %v10558_v33 = vpop.eup %9241  ;;  %v1072_v62 = vmul.f32 1.442695, %v1052_v53 }
 0x45e   :  { %v1037_v0 = vpop.xlane.xlu0 %1036 }
 0x45f   :  { %v1039_v54 = vpop.xlane.xlu1 %1038  ;;  %9249 = vpow2.f32 %v1072_v62  ;;  %v1058_v14 = vsub.f32 %v10483_v11, %v1037_v0 }
 0x460   :  { %v10560_v36 = vpop.eup %9243 }
 0x461   :  { %1102 = vadd.xlane.f32.xlu1 %v10560_v36  ;;  %1096 = vadd.xlane.f32.xlu0 %v10558_v33  ;;  %v10564_v35 = vpop.eup %9245  ;;  %v1084_v41 = vmul.f32 1.442695, %v1058_v14 }
 0x462   :  { %v1033_v38 = vpop.xlane.xlu0 %1032 }
 0x463   :  { %v1035_v10 = vpop.xlane.xlu1 %1034  ;;  %v1056_v59 = vsub.f32 %v10502_v47, %v1033_v38 }
 0x464   :  { %v1057_v11 = vsub.f32 %v10510_v13, %v1035_v10 }
 0x465   :  { %1098 = vadd.xlane.f32.xlu1 %v10564_v35  ;;  %v10581_v43 = vpop.eup %9247  ;;  %v1080_v62 = vmul.f32 1.442695, %v1056_v59 }
 0x466   :  { %v1045_v12 = vpop.xlane.xlu0 %1044 }
 0x467   :  { %v10579_v61 = vpop.permute.xlu1 %1303 }
 0x46a   :  { %v1041_v34 = vpop.xlane.xlu0 %1040 }
 0x46b   :  { %v1060_v37 = vsub.f32 %v10524_v4, %v1041_v34 }
 0x46d   :  { %v1088_v15 = vmul.f32 1.442695, %v1060_v37 }
 0x46e   :  { %v1302_v46 = vpop.permute.xlu0 %1301 }
 0x476   :  { %1307 = vrot.lane.b32.xlu1 %v10304_v22, %s9911_s0  ;;  %v1074_v22 = vmul.f32 1.442695, %v1053_v52 }
 0x477   :  { %1305 = vrot.lane.b32.xlu0 %v10308_v24, %s9911_s0  ;;  %v1062_v24 = vsub.f32 %v10514_v58, %v1045_v12  ;;  %v1059_v58 = vsub.f32 %v10492_v2, %v1039_v54 }
 0x478   :  { %9251 = vpow2.f32 %v1074_v22  ;;  %v10585_v22 = vpop.eup %9249 }
 0x479   :  { %v1092_v30 = vmul.f32 1.442695, %v1062_v24  ;;  %9253 = vpow2.f32 %v1078_v49  ;;  %v1086_v49 = vmul.f32 1.442695, %v1059_v58 }
 0x47b   :  { %9255 = vpow2.f32 %v1092_v30 }
 0x47c   :  { %9257 = vpow2.f32 %v1084_v41 }
 0x47d   :  { %9259 = vpow2.f32 %v1088_v15 }
 0x47e   :  { %9261 = vpow2.f32 %v1080_v62 }
 0x482   :  { %v10587_v34 = vpop.eup %9251 }
 0x483   :  { %v10593_v4 = vpop.eup %9253 }
 0x485   :  { %v10595_v0 = vpop.eup %9255 }
 0x486   :  { %v10600_v51 = vpop.eup %9257 }
 0x487   :  { %v10602_v53 = vpop.eup %9259 }
 0x488   :  { %v10606_v12 = vpop.eup %9261 }
 0x496   :  { %1108 = vadd.xlane.f32.xlu0 %v10581_v43 }
 0x498   :  { %v1047_v24 = vpop.xlane.xlu1 %1046 }
 0x499   :  { %v1063_v14 = vsub.f32 %v10537_v48, %v1047_v24  ;;  %v1082_v48 = vmul.f32 1.442695, %v1057_v11 }
 0x49a   :  { %1106 = vadd.xlane.f32.xlu0 %v10587_v34  ;;  %1104 = vadd.xlane.f32.xlu1 %v10585_v22 }
 0x49b   :  { %v1094_v47 = vmul.f32 1.442695, %v1063_v14 }
 0x49c   :  { %v1043_v2 = vpop.xlane.xlu1 %1042 }
 0x49d   :  { %9263 = vpow2.f32 %v1094_v47  ;;  %v1061_v38 = vsub.f32 %v10546_v42, %v1043_v2 }
 0x49e   :  { %1110 = vadd.xlane.f32.xlu1 %v10593_v4  ;;  %1124 = vadd.xlane.f32.xlu0 %v10595_v0  ;;  %9265 = vpow2.f32 %v1086_v49 }
 0x49f   :  { %9267 = vpow2.f32 %v1082_v48  ;;  %v1090_v13 = vmul.f32 1.442695, %v1061_v38  ;;  %v1338_v48 = vsel %vm870_vm3, %v10397_v7, 0 }
 0x4a1   :  { %9269 = vpow2.f32 %v1090_v13 }
 0x4a2   :  { %1116 = vadd.xlane.f32.xlu1 %v10600_v51  ;;  %1120 = vadd.xlane.f32.xlu0 %v10602_v53 }
 0x4a6   :  { %1112 = vadd.xlane.f32.xlu1 %v10606_v12 }
 0x4a7   :  { %v10609_v56 = vpop.eup %9263 }
 0x4a8   :  { %1126 = vadd.xlane.f32.xlu0 %v10609_v56  ;;  %v10612_v42 = vpop.eup %9265 }
 0x4a9   :  { %v10615_v52 = vpop.eup %9267 }
 0x4aa   :  { %1118 = vadd.xlane.f32.xlu1 %v10612_v42 }
 0x4ab   :  { %v10618_v54 = vpop.eup %9269 }
 0x4ae   :  { %1114 = vadd.xlane.f32.xlu1 %v10615_v52 }
 0x4b2   :  { %1122 = vadd.xlane.f32.xlu1 %v10618_v54 }
 0x4be   :  { %1309 = vrot.lane.b32.xlu0 %v10328_v5, %s9911_s0 }
 0x4c2   :  { %1273 = vrot.lane.b32.xlu0 %v10258_v27, %s9911_s0 }
 0x4c3   :  { %1311 = vrot.lane.b32.xlu1 %v10324_v1, %s9911_s0 }
 0x4c6   :  { %1277 = vrot.lane.b32.xlu0 %v10286_v60, %s9911_s0 }
 0x4c7   :  { %1275 = vrot.lane.b32.xlu1 %v10254_v25, %s9911_s0 }
 0x4ca   :  { %1281 = vrot.lane.b32.xlu0 %v10306_v23, %s9911_s0 }
 0x4cb   :  { %1279 = vrot.lane.b32.xlu1 %v10282_v57, %s9911_s0 }
 0x4ce   :  { %1285 = vrot.lane.b32.xlu0 %v10326_v3, %s9911_s0 }
 0x4cf   :  { %1283 = vrot.lane.b32.xlu1 %v10302_v21, %s9911_s0 }
 0x4d2   :  { %1618 = vrot.lane.b32.xlu0 %v10339_v17, %s9911_s0 }
 0x4d3   :  { %1287 = vrot.lane.b32.xlu1 %v10322_v63, %s9911_s0 }
 0x4d6   :  { %1622 = vrot.lane.b32.xlu0 %v10351_v40, %s9911_s0 }
 0x4d7   :  { %1620 = vrot.lane.b32.xlu1 %v10337_v16, %s9911_s0 }
 0x4da   :  { %1626 = vrot.lane.b32.xlu0 %v10363_v9, %s9911_s0 }
 0x4db   :  { %1624 = vrot.lane.b32.xlu1 %v10348_v39, %s9911_s0 }
 0x4de   :  { %1630 = vrot.lane.b32.xlu0 %v10375_v29, %s9911_s0 }
 0x4df   :  { %1628 = vrot.lane.b32.xlu1 %v10360_v6, %s9911_s0 }
 0x4e2   :  { %1755 = vrot.lane.b32.xlu0 %v10260_v28, %s9912_s26 }
 0x4e3   :  { %1632 = vrot.lane.b32.xlu1 %v10372_v20, %s9911_s0 }
 0x4e7   :  { %1757 = vrot.lane.b32.xlu1 %v10256_v26, %s9912_s26 }
 0x4ea   :  { %v1101_v10 = vpop.xlane.xlu0 %1100 }
 0x4ee   :  { %v1103_v30 = vpop.xlane.xlu1 %1102  ;;  %v1097_v37 = vpop.xlane.xlu0 %1096 }
 0x4ef   :  { %9271 = vrcp.f32 %v1103_v30 }
 0x4f0   :  { %9273 = vrcp.f32 %v1097_v37 }
 0x4f1   :  { %9275 = vrcp.f32 %v1101_v10 }
 0x4f2   :  { %v1099_v41 = vpop.xlane.xlu1 %1098  ;;  %v1306_v7 = vpop.permute.xlu0 %1305 }
 0x4f3   :  { %9277 = vrcp.f32 %v1099_v41  ;;  %v1350_v38 = vsel %vm870_vm3, %v1306_v7, 0 }
 0x4f9   :  { %v9272_v59 = vpop.eup %9271 }
 0x4fa   :  { %v9274_v15 = vpop.eup %9273  ;;  %v1147_v24 = vmul.f32 %v9272_v59, %v10560_v36  ;;  %v1341_v36 = vsel %vm870_vm3, %v10549_v44, 0 }
 0x4fb   :  { %v9276_v58 = vpop.eup %9275  ;;  %v1144_v14 = vmul.f32 %v9274_v15, %v10558_v33  ;;  %v1344_v33 = vsel %vm870_vm3, %v1302_v46, 0 }
 0x4fc   :  { %v1146_v11 = vmul.f32 %v9276_v58, %v10555_v18  ;;  %v1347_v18 = vsel %vm870_vm3, %v10579_v61, 0 }
 0x4fd   :  { %v9278_v62 = vpop.eup %9277 }
 0x4fe   :  { %v1145_v49 = vmul.f32 %v9278_v62, %v10564_v35  ;;  %v1161_v2 = vpack.c.bf16 %v1147_v24, %v1146_v11  ;;  %v1308_v35 = vpop.permute.xlu1 %1307 }
 0x4ff   :  { %v1353_v30 = vsel %vm870_vm3, %v1308_v35, 0 }
 0x500   :  { %v1160_v47 = vpack.c.bf16 %v1145_v49, %v1144_v14 }
 0x502   :  { %8242 = vmatprep.mubr.bf16.mxu0 %v1160_v47 }
 0x503   :  { %8243 = vmatmul.mubr.bf16.vlgmr.msra.gmra.mrb[48].mxu0 %v1161_v2 }
 0x504   :  { %8259 = vmatpush3.bf16.xpose.msra.mxu0 %v1338_v48 }
 0x505   :  { %8903 = vmatprep.subr.msk.bf16.mxu0 %vm870_vm3, %v10549_v44 }
 0x50c   :  { %8261 = vmatpush3.bf16.xpose.msra.mxu0 %v1341_v36 }
 0x50d   :  { %8904 = vmatprep.subr.msk.bf16.mxu0 %vm870_vm3, %v1302_v46 }
 0x514   :  { %8263 = vmatpush3.bf16.xpose.msra.mxu0 %v1344_v33 }
 0x515   :  { %8905 = vmatprep.subr.msk.bf16.mxu0 %vm870_vm3, %v10579_v61 }
 0x51c   :  { %8265 = vmatpush3.bf16.xpose.msra.mxu0 %v1347_v18 }
 0x51d   :  { %8906 = vmatprep.subr.msk.bf16.mxu0 %vm870_vm3, %v1306_v7 }
 0x523   :  { %v1109_v44 = vpop.xlane.xlu0 %1108 }
 0x524   :  { %8267 = vmatpush3.bf16.xpose.msra.mxu0 %v1350_v38 }
 0x525   :  { %8907 = vmatprep.subr.msk.bf16.mxu0 %vm870_vm3, %v1308_v35 }
 0x527   :  { %v1105_v13 = vpop.xlane.xlu1 %1104  ;;  %v1107_v46 = vpop.xlane.xlu0 %1106 }
 0x528   :  { %9279 = vrcp.f32 %v1105_v13 }
 0x529   :  { %9281 = vrcp.f32 %v1107_v46 }
 0x52a   :  { %9283 = vrcp.f32 %v1109_v44 }
 0x52b   :  { %v1111_v10 = vpop.xlane.xlu1 %1110  ;;  %v1125_v61 = vpop.xlane.xlu0 %1124 }
 0x52c   :  { %9285 = vrcp.f32 %v1111_v10  ;;  %8269 = vmatpush3.bf16.xpose.msra.mxu0 %v1353_v30 }
 0x52f   :  { %v1117_v37 = vpop.xlane.xlu1 %1116  ;;  %v1121_v41 = vpop.xlane.xlu0 %1120 }
 0x532   :  { %v9280_v59 = vpop.eup %9279 }
 0x533   :  { %v9282_v15 = vpop.eup %9281  ;;  %v1113_v58 = vpop.xlane.xlu1 %1112  ;;  %v1148_v62 = vmul.f32 %v9280_v59, %v10585_v22 }
 0x534   :  { %v9284_v24 = vpop.eup %9283  ;;  %v1149_v14 = vmul.f32 %v9282_v15, %v10587_v34 }
 0x535   :  { %v1127_v49 = vpop.xlane.xlu0 %1126  ;;  %v1150_v48 = vmul.f32 %v9284_v24, %v10581_v43 }
 0x536   :  { %v9286_v11 = vpop.eup %9285  ;;  %v1162_v47 = vpack.c.bf16 %v1149_v14, %v1148_v62 }
 0x537   :  { %v1119_v2 = vpop.xlane.xlu1 %1118  ;;  %v1151_v36 = vmul.f32 %v9286_v11, %v10593_v4 }
 0x538   :  { %8246 = vmatprep.mubr.bf16.mxu0 %v1162_v47  ;;  %9287 = vrcp.f32 %v1119_v2 }
 0x539   :  { %v1310_v33 = vpop.permute.xlu0 %1309  ;;  %v1163_v18 = vpack.c.bf16 %v1151_v36, %v1150_v48  ;;  %9289 = vrcp.f32 %v1113_v58 }
 0x53a   :  { %8908 = vmatprep.subr.msk.bf16.mxu0 %vm870_vm3, %v1310_v33  ;;  %v1356_v22 = vsel %vm870_vm3, %v1310_v33, 0  ;;  %9291 = vrcp.f32 %v1117_v37 }
 0x53b   :  { %v1115_v7 = vpop.xlane.xlu1 %1114  ;;  %8247 = vmatmul.mubr.bf16.gmra.mrb[52].mxu0 %v1163_v18 }
 0x53c   :  { %9293 = vrcp.f32 %v1115_v7  ;;  %8271 = vmatpush3.bf16.xpose.msra.mxu0 %v1356_v22 }
 0x53d   :  { %v1274_v34 = vpop.permute.xlu0 %1273  ;;  %9295 = vrcp.f32 %v1121_v41 }
 0x53f   :  { %v1123_v35 = vpop.xlane.xlu1 %1122 }
 0x540   :  { %9297 = vrcp.f32 %v1123_v35 }
 0x541   :  { %9299 = vrcp.f32 %v1127_v49  ;;  %v1278_v43 = vpop.permute.xlu0 %1277 }
 0x542   :  { %v9288_v4 = vpop.eup %9287  ;;  %9301 = vrcp.f32 %v1125_v61 }
 0x543   :  { %v1312_v38 = vpop.permute.xlu1 %1311  ;;  %v9290_v44 = vpop.eup %9289  ;;  %v1155_v37 = vmul.f32 %v9288_v4, %v10612_v42 }
 0x544   :  { %8909 = vmatprep.subr.msk.bf16.mxu0 %vm870_vm3, %v1312_v38  ;;  %v1359_v13 = vsel %vm870_vm3, %v1312_v38, 0  ;;  %v9292_v46 = vpop.eup %9291  ;;  %v1152_v41 = vmul.f32 %v9290_v44, %v10606_v12 }
 0x545   :  { %8273 = vmatpush3.bf16.xpose.msra.mxu0 %v1359_v13  ;;  %v1282_v10 = vpop.permute.xlu0 %1281  ;;  %v1154_v61 = vmul.f32 %v9292_v46, %v10600_v51 }
 0x546   :  { %v9294_v30 = vpop.eup %9293 }
 0x547   :  { %v1276_v59 = vpop.permute.xlu1 %1275  ;;  %v1153_v15 = vmul.f32 %v9294_v30, %v10615_v52  ;;  %v9296_v58 = vpop.eup %9295  ;;  %v1165_v49 = vpack.c.bf16 %v1155_v37, %v1154_v61 }
 0x548   :  { %v1156_v2 = vmul.f32 %v9296_v58, %v10602_v53 }
 0x549   :  { %v1286_v62 = vpop.permute.xlu0 %1285  ;;  %v1164_v24 = vpack.c.bf16 %v1153_v15, %v1152_v41 }
 0x54a   :  { %v9298_v14 = vpop.eup %9297 }
 0x54b   :  { %v9300_v11 = vpop.eup %9299  ;;  %v1280_v47 = vpop.permute.xlu1 %1279  ;;  %8250 = vmatprep.mubr.bf16.mxu0 %v1164_v24  ;;  %v1157_v48 = vmul.f32 %v9298_v14, %v10618_v54 }
 0x54c   :  { %8251 = vmatmul.mubr.bf16.gmra.mrb[56].mxu0 %v1165_v49  ;;  %v9302_v42 = vpop.eup %9301  ;;  %v1159_v52 = vmul.f32 %v9300_v11, %v10609_v56 }
 0x54d   :  { %v1619_v36 = vpop.permute.xlu0 %1618  ;;  %v1166_v12 = vpack.c.bf16 %v1157_v48, %v1156_v2  ;;  %v1158_v51 = vmul.f32 %v9302_v42, %v10595_v0 }
 0x54e   :  { %8290 = vmatprep.subr.bf16.mxu1 %v1619_v36 }
 0x54f   :  { %v1284_v33 = vpop.permute.xlu1 %1283  ;;  %8254 = vmatprep.mubr.bf16.mxu0 %v1166_v12  ;;  %8291 = vmatpush3.bf16.msra.mxu1 %v1619_v36  ;;  %v1167_v18 = vpack.c.bf16 %v1159_v52, %v1158_v51 }
 0x551   :  { %v1623_v54 = vpop.permute.xlu0 %1622 }
 0x553   :  { %v1288_v22 = vpop.permute.xlu1 %1287 }
 0x554   :  { %8255 = vmatmul.mubr.bf16.gmra.mrb[60].mxu0 %v1167_v18 }
 0x555   :  { %8274 = vmatprep.mubr.msk.bf16.mxu0 %vm870_vm3, %v1274_v34  ;;  %v1627_v56 = vpop.permute.xlu0 %1626 }
 0x557   :  { %v1621_v53 = vpop.permute.xlu1 %1620 }
 0x558   :  { %8292 = vmatprep.subr.bf16.mxu1 %v1621_v53 }
 0x559   :  { %8293 = vmatpush3.bf16.msra.mxu1 %v1621_v53  ;;  %v1631_v34 = vpop.permute.xlu0 %1630  ;;  %v14573_v53 = vld [vmem:[#allocation26_spill] sm:$0xff] }
 0x55a   :  { %8294 = vmatprep.subr.bf16.mxu1 %v1623_v54 }
 0x55b   :  { %v1625_v7 = vpop.permute.xlu1 %1624 }
 0x55c   :  { %8275 = vmatmul.mubr.msk.bf16.vlgmr.msra.gmra.mrb[64].mxu0 %vm870_vm3, %v1276_v59 }
 0x55d   :  { %8278 = vmatprep.mubr.msk.bf16.mxu0 %vm870_vm3, %v1278_v43  ;;  %8295 = vmatpush3.bf16.msra.mxu1 %v1623_v54  ;;  %v10704_v43 = vpop.permute.xlu0 %1755 }
 0x55e   :  { %8296 = vmatprep.subr.bf16.mxu1 %v1625_v7 }
 0x55f   :  { %v1629_v0 = vpop.permute.xlu1 %1628 }
 0x561   :  { %8297 = vmatpush3.bf16.msra.mxu1 %v1625_v7  ;;  %v14574_v7 = vld [vmem:[#allocation28_spill] sm:$0xff] }
 0x562   :  { %8298 = vmatprep.subr.bf16.mxu1 %v1627_v56 }
 0x563   :  { %v1633_v35 = vpop.permute.xlu1 %1632 }
 0x564   :  { %8279 = vmatmul.mubr.msk.bf16.gmra.mrb[68].mxu0 %vm870_vm3, %v1280_v47 }
 0x565   :  { %8282 = vmatprep.mubr.msk.bf16.mxu0 %vm870_vm3, %v1282_v10  ;;  %8299 = vmatpush3.bf16.msra.mxu1 %v1627_v56 }
 0x566   :  { %8300 = vmatprep.subr.bf16.mxu1 %v1629_v0 }
 0x569   :  { %8301 = vmatpush3.bf16.msra.mxu1 %v1629_v0  ;;  %v14575_v0 = vld [vmem:[#allocation27_spill] sm:$0xff] }
 0x56a   :  { %8302 = vmatprep.subr.bf16.mxu1 %v1631_v34 }
 0x56c   :  { %8283 = vmatmul.mubr.msk.bf16.gmra.mrb[72].mxu0 %vm870_vm3, %v1284_v33 }
 0x56d   :  { %8286 = vmatprep.mubr.msk.bf16.mxu0 %vm870_vm3, %v1286_v62  ;;  %8303 = vmatpush3.bf16.msra.mxu1 %v1631_v34 }
 0x56e   :  { %8304 = vmatprep.subr.bf16.mxu1 %v1633_v35 }
 0x571   :  { %8305 = vmatpush3.bf16.msra.mxu1 %v1633_v35 }
 0x572   :  { %8910 = vmatprep.subr.msk.bf16.mxu1 %vm870_vm3, %v10704_v43 }
 0x574   :  { %8287 = vmatmul.mubr.msk.bf16.gmra.mrb[76].mxu0 %vm870_vm3, %v1288_v22 }
 0x5d6   :  { %v10709_v4 = vpop.f32.mrb[48].mxu0 }
 0x5d7   :  { %14557 = vst [vmem:[#allocation35_spill] sm:$0xff] %v10709_v4  ;;  %v10711_v38 = vpop.f32.mrb[49].mxu0 }
 0x5d8   :  { %14558 = vst [vmem:[#allocation36_spill] sm:$0xff] %v10711_v38  ;;  %v10713_v44 = vpop.f32.mrb[50].mxu0 }
 0x5d9   :  { %14559 = vst [vmem:[#allocation37_spill] sm:$0xff] %v10713_v44  ;;  %v10715_v13 = vpop.f32.mrb[51].mxu0 }
 0x5da   :  { %14560 = vst [vmem:[#allocation38_spill] sm:$0xff] %v10715_v13  ;;  %v11093_v13 = vld [vmem:[%s14377_s1 + $0x48] sm:$0xff] }
 0x60e   :  { %v10717_v46 = vpop.f32.mrb[52].mxu0 }
 0x60f   :  { %14561 = vst [vmem:[#allocation39_spill] sm:$0xff] %v10717_v46  ;;  %v10719_v10 = vpop.f32.mrb[53].mxu0 }
 0x610   :  { %14562 = vst [vmem:[#allocation40_spill] sm:$0xff] %v10719_v10  ;;  %v10721_v30 = vpop.f32.mrb[54].mxu0 }
 0x611   :  { %14563 = vst [vmem:[#allocation41_spill] sm:$0xff] %v10721_v30  ;;  %v10723_v37 = vpop.f32.mrb[55].mxu0 }
 0x612   :  { %14564 = vst [vmem:[#allocation42_spill] sm:$0xff] %v10723_v37 }
 0x61f   :  { %v10725_v59 = vpop.f32.mrb[56].mxu0 }
 0x620   :  { %14565 = vst [vmem:[#allocation43_spill] sm:$0xff] %v10725_v59  ;;  %v10727_v41 = vpop.f32.mrb[57].mxu0 }
 0x621   :  { %14566 = vst [vmem:[#allocation44_spill] sm:$0xff] %v10727_v41  ;;  %v10729_v15 = vpop.f32.mrb[58].mxu0 }
 0x622   :  { %14567 = vst [vmem:[#allocation45_spill] sm:$0xff] %v10729_v15  ;;  %v10731_v58 = vpop.f32.mrb[59].mxu0 }
 0x623   :  { %14568 = vst [vmem:[#allocation46_spill] sm:$0xff] %v10731_v58 }
 0x627   :  { %v10733_v61 = vpop.f32.mrb[60].mxu0 }
 0x628   :  { %14569 = vst [vmem:[#allocation47_spill] sm:$0xff] %v10733_v61  ;;  %v10735_v62 = vpop.f32.mrb[61].mxu0 }
 0x629   :  { %14570 = vst [vmem:[#allocation48_spill] sm:$0xff] %v10735_v62  ;;  %v10737_v24 = vpop.f32.mrb[62].mxu0 }
 0x62a   :  { %14571 = vst [vmem:[#allocation49_spill] sm:$0xff] %v10737_v24  ;;  %v10739_v14 = vpop.f32.mrb[63].mxu0 }
 0x62b   :  { %14572 = vst [vmem:[#allocation50_spill] sm:$0xff] %v10739_v14 }
 0x62f   :  { %v8276_v49 = vpop.f32.mrb[64].mxu0 }
 0x630   :  { %v1404_v11 = vadd.f32 %v8276_v49, %v10404_v31  ;;  %v1395_v47 = vpop.f32.mrb[65].mxu0 }
 0x631   :  { %v8277_v2 = vpop.f32.mrb[66].mxu0  ;;  %v1396_v36 = vadd.f32 %v1395_v47, %v10409_v32  ;;  %v14577_v47 = vld [vmem:[#allocation29_spill] sm:$0xff] }
 0x632   :  { %1462 = vmax.xlane.f32.xlu0 %v1404_v11  ;;  %v1398_v48 = vpop.f32.mrb[67].mxu0  ;;  %v1407_v52 = vadd.f32 %v8277_v2, %v10420_v45 }
 0x633   :  { %v1399_v42 = vadd.f32 %v1398_v48, %v10426_v50 }
 0x635   :  { %1460 = vmax.xlane.f32.xlu1 %v1399_v42 }
 0x636   :  { %1458 = vmax.xlane.f32.xlu0 %v1396_v36 }
 0x637   :  { %v8280_v12 = vpop.f32.mrb[68].mxu0 }
 0x638   :  { %v1411_v33 = vpop.f32.mrb[69].mxu0  ;;  %v10749_v22 = vadd.f32 %v8280_v12, %v10438_v55 }
 0x639   :  { %v8281_v51 = vpop.f32.mrb[70].mxu0  ;;  %v10757_v45 = vadd.f32 %v1411_v33, %v14573_v53 }
 0x63a   :  { %v10746_v18 = vadd.f32 %v8281_v51, %v10445_v8  ;;  %1464 = vmax.xlane.f32.xlu0 %v1407_v52  ;;  %v1414_v31 = vpop.f32.mrb[71].mxu0  ;;  %v14578_v51 = vld [vmem:[#allocation31_spill] sm:$0xff] }
 0x63b   :  { %v10753_v50 = vadd.f32 %v1414_v31, %v10461_v19  ;;  %v14576_v19 = vld [vmem:[#allocation30_spill] sm:$0xff] }
 0x63c   :  { %1472 = vmax.xlane.f32.xlu1 %v10746_v18 }
 0x63e   :  { %1470 = vmax.xlane.f32.xlu0 %v10749_v22 }
 0x63f   :  { %v8284_v32 = vpop.f32.mrb[72].mxu0 }
 0x640   :  { %1468 = vmax.xlane.f32.xlu1 %v10753_v50  ;;  %v1427_v8 = vpop.f32.mrb[73].mxu0  ;;  %v10765_v34 = vadd.f32 %v8284_v32, %v14575_v0  ;;  %v14579_v32 = vld [vmem:[#allocation32_spill] sm:$0xff]  ;;  %v14583_v0 = vld [vmem:[#allocation34_spill] sm:$0xff] }
 0x641   :  { %v8285_v54 = vpop.f32.mrb[74].mxu0  ;;  %v10773_v2 = vadd.f32 %v1427_v8, %v14577_v47  ;;  %v14580_v8 = vld [vmem:[#allocation18_spill] sm:$0xff] }
 0x642   :  { %v10761_v56 = vadd.f32 %v8285_v54, %v14574_v7  ;;  %1466 = vmax.xlane.f32.xlu0 %v10757_v45  ;;  %v1430_v55 = vpop.f32.mrb[75].mxu0  ;;  %v14581_v54 = vld [vmem:[#allocation19_spill] sm:$0xff]  ;;  %v14582_v7 = vld [vmem:[#allocation33_spill] sm:$0xff] }
 0x643   :  { %v10769_v35 = vadd.f32 %v1430_v55, %v14576_v19 }
 0x644   :  { %1480 = vmax.xlane.f32.xlu1 %v10761_v56 }
 0x646   :  { %1478 = vmax.xlane.f32.xlu0 %v10765_v34 }
 0x647   :  { %v8288_v49 = vpop.f32.mrb[76].mxu0 }
 0x648   :  { %1476 = vmax.xlane.f32.xlu1 %v10769_v35  ;;  %v1443_v48 = vpop.f32.mrb[77].mxu0  ;;  %v10778_v31 = vadd.f32 %v8288_v49, %v14578_v51  ;;  %v10797_v49 = vpop.permute.xlu1 %1757 }
 0x649   :  { %v8289_v12 = vpop.f32.mrb[78].mxu0  ;;  %v10782_v53 = vadd.f32 %v1443_v48, %v14579_v32 }
 0x64a   :  { %1474 = vmax.xlane.f32.xlu0 %v10773_v2  ;;  %v1446_v33 = vpop.f32.mrb[79].mxu0  ;;  %v10790_v55 = vadd.f32 %v8289_v12, %v14582_v7 }
 0x64b   :  { %v10794_v19 = vadd.f32 %v1446_v33, %v14583_v0 }
 0x64e   :  { %1486 = vmax.xlane.f32.xlu0 %v10778_v31 }
 0x652   :  { %1482 = vmax.xlane.f32.xlu0 %v10782_v53 }
 0x659   :  { %1761 = vrot.lane.b32.xlu1 %v14580_v8, %s9912_s26 }
 0x668   :  { %1759 = vrot.lane.b32.xlu0 %v14581_v54, %s9912_s26 }
 0x67d   :  { %1488 = vmax.xlane.f32.xlu1 %v10790_v55 }
 0x681   :  { %1484 = vmax.xlane.f32.xlu1 %v10794_v19 }
 0x6bf   :  { %v1463_v47 = vpop.xlane.xlu0 %1462 }
 0x6c0   :  { %v1492_v48 = vsub.f32 %v1404_v11, %v1463_v47 }
 0x6c2   :  { %v1510_v51 = vmul.f32 1.442695, %v1492_v48  ;;  %v1461_v32 = vpop.xlane.xlu1 %1460 }
 0x6c3   :  { %v1491_v62 = vsub.f32 %v1399_v42, %v1461_v32  ;;  %v1459_v14 = vpop.xlane.xlu0 %1458 }
 0x6c4   :  { %9303 = vpow2.f32 %v1510_v51  ;;  %v1490_v61 = vsub.f32 %v1396_v36, %v1459_v14 }
 0x6c5   :  { %v1508_v24 = vmul.f32 1.442695, %v1491_v62 }
 0x6c6   :  { %v1506_v12 = vmul.f32 1.442695, %v1490_v61 }
 0x6c7   :  { %9305 = vpow2.f32 %v1508_v24  ;;  %v1465_v7 = vpop.xlane.xlu0 %1464  ;;  %v14585_v24 = vld [vmem:[#allocation20_spill] sm:$0xff] }
 0x6c8   :  { %9307 = vpow2.f32 %v1506_v12  ;;  %v1493_v41 = vsub.f32 %v1407_v52, %v1465_v7 }
 0x6c9   :  { %v1473_v42 = vpop.xlane.xlu1 %1472 }
 0x6ca   :  { %v1512_v33 = vmul.f32 1.442695, %v1493_v41  ;;  %v14584_v41 = vld [vmem:[#allocation21_spill] sm:$0xff]  ;;  %v1497_v59 = vsub.f32 %v10746_v18, %v1473_v42 }
 0x6cb   :  { %v1471_v61 = vpop.xlane.xlu0 %1470 }
 0x6cc   :  { %9309 = vpow2.f32 %v1512_v33  ;;  %v1496_v52 = vsub.f32 %v10749_v22, %v1471_v61  ;;  %v1520_v46 = vmul.f32 1.442695, %v1497_v59 }
 0x6cd   :  { %v1469_v47 = vpop.xlane.xlu1 %1468 }
 0x6ce   :  { %v10799_v0 = vpop.eup %9303  ;;  %v1518_v51 = vmul.f32 1.442695, %v1496_v52  ;;  %v1495_v12 = vsub.f32 %v10753_v50, %v1469_v47 }
 0x6cf   :  { %1542 = vadd.xlane.f32.xlu1 %v10799_v0  ;;  %v1467_v14 = vpop.xlane.xlu0 %1466 }
 0x6d0   :  { %v1494_v32 = vsub.f32 %v10757_v45, %v1467_v14  ;;  %9311 = vpow2.f32 %v1518_v51  ;;  %v1516_v10 = vmul.f32 1.442695, %v1495_v12 }
 0x6d1   :  { %v10802_v58 = vpop.eup %9305  ;;  %v1481_v7 = vpop.xlane.xlu1 %1480 }
 0x6d2   :  { %v10804_v11 = vpop.eup %9307  ;;  %1540 = vadd.xlane.f32.xlu0 %v10802_v58  ;;  %v1514_v15 = vmul.f32 1.442695, %v1494_v32  ;;  %v1501_v18 = vsub.f32 %v10761_v56, %v1481_v7 }
 0x6d3   :  { %1538 = vadd.xlane.f32.xlu1 %v10804_v11  ;;  %v1479_v36 = vpop.xlane.xlu0 %1478 }
 0x6d4   :  { %v1500_v37 = vsub.f32 %v10765_v34, %v1479_v36  ;;  %9313 = vpow2.f32 %v1514_v15 }
 0x6d5   :  { %v1477_v30 = vpop.xlane.xlu1 %1476  ;;  %9315 = vpow2.f32 %v1516_v10 }
 0x6d6   :  { %v10808_v62 = vpop.eup %9309  ;;  %v1526_v61 = vmul.f32 1.442695, %v1500_v37  ;;  %9317 = vpow2.f32 %v1520_v46  ;;  %v1528_v37 = vmul.f32 1.442695, %v1501_v18  ;;  %v1499_v15 = vsub.f32 %v10769_v35, %v1477_v30 }
 0x6d7   :  { %1544 = vadd.xlane.f32.xlu1 %v10808_v62  ;;  %v1475_v48 = vpop.xlane.xlu0 %1474 }
 0x6d8   :  { %v1498_v45 = vsub.f32 %v10773_v2, %v1475_v48  ;;  %9319 = vpow2.f32 %v1526_v61 }
 0x6d9   :  { %v10826_v59 = vpop.permute.xlu1 %1761 }
 0x6da   :  { %v1522_v42 = vmul.f32 1.442695, %v1498_v45  ;;  %v10824_v47 = vpop.eup %9311 }
 0x6db   :  { %v1487_v33 = vpop.xlane.xlu0 %1486 }
 0x6dc   :  { %v1504_v22 = vsub.f32 %v10778_v31, %v1487_v33  ;;  %v1524_v31 = vmul.f32 1.442695, %v1499_v15 }
 0x6de   :  { %v1534_v50 = vmul.f32 1.442695, %v1504_v22  ;;  %v10830_v46 = vpop.eup %9313 }
 0x6df   :  { %v1483_v14 = vpop.xlane.xlu0 %1482  ;;  %v10832_v2 = vpop.eup %9315 }
 0x6e0   :  { %v1502_v52 = vsub.f32 %v10782_v53, %v1483_v14  ;;  %9321 = vpow2.f32 %v1534_v50  ;;  %v10837_v36 = vpop.eup %9317 }
 0x6e1   :  { %9323 = vpow2.f32 %v1522_v42 }
 0x6e2   :  { %v1530_v10 = vmul.f32 1.442695, %v1502_v52  ;;  %v10839_v30 = vpop.eup %9319 }
 0x6e3   :  { %v1760_v61 = vpop.permute.xlu0 %1759 }
 0x6e4   :  { %9325 = vpow2.f32 %v1530_v10 }
 0x6e5   :  { %9327 = vpow2.f32 %v1528_v37 }
 0x6e8   :  { %1763 = vrot.lane.b32.xlu0 %v14584_v41, %s9912_s26  ;;  %1765 = vrot.lane.b32.xlu1 %v14585_v24, %s9912_s26 }
 0x6ea   :  { %v10844_v51 = vpop.eup %9321 }
 0x6eb   :  { %v10846_v32 = vpop.eup %9323 }
 0x6ee   :  { %v10850_v12 = vpop.eup %9325 }
 0x6ef   :  { %v10852_v7 = vpop.eup %9327 }
 0x707   :  { %1550 = vadd.xlane.f32.xlu0 %v10824_v47 }
 0x70a   :  { %v1489_v34 = vpop.xlane.xlu1 %1488 }
 0x70b   :  { %v1505_v56 = vsub.f32 %v10790_v55, %v1489_v34  ;;  %1546 = vadd.xlane.f32.xlu0 %v10830_v46 }
 0x70c   :  { %1548 = vadd.xlane.f32.xlu1 %v10832_v2 }
 0x70d   :  { %v1536_v53 = vmul.f32 1.442695, %v1505_v56 }
 0x70e   :  { %v1485_v48 = vpop.xlane.xlu1 %1484 }
 0x70f   :  { %9329 = vpow2.f32 %v1536_v53  ;;  %v1503_v35 = vsub.f32 %v10794_v19, %v1485_v48  ;;  %1552 = vadd.xlane.f32.xlu0 %v10837_v36  ;;  %v1796_v53 = vsel %vm870_vm3, %v10704_v43, 0 }
 0x710   :  { %1558 = vadd.xlane.f32.xlu1 %v10839_v30  ;;  %9331 = vpow2.f32 %v1524_v31 }
 0x711   :  { %v1532_v55 = vmul.f32 1.442695, %v1503_v35 }
 0x713   :  { %1566 = vadd.xlane.f32.xlu0 %v10844_v51  ;;  %9333 = vpow2.f32 %v1532_v55 }
 0x714   :  { %1554 = vadd.xlane.f32.xlu1 %v10846_v32 }
 0x717   :  { %1562 = vadd.xlane.f32.xlu0 %v10850_v12 }
 0x718   :  { %1560 = vadd.xlane.f32.xlu1 %v10852_v7 }
 0x719   :  { %v10856_v19 = vpop.eup %9329 }
 0x71a   :  { %v10858_v33 = vpop.eup %9331 }
 0x71b   :  { %1568 = vadd.xlane.f32.xlu0 %v10856_v19 }
 0x71c   :  { %1556 = vadd.xlane.f32.xlu1 %v10858_v33 }
 0x71d   :  { %v10862_v22 = vpop.eup %9333 }
 0x720   :  { %1564 = vadd.xlane.f32.xlu1 %v10862_v22 }
 0x731   :  { %1769 = vrot.lane.b32.xlu1 %v10324_v1, %s9912_s26  ;;  %1767 = vrot.lane.b32.xlu0 %v10328_v5, %s9912_s26 }
 0x735   :  { %1741 = vrot.lane.b32.xlu1 %v10254_v25, %s9912_s26  ;;  %1739 = vrot.lane.b32.xlu0 %v10258_v27, %s9912_s26 }
 0x739   :  { %1745 = vrot.lane.b32.xlu1 %v10282_v57, %s9912_s26  ;;  %1743 = vrot.lane.b32.xlu0 %v10286_v60, %s9912_s26 }
 0x73d   :  { %1749 = vrot.lane.b32.xlu1 %v10302_v21, %s9912_s26  ;;  %1747 = vrot.lane.b32.xlu0 %v10306_v23, %s9912_s26 }
 0x741   :  { %1753 = vrot.lane.b32.xlu1 %v10322_v63, %s9912_s26  ;;  %1751 = vrot.lane.b32.xlu0 %v10326_v3, %s9912_s26 }
 0x745   :  { %2070 = vrot.lane.b32.xlu1 %v10337_v16, %s9912_s26  ;;  %2068 = vrot.lane.b32.xlu0 %v10339_v17, %s9912_s26 }
 0x749   :  { %2074 = vrot.lane.b32.xlu1 %v10348_v39, %s9912_s26  ;;  %2072 = vrot.lane.b32.xlu0 %v10351_v40, %s9912_s26 }
 0x74d   :  { %2078 = vrot.lane.b32.xlu1 %v10360_v6, %s9912_s26  ;;  %2076 = vrot.lane.b32.xlu0 %v10363_v9, %s9912_s26 }
 0x751   :  { %2082 = vrot.lane.b32.xlu1 %v10372_v20, %s9912_s26  ;;  %2080 = vrot.lane.b32.xlu0 %v10375_v29, %s9912_s26 }
 0x755   :  { %2207 = vrot.lane.b32.xlu1 %v10256_v26, %s9913_s6  ;;  %2205 = vrot.lane.b32.xlu0 %v10260_v28, %s9913_s6 }
 0x75c   :  { %v1543_v45 = vpop.xlane.xlu1 %1542 }
 0x75f   :  { %v1541_v14 = vpop.xlane.xlu0 %1540 }
 0x760   :  { %9335 = vrcp.f32 %v1541_v14  ;;  %v1539_v50 = vpop.xlane.xlu1 %1538 }
 0x761   :  { %9337 = vrcp.f32 %v1539_v50 }
 0x762   :  { %9339 = vrcp.f32 %v1543_v45 }
 0x763   :  { %v1764_v43 = vpop.permute.xlu0 %1763 }
 0x764   :  { %v1545_v52 = vpop.xlane.xlu1 %1544 }
 0x765   :  { %9341 = vrcp.f32 %v1545_v52 }
 0x76a   :  { %v9336_v18 = vpop.eup %9335 }
 0x76b   :  { %v9338_v42 = vpop.eup %9337  ;;  %v1587_v10 = vmul.f32 %v9336_v18, %v10802_v58  ;;  %v1799_v58 = vsel %vm870_vm3, %v10797_v49, 0 }
 0x76c   :  { %v1586_v37 = vmul.f32 %v9338_v42, %v10804_v11  ;;  %v9340_v15 = vpop.eup %9339  ;;  %v1805_v11 = vsel %vm870_vm3, %v10826_v59, 0 }
 0x76d   :  { %v1588_v28 = vmul.f32 %v9340_v15, %v10799_v0  ;;  %v1802_v0 = vsel %vm870_vm3, %v1760_v61, 0 }
 0x76e   :  { %v1602_v26 = vpack.c.bf16 %v1587_v10, %v1586_v37 }
 0x76f   :  { %v9342_v34 = vpop.eup %9341 }
 0x770   :  { %v1589_v56 = vmul.f32 %v9342_v34, %v10808_v62  ;;  %8306 = vmatprep.mubr.bf16.mxu1 %v1602_v26  ;;  %v1808_v62 = vsel %vm870_vm3, %v1764_v43, 0 }
 0x772   :  { %v1603_v31 = vpack.c.bf16 %v1589_v56, %v1588_v28 }
 0x774   :  { %8307 = vmatmul.mubr.bf16.vlgmr.msra.gmra.mrb[48].mxu1 %v1603_v31 }
 0x775   :  { %8323 = vmatpush3.bf16.xpose.msra.mxu1 %v1796_v53 }
 0x776   :  { %8911 = vmatprep.subr.msk.bf16.mxu1 %vm870_vm3, %v10797_v49  ;;  %v1766_v49 = vpop.permute.xlu1 %1765 }
 0x77d   :  { %8325 = vmatpush3.bf16.xpose.msra.mxu1 %v1799_v58 }
 0x77e   :  { %8912 = vmatprep.subr.msk.bf16.mxu1 %vm870_vm3, %v1760_v61  ;;  %v1811_v61 = vsel %vm870_vm3, %v1766_v49, 0 }
 0x785   :  { %8327 = vmatpush3.bf16.xpose.msra.mxu1 %v1802_v0 }
 0x786   :  { %8913 = vmatprep.subr.msk.bf16.mxu1 %vm870_vm3, %v10826_v59 }
 0x78d   :  { %8329 = vmatpush3.bf16.xpose.msra.mxu1 %v1805_v11 }
 0x78e   :  { %8914 = vmatprep.subr.msk.bf16.mxu1 %vm870_vm3, %v1764_v43 }
 0x794   :  { %v1551_v48 = vpop.xlane.xlu0 %1550 }
 0x795   :  { %8331 = vmatpush3.bf16.xpose.msra.mxu1 %v1808_v62 }
 0x796   :  { %8915 = vmatprep.subr.msk.bf16.mxu1 %vm870_vm3, %v1766_v49 }
 0x798   :  { %v1547_v35 = vpop.xlane.xlu0 %1546 }
 0x799   :  { %9343 = vrcp.f32 %v1547_v35  ;;  %v1549_v55 = vpop.xlane.xlu1 %1548 }
 0x79a   :  { %9345 = vrcp.f32 %v1549_v55 }
 0x79b   :  { %9347 = vrcp.f32 %v1551_v48 }
 0x79c   :  { %v1553_v45 = vpop.xlane.xlu0 %1552 }
 0x79d   :  { %8333 = vmatpush3.bf16.xpose.msra.mxu1 %v1811_v61  ;;  %9349 = vrcp.f32 %v1553_v45  ;;  %v1559_v59 = vpop.xlane.xlu1 %1558 }
 0x7a0   :  { %v1567_v14 = vpop.xlane.xlu0 %1566 }
 0x7a1   :  { %v1555_v50 = vpop.xlane.xlu1 %1554 }
 0x7a3   :  { %v9344_v52 = vpop.eup %9343 }
 0x7a4   :  { %v9346_v18 = vpop.eup %9345  ;;  %v1563_v42 = vpop.xlane.xlu0 %1562  ;;  %v1590_v10 = vmul.f32 %v9344_v52, %v10830_v46 }
 0x7a5   :  { %v9348_v37 = vpop.eup %9347  ;;  %v1561_v15 = vpop.xlane.xlu1 %1560  ;;  %v1591_v26 = vmul.f32 %v9346_v18, %v10832_v2 }
 0x7a6   :  { %9351 = vrcp.f32 %v1561_v15  ;;  %v1592_v31 = vmul.f32 %v9348_v37, %v10824_v47 }
 0x7a7   :  { %v9350_v34 = vpop.eup %9349  ;;  %v1604_v28 = vpack.c.bf16 %v1591_v26, %v1590_v10  ;;  %9353 = vrcp.f32 %v1555_v50 }
 0x7a8   :  { %v1569_v56 = vpop.xlane.xlu0 %1568  ;;  %v1593_v53 = vmul.f32 %v9350_v34, %v10837_v36  ;;  %9355 = vrcp.f32 %v1559_v59 }
 0x7a9   :  { %v1557_v58 = vpop.xlane.xlu1 %1556  ;;  %8310 = vmatprep.mubr.bf16.mxu1 %v1604_v28 }
 0x7aa   :  { %9357 = vrcp.f32 %v1557_v58  ;;  %v1605_v0 = vpack.c.bf16 %v1593_v53, %v1592_v31 }
 0x7ab   :  { %9359 = vrcp.f32 %v1563_v42 }
 0x7ac   :  { %8311 = vmatmul.mubr.bf16.gmra.mrb[52].mxu1 %v1605_v0  ;;  %v1768_v46 = vpop.permute.xlu0 %1767 }
 0x7ad   :  { %v1565_v11 = vpop.xlane.xlu1 %1564  ;;  %8916 = vmatprep.subr.msk.bf16.mxu1 %vm870_vm3, %v1768_v46  ;;  %v1814_v2 = vsel %vm870_vm3, %v1768_v46, 0 }
 0x7ae   :  { %9361 = vrcp.f32 %v1565_v11  ;;  %8335 = vmatpush3.bf16.xpose.msra.mxu1 %v1814_v2 }
 0x7af   :  { %9363 = vrcp.f32 %v1569_v56 }
 0x7b0   :  { %v1740_v43 = vpop.permute.xlu0 %1739  ;;  %v9352_v47 = vpop.eup %9351  ;;  %9365 = vrcp.f32 %v1567_v14 }
 0x7b1   :  { %v1770_v36 = vpop.permute.xlu1 %1769  ;;  %v9354_v62 = vpop.eup %9353  ;;  %v1597_v55 = vmul.f32 %v9352_v47, %v10852_v7 }
 0x7b2   :  { %8917 = vmatprep.subr.msk.bf16.mxu1 %vm870_vm3, %v1770_v36  ;;  %v9356_v48 = vpop.eup %9355  ;;  %v1817_v45 = vsel %vm870_vm3, %v1770_v36, 0  ;;  %v1594_v59 = vmul.f32 %v9354_v62, %v10846_v32 }
 0x7b3   :  { %v1596_v14 = vmul.f32 %v9356_v48, %v10839_v30 }
 0x7b4   :  { %v9358_v49 = vpop.eup %9357  ;;  %v1744_v35 = vpop.permute.xlu0 %1743 }
 0x7b5   :  { %v1742_v61 = vpop.permute.xlu1 %1741  ;;  %v1595_v50 = vmul.f32 %v9358_v49, %v10858_v33  ;;  %v9360_v52 = vpop.eup %9359  ;;  %v1607_v37 = vpack.c.bf16 %v1597_v55, %v1596_v14 }
 0x7b6   :  { %8337 = vmatpush3.bf16.xpose.msra.mxu1 %v1817_v45  ;;  %v1598_v7 = vmul.f32 %v9360_v52, %v10850_v12 }
 0x7b7   :  { %v1606_v18 = vpack.c.bf16 %v1595_v50, %v1594_v59  ;;  %v11066_v59 = vld [vmem:[%s14377_s1 + $0x20] sm:$0xff] }
 0x7b8   :  { %v9362_v42 = vpop.eup %9361  ;;  %v1748_v10 = vpop.permute.xlu0 %1747 }
 0x7b9   :  { %v9364_v15 = vpop.eup %9363  ;;  %v1746_v26 = vpop.permute.xlu1 %1745  ;;  %8314 = vmatprep.mubr.bf16.mxu1 %v1606_v18  ;;  %v1599_v34 = vmul.f32 %v9362_v42, %v10862_v22 }
 0x7ba   :  { %8315 = vmatmul.mubr.bf16.gmra.mrb[56].mxu1 %v1607_v37  ;;  %v9366_v28 = vpop.eup %9365  ;;  %v1601_v33 = vmul.f32 %v9364_v15, %v10856_v19  ;;  %v11048_v15 = vld [vmem:[%s14377_s1 + $0x30] sm:$0xff] }
 0x7bb   :  { %v1608_v32 = vpack.c.bf16 %v1599_v34, %v1598_v7  ;;  %v1600_v30 = vmul.f32 %v9366_v28, %v10844_v51 }
 0x7bc   :  { %v1752_v56 = vpop.permute.xlu0 %1751 }
 0x7bd   :  { %v1750_v31 = vpop.permute.xlu1 %1749  ;;  %8318 = vmatprep.mubr.bf16.mxu1 %v1608_v32  ;;  %v1609_v58 = vpack.c.bf16 %v1601_v33, %v1600_v30 }
 0x7c0   :  { %v2069_v53 = vpop.permute.xlu0 %2068 }
 0x7c1   :  { %v1754_v0 = vpop.permute.xlu1 %1753  ;;  %8354 = vmatprep.subr.bf16.mxu0 %v2069_v53 }
 0x7c2   :  { %8319 = vmatmul.mubr.bf16.gmra.mrb[60].mxu1 %v1609_v58  ;;  %8355 = vmatpush3.bf16.msra.mxu0 %v2069_v53 }
 0x7c3   :  { %8338 = vmatprep.mubr.msk.bf16.mxu1 %vm870_vm3, %v1740_v43 }
 0x7c4   :  { %v2073_v22 = vpop.permute.xlu0 %2072 }
 0x7c5   :  { %v2071_v12 = vpop.permute.xlu1 %2070 }
 0x7c6   :  { %8356 = vmatprep.subr.bf16.mxu0 %v2071_v12 }
 0x7c7   :  { %8357 = vmatpush3.bf16.msra.mxu0 %v2071_v12  ;;  %v11013_v12 = vld [vmem:[%s14377_s1 + $0x8] sm:$0xff] }
 0x7c8   :  { %8358 = vmatprep.subr.bf16.mxu0 %v2073_v22  ;;  %v2077_v51 = vpop.permute.xlu0 %2076 }
 0x7c9   :  { %v2075_v19 = vpop.permute.xlu1 %2074 }
 0x7ca   :  { %8339 = vmatmul.mubr.msk.bf16.vlgmr.msra.gmra.mrb[64].mxu1 %vm870_vm3, %v1742_v61 }
 0x7cb   :  { %8342 = vmatprep.mubr.msk.bf16.mxu1 %vm870_vm3, %v1744_v35  ;;  %8359 = vmatpush3.bf16.msra.mxu0 %v2073_v22 }
 0x7cc   :  { %8360 = vmatprep.subr.bf16.mxu0 %v2075_v19  ;;  %v2081_v11 = vpop.permute.xlu0 %2080 }
 0x7cd   :  { %v2079_v46 = vpop.permute.xlu1 %2078 }
 0x7cf   :  { %8361 = vmatpush3.bf16.msra.mxu0 %v2075_v19  ;;  %v11021_v19 = vld [vmem:[%s14377_s1] sm:$0xff] }
 0x7d0   :  { %8362 = vmatprep.subr.bf16.mxu0 %v2077_v51  ;;  %v10948_v43 = vpop.permute.xlu0 %2205 }
 0x7d1   :  { %v2083_v2 = vpop.permute.xlu1 %2082 }
 0x7d2   :  { %8343 = vmatmul.mubr.msk.bf16.gmra.mrb[68].mxu1 %vm870_vm3, %v1746_v26 }
 0x7d3   :  { %8346 = vmatprep.mubr.msk.bf16.mxu1 %vm870_vm3, %v1748_v10  ;;  %8363 = vmatpush3.bf16.msra.mxu0 %v2077_v51  ;;  %v11057_v10 = vld [vmem:[%s14377_s1 + $0x28] sm:$0xff] }
 0x7d4   :  { %8364 = vmatprep.subr.bf16.mxu0 %v2079_v46 }
 0x7d7   :  { %8365 = vmatpush3.bf16.msra.mxu0 %v2079_v46 }
 0x7d8   :  { %8366 = vmatprep.subr.bf16.mxu0 %v2081_v11 }
 0x7da   :  { %8347 = vmatmul.mubr.msk.bf16.gmra.mrb[72].mxu1 %vm870_vm3, %v1750_v31  ;;  %v11004_v31 = vld [vmem:[%s14377_s1 + $0x10] sm:$0xff] }
 0x7db   :  { %8350 = vmatprep.mubr.msk.bf16.mxu1 %vm870_vm3, %v1752_v56  ;;  %8367 = vmatpush3.bf16.msra.mxu0 %v2081_v11  ;;  %v11031_v11 = vld [vmem:[%s14377_s1 + $0x18] sm:$0xff] }
 0x7dc   :  { %8368 = vmatprep.subr.bf16.mxu0 %v2083_v2 }
 0x7df   :  { %8369 = vmatpush3.bf16.msra.mxu0 %v2083_v2 }
 0x7e0   :  { %8918 = vmatprep.subr.msk.bf16.mxu0 %vm870_vm3, %v10948_v43 }
 0x7e2   :  { %8351 = vmatmul.mubr.msk.bf16.gmra.mrb[76].mxu1 %vm870_vm3, %v1754_v0 }
 0x847   :  { %v10953_v47 = vpop.f32.mrb[48].mxu1 }
 0x848   :  { %14586 = vst [vmem:[#allocation26_spill] sm:$0xff] %v10953_v47  ;;  %v10955_v36 = vpop.f32.mrb[49].mxu1 }
 0x849   :  { %14587 = vst [vmem:[#allocation28_spill] sm:$0xff] %v10955_v36  ;;  %v10957_v62 = vpop.f32.mrb[50].mxu1 }
 0x84a   :  { %14588 = vst [vmem:[#allocation27_spill] sm:$0xff] %v10957_v62  ;;  %v10961_v49 = vpop.f32.mrb[51].mxu1 }
 0x84b   :  { %14589 = vst [vmem:[#allocation30_spill] sm:$0xff] %v10961_v49 }
 0x87f   :  { %v10965_v55 = vpop.f32.mrb[52].mxu1 }
 0x880   :  { %14590 = vst [vmem:[#allocation29_spill] sm:$0xff] %v10965_v55  ;;  %v10967_v61 = vpop.f32.mrb[53].mxu1 }
 0x881   :  { %14591 = vst [vmem:[#allocation31_spill] sm:$0xff] %v10967_v61  ;;  %v10969_v45 = vpop.f32.mrb[54].mxu1 }
 0x882   :  { %14592 = vst [vmem:[#allocation32_spill] sm:$0xff] %v10969_v45  ;;  %v10973_v50 = vpop.f32.mrb[55].mxu1 }
 0x883   :  { %14593 = vst [vmem:[#allocation18_spill] sm:$0xff] %v10973_v50 }
 0x88d   :  { %v10977_v14 = vpop.f32.mrb[56].mxu1 }
 0x88e   :  { %14594 = vst [vmem:[#allocation19_spill] sm:$0xff] %v10977_v14  ;;  %v10979_v18 = vpop.f32.mrb[57].mxu1 }
 0x88f   :  { %14595 = vst [vmem:[#allocation33_spill] sm:$0xff] %v10979_v18  ;;  %v10981_v42 = vpop.f32.mrb[58].mxu1 }
 0x890   :  { %14596 = vst [vmem:[#allocation34_spill] sm:$0xff] %v10981_v42  ;;  %v10985_v37 = vpop.f32.mrb[59].mxu1 }
 0x891   :  { %14597 = vst [vmem:[#allocation21_spill] sm:$0xff] %v10985_v37 }
 0x895   :  { %v10989_v26 = vpop.f32.mrb[60].mxu1 }
 0x896   :  { %14598 = vst [vmem:[#allocation20_spill] sm:$0xff] %v10989_v26  ;;  %v10991_v7 = vpop.f32.mrb[61].mxu1 }
 0x897   :  { %14599 = vst [vmem:[#allocation51_spill] sm:$0xff] %v10991_v7  ;;  %v10993_v34 = vpop.f32.mrb[62].mxu1 }
 0x898   :  { %14600 = vst [vmem:[#allocation52_spill] sm:$0xff] %v10993_v34  ;;  %v10997_v32 = vpop.f32.mrb[63].mxu1 }
 0x899   :  { %14601 = vst [vmem:[#allocation53_spill] sm:$0xff] %v10997_v32  ;;  %v11102_v32 = vld [vmem:[%s14377_s1 + $0x40] sm:$0xff] }
 0x89d   :  { %v8340_v33 = vpop.f32.mrb[64].mxu1 }
 0x89e   :  { %v11007_v30 = vadd.f32 %v11004_v31, %v8340_v33  ;;  %v1853_v53 = vpop.f32.mrb[65].mxu1 }
 0x89f   :  { %v8341_v58 = vpop.f32.mrb[66].mxu1  ;;  %v11024_v51 = vadd.f32 %v11021_v19, %v1853_v53  ;;  %v11039_v53 = vld [vmem:[%s14377_s1 + $0x38] sm:$0xff] }
 0x8a0   :  { %1920 = vmax.xlane.f32.xlu0 %v11007_v30  ;;  %v1856_v0 = vpop.f32.mrb[67].mxu1  ;;  %v11034_v2 = vadd.f32 %v11031_v11, %v8341_v58 }
 0x8a1   :  { %v11016_v22 = vadd.f32 %v11013_v12, %v1856_v0 }
 0x8a3   :  { %1918 = vmax.xlane.f32.xlu1 %v11016_v22 }
 0x8a4   :  { %1916 = vmax.xlane.f32.xlu0 %v11024_v51 }
 0x8a5   :  { %v8344_v46 = vpop.f32.mrb[68].mxu1 }
 0x8a6   :  { %v1869_v33 = vpop.f32.mrb[69].mxu1  ;;  %v11051_v58 = vadd.f32 %v11048_v15, %v8344_v46 }
 0x8a7   :  { %v8345_v0 = vpop.f32.mrb[70].mxu1  ;;  %v11069_v46 = vadd.f32 %v11066_v59, %v1869_v33  ;;  %v11084_v33 = vld [vmem:[%s14377_s1 + $0x50] sm:$0xff] }
 0x8a8   :  { %v11042_v56 = vadd.f32 %v11039_v53, %v8345_v0  ;;  %1922 = vmax.xlane.f32.xlu0 %v11034_v2  ;;  %v1872_v28 = vpop.f32.mrb[71].mxu1 }
 0x8a9   :  { %v11060_v0 = vadd.f32 %v11057_v10, %v1872_v28  ;;  %v11075_v28 = vld [vmem:[%s14377_s1 + $0x58] sm:$0xff] }
 0x8aa   :  { %1930 = vmax.xlane.f32.xlu1 %v11042_v56 }
 0x8ac   :  { %1928 = vmax.xlane.f32.xlu0 %v11051_v58 }
 0x8ad   :  { %v8348_v52 = vpop.f32.mrb[72].mxu1 }
 0x8ae   :  { %1926 = vmax.xlane.f32.xlu1 %v11060_v0  ;;  %v1885_v35 = vpop.f32.mrb[73].mxu1  ;;  %v11087_v38 = vadd.f32 %v11084_v33, %v8348_v52 }
 0x8af   :  { %v8349_v48 = vpop.f32.mrb[74].mxu1  ;;  %v11105_v52 = vadd.f32 %v11102_v32, %v1885_v35  ;;  %v11121_v35 = vld [vmem:[%s14377_s1 + $0x60] sm:$0xff] }
 0x8b0   :  { %v11078_v4 = vadd.f32 %v11075_v28, %v8349_v48  ;;  %1924 = vmax.xlane.f32.xlu0 %v11069_v46  ;;  %v1888_v44 = vpop.f32.mrb[75].mxu1 }
 0x8b1   :  { %v11096_v48 = vadd.f32 %v11093_v13, %v1888_v44  ;;  %v11112_v44 = vld [vmem:[%s14377_s1 + $0x70] sm:$0xff] }
 0x8b2   :  { %1938 = vmax.xlane.f32.xlu1 %v11078_v4 }
 0x8b4   :  { %1936 = vmax.xlane.f32.xlu0 %v11087_v38 }
 0x8b5   :  { %v8352_v7 = vpop.f32.mrb[76].mxu1 }
 0x8b6   :  { %1934 = vmax.xlane.f32.xlu1 %v11096_v48  ;;  %v1901_v26 = vpop.f32.mrb[77].mxu1  ;;  %v11115_v37 = vadd.f32 %v11112_v44, %v8352_v7  ;;  %v11134_v7 = vld [vmem:[%s14377_s1 + $0x78] sm:$0xff] }
 0x8b7   :  { %v8353_v34 = vpop.f32.mrb[78].mxu1  ;;  %v11124_v14 = vadd.f32 %v11121_v35, %v1901_v26  ;;  %14602 = vst [vmem:[#allocation54_spill] sm:$0xff] %v11134_v7  ;;  %v11143_v26 = vld [vmem:[%s14377_s1 + $0x68] sm:$0xff]  ;;  %s9914_s1 = smov 8  }
 0x8b8   :  { %1932 = vmax.xlane.f32.xlu0 %v11105_v52  ;;  %v1904_v18 = vpop.f32.mrb[79].mxu1  ;;  %v11137_v42 = vadd.f32 %v11134_v7, %v8353_v34  ;;  %14603 = vst [vmem:[#allocation55_spill] sm:$0xff] %v11143_v26 }
 0x8bc   :  { %1944 = vmax.xlane.f32.xlu0 %v11115_v37 }
 0x8c0   :  { %1940 = vmax.xlane.f32.xlu0 %v11124_v14 }
 0x8c7   :  { %2211 = vrot.lane.b32.xlu1 %v14580_v8, %s9913_s6  ;;  %v11146_v8 = vadd.f32 %v11143_v26, %v1904_v18 }
 0x8d6   :  { %2209 = vrot.lane.b32.xlu0 %v14581_v54, %s9913_s6  ;;  %v11149_v54 = vpop.permute.xlu1 %2207 }
 0x8eb   :  { %1946 = vmax.xlane.f32.xlu1 %v11137_v42 }
 0x8ef   :  { %1942 = vmax.xlane.f32.xlu1 %v11146_v8 }
 0x92d   :  { %v1921_v61 = vpop.xlane.xlu0 %1920 }
 0x92e   :  { %v1950_v50 = vsub.f32 %v11007_v30, %v1921_v61 }
 0x930   :  { %v1968_v55 = vmul.f32 1.442695, %v1950_v50  ;;  %v1919_v34 = vpop.xlane.xlu1 %1918 }
 0x931   :  { %v1949_v45 = vsub.f32 %v11016_v22, %v1919_v34  ;;  %v1917_v36 = vpop.xlane.xlu0 %1916 }
 0x932   :  { %9367 = vpow2.f32 %v1968_v55  ;;  %v1948_v49 = vsub.f32 %v11024_v51, %v1917_v36 }
 0x933   :  { %v1966_v47 = vmul.f32 1.442695, %v1949_v45 }
 0x934   :  { %v1964_v62 = vmul.f32 1.442695, %v1948_v49 }
 0x935   :  { %9369 = vpow2.f32 %v1966_v47  ;;  %v1923_v18 = vpop.xlane.xlu0 %1922 }
 0x936   :  { %9371 = vpow2.f32 %v1964_v62  ;;  %v1951_v29 = vsub.f32 %v11034_v2, %v1923_v18 }
 0x938   :  { %v1970_v20 = vmul.f32 1.442695, %v1951_v29  ;;  %v1931_v29 = vpop.xlane.xlu1 %1930 }
 0x939   :  { %v1929_v47 = vpop.xlane.xlu0 %1928  ;;  %v1955_v18 = vsub.f32 %v11042_v56, %v1931_v29 }
 0x93a   :  { %9373 = vpow2.f32 %v1970_v20  ;;  %v1954_v49 = vsub.f32 %v11051_v58, %v1929_v47 }
 0x93b   :  { %v1978_v9 = vmul.f32 1.442695, %v1955_v18 }
 0x93c   :  { %v11155_v26 = vpop.eup %9367  ;;  %v1927_v55 = vpop.xlane.xlu1 %1926  ;;  %v1976_v30 = vmul.f32 1.442695, %v1954_v49 }
 0x93d   :  { %2000 = vadd.xlane.f32.xlu1 %v11155_v26  ;;  %v1925_v20 = vpop.xlane.xlu0 %1924  ;;  %v1953_v51 = vsub.f32 %v11060_v0, %v1927_v55 }
 0x93e   :  { %v1952_v22 = vsub.f32 %v11069_v46, %v1925_v20  ;;  %9375 = vpow2.f32 %v1976_v30 }
 0x93f   :  { %v11158_v61 = vpop.eup %9369  ;;  %v1974_v7 = vmul.f32 1.442695, %v1953_v51 }
 0x940   :  { %v11160_v50 = vpop.eup %9371  ;;  %1998 = vadd.xlane.f32.xlu0 %v11158_v61  ;;  %v1939_v2 = vpop.xlane.xlu1 %1938 }
 0x941   :  { %1996 = vadd.xlane.f32.xlu1 %v11160_v50  ;;  %v1937_v62 = vpop.xlane.xlu0 %1936  ;;  %v1959_v56 = vsub.f32 %v11078_v4, %v1939_v2 }
 0x944   :  { %v11164_v36 = vpop.eup %9373  ;;  %v1935_v6 = vpop.xlane.xlu1 %1934 }
 0x945   :  { %2002 = vadd.xlane.f32.xlu1 %v11164_v36  ;;  %v1933_v45 = vpop.xlane.xlu0 %1932 }
 0x946   :  { %v1956_v46 = vsub.f32 %v11105_v52, %v1933_v45  ;;  %v1957_v52 = vsub.f32 %v11096_v48, %v1935_v6 }
 0x948   :  { %v1980_v29 = vmul.f32 1.442695, %v1956_v46  ;;  %v11180_v55 = vpop.eup %9375  ;;  %v1982_v45 = vmul.f32 1.442695, %v1957_v52  ;;  %v2246_v46 = vsel %vm870_vm3, %v10948_v43, 0 }
 0x949   :  { %v1945_v34 = vpop.xlane.xlu0 %1944 }
 0x94a   :  { %v1962_v58 = vsub.f32 %v11115_v37, %v1945_v34 }
 0x94c   :  { %v1992_v0 = vmul.f32 1.442695, %v1962_v58 }
 0x94d   :  { %v1941_v20 = vpop.xlane.xlu0 %1940 }
 0x94e   :  { %v1960_v49 = vsub.f32 %v11124_v14, %v1941_v20 }
 0x950   :  { %v1988_v37 = vmul.f32 1.442695, %v1960_v49 }
 0x956   :  { %2213 = vrot.lane.b32.xlu0 %v14584_v41, %s9913_s6  ;;  %2215 = vrot.lane.b32.xlu1 %v14585_v24, %s9913_s6  ;;  %v1972_v41 = vmul.f32 1.442695, %v1952_v22  ;;  %v1958_v24 = vsub.f32 %v11087_v38, %v1937_v62  ;;  %v11182_v38 = vpop.permute.xlu1 %2211 }
 0x958   :  { %9377 = vpow2.f32 %v1972_v41  ;;  %v1984_v47 = vmul.f32 1.442695, %v1958_v24 }
 0x959   :  { %9379 = vpow2.f32 %v1974_v7  ;;  %v1986_v7 = vmul.f32 1.442695, %v1959_v56 }
 0x95a   :  { %9381 = vpow2.f32 %v1978_v9 }
 0x95b   :  { %9383 = vpow2.f32 %v1984_v47 }
 0x95c   :  { %9385 = vpow2.f32 %v1992_v0 }
 0x95d   :  { %9387 = vpow2.f32 %v1980_v29 }
 0x95e   :  { %9389 = vpow2.f32 %v1988_v37 }
 0x95f   :  { %9391 = vpow2.f32 %v1986_v7 }
 0x962   :  { %v11186_v9 = vpop.eup %9377 }
 0x963   :  { %v11188_v14 = vpop.eup %9379 }
 0x964   :  { %v11193_v22 = vpop.eup %9381 }
 0x965   :  { %v11195_v6 = vpop.eup %9383 }
 0x966   :  { %v11200_v2 = vpop.eup %9385 }
 0x967   :  { %v11202_v34 = vpop.eup %9387 }
 0x968   :  { %v11206_v18 = vpop.eup %9389 }
 0x969   :  { %v11208_v41 = vpop.eup %9391 }
 0x975   :  { %2008 = vadd.xlane.f32.xlu0 %v11180_v55 }
 0x978   :  { %v1947_v62 = vpop.xlane.xlu1 %1946 }
 0x979   :  { %v1963_v4 = vsub.f32 %v11137_v42, %v1947_v62  ;;  %2004 = vadd.xlane.f32.xlu0 %v11186_v9 }
 0x97a   :  { %2006 = vadd.xlane.f32.xlu1 %v11188_v14 }
 0x97b   :  { %v1994_v30 = vmul.f32 1.442695, %v1963_v4 }
 0x97c   :  { %v1943_v51 = vpop.xlane.xlu1 %1942 }
 0x97d   :  { %9393 = vpow2.f32 %v1994_v30  ;;  %v1961_v48 = vsub.f32 %v11146_v8, %v1943_v51  ;;  %2010 = vadd.xlane.f32.xlu0 %v11193_v22 }
 0x97e   :  { %2016 = vadd.xlane.f32.xlu1 %v11195_v6  ;;  %9395 = vpow2.f32 %v1982_v45 }
 0x97f   :  { %v1990_v42 = vmul.f32 1.442695, %v1961_v48 }
 0x981   :  { %2024 = vadd.xlane.f32.xlu0 %v11200_v2  ;;  %9397 = vpow2.f32 %v1990_v42 }
 0x982   :  { %2012 = vadd.xlane.f32.xlu1 %v11202_v34 }
 0x985   :  { %2020 = vadd.xlane.f32.xlu0 %v11206_v18 }
 0x986   :  { %2018 = vadd.xlane.f32.xlu1 %v11208_v41 }
 0x987   :  { %v11212_v8 = vpop.eup %9393 }
 0x988   :  { %v11214_v24 = vpop.eup %9395 }
 0x989   :  { %2026 = vadd.xlane.f32.xlu0 %v11212_v8 }
 0x98a   :  { %2014 = vadd.xlane.f32.xlu1 %v11214_v24 }
 0x98b   :  { %v11218_v58 = vpop.eup %9397 }
 0x98e   :  { %2022 = vadd.xlane.f32.xlu1 %v11218_v58 }
 0x99f   :  { %2219 = vrot.lane.b32.xlu1 %v10324_v1, %s9913_s6  ;;  %2217 = vrot.lane.b32.xlu0 %v10328_v5, %s9913_s6 }
 0x9a3   :  { %2191 = vrot.lane.b32.xlu1 %v10254_v25, %s9913_s6  ;;  %2189 = vrot.lane.b32.xlu0 %v10258_v27, %s9913_s6  ;;  %v2210_v25 = vpop.permute.xlu0 %2209 }
 0x9a7   :  { %2195 = vrot.lane.b32.xlu1 %v10282_v57, %s9913_s6  ;;  %2193 = vrot.lane.b32.xlu0 %v10286_v60, %s9913_s6 }
 0x9ab   :  { %2199 = vrot.lane.b32.xlu1 %v10302_v21, %s9913_s6  ;;  %2197 = vrot.lane.b32.xlu0 %v10306_v23, %s9913_s6 }
 0x9af   :  { %2203 = vrot.lane.b32.xlu1 %v10322_v63, %s9913_s6  ;;  %2201 = vrot.lane.b32.xlu0 %v10326_v3, %s9913_s6 }
 0x9b3   :  { %2520 = vrot.lane.b32.xlu1 %v10337_v16, %s9913_s6  ;;  %2518 = vrot.lane.b32.xlu0 %v10339_v17, %s9913_s6 }
 0x9b7   :  { %2522 = vrot.lane.b32.xlu0 %v10351_v40, %s9913_s6 }
 0x9bb   :  { %2524 = vrot.lane.b32.xlu0 %v10348_v39, %s9913_s6 }
 0x9ca   :  { %v2001_v27 = vpop.xlane.xlu1 %2000 }
 0x9cd   :  { %v1999_v57 = vpop.xlane.xlu0 %1998 }
 0x9ce   :  { %9399 = vrcp.f32 %v1999_v57  ;;  %v1997_v60 = vpop.xlane.xlu1 %1996 }
 0x9cf   :  { %9401 = vrcp.f32 %v1997_v60 }
 0x9d0   :  { %9403 = vrcp.f32 %v2001_v27 }
 0x9d1   :  { %v2214_v43 = vpop.permute.xlu0 %2213 }
 0x9d2   :  { %v2003_v21 = vpop.xlane.xlu1 %2002 }
 0x9d3   :  { %9405 = vrcp.f32 %v2003_v21 }
 0x9d8   :  { %v9400_v23 = vpop.eup %9399 }
 0x9d9   :  { %v9402_v63 = vpop.eup %9401  ;;  %v2045_v1 = vmul.f32 %v9400_v23, %v11158_v61  ;;  %v2249_v61 = vsel %vm870_vm3, %v11149_v54, 0 }
 0x9da   :  { %v2044_v3 = vmul.f32 %v9402_v63, %v11160_v50  ;;  %v9404_v5 = vpop.eup %9403  ;;  %v2255_v50 = vsel %vm870_vm3, %v11182_v38, 0 }
 0x9db   :  { %v2046_v39 = vmul.f32 %v9404_v5, %v11155_v26  ;;  %v2252_v26 = vsel %vm870_vm3, %v2210_v25, 0 }
 0x9dc   :  { %v2060_v16 = vpack.c.bf16 %v2045_v1, %v2044_v3 }
 0x9dd   :  { %v9406_v17 = vpop.eup %9405 }
 0x9de   :  { %v2047_v40 = vmul.f32 %v9406_v17, %v11164_v36  ;;  %8370 = vmatprep.mubr.bf16.mxu0 %v2060_v16  ;;  %v2258_v36 = vsel %vm870_vm3, %v2214_v43, 0 }
 0x9e0   :  { %v2061_v47 = vpack.c.bf16 %v2047_v40, %v2046_v39 }
 0x9e2   :  { %8371 = vmatmul.mubr.bf16.vlgmr.msra.gmra.mrb[80].mxu0 %v2061_v47 }
 0x9e3   :  { %8387 = vmatpush3.bf16.xpose.msra.mxu0 %v2246_v46 }
 0x9e4   :  { %8919 = vmatprep.subr.msk.bf16.mxu0 %vm870_vm3, %v11149_v54  ;;  %v2216_v54 = vpop.permute.xlu1 %2215 }
 0x9e5   :  { %v2261_v56 = vsel %vm870_vm3, %v2216_v54, 0 }
 0x9eb   :  { %8389 = vmatpush3.bf16.xpose.msra.mxu0 %v2249_v61 }
 0x9ec   :  { %8920 = vmatprep.subr.msk.bf16.mxu0 %vm870_vm3, %v2210_v25 }
 0x9f3   :  { %8391 = vmatpush3.bf16.xpose.msra.mxu0 %v2252_v26 }
 0x9f4   :  { %8921 = vmatprep.subr.msk.bf16.mxu0 %vm870_vm3, %v11182_v38 }
 0x9fb   :  { %8393 = vmatpush3.bf16.xpose.msra.mxu0 %v2255_v50 }
 0x9fc   :  { %8922 = vmatprep.subr.msk.bf16.mxu0 %vm870_vm3, %v2214_v43 }
 0xa02   :  { %v2009_v20 = vpop.xlane.xlu0 %2008 }
 0xa03   :  { %8395 = vmatpush3.bf16.xpose.msra.mxu0 %v2258_v36 }
 0xa04   :  { %8923 = vmatprep.subr.msk.bf16.mxu0 %vm870_vm3, %v2216_v54 }
 0xa06   :  { %v2005_v0 = vpop.xlane.xlu0 %2004 }
 0xa07   :  { %9407 = vrcp.f32 %v2005_v0  ;;  %v2007_v49 = vpop.xlane.xlu1 %2006 }
 0xa08   :  { %9409 = vrcp.f32 %v2007_v49 }
 0xa09   :  { %9411 = vrcp.f32 %v2009_v20 }
 0xa0a   :  { %v2011_v29 = vpop.xlane.xlu0 %2010 }
 0xa0b   :  { %8397 = vmatpush3.bf16.xpose.msra.mxu0 %v2261_v56  ;;  %9413 = vrcp.f32 %v2011_v29  ;;  %v2017_v38 = vpop.xlane.xlu1 %2016 }
 0xa0e   :  { %v2025_v37 = vpop.xlane.xlu0 %2024 }
 0xa0f   :  { %v2013_v7 = vpop.xlane.xlu1 %2012 }
 0xa11   :  { %v9408_v52 = vpop.eup %9407 }
 0xa12   :  { %v9410_v62 = vpop.eup %9409  ;;  %v2021_v4 = vpop.xlane.xlu0 %2020  ;;  %v2048_v45 = vmul.f32 %v9408_v52, %v11186_v9 }
 0xa13   :  { %v9412_v30 = vpop.eup %9411  ;;  %v2019_v51 = vpop.xlane.xlu1 %2018  ;;  %v2049_v48 = vmul.f32 %v9410_v62, %v11188_v14 }
 0xa14   :  { %9415 = vrcp.f32 %v2019_v51  ;;  %v2050_v57 = vmul.f32 %v9412_v30, %v11180_v55 }
 0xa15   :  { %v9414_v42 = vpop.eup %9413  ;;  %v2062_v25 = vpack.c.bf16 %v2049_v48, %v2048_v45  ;;  %9417 = vrcp.f32 %v2013_v7 }
 0xa16   :  { %v2027_v27 = vpop.xlane.xlu0 %2026  ;;  %v2051_v60 = vmul.f32 %v9414_v42, %v11193_v22  ;;  %9419 = vrcp.f32 %v2017_v38 }
 0xa17   :  { %v2015_v21 = vpop.xlane.xlu1 %2014  ;;  %8374 = vmatprep.mubr.bf16.mxu0 %v2062_v25 }
 0xa18   :  { %9421 = vrcp.f32 %v2015_v21  ;;  %v2063_v23 = vpack.c.bf16 %v2051_v60, %v2050_v57 }
 0xa19   :  { %9423 = vrcp.f32 %v2021_v4 }
 0xa1a   :  { %8375 = vmatmul.mubr.bf16.gmra.mrb[84].mxu0 %v2063_v23  ;;  %v2218_v9 = vpop.permute.xlu0 %2217 }
 0xa1b   :  { %v2023_v63 = vpop.xlane.xlu1 %2022  ;;  %8924 = vmatprep.subr.msk.bf16.mxu0 %vm870_vm3, %v2218_v9  ;;  %v2264_v14 = vsel %vm870_vm3, %v2218_v9, 0 }
 0xa1c   :  { %9425 = vrcp.f32 %v2023_v63  ;;  %8399 = vmatpush3.bf16.xpose.msra.mxu0 %v2264_v14 }
 0xa1d   :  { %9427 = vrcp.f32 %v2027_v27 }
 0xa1e   :  { %v2190_v1 = vpop.permute.xlu0 %2189  ;;  %v9416_v55 = vpop.eup %9415  ;;  %9429 = vrcp.f32 %v2025_v37 }
 0xa1f   :  { %v2220_v22 = vpop.permute.xlu1 %2219  ;;  %v9418_v3 = vpop.eup %9417  ;;  %v2055_v39 = vmul.f32 %v9416_v55, %v11208_v41 }
 0xa20   :  { %8925 = vmatprep.subr.msk.bf16.mxu0 %vm870_vm3, %v2220_v22  ;;  %v9420_v5 = vpop.eup %9419  ;;  %v2267_v47 = vsel %vm870_vm3, %v2220_v22, 0  ;;  %v2052_v46 = vmul.f32 %v9418_v3, %v11202_v34 }
 0xa21   :  { %v2054_v50 = vmul.f32 %v9420_v5, %v11195_v6 }
 0xa22   :  { %v9422_v16 = vpop.eup %9421  ;;  %v2194_v17 = vpop.permute.xlu0 %2193 }
 0xa23   :  { %v2192_v40 = vpop.permute.xlu1 %2191  ;;  %v2053_v61 = vmul.f32 %v9422_v16, %v11214_v24  ;;  %v9424_v26 = vpop.eup %9423  ;;  %v2065_v54 = vpack.c.bf16 %v2055_v39, %v2054_v50 }
 0xa24   :  { %8401 = vmatpush3.bf16.xpose.msra.mxu0 %v2267_v47  ;;  %v2056_v41 = vmul.f32 %v9424_v26, %v11206_v18 }
 0xa25   :  { %v2064_v43 = vpack.c.bf16 %v2053_v61, %v2052_v46 }
 0xa26   :  { %v9426_v36 = vpop.eup %9425  ;;  %v2198_v20 = vpop.permute.xlu0 %2197 }
 0xa27   :  { %v9428_v0 = vpop.eup %9427  ;;  %v2196_v49 = vpop.permute.xlu1 %2195  ;;  %8378 = vmatprep.mubr.bf16.mxu0 %v2064_v43  ;;  %v2057_v56 = vmul.f32 %v9426_v36, %v11218_v58 }
 0xa28   :  { %8379 = vmatmul.mubr.bf16.gmra.mrb[88].mxu0 %v2065_v54  ;;  %v9430_v29 = vpop.eup %9429  ;;  %v2059_v24 = vmul.f32 %v9428_v0, %v11212_v8 }
 0xa29   :  { %v2066_v34 = vpack.c.bf16 %v2057_v56, %v2056_v41  ;;  %v2058_v6 = vmul.f32 %v9430_v29, %v11200_v2 }
 0xa2a   :  { %v2202_v38 = vpop.permute.xlu0 %2201 }
 0xa2b   :  { %v2200_v37 = vpop.permute.xlu1 %2199  ;;  %8382 = vmatprep.mubr.bf16.mxu0 %v2066_v34  ;;  %v2067_v52 = vpack.c.bf16 %v2059_v24, %v2058_v6  ;;  %v14605_v6 = vld [vmem:[#allocation23_spill] sm:$0xff] }
 0xa2e   :  { %v2519_v7 = vpop.permute.xlu0 %2518 }
 0xa2f   :  { %v2204_v62 = vpop.permute.xlu1 %2203  ;;  %8418 = vmatprep.subr.bf16.mxu1 %v2519_v7 }
 0xa30   :  { %8383 = vmatmul.mubr.bf16.gmra.mrb[92].mxu0 %v2067_v52  ;;  %8419 = vmatpush3.bf16.msra.mxu1 %v2519_v7  ;;  %v14606_v7 = vld [vmem:[#allocation54_spill] sm:$0xff] }
 0xa31   :  { %8402 = vmatprep.mubr.msk.bf16.mxu0 %vm870_vm3, %v2190_v1 }
 0xa32   :  { %v2523_v18 = vpop.permute.xlu0 %2522 }
 0xa33   :  { %v2521_v58 = vpop.permute.xlu1 %2520 }
 0xa34   :  { %8420 = vmatprep.subr.bf16.mxu1 %v2521_v58 }
 0xa35   :  { %8421 = vmatpush3.bf16.msra.mxu1 %v2521_v58 }
 0xa36   :  { %8422 = vmatprep.subr.bf16.mxu1 %v2523_v18  ;;  %v2525_v8 = vpop.permute.xlu0 %2524 }
 0xa38   :  { %8403 = vmatmul.mubr.msk.bf16.vlgmr.msra.gmra.mrb[96].mxu0 %vm870_vm3, %v2192_v40 }
 0xa39   :  { %8406 = vmatprep.mubr.msk.bf16.mxu0 %vm870_vm3, %v2194_v17  ;;  %8423 = vmatpush3.bf16.msra.mxu1 %v2523_v18 }
 0xa3a   :  { %8424 = vmatprep.subr.bf16.mxu1 %v2525_v8 }
 0xa3d   :  { %8425 = vmatpush3.bf16.msra.mxu1 %v2525_v8 }
 0xa40   :  { %8407 = vmatmul.mubr.msk.bf16.gmra.mrb[100].mxu0 %vm870_vm3, %v2196_v49 }
 0xa41   :  { %8410 = vmatprep.mubr.msk.bf16.mxu0 %vm870_vm3, %v2198_v20 }
 0xa48   :  { %8411 = vmatmul.mubr.msk.bf16.gmra.mrb[104].mxu0 %vm870_vm3, %v2200_v37 }
 0xa49   :  { %8414 = vmatprep.mubr.msk.bf16.mxu0 %vm870_vm3, %v2202_v38 }
 0xa50   :  { %8415 = vmatmul.mubr.msk.bf16.gmra.mrb[108].mxu0 %vm870_vm3, %v2204_v62 }
 0xab5   :  { %v11293_v2 = vpop.f32.mrb[80].mxu0 }
 0xab6   :  { %v11295_v4 = vpop.f32.mrb[81].mxu0 }
 0xab7   :  { %v11297_v45 = vpop.f32.mrb[82].mxu0 }
 0xab8   :  { %v8979_v30 = vpack.i.bf16 %v11297_v45, %v11293_v2  ;;  %v11301_v51 = vpop.f32.mrb[83].mxu0 }
 0xab9   :  { %v8974_v48 = vpack.i.bf16 %v11301_v51, %v11295_v4 }
 0xaed   :  { %v11305_v42 = vpop.f32.mrb[84].mxu0 }
 0xaee   :  { %v11307_v25 = vpop.f32.mrb[85].mxu0 }
 0xaef   :  { %v11309_v27 = vpop.f32.mrb[86].mxu0 }
 0xaf0   :  { %v9009_v57 = vpack.i.bf16 %v11309_v27, %v11305_v42  ;;  %v11313_v60 = vpop.f32.mrb[87].mxu0 }
 0xaf1   :  { %v9004_v21 = vpack.i.bf16 %v11313_v60, %v11307_v25 }
 0xafb   :  { %v11317_v23 = vpop.f32.mrb[88].mxu0 }
 0xafc   :  { %v11319_v9 = vpop.f32.mrb[89].mxu0 }
 0xafd   :  { %v11321_v63 = vpop.f32.mrb[90].mxu0 }
 0xafe   :  { %v9039_v14 = vpack.i.bf16 %v11321_v63, %v11317_v23  ;;  %v11325_v1 = vpop.f32.mrb[91].mxu0  ;;  %v14629_v23 = vld [vmem:[#allocation20_spill] sm:$0xff] }
 0xaff   :  { %v9034_v55 = vpack.i.bf16 %v11325_v1, %v11319_v9  ;;  %v14631_v9 = vld [vmem:[#allocation53_spill] sm:$0xff]  ;;  %v14632_v1 = vld [vmem:[#allocation51_spill] sm:$0xff] }
 0xb03   :  { %v11329_v22 = vpop.f32.mrb[92].mxu0 }
 0xb04   :  { %v11331_v3 = vpop.f32.mrb[93].mxu0 }
 0xb05   :  { %v11333_v5 = vpop.f32.mrb[94].mxu0 }
 0xb06   :  { %v9069_v16 = vpack.i.bf16 %v11333_v5, %v11329_v22  ;;  %v11337_v17 = vpop.f32.mrb[95].mxu0 }
 0xb07   :  { %v9064_v39 = vpack.i.bf16 %v11337_v17, %v11331_v3  ;;  %v14635_v17 = vld [vmem:[#allocation36_spill] sm:$0xff] }
 0xb0b   :  { %v8404_v40 = vpop.f32.mrb[96].mxu0 }
 0xb0c   :  { %v2312_v47 = vadd.f32 %v11004_v31, %v8404_v40  ;;  %v2303_v46 = vpop.f32.mrb[97].mxu0 }
 0xb0d   :  { %v8405_v61 = vpop.f32.mrb[98].mxu0  ;;  %v2304_v43 = vadd.f32 %v11021_v19, %v2303_v46 }
 0xb0e   :  { %2370 = vmax.xlane.f32.xlu0 %v2312_v47  ;;  %v2306_v26 = vpop.f32.mrb[99].mxu0  ;;  %v2315_v20 = vadd.f32 %v11031_v11, %v8405_v61 }
 0xb0f   :  { %v2307_v50 = vadd.f32 %v11013_v12, %v2306_v26 }
 0xb11   :  { %2368 = vmax.xlane.f32.xlu1 %v2307_v50 }
 0xb12   :  { %2366 = vmax.xlane.f32.xlu0 %v2304_v43 }
 0xb13   :  { %v8408_v36 = vpop.f32.mrb[100].mxu0 }
 0xb14   :  { %v2319_v54 = vpop.f32.mrb[101].mxu0  ;;  %v2328_v31 = vadd.f32 %v11048_v15, %v8408_v36 }
 0xb15   :  { %v8409_v0 = vpop.f32.mrb[102].mxu0  ;;  %v2320_v19 = vadd.f32 %v11066_v59, %v2319_v54 }
 0xb16   :  { %v2331_v49 = vadd.f32 %v11039_v53, %v8409_v0  ;;  %2372 = vmax.xlane.f32.xlu0 %v2315_v20  ;;  %v2322_v41 = vpop.f32.mrb[103].mxu0 }
 0xb17   :  { %v11348_v56 = vadd.f32 %v11057_v10, %v2322_v41 }
 0xb18   :  { %2380 = vmax.xlane.f32.xlu1 %v2331_v49 }
 0xb1a   :  { %2378 = vmax.xlane.f32.xlu0 %v2328_v31 }
 0xb1b   :  { %v8412_v12 = vpop.f32.mrb[104].mxu0 }
 0xb1c   :  { %2376 = vmax.xlane.f32.xlu1 %v11348_v56  ;;  %v2335_v29 = vpop.f32.mrb[105].mxu0  ;;  %v11356_v38 = vadd.f32 %v11084_v33, %v8412_v12 }
 0xb1d   :  { %v8413_v11 = vpop.f32.mrb[106].mxu0  ;;  %v11364_v15 = vadd.f32 %v11102_v32, %v2335_v29  ;;  %v14604_v32 = vld [vmem:[#allocation22_spill] sm:$0xff] }
 0xb1e   :  { %v11353_v34 = vadd.f32 %v11075_v28, %v8413_v11  ;;  %2374 = vmax.xlane.f32.xlu0 %v2320_v19  ;;  %v2338_v53 = vpop.f32.mrb[107].mxu0 }
 0xb1f   :  { %v11360_v10 = vadd.f32 %v11093_v13, %v2338_v53 }
 0xb20   :  { %2388 = vmax.xlane.f32.xlu1 %v11353_v34 }
 0xb22   :  { %2386 = vmax.xlane.f32.xlu0 %v11356_v38 }
 0xb23   :  { %v8416_v59 = vpop.f32.mrb[108].mxu0 }
 0xb24   :  { %2384 = vmax.xlane.f32.xlu1 %v11360_v10  ;;  %v2351_v28 = vpop.f32.mrb[109].mxu0  ;;  %v11369_v33 = vadd.f32 %v11112_v44, %v8416_v59  ;;  %v14607_v44 = vld [vmem:[#allocation55_spill] sm:$0xff] }
 0xb25   :  { %v8417_v24 = vpop.f32.mrb[110].mxu0  ;;  %v11373_v13 = vadd.f32 %v11121_v35, %v2351_v28 }
 0xb26   :  { %2382 = vmax.xlane.f32.xlu0 %v11364_v15  ;;  %v2354_v37 = vpop.f32.mrb[111].mxu0  ;;  %v11381_v52 = vadd.f32 %v14606_v7, %v8417_v24 }
 0xb27   :  { %v11385_v62 = vadd.f32 %v14607_v44, %v2354_v37 }
 0xb2a   :  { %2394 = vmax.xlane.f32.xlu0 %v11369_v33 }
 0xb2e   :  { %2390 = vmax.xlane.f32.xlu0 %v11373_v13 }
 0xb35   :  { %2528 = vrot.lane.b32.xlu1 %v14604_v32, %s9913_s6 }
 0xb44   :  { %2526 = vrot.lane.b32.xlu0 %v14605_v6, %s9913_s6 }
 0xb59   :  { %2396 = vmax.xlane.f32.xlu1 %v11381_v52 }
 0xb5d   :  { %2392 = vmax.xlane.f32.xlu1 %v11385_v62 }
 0xb9b   :  { %v2371_v35 = vpop.xlane.xlu0 %2370 }
 0xb9c   :  { %v2400_v18 = vsub.f32 %v2312_v47, %v2371_v35 }
 0xb9e   :  { %v2418_v58 = vmul.f32 1.442695, %v2400_v18  ;;  %v2369_v40 = vpop.xlane.xlu1 %2368 }
 0xb9f   :  { %v2367_v8 = vpop.xlane.xlu0 %2366  ;;  %v2399_v26 = vsub.f32 %v2307_v50, %v2369_v40 }
 0xba0   :  { %9431 = vpow2.f32 %v2418_v58  ;;  %v2398_v46 = vsub.f32 %v2304_v43, %v2367_v8 }
 0xba1   :  { %v2416_v12 = vmul.f32 1.442695, %v2399_v26 }
 0xba2   :  { %v2414_v61 = vmul.f32 1.442695, %v2398_v46 }
 0xba3   :  { %v2373_v36 = vpop.xlane.xlu0 %2372 }
 0xba4   :  { %9433 = vpow2.f32 %v2414_v61  ;;  %v2401_v54 = vsub.f32 %v2315_v20, %v2373_v36  ;;  %v14608_v36 = vld [vmem:[#allocation24_spill] sm:$0xff] }
 0xba5   :  { %v2381_v0 = vpop.xlane.xlu1 %2380 }
 0xba6   :  { %v2420_v41 = vmul.f32 1.442695, %v2401_v54  ;;  %v2405_v29 = vsub.f32 %v2331_v49, %v2381_v0  ;;  %v14609_v54 = vld [vmem:[#allocation25_spill] sm:$0xff] }
 0xba7   :  { %v2379_v11 = vpop.xlane.xlu0 %2378 }
 0xba8   :  { %9435 = vpow2.f32 %v2420_v41  ;;  %v2404_v53 = vsub.f32 %v2328_v31, %v2379_v11  ;;  %v2428_v24 = vmul.f32 1.442695, %v2405_v29 }
 0xba9   :  { %v2377_v59 = vpop.xlane.xlu1 %2376  ;;  %9437 = vpow2.f32 %v2416_v12 }
 0xbaa   :  { %v11388_v28 = vpop.eup %9431  ;;  %v2426_v47 = vmul.f32 1.442695, %v2404_v53  ;;  %v2403_v50 = vsub.f32 %v11348_v56, %v2377_v59 }
 0xbab   :  { %2450 = vadd.xlane.f32.xlu1 %v11388_v28  ;;  %v2375_v43 = vpop.xlane.xlu0 %2374 }
 0xbac   :  { %9439 = vpow2.f32 %v2426_v47  ;;  %v2402_v20 = vsub.f32 %v2320_v19, %v2375_v43  ;;  %v2424_v31 = vmul.f32 1.442695, %v2403_v50 }
 0xbad   :  { %9441 = vpow2.f32 %v2428_v24  ;;  %v2389_v35 = vpop.xlane.xlu1 %2388 }
 0xbae   :  { %v11392_v37 = vpop.eup %9433  ;;  %v2422_v32 = vmul.f32 1.442695, %v2402_v20  ;;  %v2409_v41 = vsub.f32 %v11353_v34, %v2389_v35 }
 0xbaf   :  { %2446 = vadd.xlane.f32.xlu1 %v11392_v37  ;;  %v2387_v49 = vpop.xlane.xlu0 %2386 }
 0xbb0   :  { %9443 = vpow2.f32 %v2422_v32  ;;  %v2436_v11 = vmul.f32 1.442695, %v2409_v41  ;;  %v2408_v53 = vsub.f32 %v11356_v38, %v2387_v49 }
 0xbb1   :  { %9445 = vpow2.f32 %v2424_v31  ;;  %v2385_v8 = vpop.xlane.xlu1 %2384 }
 0xbb2   :  { %v11395_v6 = vpop.eup %9435  ;;  %v2407_v12 = vsub.f32 %v11360_v10, %v2385_v8  ;;  %v2434_v24 = vmul.f32 1.442695, %v2408_v53  ;;  %v14610_v8 = vld [vmem:[#allocation27_spill] sm:$0xff] }
 0xbb3   :  { %2452 = vadd.xlane.f32.xlu1 %v11395_v6  ;;  %v2383_v7 = vpop.xlane.xlu0 %2382  ;;  %v11398_v44 = vpop.eup %9437 }
 0xbb4   :  { %v2406_v0 = vsub.f32 %v11364_v15, %v2383_v7  ;;  %v2432_v59 = vmul.f32 1.442695, %v2407_v12 }
 0xbb5   :  { %v2529_v26 = vpop.permute.xlu1 %2528 }
 0xbb6   :  { %v11400_v56 = vpop.eup %9439  ;;  %v2430_v29 = vmul.f32 1.442695, %v2406_v0 }
 0xbb7   :  { %2448 = vadd.xlane.f32.xlu1 %v11398_v44  ;;  %2458 = vadd.xlane.f32.xlu0 %v11400_v56  ;;  %v2395_v19 = vpop.xlane.xlu0 %2394  ;;  %v11404_v18 = vpop.eup %9441 }
 0xbb8   :  { %9447 = vpow2.f32 %v2430_v29  ;;  %v2412_v34 = vsub.f32 %v11369_v33, %v2395_v19 }
 0xbb9   :  { %9449 = vpow2.f32 %v2436_v11 }
 0xbba   :  { %v11406_v58 = vpop.eup %9443  ;;  %9451 = vpow2.f32 %v2432_v59  ;;  %v2442_v49 = vmul.f32 1.442695, %v2412_v34 }
 0xbbb   :  { %2460 = vadd.xlane.f32.xlu0 %v11404_v18  ;;  %2454 = vadd.xlane.f32.xlu1 %v11406_v58  ;;  %v2391_v40 = vpop.xlane.xlu0 %2390  ;;  %v11410_v46 = vpop.eup %9445  ;;  %9453 = vpow2.f32 %v2434_v24 }
 0xbbc   :  { %v2410_v43 = vsub.f32 %v11373_v13, %v2391_v40  ;;  %v14611_v40 = vld [vmem:[#allocation26_spill] sm:$0xff] }
 0xbbe   :  { %v2438_v10 = vmul.f32 1.442695, %v2410_v43 }
 0xbbf   :  { %2456 = vadd.xlane.f32.xlu0 %v11410_v46  ;;  %v2527_v61 = vpop.permute.xlu0 %2526 }
 0xbc0   :  { %8426 = vmatprep.subr.bf16.mxu1 %v2527_v61 }
 0xbc1   :  { %8427 = vmatpush3.bf16.msra.mxu1 %v2527_v61  ;;  %v14612_v61 = vpack.i.bf16 %v14610_v8, %v14611_v40 }
 0xbc2   :  { %8428 = vmatprep.subr.bf16.mxu1 %v2529_v26  ;;  %v11425_v31 = vpop.eup %9447 }
 0xbc3   :  { %v11428_v7 = vpop.eup %9449 }
 0xbc4   :  { %v11430_v13 = vpop.eup %9451 }
 0xbc5   :  { %8429 = vmatpush3.bf16.msra.mxu1 %v2529_v26  ;;  %v11434_v33 = vpop.eup %9453  ;;  %v14613_v26 = vld [vmem:[#allocation30_spill] sm:$0xff] }
 0xbcc   :  { %2532 = vrot.lane.b32.xlu1 %v14608_v36, %s9913_s6  ;;  %v14614_v36 = vld [vmem:[#allocation28_spill] sm:$0xff] }
 0xbd5   :  { %2530 = vrot.lane.b32.xlu0 %v14609_v54, %s9913_s6  ;;  %v14615_v54 = vpack.i.bf16 %v14613_v26, %v14614_v36 }
 0xbe6   :  { %v2397_v47 = vpop.xlane.xlu1 %2396 }
 0xbe7   :  { %v2413_v20 = vsub.f32 %v11381_v52, %v2397_v47 }
 0xbe9   :  { %v2444_v38 = vmul.f32 1.442695, %v2413_v20 }
 0xbea   :  { %v2393_v50 = vpop.xlane.xlu1 %2392 }
 0xbeb   :  { %v2411_v15 = vsub.f32 %v11385_v62, %v2393_v50 }
 0xbed   :  { %v2440_v32 = vmul.f32 1.442695, %v2411_v15 }
 0xbef   :  { %9455 = vpow2.f32 %v2440_v32 }
 0xbf0   :  { %2462 = vadd.xlane.f32.xlu1 %v11425_v31  ;;  %9457 = vpow2.f32 %v2438_v10 }
 0xbf1   :  { %9459 = vpow2.f32 %v2444_v38 }
 0xbf2   :  { %9461 = vpow2.f32 %v2442_v49 }
 0xbf4   :  { %2464 = vadd.xlane.f32.xlu0 %v11430_v13  ;;  %2468 = vadd.xlane.f32.xlu1 %v11428_v7 }
 0xbf8   :  { %2466 = vadd.xlane.f32.xlu0 %v11434_v33 }
 0xbf9   :  { %v11437_v52 = vpop.eup %9455 }
 0xbfa   :  { %2472 = vadd.xlane.f32.xlu1 %v11437_v52  ;;  %v11440_v62 = vpop.eup %9457 }
 0xbfb   :  { %v11443_v35 = vpop.eup %9459 }
 0xbfc   :  { %2470 = vadd.xlane.f32.xlu0 %v11440_v62  ;;  %v11446_v19 = vpop.eup %9461 }
 0xbfe   :  { %2476 = vadd.xlane.f32.xlu1 %v11443_v35 }
 0xc00   :  { %2474 = vadd.xlane.f32.xlu0 %v11446_v19 }
 0xc0f   :  { %8970 = vrot.lane.b32.xlu1 %v14612_v61, %s9914_s1 }
 0xc13   :  { %8975 = vrot.lane.b32.xlu1 %v8974_v48, %s9915_s4 }
 0xc16   :  { %8965 = vrot.lane.b32.xlu0 %v14615_v54, %s9914_s1 }
 0xc17   :  { %8980 = vrot.lane.b32.xlu1 %v8979_v30, %s9915_s4 }
 0xc38   :  { %v2451_v0 = vpop.xlane.xlu1 %2450 }
 0xc3c   :  { %v2447_v41 = vpop.xlane.xlu1 %2446 }
 0xc3d   :  { %9463 = vrcp.f32 %v2447_v41 }
 0xc40   :  { %v2453_v12 = vpop.xlane.xlu1 %2452 }
 0xc44   :  { %v2449_v29 = vpop.xlane.xlu1 %2448  ;;  %v2459_v11 = vpop.xlane.xlu0 %2458 }
 0xc45   :  { %9465 = vrcp.f32 %v2449_v29 }
 0xc46   :  { %9467 = vrcp.f32 %v2453_v12 }
 0xc47   :  { %9469 = vrcp.f32 %v2451_v0  ;;  %v9464_v53 = vpop.eup %9463 }
 0xc48   :  { %v2455_v4 = vpop.xlane.xlu1 %2454  ;;  %v2461_v51 = vpop.xlane.xlu0 %2460  ;;  %v2494_v45 = vmul.f32 %v9464_v53, %v11392_v37 }
 0xc49   :  { %9471 = vrcp.f32 %v2455_v4 }
 0xc4c   :  { %v2457_v48 = vpop.xlane.xlu0 %2456  ;;  %v2533_v43 = vpop.permute.xlu1 %2532 }
 0xc4d   :  { %9473 = vrcp.f32 %v2457_v48 }
 0xc4e   :  { %9475 = vrcp.f32 %v2461_v51 }
 0xc4f   :  { %v9466_v59 = vpop.eup %9465  ;;  %9477 = vrcp.f32 %v2459_v11 }
 0xc50   :  { %v9468_v47 = vpop.eup %9467  ;;  %v2531_v2 = vpop.permute.xlu0 %2530  ;;  %v2495_v30 = vmul.f32 %v9466_v59, %v11398_v44 }
 0xc51   :  { %8430 = vmatprep.subr.bf16.mxu1 %v2531_v2  ;;  %v9470_v24 = vpop.eup %9469  ;;  %v2497_v20 = vmul.f32 %v9468_v47, %v11395_v6 }
 0xc52   :  { %8431 = vmatpush3.bf16.msra.mxu1 %v2531_v2  ;;  %v2510_v50 = vpack.c.bf16 %v2495_v30, %v2494_v45  ;;  %v2496_v34 = vmul.f32 %v9470_v24, %v11388_v28 }
 0xc53   :  { %8432 = vmatprep.subr.bf16.mxu1 %v2533_v43  ;;  %v9472_v15 = vpop.eup %9471 }
 0xc54   :  { %8434 = vmatprep.mubr.bf16.mxu1 %v2510_v50  ;;  %v2511_v32 = vpack.c.bf16 %v2497_v20, %v2496_v34  ;;  %v2498_v37 = vmul.f32 %v9472_v15, %v11406_v58 }
 0xc56   :  { %8433 = vmatpush3.bf16.msra.mxu1 %v2533_v43 }
 0xc57   :  { %v9474_v10 = vpop.eup %9473 }
 0xc58   :  { %v9476_v38 = vpop.eup %9475  ;;  %v2499_v44 = vmul.f32 %v9474_v10, %v11410_v46 }
 0xc59   :  { %8435 = vmatmul.mubr.bf16.vlgmr.msra.gmra.mrb[80].mxu1 %v2511_v32  ;;  %v9478_v49 = vpop.eup %9477  ;;  %v2501_v40 = vmul.f32 %v9476_v38, %v11404_v18  ;;  %v14616_v32 = vld [vmem:[#allocation32_spill] sm:$0xff]  ;;  %v14617_v38 = vld [vmem:[#allocation29_spill] sm:$0xff] }
 0xc5a   :  { %v2512_v8 = vpack.c.bf16 %v2499_v44, %v2498_v37  ;;  %v2500_v6 = vmul.f32 %v9478_v49, %v11400_v56  ;;  %v14618_v37 = vpack.i.bf16 %v14616_v32, %v14617_v38  ;;  %v14619_v49 = vld [vmem:[#allocation18_spill] sm:$0xff] }
 0xc5c   :  { %8438 = vmatprep.mubr.bf16.mxu1 %v2512_v8  ;;  %v2513_v61 = vpack.c.bf16 %v2501_v40, %v2500_v6  ;;  %v14620_v8 = vld [vmem:[#allocation31_spill] sm:$0xff] }
 0xc5d   :  { %v14621_v40 = vpack.i.bf16 %v14619_v49, %v14620_v8 }
 0xc61   :  { %8439 = vmatmul.mubr.bf16.gmra.mrb[84].mxu1 %v2513_v61 }
 0xc7d   :  { %v2463_v26 = vpop.xlane.xlu1 %2462 }
 0xc7e   :  { %9479 = vrcp.f32 %v2463_v26 }
 0xc81   :  { %v2469_v28 = vpop.xlane.xlu1 %2468  ;;  %v2465_v36 = vpop.xlane.xlu0 %2464 }
 0xc82   :  { %9481 = vrcp.f32 %v2465_v36  ;;  %v14622_v36 = vld [vmem:[#allocation34_spill] sm:$0xff] }
 0xc83   :  { %9483 = vrcp.f32 %v2469_v28 }
 0xc85   :  { %v2467_v54 = vpop.xlane.xlu0 %2466 }
 0xc86   :  { %9485 = vrcp.f32 %v2467_v54  ;;  %v14623_v54 = vld [vmem:[#allocation19_spill] sm:$0xff] }
 0xc87   :  { %v2473_v58 = vpop.xlane.xlu1 %2472 }
 0xc88   :  { %9487 = vrcp.f32 %v2473_v58  ;;  %v9480_v0 = vpop.eup %9479  ;;  %v14624_v58 = vpack.i.bf16 %v14622_v36, %v14623_v54 }
 0xc89   :  { %v2471_v46 = vpop.xlane.xlu0 %2470  ;;  %v2502_v29 = vmul.f32 %v9480_v0, %v11425_v31  ;;  %v14626_v0 = vld [vmem:[#allocation33_spill] sm:$0xff] }
 0xc8a   :  { %9489 = vrcp.f32 %v2471_v46  ;;  %v14625_v46 = vld [vmem:[#allocation21_spill] sm:$0xff] }
 0xc8b   :  { %v2477_v41 = vpop.xlane.xlu1 %2476 }
 0xc8c   :  { %9491 = vrcp.f32 %v2477_v41  ;;  %v9482_v18 = vpop.eup %9481  ;;  %v14627_v41 = vpack.i.bf16 %v14625_v46, %v14626_v0 }
 0xc8d   :  { %v2475_v12 = vpop.xlane.xlu0 %2474  ;;  %v9484_v56 = vpop.eup %9483  ;;  %v2503_v11 = vmul.f32 %v9482_v18, %v11430_v13 }
 0xc8e   :  { %9493 = vrcp.f32 %v2475_v12  ;;  %v2505_v53 = vmul.f32 %v9484_v56, %v11428_v7  ;;  %v9217_v7 = vld [vmem:[%s14378_s13] sm:$0xff]   ;;  %v14628_v12 = vld [vmem:[#allocation52_spill] sm:$0xff] }
 0xc8f   :  { %v2514_v51 = vpack.c.bf16 %v2503_v11, %v2502_v29  ;;  %8450 = vmatprep.subr.bf16.mxu1 %v9217_v7  ;;  %v14630_v63 = vpack.i.bf16 %v14628_v12, %v14629_v23  ;;  %v14640_v12 = vld [vmem:[#allocation42_spill] sm:$0xff] }
 0xc90   :  { %v9486_v4 = vpop.eup %9485  ;;  %8451 = vmatpush3.bf16.msra.mxu1 %v9217_v7 }
 0xc91   :  { %v2504_v48 = vmul.f32 %v9486_v4, %v11434_v33  ;;  %8442 = vmatprep.mubr.bf16.mxu1 %v2514_v51  ;;  %v8971_v51 = vpop.permute.xlu1 %8970 }
 0xc92   :  { %v9488_v59 = vpop.eup %9487 }
 0xc93   :  { %v2515_v47 = vpack.c.bf16 %v2505_v53, %v2504_v48  ;;  %v2507_v30 = vmul.f32 %v9488_v59, %v11437_v52  ;;  %v9218_v52 = vld [vmem:[%s14378_s13 + $0x8] sm:$0xff]   ;;  %v8966_v53 = vpop.permute.xlu0 %8965 }
 0xc94   :  { %v9490_v2 = vpop.eup %9489  ;;  %8452 = vmatprep.subr.bf16.mxu1 %v9218_v52 }
 0xc95   :  { %8443 = vmatmul.mubr.bf16.gmra.mrb[88].mxu1 %v2515_v47  ;;  %v2506_v45 = vmul.f32 %v9490_v2, %v11440_v62  ;;  %v8976_v48 = vpop.permute.xlu1 %8975  ;;  %v8968_v47 = vunpack.i.h.bf16 %v8966_v53  ;;  %v8967_v2 = vunpack.i.l.bf16 %v8966_v53 }
 0xc96   :  { %v9492_v24 = vpop.eup %9491  ;;  %8453 = vmatpush3.bf16.msra.mxu1 %v9218_v52  ;;  %v8978_v5 = vunpack.i.h.bf16 %v8976_v48 }
 0xc97   :  { %v2516_v43 = vpack.c.bf16 %v2507_v30, %v2506_v45  ;;  %v2509_v50 = vmul.f32 %v9492_v24, %v11443_v35  ;;  %v8973_v45 = vunpack.i.h.bf16 %v8971_v51  ;;  %v8972_v30 = vunpack.i.l.bf16 %v8971_v51 }
 0xc98   :  { %v9494_v31 = vpop.eup %9493 }
 0xc99   :  { %8446 = vmatprep.mubr.bf16.mxu1 %v2516_v43  ;;  %v2508_v13 = vmul.f32 %v9494_v31, %v11446_v19  ;;  %v8981_v59 = vpop.permute.xlu1 %8980  ;;  %v14634_v43 = vld [vmem:[#allocation38_spill] sm:$0xff] }
 0xc9a   :  { %v8983_v24 = vunpack.i.h.bf16 %v8981_v59  ;;  %v8982_v22 = vunpack.i.l.bf16 %v8981_v59  ;;  %v2832_v3 = vsel %vm870_vm3, %v14634_v43, %v8968_v47 }
 0xc9b   :  { %v2517_v33 = vpack.c.bf16 %v2509_v50, %v2508_v13  ;;  %v14636_v13 = vld [vmem:[#allocation37_spill] sm:$0xff]  ;;  %v2849_v32 = vsel %vm2847_vm4, %v2832_v3, %v8978_v5 }
 0xc9c   :  { %v2834_v50 = vsel %vm870_vm3, %v14636_v13, %v8973_v45 }
 0xc9d   :  { %8447 = vmatmul.mubr.bf16.gmra.mrb[92].mxu1 %v2517_v33  ;;  %v14637_v33 = vld [vmem:[#allocation35_spill] sm:$0xff] }
 0xc9e   :  { %v2833_v7 = vsel %vm870_vm3, %v14637_v33, %v8972_v30 }
 0xd2c   :  { %v8436_v62 = vpop.f32.mrb[80].mxu1 }
 0xd2d   :  { %v2576_v20 = vpop.f32.mrb[81].mxu1 }
 0xd2e   :  { %v8437_v15 = vpop.f32.mrb[82].mxu1 }
 0xd2f   :  { %v8989_v19 = vpack.i.bf16 %v8437_v15, %v8436_v62  ;;  %v2579_v34 = vpop.f32.mrb[83].mxu1  ;;  %v2850_v15 = vsel %vm2847_vm4, %v2833_v7, %v8982_v22  ;;  %v14642_v7 = vld [vmem:[#allocation45_spill] sm:$0xff] }
 0xd30   :  { %v8984_v35 = vpack.i.bf16 %v2579_v34, %v2576_v20 }
 0xd31   :  { %8990 = vrot.lane.b32.xlu1 %v8989_v19, %s14451_s29  ;;  %v2851_v19 = vsel %vm2847_vm4, %v2834_v50, %v8983_v24 }
 0xd32   :  { %8985 = vrot.lane.b32.xlu0 %v8984_v35, %s14451_s29 }
 0xd34   :  { %v8440_v10 = vpop.f32.mrb[84].mxu1 }
 0xd35   :  { %9000 = vrot.lane.b32.xlu1 %v14618_v37, %s9914_s1  ;;  %v2592_v44 = vpop.f32.mrb[85].mxu1 }
 0xd36   :  { %8995 = vrot.lane.b32.xlu0 %v14621_v40, %s9914_s1  ;;  %v8441_v6 = vpop.f32.mrb[86].mxu1 }
 0xd37   :  { %v9019_v61 = vpack.i.bf16 %v8441_v6, %v8440_v10  ;;  %v2595_v26 = vpop.f32.mrb[87].mxu1 }
 0xd38   :  { %v9014_v28 = vpack.i.bf16 %v2595_v26, %v2592_v44 }
 0xd39   :  { %9010 = vrot.lane.b32.xlu1 %v9009_v57, %s9915_s4 }
 0xd3a   :  { %9005 = vrot.lane.b32.xlu0 %v9004_v21, %s9915_s4 }
 0xd3d   :  { %9020 = vrot.lane.b32.xlu1 %v9019_v61, %s14451_s29 }
 0xd3e   :  { %9015 = vrot.lane.b32.xlu0 %v9014_v28, %s14451_s29 }
 0xd41   :  { %9030 = vrot.lane.b32.xlu1 %v14624_v58, %s9914_s1 }
 0xd42   :  { %9025 = vrot.lane.b32.xlu0 %v14627_v41, %s9914_s1 }
 0xd45   :  { %9040 = vrot.lane.b32.xlu1 %v9039_v14, %s9915_s4 }
 0xd46   :  { %9035 = vrot.lane.b32.xlu0 %v9034_v55, %s9915_s4  ;;  %v14633_v55 = vpack.i.bf16 %v14631_v9, %v14632_v1 }
 0xd68   :  { %v8444_v42 = vpop.f32.mrb[88].mxu1 }
 0xd69   :  { %v2608_v25 = vpop.f32.mrb[89].mxu1 }
 0xd6a   :  { %v8445_v27 = vpop.f32.mrb[90].mxu1 }
 0xd6b   :  { %v9049_v57 = vpack.i.bf16 %v8445_v27, %v8444_v42  ;;  %v2611_v60 = vpop.f32.mrb[91].mxu1  ;;  %v14638_v27 = vld [vmem:[#allocation41_spill] sm:$0xff] }
 0xd6c   :  { %v9044_v21 = vpack.i.bf16 %v2611_v60, %v2608_v25  ;;  %v14639_v60 = vld [vmem:[#allocation39_spill] sm:$0xff] }
 0xd6d   :  { %9050 = vrot.lane.b32.xlu1 %v9049_v57, %s14451_s29 }
 0xd6e   :  { %9045 = vrot.lane.b32.xlu0 %v9044_v21, %s14451_s29 }
 0xd70   :  { %v8448_v18 = vpop.f32.mrb[92].mxu1 }
 0xd71   :  { %9060 = vrot.lane.b32.xlu1 %v14630_v63, %s9914_s1  ;;  %v2624_v14 = vpop.f32.mrb[93].mxu1  ;;  %v14641_v63 = vld [vmem:[#allocation40_spill] sm:$0xff] }
 0xd72   :  { %9055 = vrot.lane.b32.xlu0 %v14633_v55, %s9914_s1  ;;  %v8449_v56 = vpop.f32.mrb[94].mxu1 }
 0xd73   :  { %v9079_v29 = vpack.i.bf16 %v8449_v56, %v8448_v18  ;;  %v2627_v11 = vpop.f32.mrb[95].mxu1 }
 0xd74   :  { %v9074_v4 = vpack.i.bf16 %v2627_v11, %v2624_v14 }
 0xd75   :  { %9070 = vrot.lane.b32.xlu1 %v9069_v16, %s9915_s4  ;;  %v8977_v16 = vunpack.i.l.bf16 %v8976_v48 }
 0xd76   :  { %9065 = vrot.lane.b32.xlu0 %v9064_v39, %s9915_s4  ;;  %v2831_v39 = vsel %vm870_vm3, %v14635_v17, %v8967_v2 }
 0xd77   :  { %v2848_v10 = vsel %vm2847_vm4, %v2831_v39, %v8977_v16 }
 0xd79   :  { %9080 = vrot.lane.b32.xlu1 %v9079_v29, %s14451_s29 }
 0xd7a   :  { %9075 = vrot.lane.b32.xlu0 %v9074_v4, %s14451_s29 }
 0xda3   :  { %v8991_v31 = vpop.permute.xlu1 %8990 }
 0xda4   :  { %v8993_v52 = vunpack.i.h.bf16 %v8991_v31  ;;  %v8992_v62 = vunpack.i.l.bf16 %v8991_v31  ;;  %v8986_v20 = vpop.permute.xlu0 %8985 }
 0xda5   :  { %v8988_v34 = vunpack.i.h.bf16 %v8986_v20  ;;  %v8987_v35 = vunpack.i.l.bf16 %v8986_v20 }
 0xda6   :  { %v2868_v38 = vsel %vm2864_vm5, %v2851_v19, %v8993_v52  ;;  %v2867_v37 = vsel %vm2864_vm5, %v2850_v15, %v8992_v62  ;;  %v14643_v62 = vld [vmem:[#allocation43_spill] sm:$0xff]  ;;  %v14644_v19 = vld [vmem:[#allocation46_spill] sm:$0xff] }
 0xda7   :  { %v2882_v44 = vpack.c.bf16 %v2868_v38, %v2867_v37  ;;  %v2865_v49 = vsel %vm2864_vm5, %v2848_v10, %v8987_v35  ;;  %v2866_v8 = vsel %vm2864_vm5, %v2849_v32, %v8988_v34  ;;  %v9001_v40 = vpop.permute.xlu1 %9000  ;;  %v14645_v35 = vld [vmem:[#allocation44_spill] sm:$0xff] }
 0xda8   :  { %v8996_v6 = vpop.permute.xlu0 %8995  ;;  %v2881_v61 = vpack.c.bf16 %v2866_v8, %v2865_v49  ;;  %v9003_v26 = vunpack.i.h.bf16 %v9001_v40  ;;  %v9002_v28 = vunpack.i.l.bf16 %v9001_v40 }
 0xda9   :  { %v8998_v54 = vunpack.i.h.bf16 %v8996_v6  ;;  %v8997_v58 = vunpack.i.l.bf16 %v8996_v6 }
 0xdaa   :  { %8454 = vmatprep.mubr.msk.bf16.mxu1 %vm484_vm2, %v2881_v61  ;;  %v2838_v57 = vsel %vm870_vm3, %v14638_v27, %v9003_v26  ;;  %v2837_v21 = vsel %vm870_vm3, %v14639_v60, %v9002_v28 }
 0xdab   :  { %v9011_v36 = vpop.permute.xlu1 %9010  ;;  %8455 = vmatmul.mubr.msk.bf16.vlgmr.msra.gmra.mrb[96].mxu1 %vm484_vm2, %v2882_v44  ;;  %v2836_v23 = vsel %vm870_vm3, %v14640_v12, %v8998_v54  ;;  %v2835_v14 = vsel %vm870_vm3, %v14641_v63, %v8997_v58 }
 0xdac   :  { %v9006_v46 = vpop.permute.xlu0 %9005  ;;  %v9013_v0 = vunpack.i.h.bf16 %v9011_v36  ;;  %v9012_v41 = vunpack.i.l.bf16 %v9011_v36 }
 0xdad   :  { %v9008_v42 = vunpack.i.h.bf16 %v9006_v46  ;;  %v9007_v25 = vunpack.i.l.bf16 %v9006_v46 }
 0xdae   :  { %v2854_v56 = vsel %vm2847_vm4, %v2837_v21, %v9012_v41  ;;  %v2855_v29 = vsel %vm2847_vm4, %v2838_v57, %v9013_v0 }
 0xdaf   :  { %v9021_v18 = vpop.permute.xlu1 %9020  ;;  %v2852_v51 = vsel %vm2847_vm4, %v2835_v14, %v9007_v25  ;;  %v2853_v48 = vsel %vm2847_vm4, %v2836_v23, %v9008_v42  ;;  %v14646_v14 = vld [vmem:[#allocation49_spill] sm:$0xff] }
 0xdb0   :  { %v9023_v9 = vunpack.i.h.bf16 %v9021_v18  ;;  %v9022_v1 = vunpack.i.l.bf16 %v9021_v18  ;;  %v9016_v55 = vpop.permute.xlu0 %9015 }
 0xdb1   :  { %v9018_v11 = vunpack.i.h.bf16 %v9016_v55  ;;  %v9017_v4 = vunpack.i.l.bf16 %v9016_v55 }
 0xdb2   :  { %v2872_v53 = vsel %vm2864_vm5, %v2855_v29, %v9023_v9  ;;  %v2871_v59 = vsel %vm2864_vm5, %v2854_v56, %v9022_v1  ;;  %v14647_v1 = vld [vmem:[#allocation47_spill] sm:$0xff]  ;;  %v14648_v29 = vld [vmem:[#allocation50_spill] sm:$0xff] }
 0xdb3   :  { %v2869_v47 = vsel %vm2864_vm5, %v2852_v51, %v9017_v4  ;;  %v2870_v2 = vsel %vm2864_vm5, %v2853_v48, %v9018_v11  ;;  %v2884_v45 = vpack.c.bf16 %v2872_v53, %v2871_v59  ;;  %v9031_v24 = vpop.permute.xlu1 %9030  ;;  %v14649_v4 = vld [vmem:[#allocation48_spill] sm:$0xff] }
 0xdb4   :  { %v2883_v30 = vpack.c.bf16 %v2870_v2, %v2869_v47  ;;  %v9026_v22 = vpop.permute.xlu0 %9025  ;;  %v9033_v16 = vunpack.i.h.bf16 %v9031_v24  ;;  %v9032_v43 = vunpack.i.l.bf16 %v9031_v24 }
 0xdb5   :  { %v9028_v17 = vunpack.i.h.bf16 %v9026_v22  ;;  %v9027_v39 = vunpack.i.l.bf16 %v9026_v22 }
 0xdb6   :  { %8458 = vmatprep.mubr.msk.bf16.mxu1 %vm484_vm2, %v2883_v30  ;;  %v2842_v52 = vsel %vm870_vm3, %v14642_v7, %v9033_v16  ;;  %v2841_v20 = vsel %vm870_vm3, %v14643_v62, %v9032_v43 }
 0xdb7   :  { %8459 = vmatmul.mubr.msk.bf16.gmra.mrb[100].mxu1 %vm484_vm2, %v2884_v45  ;;  %v9041_v5 = vpop.permute.xlu1 %9040  ;;  %v2840_v34 = vsel %vm870_vm3, %v14644_v19, %v9028_v17  ;;  %v2839_v10 = vsel %vm870_vm3, %v14645_v35, %v9027_v39 }
 0xdb8   :  { %v9036_v3 = vpop.permute.xlu0 %9035  ;;  %v9043_v31 = vunpack.i.h.bf16 %v9041_v5  ;;  %v9042_v13 = vunpack.i.l.bf16 %v9041_v5 }
 0xdb9   :  { %v9038_v50 = vunpack.i.h.bf16 %v9036_v3  ;;  %v9037_v33 = vunpack.i.l.bf16 %v9036_v3 }
 0xdba   :  { %v2858_v44 = vsel %vm2847_vm4, %v2841_v20, %v9042_v13  ;;  %v2859_v49 = vsel %vm2847_vm4, %v2842_v52, %v9043_v31  ;;  %v11618_v31 = vld [vmem:[%s14379_s14] ss:$0 sm:$0xff]  ;;  %v14650_v20 = vld [vmem:[#allocation3_spill] sm:$0xff] }
 0xdbb   :  { %v2856_v6 = vsel %vm2847_vm4, %v2839_v10, %v9037_v33  ;;  %v2857_v61 = vsel %vm2847_vm4, %v2840_v34, %v9038_v50  ;;  %v14651_v34 = vld [vmem:[#allocation5_spill] sm:$0xff] }
 0xddf   :  { %v9051_v15 = vpop.permute.xlu1 %9050 }
 0xde0   :  { %v9053_v32 = vunpack.i.h.bf16 %v9051_v15  ;;  %v9052_v38 = vunpack.i.l.bf16 %v9051_v15  ;;  %v9046_v37 = vpop.permute.xlu0 %9045 }
 0xde1   :  { %v9048_v8 = vunpack.i.h.bf16 %v9046_v37  ;;  %v9047_v40 = vunpack.i.l.bf16 %v9046_v37 }
 0xde2   :  { %v2876_v26 = vsel %vm2864_vm5, %v2859_v49, %v9053_v32  ;;  %v2875_v28 = vsel %vm2864_vm5, %v2858_v44, %v9052_v38  ;;  %v14652_v32 = vld [vmem:[#allocation4_spill] sm:$0xff]  ;;  %v14653_v49 = vld [vmem:[#allocation2_spill] sm:$0xff] }
 0xde3   :  { %v2873_v36 = vsel %vm2864_vm5, %v2856_v6, %v9047_v40  ;;  %v2874_v54 = vsel %vm2864_vm5, %v2857_v61, %v9048_v8  ;;  %v9061_v58 = vpop.permute.xlu1 %9060  ;;  %v2886_v46 = vpack.c.bf16 %v2876_v26, %v2875_v28 }
 0xde4   :  { %v9056_v0 = vpop.permute.xlu0 %9055  ;;  %v2885_v41 = vpack.c.bf16 %v2874_v54, %v2873_v36  ;;  %v9063_v42 = vunpack.i.h.bf16 %v9061_v58  ;;  %v9062_v25 = vunpack.i.l.bf16 %v9061_v58 }
 0xde5   :  { %v9058_v57 = vunpack.i.h.bf16 %v9056_v0  ;;  %v9057_v60 = vunpack.i.l.bf16 %v9056_v0 }
 0xde6   :  { %8462 = vmatprep.mubr.msk.bf16.mxu1 %vm484_vm2, %v2885_v41  ;;  %v2846_v9 = vsel %vm870_vm3, %v14646_v14, %v9063_v42  ;;  %v2845_v55 = vsel %vm870_vm3, %v14647_v1, %v9062_v25  ;;  %v14655_v25 = vld [vmem:[#allocation6_spill] sm:$0xff] }
 0xde7   :  { %v9071_v27 = vpop.permute.xlu1 %9070  ;;  %8463 = vmatmul.mubr.msk.bf16.gmra.mrb[104].mxu1 %vm484_vm2, %v2886_v46  ;;  %v2844_v11 = vsel %vm870_vm3, %v14648_v29, %v9058_v57  ;;  %v2843_v51 = vsel %vm870_vm3, %v14649_v4, %v9057_v60  ;;  %v14654_v46 = vld [vmem:[#allocation7_spill] sm:$0xff]  ;;  %v14656_v57 = vld [vmem:[#allocation9_spill] sm:$0xff] }
 0xde8   :  { %v9066_v21 = vpop.permute.xlu0 %9065  ;;  %v9073_v18 = vunpack.i.h.bf16 %v9071_v27  ;;  %v9072_v12 = vunpack.i.l.bf16 %v9071_v27  ;;  %v14658_v4 = vld [vmem:[#allocation11_spill] sm:$0xff] }
 0xde9   :  { %v9068_v23 = vunpack.i.h.bf16 %v9066_v21  ;;  %v9067_v63 = vunpack.i.l.bf16 %v9066_v21 }
 0xdea   :  { %v2862_v47 = vsel %vm2847_vm4, %v2845_v55, %v9072_v12  ;;  %v2863_v2 = vsel %vm2847_vm4, %v2846_v9, %v9073_v18  ;;  %v14657_v18 = vld [vmem:[#allocation8_spill] sm:$0xff] }
 0xdeb   :  { %v9081_v56 = vpop.permute.xlu1 %9080  ;;  %v2860_v24 = vsel %vm2847_vm4, %v2843_v51, %v9067_v63  ;;  %v2861_v22 = vsel %vm2847_vm4, %v2844_v11, %v9068_v23 }
 0xdec   :  { %v9083_v48 = vunpack.i.h.bf16 %v9081_v56  ;;  %v9082_v53 = vunpack.i.l.bf16 %v9081_v56  ;;  %v9076_v59 = vpop.permute.xlu0 %9075 }
 0xded   :  { %v9078_v45 = vunpack.i.h.bf16 %v9076_v59  ;;  %v9077_v30 = vunpack.i.l.bf16 %v9076_v59  ;;  %v14659_v59 = vld [vmem:[#allocation10_spill] sm:$0xff] }
 0xdee   :  { %v2880_v5 = vsel %vm2864_vm5, %v2863_v2, %v9083_v48  ;;  %v2879_v16 = vsel %vm2864_vm5, %v2862_v47, %v9082_v53  ;;  %v14660_v2 = vld [vmem:[#allocation13_spill] sm:$0xff] }
 0xdef   :  { %v2877_v43 = vsel %vm2864_vm5, %v2860_v24, %v9077_v30  ;;  %v2878_v3 = vsel %vm2864_vm5, %v2861_v22, %v9078_v45  ;;  %v2888_v17 = vpack.c.bf16 %v2880_v5, %v2879_v16  ;;  %v14661_v24 = vld [vmem:[#allocation12_spill] sm:$0xff] }
 0xdf0   :  { %v2887_v39 = vpack.c.bf16 %v2878_v3, %v2877_v43 }
 0xdf2   :  { %8466 = vmatprep.mubr.msk.bf16.mxu1 %vm484_vm2, %v2887_v39 }
 0xdf3   :  { %8467 = vmatmul.mubr.msk.bf16.gmra.mrb[108].mxu1 %vm484_vm2, %v2888_v17 }
 0xe7e   :  { %v8456_v13 = vpop.f32.mrb[96].mxu1 }
 0xe7f   :  { %v2970_v50 = vpop.f32.mrb[97].mxu1  ;;  %v2979_v33 = vadd.f32 %v8456_v13, %v11618_v31 }
 0xe80   :  { %v2971_v7 = vadd.f32 %v11618_v31, %v2970_v50  ;;  %v8457_v52 = vpop.f32.mrb[98].mxu1 }
 0xe81   :  { %v2973_v62 = vpop.f32.mrb[99].mxu1  ;;  %v11627_v35 = vadd.f32 %v2979_v33, %v14651_v34  ;;  %v2982_v10 = vadd.f32 %v8457_v52, %v11618_v31 }
 0xe82   :  { %v11623_v15 = vadd.f32 %v2971_v7, %v14650_v20  ;;  %v2974_v19 = vadd.f32 %v11618_v31, %v2973_v62  ;;  %v14662_v7 = vld [vmem:[#allocation15_spill] sm:$0xff] }
 0xe83   :  { %v11638_v8 = vadd.f32 %v2982_v10, %v14653_v49  ;;  %v3057_v40 = vsel %vm484_vm2, %v11627_v35, 0.0  ;;  %v14664_v10 = vld [vmem:[#allocation17_spill] sm:$0xff] }
 0xe84   :  { %v11631_v38 = vadd.f32 %v2974_v19, %v14652_v32  ;;  %v3051_v37 = vsel %vm484_vm2, %v11623_v15, 0.0  ;;  %v14663_v19 = vld [vmem:[#allocation14_spill] sm:$0xff] }
 0xe85   :  { %3052 = vadd.xlane.f32.xlu0 %v3051_v37  ;;  %v3060_v54 = vsel %vm484_vm2, %v11638_v8, 0.0 }
 0xe86   :  { %v3054_v44 = vsel %vm484_vm2, %v11631_v38, 0.0 }
 0xe87   :  { %3055 = vadd.xlane.f32.xlu1 %v3054_v44  ;;  %v14665_v44 = vld [vmem:[#allocation16_spill] sm:$0xff] }
 0xe89   :  { %3058 = vadd.xlane.f32.xlu0 %v3057_v40 }
 0xe8a   :  { %v8460_v6 = vpop.f32.mrb[100].mxu1 }
 0xe8b   :  { %v2986_v61 = vpop.f32.mrb[101].mxu1  ;;  %v2995_v26 = vadd.f32 %v8460_v6, %v11618_v31 }
 0xe8c   :  { %v2987_v28 = vadd.f32 %v11618_v31, %v2986_v61  ;;  %v8461_v36 = vpop.f32.mrb[102].mxu1 }
 0xe8d   :  { %v2989_v58 = vpop.f32.mrb[103].mxu1  ;;  %3061 = vadd.xlane.f32.xlu0 %v3060_v54  ;;  %v2998_v41 = vadd.f32 %v8461_v36, %v11618_v31  ;;  %v11652_v27 = vadd.f32 %v2995_v26, %v14655_v25 }
 0xe8e   :  { %v11647_v0 = vadd.f32 %v2987_v28, %v14654_v46  ;;  %v2990_v42 = vadd.f32 %v11618_v31, %v2989_v58 }
 0xe8f   :  { %v11660_v12 = vadd.f32 %v2998_v41, %v14657_v18  ;;  %v3069_v63 = vsel %vm484_vm2, %v11652_v27, 0.0 }
 0xe90   :  { %v11655_v60 = vadd.f32 %v2990_v42, %v14656_v57  ;;  %v3063_v21 = vsel %vm484_vm2, %v11647_v0, 0.0 }
 0xe91   :  { %3064 = vadd.xlane.f32.xlu0 %v3063_v21  ;;  %v3072_v14 = vsel %vm484_vm2, %v11660_v12, 0.0 }
 0xe92   :  { %v3066_v23 = vsel %vm484_vm2, %v11655_v60, 0.0 }
 0xe93   :  { %3067 = vadd.xlane.f32.xlu1 %v3066_v23 }
 0xe95   :  { %3070 = vadd.xlane.f32.xlu0 %v3069_v63 }
 0xe97   :  { %3073 = vadd.xlane.f32.xlu1 %v3072_v14 }
 0xeba   :  { %v8464_v9 = vpop.f32.mrb[104].mxu1 }
 0xebb   :  { %v3002_v1 = vpop.f32.mrb[105].mxu1  ;;  %v3011_v55 = vadd.f32 %v8464_v9, %v11618_v31 }
 0xebc   :  { %v3003_v56 = vadd.f32 %v11618_v31, %v3002_v1  ;;  %v8465_v29 = vpop.f32.mrb[106].mxu1 }
 0xebd   :  { %v3005_v11 = vpop.f32.mrb[107].mxu1  ;;  %v3014_v48 = vadd.f32 %v8465_v29, %v11618_v31  ;;  %v11676_v47 = vadd.f32 %v3011_v55, %v14659_v59 }
 0xebe   :  { %v11671_v51 = vadd.f32 %v3003_v56, %v14658_v4  ;;  %v3006_v53 = vadd.f32 %v11618_v31, %v3005_v11 }
 0xebf   :  { %v11684_v22 = vadd.f32 %v3014_v48, %v14661_v24  ;;  %v3081_v16 = vsel %vm484_vm2, %v11676_v47, 0.0 }
 0xec0   :  { %v11679_v45 = vadd.f32 %v3006_v53, %v14660_v2  ;;  %v3075_v30 = vsel %vm484_vm2, %v11671_v51, 0.0 }
 0xec1   :  { %3076 = vadd.xlane.f32.xlu0 %v3075_v30  ;;  %v3084_v3 = vsel %vm484_vm2, %v11684_v22, 0.0 }
 0xec2   :  { %v3078_v5 = vsel %vm484_vm2, %v11679_v45, 0.0 }
 0xec3   :  { %3079 = vadd.xlane.f32.xlu1 %v3078_v5 }
 0xec5   :  { %3082 = vadd.xlane.f32.xlu0 %v3081_v16 }
 0xec6   :  { %v8468_v43 = vpop.f32.mrb[108].mxu1 }
 0xec7   :  { %v3018_v17 = vpop.f32.mrb[109].mxu1  ;;  %3085 = vadd.xlane.f32.xlu1 %v3084_v3  ;;  %v3027_v39 = vadd.f32 %v8468_v43, %v11618_v31 }
 0xec8   :  { %v3019_v13 = vadd.f32 %v11618_v31, %v3018_v17  ;;  %v8469_v50 = vpop.f32.mrb[110].mxu1  ;;  %v9220_v17 = vld [vmem:[%s14380_s17 + $0x8] sm:$0xff]  }
 0xec9   :  { %v3021_v33 = vpop.f32.mrb[111].mxu1  ;;  %v3030_v62 = vadd.f32 %v8469_v50, %v11618_v31  ;;  %v11700_v34 = vadd.f32 %v3027_v39, %v14663_v19 }
 0xeca   :  { %v11695_v52 = vadd.f32 %v3019_v13, %v14662_v7  ;;  %v3022_v20 = vadd.f32 %v11618_v31, %v3021_v33 }
 0xecb   :  { %v11708_v49 = vadd.f32 %v3030_v62, %v14665_v44  ;;  %v3093_v31 = vsel %vm484_vm2, %v11700_v34, 0.0 }
 0xecc   :  { %v11703_v32 = vadd.f32 %v3022_v20, %v14664_v10  ;;  %v3087_v37 = vsel %vm484_vm2, %v11695_v52, 0.0 }
 0xecd   :  { %3088 = vadd.xlane.f32.xlu0 %v3087_v37  ;;  %v3096_v6 = vsel %vm484_vm2, %v11708_v49, 0.0 }
 0xece   :  { %v3090_v40 = vsel %vm484_vm2, %v11703_v32, 0.0 }
 0xecf   :  { %3091 = vadd.xlane.f32.xlu1 %v3090_v40 }
 0xed1   :  { %3094 = vadd.xlane.f32.xlu0 %v3093_v31 }
 0xed3   :  { %3097 = vadd.xlane.f32.xlu1 %v3096_v6 }
 0xf12   :  { %v3053_v61 = vpop.xlane.xlu0 %3052 }
 0xf13   :  { %v3100_v26 = vmul.f32 0.03125, %v3053_v61 }
 0xf14   :  { %v3056_v28 = vpop.xlane.xlu1 %3055 }
 0xf15   :  { %v11717_v36 = vsub.f32 %v11623_v15, %v3100_v26  ;;  %v3101_v54 = vmul.f32 0.03125, %v3056_v28 }
 0xf16   :  { %v3059_v58 = vpop.xlane.xlu0 %3058 }
 0xf17   :  { %v11720_v46 = vsub.f32 %v11631_v38, %v3101_v54  ;;  %v3102_v41 = vmul.f32 0.03125, %v3059_v58  ;;  %v3132_v42 = vmul.f32 %v11717_v36, %v11717_v36 }
 0xf19   :  { %v11725_v25 = vsub.f32 %v11627_v35, %v3102_v41  ;;  %v3148_v57 = vsel %vm484_vm2, %v3132_v42, 0.0  ;;  %v3133_v21 = vmul.f32 %v11720_v46, %v11720_v46 }
 0xf1a   :  { %3149 = vadd.xlane.f32.xlu0 %v3148_v57  ;;  %v3062_v15 = vpop.xlane.xlu0 %3061 }
 0xf1b   :  { %v3103_v18 = vmul.f32 0.03125, %v3062_v15  ;;  %v3151_v23 = vsel %vm484_vm2, %v3133_v21, 0.0  ;;  %v3134_v38 = vmul.f32 %v11725_v25, %v11725_v25 }
 0xf1c   :  { %3152 = vadd.xlane.f32.xlu1 %v3151_v23 }
 0xf1d   :  { %v11734_v63 = vsub.f32 %v11638_v8, %v3103_v18  ;;  %v3154_v35 = vsel %vm484_vm2, %v3134_v38, 0.0 }
 0xf1e   :  { %3155 = vadd.xlane.f32.xlu0 %v3154_v35  ;;  %v3065_v14 = vpop.xlane.xlu0 %3064 }
 0xf1f   :  { %v3104_v9 = vmul.f32 0.03125, %v3065_v14  ;;  %v3135_v1 = vmul.f32 %v11734_v63, %v11734_v63 }
 0xf20   :  { %v3068_v55 = vpop.xlane.xlu1 %3067 }
 0xf21   :  { %v11740_v56 = vsub.f32 %v11647_v0, %v3104_v9  ;;  %v3105_v29 = vmul.f32 0.03125, %v3068_v55  ;;  %v3157_v11 = vsel %vm484_vm2, %v3135_v1, 0.0 }
 0xf22   :  { %3158 = vadd.xlane.f32.xlu1 %v3157_v11  ;;  %v3071_v4 = vpop.xlane.xlu0 %3070  ;;  %v9222_v11 = vld [vmem:[%s14381_s19 + $0x8] sm:$0xff]  }
 0xf23   :  { %v11744_v8 = vsub.f32 %v11655_v60, %v3105_v29  ;;  %v3106_v48 = vmul.f32 0.03125, %v3071_v4  ;;  %v3136_v53 = vmul.f32 %v11740_v56, %v11740_v56 }
 0xf24   :  { %v3074_v59 = vpop.xlane.xlu1 %3073 }
 0xf25   :  { %v11749_v2 = vsub.f32 %v11652_v27, %v3106_v48  ;;  %v3107_v30 = vmul.f32 0.03125, %v3074_v59  ;;  %v3160_v0 = vsel %vm484_vm2, %v3136_v53, 0.0  ;;  %v3137_v24 = vmul.f32 %v11744_v8, %v11744_v8 }
 0xf26   :  { %3161 = vadd.xlane.f32.xlu0 %v3160_v0 }
 0xf27   :  { %v11755_v5 = vsub.f32 %v11660_v12, %v3107_v30  ;;  %v3163_v60 = vsel %vm484_vm2, %v3137_v24, 0.0  ;;  %v3138_v16 = vmul.f32 %v11749_v2, %v11749_v2  ;;  %v9219_v12 = vld [vmem:[%s14380_s17] sm:$0xff]  }
 0xf28   :  { %3164 = vadd.xlane.f32.xlu1 %v3163_v60  ;;  %8470 = vmatprep.subr.bf16.mxu0 %v9219_v12 }
 0xf29   :  { %v3166_v43 = vsel %vm484_vm2, %v3138_v16, 0.0  ;;  %v3139_v27 = vmul.f32 %v11755_v5, %v11755_v5  ;;  %8471 = vmatpush3.bf16.msra.mxu0 %v9219_v12 }
 0xf2a   :  { %3167 = vadd.xlane.f32.xlu0 %v3166_v43  ;;  %8472 = vmatprep.subr.bf16.mxu0 %v9220_v17 }
 0xf2b   :  { %v3169_v3 = vsel %vm484_vm2, %v3139_v27, 0.0 }
 0xf2c   :  { %3170 = vadd.xlane.f32.xlu1 %v3169_v3 }
 0xf2d   :  { %8473 = vmatpush3.bf16.msra.mxu0 %v9220_v17 }
 0xf4e   :  { %v3077_v39 = vpop.xlane.xlu0 %3076 }
 0xf4f   :  { %v3108_v13 = vmul.f32 0.03125, %v3077_v39 }
 0xf50   :  { %v3080_v50 = vpop.xlane.xlu1 %3079 }
 0xf51   :  { %v11771_v33 = vsub.f32 %v11671_v51, %v3108_v13  ;;  %v3109_v7 = vmul.f32 0.03125, %v3080_v50  ;;  %v11827_v50 = vld [vmem:[%s14382_s15] ss:$0 sm:$0xff] }
 0xf52   :  { %v3083_v62 = vpop.xlane.xlu0 %3082 }
 0xf53   :  { %v11774_v20 = vsub.f32 %v11679_v45, %v3109_v7  ;;  %v3110_v19 = vmul.f32 0.03125, %v3083_v62  ;;  %v3140_v10 = vmul.f32 %v11771_v33, %v11771_v33 }
 0xf54   :  { %v3086_v37 = vpop.xlane.xlu1 %3085 }
 0xf55   :  { %v11779_v44 = vsub.f32 %v11676_v47, %v3110_v19  ;;  %v3111_v40 = vmul.f32 0.03125, %v3086_v37  ;;  %v3172_v31 = vsel %vm484_vm2, %v3140_v10, 0.0  ;;  %v3141_v51 = vmul.f32 %v11774_v20, %v11774_v20 }
 0xf56   :  { %3173 = vadd.xlane.f32.xlu0 %v3172_v31 }
 0xf57   :  { %v11785_v6 = vsub.f32 %v11684_v22, %v3111_v40  ;;  %v3175_v45 = vsel %vm484_vm2, %v3141_v51, 0.0  ;;  %v3142_v61 = vmul.f32 %v11779_v44, %v11779_v44 }
 0xf58   :  { %3176 = vadd.xlane.f32.xlu1 %v3175_v45 }
 0xf59   :  { %v3178_v26 = vsel %vm484_vm2, %v3142_v61, 0.0  ;;  %v3143_v47 = vmul.f32 %v11785_v6, %v11785_v6 }
 0xf5a   :  { %3179 = vadd.xlane.f32.xlu0 %v3178_v26  ;;  %v3089_v28 = vpop.xlane.xlu0 %3088 }
 0xf5b   :  { %v3112_v54 = vmul.f32 0.03125, %v3089_v28  ;;  %v3181_v58 = vsel %vm484_vm2, %v3143_v47, 0.0  ;;  %v11835_v47 = vld [vmem:[%s14383_s16] ss:$0 sm:$0xff] }
 0xf5c   :  { %v3092_v41 = vpop.xlane.xlu1 %3091  ;;  %3182 = vadd.xlane.f32.xlu1 %v3181_v58 }
 0xf5d   :  { %v11795_v22 = vsub.f32 %v11695_v52, %v3112_v54  ;;  %v3113_v42 = vmul.f32 0.03125, %v3092_v41 }
 0xf5e   :  { %v3095_v57 = vpop.xlane.xlu0 %3094 }
 0xf5f   :  { %v11798_v21 = vsub.f32 %v11703_v32, %v3113_v42  ;;  %v3114_v15 = vmul.f32 0.03125, %v3095_v57  ;;  %v3144_v18 = vmul.f32 %v11795_v22, %v11795_v22 }
 0xf60   :  { %v3098_v23 = vpop.xlane.xlu1 %3097 }
 0xf61   :  { %v11803_v38 = vsub.f32 %v11700_v34, %v3114_v15  ;;  %v3115_v35 = vmul.f32 0.03125, %v3098_v23  ;;  %v3184_v14 = vsel %vm484_vm2, %v3144_v18, 0.0  ;;  %v3145_v52 = vmul.f32 %v11798_v21, %v11798_v21 }
 0xf62   :  { %3185 = vadd.xlane.f32.xlu0 %v3184_v14 }
 0xf63   :  { %v11809_v9 = vsub.f32 %v11708_v49, %v3115_v35  ;;  %v3187_v32 = vsel %vm484_vm2, %v3145_v52, 0.0  ;;  %v3146_v1 = vmul.f32 %v11803_v38, %v11803_v38  ;;  %v9221_v49 = vld [vmem:[%s14381_s19] sm:$0xff]  }
 0xf64   :  { %3188 = vadd.xlane.f32.xlu1 %v3187_v32  ;;  %8490 = vmatprep.subr.bf16.mxu1 %v9221_v49 }
 0xf65   :  { %v3190_v55 = vsel %vm484_vm2, %v3146_v1, 0.0  ;;  %v3147_v34 = vmul.f32 %v11809_v9, %v11809_v9  ;;  %8491 = vmatpush3.bf16.msra.mxu1 %v9221_v49 }
 0xf66   :  { %3191 = vadd.xlane.f32.xlu0 %v3190_v55  ;;  %8492 = vmatprep.subr.bf16.mxu1 %v9222_v11 }
 0xf67   :  { %v3193_v29 = vsel %vm484_vm2, %v3147_v34, 0.0 }
 0xf68   :  { %3194 = vadd.xlane.f32.xlu1 %v3193_v29 }
 0xf69   :  { %8493 = vmatpush3.bf16.msra.mxu1 %v9222_v11 }
 0xfa7   :  { %v3150_v4 = vpop.xlane.xlu0 %3149 }
 0xfa8   :  { %v3196_v48 = vmul.f32 0.03125, %v3150_v4 }
 0xfa9   :  { %v3153_v53 = vpop.xlane.xlu1 %3152 }
 0xfaa   :  { %v3212_v59 = vadd.f32 1e-05, %v3196_v48  ;;  %v3197_v30 = vmul.f32 0.03125, %v3153_v53 }
 0xfab   :  { %v3156_v0 = vpop.xlane.xlu0 %3155 }
 0xfac   :  { %9495 = vrsqrt.f32 %v3212_v59  ;;  %v3213_v24 = vadd.f32 1e-05, %v3197_v30  ;;  %v3198_v60 = vmul.f32 0.03125, %v3156_v0 }
 0xfae   :  { %9497 = vrsqrt.f32 %v3213_v24  ;;  %v3214_v16 = vadd.f32 1e-05, %v3198_v60 }
 0xfaf   :  { %v3159_v43 = vpop.xlane.xlu1 %3158 }
 0xfb0   :  { %9499 = vrsqrt.f32 %v3214_v16  ;;  %v3199_v27 = vmul.f32 0.03125, %v3159_v43 }
 0xfb2   :  { %v3215_v3 = vadd.f32 1e-05, %v3199_v27 }
 0xfb3   :  { %v3162_v12 = vpop.xlane.xlu0 %3161 }
 0xfb4   :  { %9501 = vrsqrt.f32 %v3215_v3  ;;  %v3200_v17 = vmul.f32 0.03125, %v3162_v12 }
 0xfb5   :  { %v3165_v39 = vpop.xlane.xlu1 %3164 }
 0xfb6   :  { %v9496_v13 = vpop.eup %9495  ;;  %v3216_v7 = vadd.f32 1e-05, %v3200_v17  ;;  %v3201_v62 = vmul.f32 0.03125, %v3165_v39 }
 0xfb7   :  { %v3168_v19 = vpop.xlane.xlu0 %3167  ;;  %v3244_v10 = vmul.f32 %v9496_v13, %v11717_v36 }
 0xfb8   :  { %v9498_v37 = vpop.eup %9497  ;;  %9503 = vrsqrt.f32 %v3216_v7  ;;  %v3217_v40 = vadd.f32 1e-05, %v3201_v62  ;;  %v3202_v31 = vmul.f32 0.03125, %v3168_v19 }
 0xfb9   :  { %v3171_v51 = vpop.xlane.xlu1 %3170  ;;  %v3245_v45 = vmul.f32 %v9498_v37, %v11720_v46  ;;  %v3266_v61 = vmul.f32 %v11827_v50, %v3244_v10 }
 0xfba   :  { %v9500_v26 = vpop.eup %9499  ;;  %9505 = vrsqrt.f32 %v3217_v40  ;;  %v3218_v28 = vadd.f32 1e-05, %v3202_v31  ;;  %v3203_v54 = vmul.f32 0.03125, %v3171_v51 }
 0xfbb   :  { %v3246_v36 = vmul.f32 %v9500_v26, %v11725_v25  ;;  %v3267_v58 = vmul.f32 %v11827_v50, %v3245_v45  ;;  %v11840_v42 = vadd.f32 %v11835_v47, %v3266_v61 }
 0xfbc   :  { %9507 = vrsqrt.f32 %v3218_v28  ;;  %v3219_v41 = vadd.f32 1e-05, %v3203_v54 }
 0xfbd   :  { %v11843_v46 = vadd.f32 %v11835_v47, %v3267_v58  ;;  %v3268_v15 = vmul.f32 %v11827_v50, %v3246_v36 }
 0xfbe   :  { %v9502_v57 = vpop.eup %9501  ;;  %9509 = vrsqrt.f32 %v3219_v41 }
 0xfbf   :  { %v3247_v18 = vmul.f32 %v9502_v57, %v11734_v63  ;;  %v3304_v23 = vpack.c.bf16 %v11843_v46, %v11840_v42  ;;  %v11852_v14 = vadd.f32 %v11835_v47, %v3268_v15 }
 0xfc1   :  { %v3269_v25 = vmul.f32 %v11827_v50, %v3247_v18  ;;  %8474 = vmatprep.mubr.msk.bf16.mxu0 %vm484_vm2, %v3304_v23 }
 0xfc2   :  { %v9504_v35 = vpop.eup %9503 }
 0xfc3   :  { %v11855_v52 = vadd.f32 %v11835_v47, %v3269_v25  ;;  %v3248_v32 = vmul.f32 %v9504_v35, %v11740_v56 }
 0xfc4   :  { %v9506_v1 = vpop.eup %9505 }
 0xfc5   :  { %v3305_v63 = vpack.c.bf16 %v11855_v52, %v11852_v14  ;;  %v3249_v55 = vmul.f32 %v9506_v1, %v11744_v8  ;;  %v3270_v34 = vmul.f32 %v11827_v50, %v3248_v32 }
 0xfc6   :  { %v9508_v29 = vpop.eup %9507 }
 0xfc7   :  { %8475 = vmatmul.mubr.msk.bf16.vlgmr.msra.gmra.mrb[112].mxu0 %vm484_vm2, %v3305_v63  ;;  %v3271_v49 = vmul.f32 %v11827_v50, %v3249_v55  ;;  %v3250_v11 = vmul.f32 %v9508_v29, %v11749_v2  ;;  %v11866_v48 = vadd.f32 %v11835_v47, %v3270_v34 }
 0xfc8   :  { %v9510_v4 = vpop.eup %9509 }
 0xfc9   :  { %v11869_v56 = vadd.f32 %v11835_v47, %v3271_v49  ;;  %v3251_v53 = vmul.f32 %v9510_v4, %v11755_v5  ;;  %v3272_v8 = vmul.f32 %v11827_v50, %v3250_v11 }
 0xfcb   :  { %v3306_v59 = vpack.c.bf16 %v11869_v56, %v11866_v48  ;;  %v3273_v30 = vmul.f32 %v11827_v50, %v3251_v53  ;;  %v11878_v2 = vadd.f32 %v11835_v47, %v3272_v8 }
 0xfcd   :  { %8478 = vmatprep.mubr.msk.bf16.mxu0 %vm484_vm2, %v3306_v59  ;;  %v11881_v0 = vadd.f32 %v11835_v47, %v3273_v30 }
 0xfcf   :  { %v3307_v24 = vpack.c.bf16 %v11881_v0, %v11878_v2 }
 0xfd1   :  { %8479 = vmatmul.mubr.msk.bf16.gmra.mrb[116].mxu0 %vm484_vm2, %v3307_v24 }
 0xfe3   :  { %v3174_v5 = vpop.xlane.xlu0 %3173 }
 0xfe4   :  { %v3204_v60 = vmul.f32 0.03125, %v3174_v5 }
 0xfe5   :  { %v3177_v16 = vpop.xlane.xlu1 %3176 }
 0xfe6   :  { %v3220_v43 = vadd.f32 1e-05, %v3204_v60  ;;  %v3205_v27 = vmul.f32 0.03125, %v3177_v16 }
 0xfe7   :  { %v3180_v3 = vpop.xlane.xlu0 %3179 }
 0xfe8   :  { %9511 = vrsqrt.f32 %v3220_v43  ;;  %v3221_v12 = vadd.f32 1e-05, %v3205_v27  ;;  %v3206_v17 = vmul.f32 0.03125, %v3180_v3 }
 0xfe9   :  { %v3183_v39 = vpop.xlane.xlu1 %3182 }
 0xfea   :  { %9513 = vrsqrt.f32 %v3221_v12  ;;  %v3222_v13 = vadd.f32 1e-05, %v3206_v17  ;;  %v3207_v7 = vmul.f32 0.03125, %v3183_v39 }
 0xfec   :  { %9515 = vrsqrt.f32 %v3222_v13  ;;  %v3223_v62 = vadd.f32 1e-05, %v3207_v7 }
 0xfee   :  { %9517 = vrsqrt.f32 %v3223_v62 }
 0xfef   :  { %v3186_v19 = vpop.xlane.xlu0 %3185 }
 0xff0   :  { %v3208_v10 = vmul.f32 0.03125, %v3186_v19 }
 0xff1   :  { %v3189_v37 = vpop.xlane.xlu1 %3188 }
 0xff2   :  { %v9512_v40 = vpop.eup %9511  ;;  %v3224_v31 = vadd.f32 1e-05, %v3208_v10  ;;  %v3209_v51 = vmul.f32 0.03125, %v3189_v37 }
 0xff3   :  { %v3192_v45 = vpop.xlane.xlu0 %3191  ;;  %v3252_v61 = vmul.f32 %v9512_v40, %v11771_v33 }
 0xff4   :  { %v9514_v26 = vpop.eup %9513  ;;  %9519 = vrsqrt.f32 %v3224_v31  ;;  %v3225_v28 = vadd.f32 1e-05, %v3209_v51  ;;  %v3210_v54 = vmul.f32 0.03125, %v3192_v45 }
 0xff5   :  { %v3195_v36 = vpop.xlane.xlu1 %3194  ;;  %v3253_v58 = vmul.f32 %v9514_v26, %v11774_v20  ;;  %v3274_v41 = vmul.f32 %v11827_v50, %v3252_v61 }
 0xff6   :  { %v9516_v57 = vpop.eup %9515  ;;  %9521 = vrsqrt.f32 %v3225_v28  ;;  %v3226_v15 = vadd.f32 1e-05, %v3210_v54  ;;  %v3211_v18 = vmul.f32 0.03125, %v3195_v36 }
 0xff7   :  { %v3275_v23 = vmul.f32 %v11827_v50, %v3253_v58  ;;  %v3254_v25 = vmul.f32 %v9516_v57, %v11779_v44  ;;  %v11892_v32 = vadd.f32 %v11835_v47, %v3274_v41 }
 0xff8   :  { %v9518_v35 = vpop.eup %9517  ;;  %9523 = vrsqrt.f32 %v3226_v15  ;;  %v3227_v33 = vadd.f32 1e-05, %v3211_v18 }
 0xff9   :  { %v11895_v1 = vadd.f32 %v11835_v47, %v3275_v23  ;;  %v3255_v20 = vmul.f32 %v9518_v35, %v11785_v6  ;;  %v3276_v63 = vmul.f32 %v11827_v50, %v3254_v25 }
 0xffa   :  { %9525 = vrsqrt.f32 %v3227_v33 }
 0xffb   :  { %v3308_v55 = vpack.c.bf16 %v11895_v1, %v11892_v32  ;;  %v3277_v34 = vmul.f32 %v11827_v50, %v3255_v20  ;;  %v11904_v44 = vadd.f32 %v11835_v47, %v3276_v63 }
 0xffd   :  { %8482 = vmatprep.mubr.msk.bf16.mxu0 %vm484_vm2, %v3308_v55  ;;  %v11907_v29 = vadd.f32 %v11835_v47, %v3277_v34 }
 0xffe   :  { %v9520_v49 = vpop.eup %9519 }
 0xfff   :  { %v3309_v6 = vpack.c.bf16 %v11907_v29, %v11904_v44  ;;  %v3256_v11 = vmul.f32 %v9520_v49, %v11795_v22 }
0x1000   :  { %v9522_v4 = vpop.eup %9521 }
0x1001   :  { %8483 = vmatmul.mubr.msk.bf16.gmra.mrb[120].mxu0 %vm484_vm2, %v3309_v6  ;;  %v3257_v53 = vmul.f32 %v9522_v4, %v11798_v21  ;;  %v3278_v8 = vmul.f32 %v11827_v50, %v3256_v11 }
0x1002   :  { %v9524_v59 = vpop.eup %9523 }
0x1003   :  { %v3279_v30 = vmul.f32 %v11827_v50, %v3257_v53  ;;  %v3258_v24 = vmul.f32 %v9524_v59, %v11803_v38  ;;  %v11918_v60 = vadd.f32 %v11835_v47, %v3278_v8 }
0x1004   :  { %v9526_v5 = vpop.eup %9525 }
0x1005   :  { %v11921_v16 = vadd.f32 %v11835_v47, %v3279_v30  ;;  %v3259_v22 = vmul.f32 %v9526_v5, %v11809_v9  ;;  %v3280_v43 = vmul.f32 %v11827_v50, %v3258_v24  ;;  %v9223_v9 = vld [vmem:[%s14381_s19 + $0x10] sm:$0xff]  }
0x1006   :  { %8494 = vmatprep.subr.bf16.mxu1 %v9223_v9 }
0x1007   :  { %v3310_v21 = vpack.c.bf16 %v11921_v16, %v11918_v60  ;;  %v3281_v27 = vmul.f32 %v11827_v50, %v3259_v22  ;;  %v11930_v38 = vadd.f32 %v11835_v47, %v3280_v43  ;;  %8495 = vmatpush3.bf16.msra.mxu1 %v9223_v9  ;;  %v9224_v50 = vld [vmem:[%s14381_s19 + $0x18] sm:$0xff]  }
0x1008   :  { %8496 = vmatprep.subr.bf16.mxu1 %v9224_v50 }
0x1009   :  { %8486 = vmatprep.mubr.msk.bf16.mxu0 %vm484_vm2, %v3310_v21  ;;  %v11933_v3 = vadd.f32 %v11835_v47, %v3281_v27  ;;  %v7517_v47 = vld [vmem:[%s14384_s18] ss:$0 sm:$0xff] }
0x100b   :  { %v3311_v12 = vpack.c.bf16 %v11933_v3, %v11930_v38  ;;  %8497 = vmatpush3.bf16.msra.mxu1 %v9224_v50 }
0x100d   :  { %8487 = vmatmul.mubr.msk.bf16.gmra.mrb[124].mxu0 %vm484_vm2, %v3311_v12 }
0x109a   :  { %v8476_v17 = vpop.f32.mrb[112].mxu0 }
0x109b   :  { %v3402_v39 = vadd.f32 %v8476_v17, %v7517_v47  ;;  %v3393_v13 = vpop.f32.mrb[113].mxu0 }
0x109c   :  { %v3394_v7 = vadd.f32 %v7517_v47, %v3393_v13  ;;  %v8477_v62 = vpop.f32.mrb[114].mxu0 }
0x109d   :  { %v3405_v19 = vadd.f32 %v8477_v62, %v7517_v47  ;;  %v3396_v10 = vpop.f32.mrb[115].mxu0  ;;  %v3458_v40 = vmax.f32 %v3402_v39, 0.0 }
0x109e   :  { %v3397_v37 = vadd.f32 %v7517_v47, %v3396_v10  ;;  %v3456_v51 = vmax.f32 %v3394_v7, 0.0 }
0x109f   :  { %v3459_v31 = vmax.f32 %v3405_v19, 0.0 }
0x10a0   :  { %v3457_v45 = vmax.f32 %v3397_v37, 0.0 }
0x10a1   :  { %v3473_v61 = vpack.c.bf16 %v3459_v31, %v3458_v40  ;;  %v11958_v31 = vld [vmem:[%s14385_s20] ss:$0 sm:$0xff] }
0x10a2   :  { %v3472_v26 = vpack.c.bf16 %v3457_v45, %v3456_v51 }
0x10a4   :  { %v8480_v28 = vpop.f32.mrb[116].mxu0  ;;  %8498 = vmatprep.mubr.msk.bf16.mxu1 %vm315_vm1, %v3472_v26 }
0x10a5   :  { %v3418_v54 = vadd.f32 %v8480_v28, %v7517_v47  ;;  %v3409_v36 = vpop.f32.mrb[117].mxu0  ;;  %8499 = vmatmul.mubr.msk.bf16.vlgmr.msra.gmra.mrb[112].mxu1 %vm315_vm1, %v3473_v61 }
0x10a6   :  { %v3410_v58 = vadd.f32 %v7517_v47, %v3409_v36  ;;  %v8481_v41 = vpop.f32.mrb[118].mxu0 }
0x10a7   :  { %v3421_v57 = vadd.f32 %v8481_v41, %v7517_v47  ;;  %v3412_v15 = vpop.f32.mrb[119].mxu0  ;;  %v3462_v23 = vmax.f32 %v3418_v54, 0.0 }
0x10a8   :  { %v3413_v18 = vadd.f32 %v7517_v47, %v3412_v15  ;;  %v3460_v35 = vmax.f32 %v3410_v58, 0.0 }
0x10a9   :  { %v3463_v25 = vmax.f32 %v3421_v57, 0.0 }
0x10aa   :  { %v3461_v33 = vmax.f32 %v3413_v18, 0.0 }
0x10ab   :  { %v3475_v20 = vpack.c.bf16 %v3463_v25, %v3462_v23 }
0x10ac   :  { %v3474_v63 = vpack.c.bf16 %v3461_v33, %v3460_v35 }
0x10ae   :  { %8502 = vmatprep.mubr.msk.bf16.mxu1 %vm315_vm1, %v3474_v63 }
0x10af   :  { %8503 = vmatmul.mubr.msk.bf16.gmra.mrb[116].mxu1 %vm315_vm1, %v3475_v20 }
0x10d4   :  { %v8484_v55 = vpop.f32.mrb[120].mxu0 }
0x10d5   :  { %v3434_v34 = vadd.f32 %v8484_v55, %v7517_v47  ;;  %v3425_v49 = vpop.f32.mrb[121].mxu0 }
0x10d6   :  { %v3426_v6 = vadd.f32 %v7517_v47, %v3425_v49  ;;  %v8485_v11 = vpop.f32.mrb[122].mxu0 }
0x10d7   :  { %v3437_v4 = vadd.f32 %v8485_v11, %v7517_v47  ;;  %v3428_v53 = vpop.f32.mrb[123].mxu0  ;;  %v3466_v59 = vmax.f32 %v3434_v34, 0.0 }
0x10d8   :  { %v3429_v8 = vadd.f32 %v7517_v47, %v3428_v53  ;;  %v3464_v24 = vmax.f32 %v3426_v6, 0.0 }
0x10d9   :  { %v3467_v30 = vmax.f32 %v3437_v4, 0.0 }
0x10da   :  { %v3465_v5 = vmax.f32 %v3429_v8, 0.0 }
0x10db   :  { %v3477_v22 = vpack.c.bf16 %v3467_v30, %v3466_v59 }
0x10dc   :  { %v3476_v43 = vpack.c.bf16 %v3465_v5, %v3464_v24 }
0x10de   :  { %8506 = vmatprep.mubr.msk.bf16.mxu1 %vm315_vm1, %v3476_v43 }
0x10df   :  { %8507 = vmatmul.mubr.msk.bf16.gmra.mrb[120].mxu1 %vm315_vm1, %v3477_v22 }
0x10e0   :  { %v8488_v21 = vpop.f32.mrb[124].mxu0 }
0x10e1   :  { %v3450_v27 = vadd.f32 %v8488_v21, %v7517_v47  ;;  %v3441_v12 = vpop.f32.mrb[125].mxu0 }
0x10e2   :  { %v3442_v9 = vadd.f32 %v7517_v47, %v3441_v12  ;;  %v8489_v50 = vpop.f32.mrb[126].mxu0 }
0x10e3   :  { %v3453_v17 = vadd.f32 %v8489_v50, %v7517_v47  ;;  %v3444_v39 = vpop.f32.mrb[127].mxu0  ;;  %v3470_v7 = vmax.f32 %v3450_v27, 0.0 }
0x10e4   :  { %v3445_v13 = vadd.f32 %v7517_v47, %v3444_v39  ;;  %v3468_v19 = vmax.f32 %v3442_v9, 0.0 }
0x10e5   :  { %v3471_v62 = vmax.f32 %v3453_v17, 0.0 }
0x10e6   :  { %v3469_v10 = vmax.f32 %v3445_v13, 0.0 }
0x10e7   :  { %v3479_v37 = vpack.c.bf16 %v3471_v62, %v3470_v7 }
0x10e8   :  { %v3478_v40 = vpack.c.bf16 %v3469_v10, %v3468_v19 }
0x10ea   :  { %8510 = vmatprep.mubr.msk.bf16.mxu1 %vm315_vm1, %v3478_v40 }
0x10eb   :  { %8511 = vmatmul.mubr.msk.bf16.gmra.mrb[124].mxu1 %vm315_vm1, %v3479_v37 }
0x1178   :  { %v8500_v51 = vpop.f32.mrb[112].mxu1 }
0x1179   :  { %v3577_v45 = vpop.f32.mrb[113].mxu1  ;;  %v3586_v61 = vadd.f32 %v8500_v51, %v11958_v31 }
0x117a   :  { %v3578_v47 = vadd.f32 %v11958_v31, %v3577_v45  ;;  %v8501_v26 = vpop.f32.mrb[114].mxu1 }
0x117b   :  { %v3580_v28 = vpop.f32.mrb[115].mxu1  ;;  %v3589_v36 = vadd.f32 %v8501_v26, %v11958_v31  ;;  %v11968_v41 = vadd.f32 %v3586_v61, %v11852_v14 }
0x117c   :  { %v11963_v54 = vadd.f32 %v3578_v47, %v11840_v42  ;;  %v3581_v58 = vadd.f32 %v11958_v31, %v3580_v28 }
0x117d   :  { %v11976_v18 = vadd.f32 %v3589_v36, %v11855_v52  ;;  %v3664_v25 = vsel %vm484_vm2, %v11968_v41, 0.0 }
0x117e   :  { %v11971_v57 = vadd.f32 %v3581_v58, %v11843_v46  ;;  %v3658_v15 = vsel %vm484_vm2, %v11963_v54, 0.0 }
0x117f   :  { %3659 = vadd.xlane.f32.xlu0 %v3658_v15  ;;  %v3667_v20 = vsel %vm484_vm2, %v11976_v18, 0.0 }
0x1180   :  { %v3661_v42 = vsel %vm484_vm2, %v11971_v57, 0.0 }
0x1181   :  { %3662 = vadd.xlane.f32.xlu1 %v3661_v42 }
0x1182   :  { %v8504_v23 = vpop.f32.mrb[116].mxu1 }
0x1183   :  { %3665 = vadd.xlane.f32.xlu0 %v3664_v25  ;;  %v3593_v14 = vpop.f32.mrb[117].mxu1  ;;  %v3602_v46 = vadd.f32 %v8504_v23, %v11958_v31 }
0x1184   :  { %v3594_v35 = vadd.f32 %v11958_v31, %v3593_v14  ;;  %v8505_v33 = vpop.f32.mrb[118].mxu1 }
0x1185   :  { %3668 = vadd.xlane.f32.xlu1 %v3667_v20  ;;  %v3596_v52 = vpop.f32.mrb[119].mxu1  ;;  %v3605_v55 = vadd.f32 %v8505_v33, %v11958_v31  ;;  %v11992_v49 = vadd.f32 %v3602_v46, %v11878_v2 }
0x1186   :  { %v11987_v63 = vadd.f32 %v3594_v35, %v11866_v48  ;;  %v3597_v34 = vadd.f32 %v11958_v31, %v3596_v52 }
0x1187   :  { %v12000_v4 = vadd.f32 %v3605_v55, %v11881_v0  ;;  %v3676_v53 = vsel %vm484_vm2, %v11992_v49, 0.0 }
0x1188   :  { %v11995_v6 = vadd.f32 %v3597_v34, %v11869_v56  ;;  %v3670_v11 = vsel %vm484_vm2, %v11987_v63, 0.0 }
0x1189   :  { %3671 = vadd.xlane.f32.xlu0 %v3670_v11  ;;  %v3679_v2 = vsel %vm484_vm2, %v12000_v4, 0.0 }
0x118a   :  { %v3673_v48 = vsel %vm484_vm2, %v11995_v6, 0.0 }
0x118b   :  { %3674 = vadd.xlane.f32.xlu1 %v3673_v48 }
0x118d   :  { %3677 = vadd.xlane.f32.xlu0 %v3676_v53 }
0x118f   :  { %3680 = vadd.xlane.f32.xlu1 %v3679_v2 }
0x11b2   :  { %v8508_v56 = vpop.f32.mrb[120].mxu1 }
0x11b3   :  { %v3609_v8 = vpop.f32.mrb[121].mxu1  ;;  %v3618_v59 = vadd.f32 %v8508_v56, %v11958_v31 }
0x11b4   :  { %v3610_v30 = vadd.f32 %v11958_v31, %v3609_v8  ;;  %v8509_v0 = vpop.f32.mrb[122].mxu1 }
0x11b5   :  { %v3612_v24 = vpop.f32.mrb[123].mxu1  ;;  %v3621_v22 = vadd.f32 %v8509_v0, %v11958_v31  ;;  %v12016_v21 = vadd.f32 %v3618_v59, %v11904_v44 }
0x11b6   :  { %v12011_v5 = vadd.f32 %v3610_v30, %v11892_v32  ;;  %v3613_v43 = vadd.f32 %v11958_v31, %v3612_v24 }
0x11b7   :  { %v12024_v9 = vadd.f32 %v3621_v22, %v11907_v29  ;;  %v3688_v50 = vsel %vm484_vm2, %v12016_v21, 0.0 }
0x11b8   :  { %v12019_v27 = vadd.f32 %v3613_v43, %v11895_v1  ;;  %v3682_v12 = vsel %vm484_vm2, %v12011_v5, 0.0 }
0x11b9   :  { %3683 = vadd.xlane.f32.xlu0 %v3682_v12  ;;  %v3691_v1 = vsel %vm484_vm2, %v12024_v9, 0.0 }
0x11ba   :  { %v3685_v32 = vsel %vm484_vm2, %v12019_v27, 0.0 }
0x11bb   :  { %3686 = vadd.xlane.f32.xlu1 %v3685_v32  ;;  %v9226_v32 = vld [vmem:[%s14519_s28 + $0x10] sm:$0xff]  }
0x11bc   :  { %8534 = vmatprep.subr.bf16.mxu1 %v9226_v32 }
0x11bd   :  { %3689 = vadd.xlane.f32.xlu0 %v3688_v50  ;;  %8535 = vmatpush3.bf16.msra.mxu1 %v9226_v32  ;;  %v9227_v50 = vld [vmem:[%s14521_s25 + $0x18] sm:$0xff]  }
0x11be   :  { %v8512_v44 = vpop.f32.mrb[124].mxu1 }
0x11bf   :  { %3692 = vadd.xlane.f32.xlu1 %v3691_v1  ;;  %v3625_v17 = vpop.f32.mrb[125].mxu1  ;;  %v3634_v39 = vadd.f32 %v8512_v44, %v11958_v31  ;;  %v9228_v44 = vld [vmem:[%s14519_s28 + $0x18] sm:$0xff]  }
0x11c0   :  { %v3626_v13 = vadd.f32 %v11958_v31, %v3625_v17  ;;  %v8513_v29 = vpop.f32.mrb[126].mxu1  ;;  %8536 = vmatprep.subr.bf16.mxu1 %v9228_v44 }
0x11c1   :  { %v3628_v7 = vpop.f32.mrb[127].mxu1  ;;  %v3637_v19 = vadd.f32 %v8513_v29, %v11958_v31  ;;  %v12040_v37 = vadd.f32 %v3634_v39, %v11930_v38  ;;  %8537 = vmatpush3.bf16.msra.mxu1 %v9228_v44 }
0x11c2   :  { %v12035_v62 = vadd.f32 %v3626_v13, %v11918_v60  ;;  %v3629_v10 = vadd.f32 %v11958_v31, %v3628_v7 }
0x11c3   :  { %v12048_v45 = vadd.f32 %v3637_v19, %v11933_v3  ;;  %v3700_v31 = vsel %vm484_vm2, %v12040_v37, 0.0 }
0x11c4   :  { %v12043_v40 = vadd.f32 %v3629_v10, %v11921_v16  ;;  %v3694_v51 = vsel %vm484_vm2, %v12035_v62, 0.0 }
0x11c5   :  { %3695 = vadd.xlane.f32.xlu0 %v3694_v51  ;;  %v3703_v38 = vsel %vm484_vm2, %v12048_v45, 0.0 }
0x11c6   :  { %v3697_v60 = vsel %vm484_vm2, %v12043_v40, 0.0 }
0x11c7   :  { %3698 = vadd.xlane.f32.xlu1 %v3697_v60 }
0x11c9   :  { %3701 = vadd.xlane.f32.xlu0 %v3700_v31 }
0x11cb   :  { %3704 = vadd.xlane.f32.xlu1 %v3703_v38 }
0x120c   :  { %v3660_v16 = vpop.xlane.xlu0 %3659 }
0x120d   :  { %v3706_v61 = vmul.f32 0.03125, %v3660_v16 }
0x120e   :  { %v3663_v47 = vpop.xlane.xlu1 %3662 }
0x120f   :  { %v12057_v26 = vsub.f32 %v11963_v54, %v3706_v61  ;;  %v3707_v3 = vmul.f32 0.03125, %v3663_v47 }
0x1210   :  { %v3666_v28 = vpop.xlane.xlu0 %3665 }
0x1211   :  { %v12060_v36 = vsub.f32 %v11971_v57, %v3707_v3  ;;  %v3708_v58 = vmul.f32 0.03125, %v3666_v28  ;;  %v3738_v15 = vmul.f32 %v12057_v26, %v12057_v26 }
0x1212   :  { %v3669_v42 = vpop.xlane.xlu1 %3668 }
0x1213   :  { %v12065_v23 = vsub.f32 %v11968_v41, %v3708_v58  ;;  %v3709_v25 = vmul.f32 0.03125, %v3669_v42  ;;  %v3754_v14 = vsel %vm484_vm2, %v3738_v15, 0.0  ;;  %v3739_v54 = vmul.f32 %v12060_v36, %v12060_v36 }
0x1214   :  { %3755 = vadd.xlane.f32.xlu0 %v3754_v14 }
0x1215   :  { %v12071_v46 = vsub.f32 %v11976_v18, %v3709_v25  ;;  %v3757_v57 = vsel %vm484_vm2, %v3739_v54, 0.0  ;;  %v3740_v35 = vmul.f32 %v12065_v23, %v12065_v23 }
0x1216   :  { %3758 = vadd.xlane.f32.xlu1 %v3757_v57  ;;  %v3672_v33 = vpop.xlane.xlu0 %3671 }
0x1217   :  { %v3710_v20 = vmul.f32 0.03125, %v3672_v33  ;;  %v3760_v41 = vsel %vm484_vm2, %v3740_v35, 0.0  ;;  %v3741_v52 = vmul.f32 %v12071_v46, %v12071_v46 }
0x1218   :  { %v3675_v55 = vpop.xlane.xlu1 %3674  ;;  %3761 = vadd.xlane.f32.xlu0 %v3760_v41 }
0x1219   :  { %v12080_v34 = vsub.f32 %v11987_v63, %v3710_v20  ;;  %v3711_v18 = vmul.f32 0.03125, %v3675_v55  ;;  %v3763_v11 = vsel %vm484_vm2, %v3741_v52, 0.0 }
0x121a   :  { %3764 = vadd.xlane.f32.xlu1 %v3763_v11  ;;  %v3678_v48 = vpop.xlane.xlu0 %3677 }
0x121b   :  { %v12084_v53 = vsub.f32 %v11995_v6, %v3711_v18  ;;  %v3712_v2 = vmul.f32 0.03125, %v3678_v48  ;;  %v3742_v56 = vmul.f32 %v12080_v34, %v12080_v34 }
0x121c   :  { %v3681_v8 = vpop.xlane.xlu1 %3680 }
0x121d   :  { %v12089_v59 = vsub.f32 %v11992_v49, %v3712_v2  ;;  %v3713_v30 = vmul.f32 0.03125, %v3681_v8  ;;  %v3766_v63 = vsel %vm484_vm2, %v3742_v56, 0.0  ;;  %v3743_v0 = vmul.f32 %v12084_v53, %v12084_v53 }
0x121e   :  { %3767 = vadd.xlane.f32.xlu0 %v3766_v63 }
0x121f   :  { %v12095_v24 = vsub.f32 %v12000_v4, %v3713_v30  ;;  %v3769_v6 = vsel %vm484_vm2, %v3743_v0, 0.0  ;;  %v3744_v22 = vmul.f32 %v12089_v59, %v12089_v59  ;;  %v9225_v4 = vld [vmem:[%s14521_s25 + $0x10] sm:$0xff]  }
0x1220   :  { %3770 = vadd.xlane.f32.xlu1 %v3769_v6  ;;  %8514 = vmatprep.subr.bf16.mxu0 %v9225_v4 }
0x1221   :  { %v3772_v43 = vsel %vm484_vm2, %v3744_v22, 0.0  ;;  %v3745_v49 = vmul.f32 %v12095_v24, %v12095_v24  ;;  %8515 = vmatpush3.bf16.msra.mxu0 %v9225_v4 }
0x1222   :  { %3773 = vadd.xlane.f32.xlu0 %v3772_v43  ;;  %8516 = vmatprep.subr.bf16.mxu0 %v9227_v50 }
0x1223   :  { %v3775_v12 = vsel %vm484_vm2, %v3745_v49, 0.0 }
0x1224   :  { %3776 = vadd.xlane.f32.xlu1 %v3775_v12 }
0x1225   :  { %8517 = vmatpush3.bf16.msra.mxu0 %v9227_v50 }
0x1246   :  { %v3684_v1 = vpop.xlane.xlu0 %3683 }
0x1247   :  { %v3714_v17 = vmul.f32 0.03125, %v3684_v1 }
0x1248   :  { %v3687_v39 = vpop.xlane.xlu1 %3686 }
0x1249   :  { %v12117_v13 = vsub.f32 %v12011_v5, %v3714_v17  ;;  %v3715_v29 = vmul.f32 0.03125, %v3687_v39 }
0x124a   :  { %v3690_v7 = vpop.xlane.xlu0 %3689 }
0x124b   :  { %v12120_v19 = vsub.f32 %v12019_v27, %v3715_v29  ;;  %v3716_v10 = vmul.f32 0.03125, %v3690_v7  ;;  %v3746_v51 = vmul.f32 %v12117_v13, %v12117_v13  ;;  %v12173_v7 = vld [vmem:[%s14386_s21] ss:$0 sm:$0xff] }
0x124c   :  { %v3693_v60 = vpop.xlane.xlu1 %3692 }
0x124d   :  { %v12125_v31 = vsub.f32 %v12016_v21, %v3716_v10  ;;  %v3717_v38 = vmul.f32 0.03125, %v3693_v60  ;;  %v3778_v16 = vsel %vm484_vm2, %v3746_v51, 0.0  ;;  %v3747_v5 = vmul.f32 %v12120_v19, %v12120_v19 }
0x124e   :  { %3779 = vadd.xlane.f32.xlu0 %v3778_v16 }
0x124f   :  { %v12131_v61 = vsub.f32 %v12024_v9, %v3717_v38  ;;  %v3781_v27 = vsel %vm484_vm2, %v3747_v5, 0.0  ;;  %v3748_v47 = vmul.f32 %v12125_v31, %v12125_v31 }
0x1250   :  { %3782 = vadd.xlane.f32.xlu1 %v3781_v27 }
0x1251   :  { %v3784_v3 = vsel %vm484_vm2, %v3748_v47, 0.0  ;;  %v3749_v21 = vmul.f32 %v12131_v61, %v12131_v61 }
0x1252   :  { %3785 = vadd.xlane.f32.xlu0 %v3784_v3  ;;  %v3696_v28 = vpop.xlane.xlu0 %3695 }
0x1253   :  { %v3718_v58 = vmul.f32 0.03125, %v3696_v28  ;;  %v3787_v15 = vsel %vm484_vm2, %v3749_v21, 0.0  ;;  %v12181_v28 = vld [vmem:[%s14387_s22] ss:$0 sm:$0xff] }
0x1254   :  { %3788 = vadd.xlane.f32.xlu1 %v3787_v15  ;;  %v3699_v42 = vpop.xlane.xlu1 %3698 }
0x1255   :  { %v12141_v9 = vsub.f32 %v12035_v62, %v3718_v58  ;;  %v3719_v25 = vmul.f32 0.03125, %v3699_v42 }
0x1256   :  { %v3702_v14 = vpop.xlane.xlu0 %3701 }
0x1257   :  { %v12144_v54 = vsub.f32 %v12043_v40, %v3719_v25  ;;  %v3720_v57 = vmul.f32 0.03125, %v3702_v14  ;;  %v3750_v35 = vmul.f32 %v12141_v9, %v12141_v9 }
0x1258   :  { %v3705_v33 = vpop.xlane.xlu1 %3704 }
0x1259   :  { %v12149_v20 = vsub.f32 %v12040_v37, %v3720_v57  ;;  %v3721_v41 = vmul.f32 0.03125, %v3705_v33  ;;  %v3790_v52 = vsel %vm484_vm2, %v3750_v35, 0.0  ;;  %v3751_v62 = vmul.f32 %v12144_v54, %v12144_v54 }
0x125a   :  { %3791 = vadd.xlane.f32.xlu0 %v3790_v52 }
0x125b   :  { %v12155_v55 = vsub.f32 %v12048_v45, %v3721_v41  ;;  %v3793_v40 = vsel %vm484_vm2, %v3751_v62, 0.0  ;;  %v3752_v18 = vmul.f32 %v12149_v20, %v12149_v20  ;;  %v12167_v45 = vld [vmem:[%s14522_s27 + $0x10] sm:$0xff]  }
0x125c   :  { %3794 = vadd.xlane.f32.xlu1 %v3793_v40  ;;  %8554 = vmatprep.subr.bf16.mxu0 %v12167_v45 }
0x125d   :  { %v3796_v11 = vsel %vm484_vm2, %v3752_v18, 0.0  ;;  %v3753_v37 = vmul.f32 %v12155_v55, %v12155_v55 }
0x125e   :  { %3797 = vadd.xlane.f32.xlu0 %v3796_v11 }
0x125f   :  { %v3799_v48 = vsel %vm484_vm2, %v3753_v37, 0.0  ;;  %v9230_v37 = vld [vmem:[%s14522_s27 + $0x18] sm:$0xff]  }
0x1260   :  { %3800 = vadd.xlane.f32.xlu1 %v3799_v48 }
0x12a1   :  { %v3756_v2 = vpop.xlane.xlu0 %3755 }
0x12a2   :  { %v3802_v56 = vmul.f32 0.03125, %v3756_v2 }
0x12a3   :  { %v3759_v8 = vpop.xlane.xlu1 %3758 }
0x12a4   :  { %v3818_v30 = vadd.f32 1e-05, %v3802_v56  ;;  %v3803_v63 = vmul.f32 0.03125, %v3759_v8 }
0x12a5   :  { %v3762_v0 = vpop.xlane.xlu0 %3761 }
0x12a6   :  { %9527 = vrsqrt.f32 %v3818_v30  ;;  %v3819_v6 = vadd.f32 1e-05, %v3803_v63  ;;  %v3804_v22 = vmul.f32 0.03125, %v3762_v0 }
0x12a7   :  { %v3765_v43 = vpop.xlane.xlu1 %3764 }
0x12a8   :  { %9529 = vrsqrt.f32 %v3819_v6  ;;  %v3820_v49 = vadd.f32 1e-05, %v3804_v22  ;;  %v3805_v12 = vmul.f32 0.03125, %v3765_v43 }
0x12aa   :  { %9531 = vrsqrt.f32 %v3820_v49  ;;  %v3821_v4 = vadd.f32 1e-05, %v3805_v12 }
0x12ab   :  { %v3768_v32 = vpop.xlane.xlu0 %3767 }
0x12ac   :  { %9533 = vrsqrt.f32 %v3821_v4  ;;  %v3806_v50 = vmul.f32 0.03125, %v3768_v32 }
0x12ad   :  { %v3771_v44 = vpop.xlane.xlu1 %3770 }
0x12ae   :  { %v3822_v1 = vadd.f32 1e-05, %v3806_v50  ;;  %v3807_v17 = vmul.f32 0.03125, %v3771_v44 }
0x12af   :  { %v3774_v39 = vpop.xlane.xlu0 %3773 }
0x12b0   :  { %v9528_v29 = vpop.eup %9527  ;;  %9535 = vrsqrt.f32 %v3822_v1  ;;  %v3823_v10 = vadd.f32 1e-05, %v3807_v17  ;;  %v3808_v51 = vmul.f32 0.03125, %v3774_v39 }
0x12b1   :  { %v3777_v60 = vpop.xlane.xlu1 %3776  ;;  %v3850_v38 = vmul.f32 %v9528_v29, %v12057_v26 }
0x12b2   :  { %v9530_v16 = vpop.eup %9529  ;;  %9537 = vrsqrt.f32 %v3823_v10  ;;  %v3824_v5 = vadd.f32 1e-05, %v3808_v51  ;;  %v3809_v27 = vmul.f32 0.03125, %v3777_v60 }
0x12b3   :  { %v3851_v47 = vmul.f32 %v9530_v16, %v12060_v36  ;;  %v3872_v3 = vmul.f32 %v12173_v7, %v3850_v38 }
0x12b4   :  { %v9532_v21 = vpop.eup %9531  ;;  %9539 = vrsqrt.f32 %v3824_v5  ;;  %v3825_v58 = vadd.f32 1e-05, %v3809_v27 }
0x12b5   :  { %v3852_v15 = vmul.f32 %v9532_v21, %v12065_v23  ;;  %v3873_v26 = vmul.f32 %v12173_v7, %v3851_v47  ;;  %v12188_v14 = vadd.f32 %v12181_v28, %v3872_v3 }
0x12b6   :  { %v9534_v42 = vpop.eup %9533  ;;  %9541 = vrsqrt.f32 %v3825_v58 }
0x12b7   :  { %v3874_v25 = vmul.f32 %v12173_v7, %v3852_v15  ;;  %v3853_v36 = vmul.f32 %v9534_v42, %v12071_v46  ;;  %14666 = vst [vmem:[#allocation22_spill] sm:$0xff] %v12188_v14  ;;  %v12191_v57 = vadd.f32 %v12181_v28, %v3873_v26 }
0x12b9   :  { %14667 = vst [vmem:[#allocation23_spill] sm:$0xff] %v12191_v57  ;;  %v3875_v35 = vmul.f32 %v12173_v7, %v3853_v36  ;;  %v12196_v33 = vpack.c.bf16 %v12191_v57, %v12188_v14  ;;  %v12199_v41 = vadd.f32 %v12181_v28, %v3874_v25 }
0x12ba   :  { %v9536_v23 = vpop.eup %9535 }
0x12bb   :  { %14668 = vst [vmem:[#allocation54_spill] sm:$0xff] %v12199_v41  ;;  %v12202_v52 = vadd.f32 %v12181_v28, %v3875_v35  ;;  %8518 = vmatprep.mubr.msk.bf16.mxu0 %vm484_vm2, %v12196_v33  ;;  %8538 = vmatprep.mubr.msk.bf16.mxu1 %vm484_vm2, %v12196_v33  ;;  %v3854_v46 = vmul.f32 %v9536_v23, %v12080_v34 }
0x12bc   :  { %v9538_v62 = vpop.eup %9537 }
0x12bd   :  { %14669 = vst [vmem:[#allocation55_spill] sm:$0xff] %v12202_v52  ;;  %v12211_v40 = vpack.c.bf16 %v12202_v52, %v12199_v41  ;;  %v3855_v18 = vmul.f32 %v9538_v62, %v12084_v53  ;;  %v3876_v11 = vmul.f32 %v12173_v7, %v3854_v46 }
0x12be   :  { %v9540_v48 = vpop.eup %9539 }
0x12bf   :  { %8519 = vmatmul.mubr.msk.bf16.vlgmr.msra.gmra.mrb[128].mxu0 %vm484_vm2, %v12211_v40  ;;  %8539 = vmatmul.mubr.msk.bf16.vlgmr.msra.gmra.mrb[128].mxu1 %vm484_vm2, %v12211_v40  ;;  %v3877_v34 = vmul.f32 %v12173_v7, %v3855_v18  ;;  %v3856_v2 = vmul.f32 %v9540_v48, %v12089_v59  ;;  %v12226_v53 = vadd.f32 %v12181_v28, %v3876_v11 }
0x12c0   :  { %v9542_v56 = vpop.eup %9541  ;;  %8555 = vmatpush3.bf16.msra.mxu0 %v12167_v45 }
0x12c1   :  { %14670 = vst [vmem:[#allocation24_spill] sm:$0xff] %v12226_v53  ;;  %v12229_v8 = vadd.f32 %v12181_v28, %v3877_v34  ;;  %v3857_v30 = vmul.f32 %v9542_v56, %v12095_v24  ;;  %v3878_v63 = vmul.f32 %v12173_v7, %v3856_v2  ;;  %8556 = vmatprep.subr.bf16.mxu0 %v9230_v37 }
0x12c3   :  { %14671 = vst [vmem:[#allocation25_spill] sm:$0xff] %v12229_v8  ;;  %v12235_v0 = vpack.c.bf16 %v12229_v8, %v12226_v53  ;;  %v3879_v59 = vmul.f32 %v12173_v7, %v3857_v30  ;;  %v12243_v45 = vadd.f32 %v12181_v28, %v3878_v63 }
0x12c4   :  { %8557 = vmatpush3.bf16.msra.mxu0 %v9230_v37 }
0x12c5   :  { %8522 = vmatprep.mubr.msk.bf16.mxu0 %vm484_vm2, %v12235_v0  ;;  %8542 = vmatprep.mubr.msk.bf16.mxu1 %vm484_vm2, %v12235_v0  ;;  %14672 = vst [vmem:[#allocation27_spill] sm:$0xff] %v12243_v45  ;;  %v12246_v24 = vadd.f32 %v12181_v28, %v3879_v59 }
0x12c7   :  { %14673 = vst [vmem:[#allocation26_spill] sm:$0xff] %v12246_v24  ;;  %v12250_v6 = vpack.c.bf16 %v12246_v24, %v12243_v45 }
0x12c9   :  { %8523 = vmatmul.mubr.msk.bf16.gmra.mrb[132].mxu0 %vm484_vm2, %v12250_v6  ;;  %8543 = vmatmul.mubr.msk.bf16.gmra.mrb[132].mxu1 %vm484_vm2, %v12250_v6 }
0x12db   :  { %v3780_v22 = vpop.xlane.xlu0 %3779 }
0x12dc   :  { %v3810_v43 = vmul.f32 0.03125, %v3780_v22 }
0x12dd   :  { %v3783_v49 = vpop.xlane.xlu1 %3782 }
0x12de   :  { %v3826_v12 = vadd.f32 1e-05, %v3810_v43  ;;  %v3811_v4 = vmul.f32 0.03125, %v3783_v49 }
0x12df   :  { %v3786_v32 = vpop.xlane.xlu0 %3785 }
0x12e0   :  { %9543 = vrsqrt.f32 %v3826_v12  ;;  %v3827_v50 = vadd.f32 1e-05, %v3811_v4  ;;  %v3812_v44 = vmul.f32 0.03125, %v3786_v32 }
0x12e1   :  { %v3789_v1 = vpop.xlane.xlu1 %3788 }
0x12e2   :  { %9545 = vrsqrt.f32 %v3827_v50  ;;  %v3828_v17 = vadd.f32 1e-05, %v3812_v44  ;;  %v3813_v39 = vmul.f32 0.03125, %v3789_v1 }
0x12e4   :  { %9547 = vrsqrt.f32 %v3828_v17  ;;  %v3829_v29 = vadd.f32 1e-05, %v3813_v39 }
0x12e6   :  { %9549 = vrsqrt.f32 %v3829_v29 }
0x12e7   :  { %v3792_v10 = vpop.xlane.xlu0 %3791 }
0x12e8   :  { %v3814_v51 = vmul.f32 0.03125, %v3792_v10 }
0x12e9   :  { %v3795_v60 = vpop.xlane.xlu1 %3794 }
0x12ea   :  { %v9544_v38 = vpop.eup %9543  ;;  %v3830_v16 = vadd.f32 1e-05, %v3814_v51  ;;  %v3815_v5 = vmul.f32 0.03125, %v3795_v60 }
0x12eb   :  { %v3798_v27 = vpop.xlane.xlu0 %3797  ;;  %v3858_v47 = vmul.f32 %v9544_v38, %v12117_v13 }
0x12ec   :  { %v9546_v3 = vpop.eup %9545  ;;  %9551 = vrsqrt.f32 %v3830_v16  ;;  %v3831_v21 = vadd.f32 1e-05, %v3815_v5  ;;  %v3816_v58 = vmul.f32 0.03125, %v3798_v27 }
0x12ed   :  { %v3801_v15 = vpop.xlane.xlu1 %3800  ;;  %v3859_v26 = vmul.f32 %v9546_v3, %v12120_v19  ;;  %v3880_v42 = vmul.f32 %v12173_v7, %v3858_v47 }
0x12ee   :  { %v9548_v25 = vpop.eup %9547  ;;  %9553 = vrsqrt.f32 %v3831_v21  ;;  %v3832_v36 = vadd.f32 1e-05, %v3816_v58  ;;  %v3817_v35 = vmul.f32 0.03125, %v3801_v15 }
0x12ef   :  { %v3881_v23 = vmul.f32 %v12173_v7, %v3859_v26  ;;  %v3860_v46 = vmul.f32 %v9548_v25, %v12125_v31  ;;  %v12262_v18 = vadd.f32 %v12181_v28, %v3880_v42 }
0x12f0   :  { %v9550_v62 = vpop.eup %9549  ;;  %9555 = vrsqrt.f32 %v3832_v36  ;;  %v3833_v13 = vadd.f32 1e-05, %v3817_v35 }
0x12f1   :  { %14674 = vst [vmem:[#allocation30_spill] sm:$0xff] %v12262_v18  ;;  %v12265_v11 = vadd.f32 %v12181_v28, %v3881_v23  ;;  %v3861_v19 = vmul.f32 %v9550_v62, %v12131_v61  ;;  %v3882_v37 = vmul.f32 %v12173_v7, %v3860_v46 }
0x12f2   :  { %9557 = vrsqrt.f32 %v3833_v13 }
0x12f3   :  { %14675 = vst [vmem:[#allocation28_spill] sm:$0xff] %v12265_v11  ;;  %v3930_v48 = vpack.c.bf16 %v12265_v11, %v12262_v18  ;;  %v3883_v34 = vmul.f32 %v12173_v7, %v3861_v19  ;;  %v12275_v31 = vadd.f32 %v12181_v28, %v3882_v37  ;;  %v12608_v11 = vld [vmem:[%s14388_s2 + $0x60] sm:$0xff] }
0x12f4   :  { %14696 = vst [vmem:[#allocation45_spill] sm:$0xff] %v12608_v11 }
0x12f5   :  { %8526 = vmatprep.mubr.msk.bf16.mxu0 %vm484_vm2, %v3930_v48  ;;  %8546 = vmatprep.mubr.msk.bf16.mxu1 %vm484_vm2, %v3930_v48  ;;  %14676 = vst [vmem:[#allocation32_spill] sm:$0xff] %v12275_v31  ;;  %v12278_v2 = vadd.f32 %v12181_v28, %v3883_v34 }
0x12f6   :  { %v9552_v56 = vpop.eup %9551 }
0x12f7   :  { %14677 = vst [vmem:[#allocation29_spill] sm:$0xff] %v12278_v2  ;;  %v3931_v61 = vpack.c.bf16 %v12278_v2, %v12275_v31  ;;  %v3862_v30 = vmul.f32 %v9552_v56, %v12141_v9 }
0x12f8   :  { %v9554_v63 = vpop.eup %9553 }
0x12f9   :  { %8527 = vmatmul.mubr.msk.bf16.gmra.mrb[136].mxu0 %vm484_vm2, %v3931_v61  ;;  %8547 = vmatmul.mubr.msk.bf16.gmra.mrb[136].mxu1 %vm484_vm2, %v3931_v61  ;;  %v3863_v59 = vmul.f32 %v9554_v63, %v12144_v54  ;;  %v3884_v22 = vmul.f32 %v12173_v7, %v3862_v30 }
0x12fa   :  { %v9556_v43 = vpop.eup %9555 }
0x12fb   :  { %v3885_v49 = vmul.f32 %v12173_v7, %v3863_v59  ;;  %v3864_v12 = vmul.f32 %v9556_v43, %v12149_v20  ;;  %v12290_v32 = vadd.f32 %v12181_v28, %v3884_v22 }
0x12fc   :  { %v9558_v4 = vpop.eup %9557 }
0x12fd   :  { %14678 = vst [vmem:[#allocation18_spill] sm:$0xff] %v12290_v32  ;;  %v12293_v9 = vadd.f32 %v12181_v28, %v3885_v49  ;;  %v3865_v50 = vmul.f32 %v9558_v4, %v12155_v55  ;;  %v3886_v44 = vmul.f32 %v12173_v7, %v3864_v12 }
0x12ff   :  { %14679 = vst [vmem:[#allocation31_spill] sm:$0xff] %v12293_v9  ;;  %v3932_v54 = vpack.c.bf16 %v12293_v9, %v12290_v32  ;;  %v3887_v1 = vmul.f32 %v12173_v7, %v3865_v50  ;;  %v12303_v20 = vadd.f32 %v12181_v28, %v3886_v44  ;;  %v12595_v32 = vld [vmem:[%s14388_s2 + $0x70] sm:$0xff] }
0x1300   :  { %14695 = vst [vmem:[#allocation40_spill] sm:$0xff] %v12595_v32 }
0x1301   :  { %8530 = vmatprep.mubr.msk.bf16.mxu0 %vm484_vm2, %v3932_v54  ;;  %8550 = vmatprep.mubr.msk.bf16.mxu1 %vm484_vm2, %v3932_v54  ;;  %14680 = vst [vmem:[#allocation34_spill] sm:$0xff] %v12303_v20  ;;  %v12306_v17 = vadd.f32 %v12181_v28, %v3887_v1  ;;  %v12327_v28 = vld [vmem:[%s14374_s10 + $0x1] ss:$0 sm:$0xff] }
0x1303   :  { %14681 = vst [vmem:[#allocation19_spill] sm:$0xff] %v12306_v17  ;;  %v3933_v55 = vpack.c.bf16 %v12306_v17, %v12303_v20 }
0x1305   :  { %8531 = vmatmul.mubr.msk.bf16.gmra.mrb[140].mxu0 %vm484_vm2, %v3933_v55  ;;  %8551 = vmatmul.mubr.msk.bf16.gmra.mrb[140].mxu1 %vm484_vm2, %v3933_v55 }
0x1306   :  { %8558 = vmatprep.mubr.msk.bf16.mxu0 %vm484_vm2, %v12196_v33 }
0x130d   :  { %8559 = vmatmul.mubr.msk.bf16.vlgmr.msra.gmra.mrb[144].mxu0 %vm484_vm2, %v12211_v40  ;;  %v12332_v40 = vld [vmem:[%s14375_s11 + $0x1] ss:$0 sm:$0xff] }
0x130e   :  { %8562 = vmatprep.mubr.msk.bf16.mxu0 %vm484_vm2, %v12235_v0 }
0x1315   :  { %8563 = vmatmul.mubr.msk.bf16.gmra.mrb[148].mxu0 %vm484_vm2, %v12250_v6 }
0x1316   :  { %8566 = vmatprep.mubr.msk.bf16.mxu0 %vm484_vm2, %v3930_v48 }
0x131d   :  { %8567 = vmatmul.mubr.msk.bf16.gmra.mrb[152].mxu0 %vm484_vm2, %v3931_v61 }
0x131e   :  { %8570 = vmatprep.mubr.msk.bf16.mxu0 %vm484_vm2, %v3932_v54 }
0x1325   :  { %8571 = vmatmul.mubr.msk.bf16.gmra.mrb[156].mxu0 %vm484_vm2, %v3933_v55 }
0x1392   :  { %v8520_v7 = vpop.f32.mrb[128].mxu0  ;;  %v8540_v33 = vpop.f32.mrb[128].mxu1 }
0x1393   :  { %v4017_v0 = vpop.f32.mrb[129].mxu0  ;;  %v4139_v6 = vpop.f32.mrb[129].mxu1  ;;  %v4026_v10 = vadd.f32 %v8520_v7, %v12327_v28  ;;  %v4148_v51 = vadd.f32 %v8540_v33, %v12332_v40 }
0x1394   :  { %v8521_v39 = vpop.f32.mrb[130].mxu0  ;;  %v8541_v29 = vpop.f32.mrb[130].mxu1  ;;  %v4018_v27 = vadd.f32 %v12327_v28, %v4017_v0  ;;  %v4140_v47 = vadd.f32 %v12332_v40, %v4139_v6 }
0x1395   :  { %v4029_v60 = vadd.f32 %v8521_v39, %v12327_v28  ;;  %v4151_v38 = vadd.f32 %v8541_v29, %v12332_v40  ;;  %v4020_v16 = vpop.f32.mrb[131].mxu0  ;;  %v4142_v5 = vpop.f32.mrb[131].mxu1 }
0x1396   :  { %v4021_v3 = vadd.f32 %v12327_v28, %v4020_v16  ;;  %v4143_v21 = vadd.f32 %v12332_v40, %v4142_v5 }
0x1397   :  { %v12342_v58 = vpack.c.bf16 %v4029_v60, %v4026_v10  ;;  %v12344_v15 = vpack.c.bf16 %v4151_v38, %v4148_v51 }
0x1398   :  { %v12346_v26 = vpack.c.bf16 %v4021_v3, %v4018_v27  ;;  %v12348_v42 = vpack.c.bf16 %v4143_v21, %v4140_v47 }
0x1399   :  { %4776 = vrot.lane.b32.xlu1 %v12344_v15, %s9911_s0  ;;  %v4376_v50 = vsel %vm870_vm3, %v12344_v15, 0 }
0x139a   :  { %4774 = vrot.lane.b32.xlu0 %v12348_v42, %s9911_s0  ;;  %8926 = vmatprep.subr.msk.bf16.mxu1 %vm870_vm3, %v12348_v42  ;;  %v4373_v25 = vsel %vm870_vm3, %v12348_v42, 0 }
0x139b   :  { %8590 = vmatprep.mubr.msk.bf16.mxu1 %vm870_vm3, %v12346_v26  ;;  %8575 = vmatpush3.bf16.xpose.msra.mxu1 %v4373_v25 }
0x139c   :  { %v8524_v36 = vpop.f32.mrb[132].mxu0  ;;  %v8544_v35 = vpop.f32.mrb[132].mxu1  ;;  %8927 = vmatprep.subr.msk.bf16.mxu1 %vm870_vm3, %v12344_v15 }
0x139d   :  { %v4033_v23 = vpop.f32.mrb[133].mxu0  ;;  %v4155_v46 = vpop.f32.mrb[133].mxu1  ;;  %v4042_v19 = vadd.f32 %v8524_v36, %v12327_v28  ;;  %v4164_v37 = vadd.f32 %v8544_v35, %v12332_v40 }
0x139e   :  { %v8525_v62 = vpop.f32.mrb[134].mxu0  ;;  %v8545_v13 = vpop.f32.mrb[134].mxu1  ;;  %v4034_v30 = vadd.f32 %v12327_v28, %v4033_v23  ;;  %v4156_v63 = vadd.f32 %v12332_v40, %v4155_v46 }
0x139f   :  { %v4045_v48 = vadd.f32 %v8525_v62, %v12327_v28  ;;  %v4167_v34 = vadd.f32 %v8545_v13, %v12332_v40  ;;  %v4036_v56 = vpop.f32.mrb[135].mxu0  ;;  %v4158_v61 = vpop.f32.mrb[135].mxu1 }
0x13a0   :  { %v4037_v59 = vadd.f32 %v12327_v28, %v4036_v56  ;;  %v4159_v22 = vadd.f32 %v12332_v40, %v4158_v61 }
0x13a1   :  { %v12370_v43 = vpack.c.bf16 %v4045_v48, %v4042_v19  ;;  %v12372_v49 = vpack.c.bf16 %v4167_v34, %v4164_v37 }
0x13a2   :  { %v12374_v12 = vpack.c.bf16 %v4037_v59, %v4034_v30  ;;  %v12376_v4 = vpack.c.bf16 %v4159_v22, %v4156_v63 }
0x13a3   :  { %14682 = vst [vmem:[#allocation21_spill] sm:$0xff] %v12372_v49  ;;  %8577 = vmatpush3.bf16.xpose.msra.mxu1 %v4376_v50  ;;  %v4382_v54 = vsel %vm870_vm3, %v12372_v49, 0 }
0x13a4   :  { %14683 = vst [vmem:[#allocation33_spill] sm:$0xff] %v12376_v4  ;;  %8928 = vmatprep.subr.msk.bf16.mxu1 %vm870_vm3, %v12376_v4  ;;  %v4379_v44 = vsel %vm870_vm3, %v12376_v4, 0 }
0x13ab   :  { %8579 = vmatpush3.bf16.xpose.msra.mxu1 %v4379_v44 }
0x13ac   :  { %8929 = vmatprep.subr.msk.bf16.mxu1 %vm870_vm3, %v12372_v49 }
0x13b3   :  { %8581 = vmatpush3.bf16.xpose.msra.mxu1 %v4382_v54 }
0x13cc   :  { %v8528_v1 = vpop.f32.mrb[136].mxu0  ;;  %v8548_v55 = vpop.f32.mrb[136].mxu1 }
0x13cd   :  { %v4049_v7 = vpop.f32.mrb[137].mxu0  ;;  %v4171_v33 = vpop.f32.mrb[137].mxu1  ;;  %v4058_v39 = vadd.f32 %v8528_v1, %v12327_v28  ;;  %v4180_v29 = vadd.f32 %v8548_v55, %v12332_v40 }
0x13ce   :  { %v8529_v0 = vpop.f32.mrb[138].mxu0  ;;  %v8549_v6 = vpop.f32.mrb[138].mxu1  ;;  %v4050_v16 = vadd.f32 %v12327_v28, %v4049_v7  ;;  %v4172_v5 = vadd.f32 %v12332_v40, %v4171_v33 }
0x13cf   :  { %v4061_v10 = vadd.f32 %v8529_v0, %v12327_v28  ;;  %v4183_v51 = vadd.f32 %v8549_v6, %v12332_v40  ;;  %v4052_v60 = vpop.f32.mrb[139].mxu0  ;;  %v4174_v38 = vpop.f32.mrb[139].mxu1  ;;  %v7580_v6 = vld [vmem:[%s14376_s12 + $0x1] ss:$0 sm:$0xff] }
0x13d0   :  { %v4053_v27 = vadd.f32 %v12327_v28, %v4052_v60  ;;  %v4175_v47 = vadd.f32 %v12332_v40, %v4174_v38 }
0x13d1   :  { %v12396_v3 = vpack.c.bf16 %v4061_v10, %v4058_v39  ;;  %v12398_v21 = vpack.c.bf16 %v4183_v51, %v4180_v29 }
0x13d2   :  { %v12400_v25 = vpack.c.bf16 %v4053_v27, %v4050_v16  ;;  %v12402_v36 = vpack.c.bf16 %v4175_v47, %v4172_v5 }
0x13d3   :  { %14684 = vst [vmem:[#allocation52_spill] sm:$0xff] %v12398_v21  ;;  %v4388_v48 = vsel %vm870_vm3, %v12398_v21, 0 }
0x13d4   :  { %14685 = vst [vmem:[#allocation20_spill] sm:$0xff] %v12402_v36  ;;  %8930 = vmatprep.subr.msk.bf16.mxu1 %vm870_vm3, %v12402_v36  ;;  %v4385_v35 = vsel %vm870_vm3, %v12402_v36, 0 }
0x13d5   :  { %8583 = vmatpush3.bf16.xpose.msra.mxu1 %v4385_v35 }
0x13d6   :  { %8931 = vmatprep.subr.msk.bf16.mxu1 %vm870_vm3, %v12398_v21 }
0x13d8   :  { %v8532_v23 = vpop.f32.mrb[140].mxu0  ;;  %v8552_v46 = vpop.f32.mrb[140].mxu1 }
0x13d9   :  { %v4065_v62 = vpop.f32.mrb[141].mxu0  ;;  %v4187_v13 = vpop.f32.mrb[141].mxu1  ;;  %v4074_v34 = vadd.f32 %v8532_v23, %v12327_v28  ;;  %v4196_v56 = vadd.f32 %v8552_v46, %v12332_v40 }
0x13da   :  { %v8533_v19 = vpop.f32.mrb[142].mxu0  ;;  %v8553_v37 = vpop.f32.mrb[142].mxu1  ;;  %v4066_v22 = vadd.f32 %v12327_v28, %v4065_v62  ;;  %v4188_v50 = vadd.f32 %v12332_v40, %v4187_v13 }
0x13db   :  { %v4077_v61 = vadd.f32 %v8533_v19, %v12327_v28  ;;  %v4199_v30 = vadd.f32 %v8553_v37, %v12332_v40  ;;  %v4068_v63 = vpop.f32.mrb[143].mxu0  ;;  %v4190_v59 = vpop.f32.mrb[143].mxu1 }
0x13dc   :  { %v4069_v44 = vadd.f32 %v12327_v28, %v4068_v63  ;;  %v4191_v54 = vadd.f32 %v12332_v40, %v4190_v59 }
0x13dd   :  { %v12420_v1 = vpack.c.bf16 %v4077_v61, %v4074_v34  ;;  %v12422_v55 = vpack.c.bf16 %v4199_v30, %v4196_v56  ;;  %8585 = vmatpush3.bf16.xpose.msra.mxu1 %v4388_v48 }
0x13de   :  { %v12424_v7 = vpack.c.bf16 %v4069_v44, %v4066_v22  ;;  %v12426_v33 = vpack.c.bf16 %v4191_v54, %v4188_v50 }
0x13df   :  { %v4394_v37 = vsel %vm870_vm3, %v12422_v55, 0 }
0x13e0   :  { %v8560_v0 = vpop.f32.mrb[144].mxu0  ;;  %8932 = vmatprep.subr.msk.bf16.mxu1 %vm870_vm3, %v12426_v33  ;;  %v4391_v38 = vsel %vm870_vm3, %v12426_v33, 0 }
0x13e1   :  { %v4261_v28 = vpop.f32.mrb[145].mxu0  ;;  %v4270_v40 = vadd.f32 %v8560_v0, %v7580_v6 }
0x13e2   :  { %v8561_v39 = vpop.f32.mrb[146].mxu0  ;;  %v4262_v51 = vadd.f32 %v7580_v6, %v4261_v28 }
0x13e3   :  { %v4273_v29 = vadd.f32 %v8561_v39, %v7580_v6  ;;  %v4264_v10 = vpop.f32.mrb[147].mxu0 }
0x13e4   :  { %v4265_v60 = vadd.f32 %v7580_v6, %v4264_v10 }
0x13e5   :  { %v12435_v16 = vpack.c.bf16 %v4273_v29, %v4270_v40  ;;  %8587 = vmatpush3.bf16.xpose.msra.mxu1 %v4391_v38 }
0x13e6   :  { %v12437_v5 = vpack.c.bf16 %v4265_v60, %v4262_v51  ;;  %8933 = vmatprep.subr.msk.bf16.mxu1 %vm870_vm3, %v12422_v55 }
0x13e8   :  { %v8564_v27 = vpop.f32.mrb[148].mxu0  ;;  %8606 = vmatprep.subr.bf16.mxu0 %v12437_v5 }
0x13e9   :  { %v4277_v47 = vpop.f32.mrb[149].mxu0  ;;  %8607 = vmatpush3.bf16.msra.mxu0 %v12437_v5  ;;  %v4286_v23 = vadd.f32 %v8564_v27, %v7580_v6 }
0x13ea   :  { %v8565_v35 = vpop.f32.mrb[150].mxu0  ;;  %8608 = vmatprep.subr.bf16.mxu0 %v12435_v16  ;;  %v4278_v13 = vadd.f32 %v7580_v6, %v4277_v47 }
0x13eb   :  { %v4289_v46 = vadd.f32 %v8565_v35, %v7580_v6  ;;  %v4280_v62 = vpop.f32.mrb[151].mxu0  ;;  %v12492_v35 = vld [vmem:[%s14388_s2 + $0x10] sm:$0xff] }
0x13ec   :  { %v4281_v19 = vadd.f32 %v7580_v6, %v4280_v62 }
0x13ed   :  { %v12446_v48 = vpack.c.bf16 %v4289_v46, %v4286_v23  ;;  %8589 = vmatpush3.bf16.xpose.msra.mxu1 %v4394_v37  ;;  %8609 = vmatpush3.bf16.msra.mxu0 %v12435_v16  ;;  %v12497_v46 = vld [vmem:[%s14388_s2 + $0x18] sm:$0xff] }
0x13ee   :  { %v12449_v34 = vpack.c.bf16 %v4281_v19, %v4278_v13  ;;  %v12505_v19 = vld [vmem:[%s14388_s2] sm:$0xff] }
0x13ef   :  { %14686 = vst [vmem:[#allocation53_spill] sm:$0xff] %v12446_v48 }
0x13f0   :  { %v8568_v56 = vpop.f32.mrb[152].mxu0  ;;  %8610 = vmatprep.subr.bf16.mxu0 %v12449_v34 }
0x13f1   :  { %v4293_v61 = vpop.f32.mrb[153].mxu0  ;;  %8611 = vmatpush3.bf16.msra.mxu0 %v12449_v34  ;;  %v4302_v63 = vadd.f32 %v8568_v56, %v7580_v6 }
0x13f2   :  { %v8569_v30 = vpop.f32.mrb[154].mxu0  ;;  %8612 = vmatprep.subr.bf16.mxu0 %v12446_v48  ;;  %v4294_v50 = vadd.f32 %v7580_v6, %v4293_v61 }
0x13f3   :  { %v4305_v59 = vadd.f32 %v8569_v30, %v7580_v6  ;;  %v4296_v22 = vpop.f32.mrb[155].mxu0  ;;  %v12514_v30 = vld [vmem:[%s14388_s2 + $0x8] sm:$0xff] }
0x13f4   :  { %v4297_v44 = vadd.f32 %v7580_v6, %v4296_v22  ;;  %8591 = vmatmul.mubr.msk.bf16.vlgmr.msra.gmra.mrb[144].mxu1 %vm870_vm3, %v12342_v58 }
0x13f5   :  { %v12456_v54 = vpack.c.bf16 %v4305_v59, %v4302_v63  ;;  %8594 = vmatprep.mubr.msk.bf16.mxu1 %vm870_vm3, %v12374_v12  ;;  %8613 = vmatpush3.bf16.msra.mxu0 %v12446_v48  ;;  %v12523_v59 = vld [vmem:[%s14388_s2 + $0x30] sm:$0xff] }
0x13f6   :  { %v12461_v0 = vpack.c.bf16 %v4297_v44, %v4294_v50  ;;  %v12532_v44 = vld [vmem:[%s14388_s2 + $0x38] sm:$0xff] }
0x13f7   :  { %14687 = vst [vmem:[#allocation51_spill] sm:$0xff] %v12456_v54 }
0x13f8   :  { %v8572_v28 = vpop.f32.mrb[156].mxu0  ;;  %8614 = vmatprep.subr.bf16.mxu0 %v12461_v0 }
0x13f9   :  { %v4309_v39 = vpop.f32.mrb[157].mxu0  ;;  %8615 = vmatpush3.bf16.msra.mxu0 %v12461_v0  ;;  %v4318_v29 = vadd.f32 %v8572_v28, %v7580_v6 }
0x13fa   :  { %v8573_v40 = vpop.f32.mrb[158].mxu0  ;;  %8616 = vmatprep.subr.bf16.mxu0 %v12456_v54  ;;  %v4310_v60 = vadd.f32 %v7580_v6, %v4309_v39 }
0x13fb   :  { %v4321_v10 = vadd.f32 %v8573_v40, %v7580_v6  ;;  %v4312_v51 = vpop.f32.mrb[159].mxu0  ;;  %v12541_v40 = vld [vmem:[%s14388_s2 + $0x20] sm:$0xff] }
0x13fc   :  { %v4313_v38 = vadd.f32 %v7580_v6, %v4312_v51  ;;  %8595 = vmatmul.mubr.msk.bf16.gmra.mrb[148].mxu1 %vm870_vm3, %v12370_v43  ;;  %14690 = vst [vmem:[#allocation37_spill] sm:$0xff] %v12541_v40 }
0x13fd   :  { %v12468_v27 = vpack.c.bf16 %v4321_v10, %v4318_v29  ;;  %8598 = vmatprep.mubr.msk.bf16.mxu1 %vm870_vm3, %v12400_v25  ;;  %8617 = vmatpush3.bf16.msra.mxu0 %v12456_v54 }
0x13fe   :  { %v12473_v47 = vpack.c.bf16 %v4313_v38, %v4310_v60  ;;  %v12550_v60 = vld [vmem:[%s14388_s2 + $0x28] sm:$0xff] }
0x13ff   :  { %14688 = vst [vmem:[#allocation38_spill] sm:$0xff] %v12468_v27 }
0x1400   :  { %14689 = vst [vmem:[#allocation36_spill] sm:$0xff] %v12473_v47  ;;  %8618 = vmatprep.subr.bf16.mxu0 %v12473_v47 }
0x1401   :  { %8619 = vmatpush3.bf16.msra.mxu0 %v12473_v47 }
0x1402   :  { %8620 = vmatprep.subr.bf16.mxu0 %v12468_v27 }
0x1404   :  { %8599 = vmatmul.mubr.msk.bf16.gmra.mrb[152].mxu1 %vm870_vm3, %v12396_v3 }
0x1405   :  { %8602 = vmatprep.mubr.msk.bf16.mxu1 %vm870_vm3, %v12424_v7  ;;  %8621 = vmatpush3.bf16.msra.mxu0 %v12468_v27 }
0x140b   :  { %v12637_v53 = vpop.permute.xlu1 %4776 }
0x140c   :  { %8603 = vmatmul.mubr.msk.bf16.gmra.mrb[156].mxu1 %vm870_vm3, %v12420_v1  ;;  %v12485_v6 = vpop.permute.xlu0 %4774 }
0x140d   :  { %8934 = vmatprep.subr.msk.bf16.mxu0 %vm870_vm3, %v12485_v6 }
0x14c7   :  { %v8592_v23 = vpop.f32.mrb[144].mxu1 }
0x14c8   :  { %v12500_v62 = vadd.f32 %v8592_v23, %v12492_v35  ;;  %v4430_v13 = vpop.f32.mrb[145].mxu1  ;;  %v12559_v23 = vld [vmem:[%s14388_s2 + $0x50] sm:$0xff] }
0x14c9   :  { %v8593_v37 = vpop.f32.mrb[146].mxu1  ;;  %v12517_v63 = vadd.f32 %v4430_v13, %v12505_v19  ;;  %14691 = vst [vmem:[#allocation35_spill] sm:$0xff] %v12559_v23 }
0x14ca   :  { %v12508_v56 = vadd.f32 %v8593_v37, %v12497_v46  ;;  %4497 = vmax.xlane.f32.xlu0 %v12500_v62  ;;  %v4433_v61 = vpop.f32.mrb[147].mxu1 }
0x14cb   :  { %v12526_v22 = vadd.f32 %v4433_v61, %v12514_v30  ;;  %v12568_v61 = vld [vmem:[%s14388_s2 + $0x58] sm:$0xff] }
0x14cc   :  { %4499 = vmax.xlane.f32.xlu1 %v12508_v56  ;;  %14692 = vst [vmem:[#allocation41_spill] sm:$0xff] %v12568_v61 }
0x14ce   :  { %4493 = vmax.xlane.f32.xlu0 %v12517_v63 }
0x14cf   :  { %v8596_v50 = vpop.f32.mrb[148].mxu1 }
0x14d0   :  { %v12535_v28 = vadd.f32 %v8596_v50, %v12523_v59  ;;  %v4446_v39 = vpop.f32.mrb[149].mxu1  ;;  %4495 = vmax.xlane.f32.xlu1 %v12526_v22 }
0x14d1   :  { %v8597_v29 = vpop.f32.mrb[150].mxu1  ;;  %v12553_v38 = vadd.f32 %v4446_v39, %v12541_v40 }
0x14d2   :  { %v12544_v10 = vadd.f32 %v8597_v29, %v12532_v44  ;;  %v4449_v51 = vpop.f32.mrb[151].mxu1  ;;  %4505 = vmax.xlane.f32.xlu0 %v12535_v28  ;;  %v12577_v29 = vld [vmem:[%s14388_s2 + $0x40] sm:$0xff] }
0x14d3   :  { %v12562_v13 = vadd.f32 %v4449_v51, %v12550_v60  ;;  %14693 = vst [vmem:[#allocation39_spill] sm:$0xff] %v12577_v29 }
0x14d4   :  { %4507 = vmax.xlane.f32.xlu1 %v12544_v10 }
0x14d6   :  { %4501 = vmax.xlane.f32.xlu0 %v12553_v38 }
0x14d7   :  { %v8600_v37 = vpop.f32.mrb[152].mxu1 }
0x14d8   :  { %v12571_v50 = vadd.f32 %v8600_v37, %v12559_v23  ;;  %v4462_v39 = vpop.f32.mrb[153].mxu1  ;;  %4503 = vmax.xlane.f32.xlu1 %v12562_v13  ;;  %v12586_v37 = vld [vmem:[%s14388_s2 + $0x48] sm:$0xff] }
0x14d9   :  { %v8601_v51 = vpop.f32.mrb[154].mxu1  ;;  %14694 = vst [vmem:[#allocation42_spill] sm:$0xff] %v12586_v37  ;;  %v12589_v20 = vadd.f32 %v4462_v39, %v12577_v29 }
0x14da   :  { %v12580_v17 = vadd.f32 %v8601_v51, %v12568_v61  ;;  %v4465_v9 = vpop.f32.mrb[155].mxu1  ;;  %4513 = vmax.xlane.f32.xlu0 %v12571_v50 }
0x14db   :  { %v12598_v51 = vadd.f32 %v4465_v9, %v12586_v37 }
0x14dc   :  { %4515 = vmax.xlane.f32.xlu1 %v12580_v17 }
0x14de   :  { %4509 = vmax.xlane.f32.xlu0 %v12589_v20 }
0x14df   :  { %v8604_v31 = vpop.f32.mrb[156].mxu1 }
0x14e0   :  { %v12602_v2 = vadd.f32 %v8604_v31, %v12595_v32  ;;  %4511 = vmax.xlane.f32.xlu1 %v12598_v51  ;;  %v4478_v39 = vpop.f32.mrb[157].mxu1  ;;  %v12622_v31 = vld [vmem:[%s14388_s2 + $0x78] sm:$0xff] }
0x14e1   :  { %v8605_v18 = vpop.f32.mrb[158].mxu1  ;;  %v12612_v9 = vadd.f32 %v4478_v39, %v12608_v11  ;;  %14697 = vst [vmem:[#allocation43_spill] sm:$0xff] %v12622_v31  ;;  %v12630_v39 = vld [vmem:[%s14388_s2 + $0x68] sm:$0xff] }
0x14e2   :  { %4521 = vmax.xlane.f32.xlu0 %v12602_v2  ;;  %v4481_v45 = vpop.f32.mrb[159].mxu1  ;;  %v12625_v24 = vadd.f32 %v8605_v18, %v12622_v31  ;;  %14698 = vst [vmem:[#allocation46_spill] sm:$0xff] %v12630_v39 }
0x14e3   :  { %v12634_v8 = vadd.f32 %v4481_v45, %v12630_v39 }
0x14e6   :  { %4517 = vmax.xlane.f32.xlu0 %v12612_v9 }
0x14f1   :  { %4780 = vrot.lane.b32.xlu1 %v12372_v49, %s9911_s0 }
0x14fc   :  { %4778 = vrot.lane.b32.xlu0 %v12376_v4, %s9911_s0 }
0x1515   :  { %4523 = vmax.xlane.f32.xlu1 %v12625_v24 }
0x1519   :  { %4519 = vmax.xlane.f32.xlu1 %v12634_v8 }
0x1557   :  { %v4498_v52 = vpop.xlane.xlu0 %4497 }
0x1558   :  { %v4527_v57 = vsub.f32 %v12500_v62, %v4498_v52 }
0x1559   :  { %v4500_v41 = vpop.xlane.xlu1 %4499 }
0x155a   :  { %v4545_v18 = vmul.f32 1.442695, %v4527_v57  ;;  %v4528_v14 = vsub.f32 %v12508_v56, %v4500_v41 }
0x155b   :  { %v4494_v31 = vpop.xlane.xlu0 %4493 }
0x155c   :  { %9559 = vpow2.f32 %v4545_v18  ;;  %v4547_v4 = vmul.f32 1.442695, %v4528_v14  ;;  %v4525_v49 = vsub.f32 %v12517_v63, %v4494_v31 }
0x155d   :  { %v4496_v11 = vpop.xlane.xlu1 %4495 }
0x155e   :  { %9561 = vpow2.f32 %v4547_v4  ;;  %v4541_v45 = vmul.f32 1.442695, %v4525_v49  ;;  %v4526_v39 = vsub.f32 %v12526_v22, %v4496_v11 }
0x155f   :  { %v4506_v52 = vpop.xlane.xlu0 %4505 }
0x1560   :  { %9563 = vpow2.f32 %v4541_v45  ;;  %v4543_v32 = vmul.f32 1.442695, %v4526_v39  ;;  %v4531_v56 = vsub.f32 %v12535_v28, %v4506_v52 }
0x1561   :  { %v4508_v49 = vpop.xlane.xlu1 %4507 }
0x1562   :  { %9565 = vpow2.f32 %v4543_v32  ;;  %v4553_v31 = vmul.f32 1.442695, %v4531_v56  ;;  %v4532_v45 = vsub.f32 %v12544_v10, %v4508_v49 }
0x1563   :  { %v4502_v11 = vpop.xlane.xlu0 %4501 }
0x1564   :  { %v4529_v63 = vsub.f32 %v12553_v38, %v4502_v11  ;;  %9567 = vpow2.f32 %v4553_v31  ;;  %v4555_v61 = vmul.f32 1.442695, %v4532_v45 }
0x1565   :  { %v4504_v62 = vpop.xlane.xlu1 %4503 }
0x1566   :  { %v12643_v29 = vpop.eup %9559  ;;  %v4530_v39 = vsub.f32 %v12562_v13, %v4504_v62  ;;  %v4549_v37 = vmul.f32 1.442695, %v4529_v63 }
0x1567   :  { %4577 = vadd.xlane.f32.xlu0 %v12643_v29  ;;  %v4514_v32 = vpop.xlane.xlu0 %4513 }
0x1568   :  { %v12646_v57 = vpop.eup %9561  ;;  %9569 = vpow2.f32 %v4549_v37  ;;  %v4535_v40 = vsub.f32 %v12571_v50, %v4514_v32 }
0x1569   :  { %4579 = vadd.xlane.f32.xlu1 %v12646_v57  ;;  %v4516_v18 = vpop.xlane.xlu1 %4515 }
0x156a   :  { %v12649_v41 = vpop.eup %9563  ;;  %v4561_v13 = vmul.f32 1.442695, %v4535_v40  ;;  %v4536_v49 = vsub.f32 %v12580_v17, %v4516_v18 }
0x156b   :  { %4573 = vadd.xlane.f32.xlu0 %v12649_v41  ;;  %v4510_v4 = vpop.xlane.xlu0 %4509 }
0x156c   :  { %v12652_v14 = vpop.eup %9565  ;;  %v4533_v11 = vsub.f32 %v12589_v20, %v4510_v4 }
0x156d   :  { %4575 = vadd.xlane.f32.xlu1 %v12652_v14  ;;  %v4512_v28 = vpop.xlane.xlu1 %4511 }
0x156e   :  { %v4557_v37 = vmul.f32 1.442695, %v4533_v11  ;;  %v4534_v17 = vsub.f32 %v12598_v51, %v4512_v28 }
0x156f   :  { %v4522_v22 = vpop.xlane.xlu0 %4521 }
0x1570   :  { %v4559_v4 = vmul.f32 1.442695, %v4534_v17 }
0x1571   :  { %v12668_v62 = vpop.permute.xlu1 %4780 }
0x1573   :  { %v4518_v23 = vpop.xlane.xlu0 %4517 }
0x1574   :  { %v4537_v52 = vsub.f32 %v12612_v9, %v4518_v23 }
0x1576   :  { %v4565_v10 = vmul.f32 1.442695, %v4537_v52 }
0x1577   :  { %v4779_v45 = vpop.permute.xlu0 %4778 }
0x157e   :  { %4784 = vrot.lane.b32.xlu1 %v12398_v21, %s9911_s0  ;;  %v4551_v21 = vmul.f32 1.442695, %v4530_v39 }
0x1580   :  { %9571 = vpow2.f32 %v4551_v21 }
0x1581   :  { %4782 = vrot.lane.b32.xlu0 %v12402_v36, %s9911_s0  ;;  %v4539_v36 = vsub.f32 %v12602_v2, %v4522_v22  ;;  %9573 = vpow2.f32 %v4555_v61  ;;  %v12670_v2 = vpop.eup %9567 }
0x1582   :  { %v12673_v21 = vpop.eup %9569 }
0x1583   :  { %v4569_v38 = vmul.f32 1.442695, %v4539_v36  ;;  %v4563_v36 = vmul.f32 1.442695, %v4536_v49 }
0x1585   :  { %9575 = vpow2.f32 %v4569_v38 }
0x1586   :  { %9577 = vpow2.f32 %v4561_v13 }
0x1587   :  { %9579 = vpow2.f32 %v4565_v10 }
0x1588   :  { %9581 = vpow2.f32 %v4557_v37 }
0x1589   :  { %9583 = vpow2.f32 %v4563_v36 }
0x158a   :  { %v12676_v20 = vpop.eup %9571 }
0x158b   :  { %v12681_v61 = vpop.eup %9573 }
0x158f   :  { %v12684_v32 = vpop.eup %9575 }
0x1590   :  { %v12688_v51 = vpop.eup %9577 }
0x15a0   :  { %4585 = vadd.xlane.f32.xlu0 %v12670_v2 }
0x15a2   :  { %v4524_v23 = vpop.xlane.xlu1 %4523  ;;  %4581 = vadd.xlane.f32.xlu1 %v12673_v21 }
0x15a3   :  { %v4540_v40 = vsub.f32 %v12625_v24, %v4524_v23  ;;  %v12691_v24 = vpop.eup %9579 }
0x15a4   :  { %4583 = vadd.xlane.f32.xlu0 %v12676_v20  ;;  %v12694_v22 = vpop.eup %9581 }
0x15a5   :  { %v4571_v50 = vmul.f32 1.442695, %v4540_v40  ;;  %v12697_v31 = vpop.eup %9583 }
0x15a6   :  { %v4520_v9 = vpop.xlane.xlu1 %4519  ;;  %4587 = vadd.xlane.f32.xlu1 %v12681_v61 }
0x15a7   :  { %9585 = vpow2.f32 %v4571_v50  ;;  %v4538_v56 = vsub.f32 %v12634_v8, %v4520_v9 }
0x15a8   :  { %4601 = vadd.xlane.f32.xlu0 %v12684_v32  ;;  %9587 = vpow2.f32 %v4559_v4  ;;  %v4815_v4 = vsel %vm870_vm3, %v12485_v6, 0 }
0x15a9   :  { %v4567_v63 = vmul.f32 1.442695, %v4538_v56 }
0x15aa   :  { %4593 = vadd.xlane.f32.xlu1 %v12688_v51 }
0x15ab   :  { %9589 = vpow2.f32 %v4567_v63 }
0x15ac   :  { %4597 = vadd.xlane.f32.xlu0 %v12691_v24 }
0x15ae   :  { %4589 = vadd.xlane.f32.xlu1 %v12694_v22 }
0x15b1   :  { %v12699_v8 = vpop.eup %9585 }
0x15b2   :  { %4595 = vadd.xlane.f32.xlu1 %v12697_v31  ;;  %4603 = vadd.xlane.f32.xlu0 %v12699_v8  ;;  %v12703_v39 = vpop.eup %9587 }
0x15b5   :  { %v12706_v18 = vpop.eup %9589 }
0x15b6   :  { %4591 = vadd.xlane.f32.xlu1 %v12703_v39 }
0x15ba   :  { %4599 = vadd.xlane.f32.xlu1 %v12706_v18 }
0x15c8   :  { %4786 = vrot.lane.b32.xlu0 %v12426_v33, %s9911_s0 }
0x15cb   :  { %4788 = vrot.lane.b32.xlu1 %v12422_v55, %s9911_s0 }
0x15cc   :  { %4750 = vrot.lane.b32.xlu0 %v12346_v26, %s9911_s0 }
0x15cf   :  { %4752 = vrot.lane.b32.xlu1 %v12342_v58, %s9911_s0 }
0x15d0   :  { %4754 = vrot.lane.b32.xlu0 %v12374_v12, %s9911_s0 }
0x15d3   :  { %4756 = vrot.lane.b32.xlu1 %v12370_v43, %s9911_s0 }
0x15d4   :  { %4758 = vrot.lane.b32.xlu0 %v12400_v25, %s9911_s0 }
0x15d7   :  { %4760 = vrot.lane.b32.xlu1 %v12396_v3, %s9911_s0 }
0x15d8   :  { %4762 = vrot.lane.b32.xlu0 %v12424_v7, %s9911_s0 }
0x15db   :  { %4764 = vrot.lane.b32.xlu1 %v12420_v1, %s9911_s0 }
0x15dc   :  { %5095 = vrot.lane.b32.xlu0 %v12437_v5, %s9911_s0 }
0x15df   :  { %5097 = vrot.lane.b32.xlu1 %v12435_v16, %s9911_s0 }
0x15e0   :  { %5099 = vrot.lane.b32.xlu0 %v12449_v34, %s9911_s0 }
0x15e3   :  { %5101 = vrot.lane.b32.xlu1 %v12446_v48, %s9911_s0 }
0x15e4   :  { %5103 = vrot.lane.b32.xlu0 %v12461_v0, %s9911_s0 }
0x15e7   :  { %5105 = vrot.lane.b32.xlu1 %v12456_v54, %s9911_s0 }
0x15e8   :  { %5107 = vrot.lane.b32.xlu0 %v12473_v47, %s9911_s0 }
0x15eb   :  { %5109 = vrot.lane.b32.xlu1 %v12468_v27, %s9911_s0 }
0x15ec   :  { %5232 = vrot.lane.b32.xlu0 %v12348_v42, %s9912_s26 }
0x15ef   :  { %5234 = vrot.lane.b32.xlu1 %v12344_v15, %s9912_s26 }
0x15f4   :  { %v4578_v28 = vpop.xlane.xlu0 %4577 }
0x15f6   :  { %v4580_v38 = vpop.xlane.xlu1 %4579 }
0x15f7   :  { %9591 = vrcp.f32 %v4580_v38 }
0x15f8   :  { %v4574_v52 = vpop.xlane.xlu0 %4573 }
0x15f9   :  { %9593 = vrcp.f32 %v4574_v52 }
0x15fa   :  { %9595 = vrcp.f32 %v4578_v28  ;;  %v4576_v13 = vpop.xlane.xlu1 %4575 }
0x15fb   :  { %9597 = vrcp.f32 %v4576_v13 }
0x15fc   :  { %v4783_v6 = vpop.permute.xlu0 %4782 }
0x15fd   :  { %v4827_v56 = vsel %vm870_vm3, %v4783_v6, 0 }
0x1601   :  { %v9592_v11 = vpop.eup %9591 }
0x1602   :  { %v4624_v36 = vmul.f32 %v9592_v11, %v12646_v57  ;;  %v4818_v57 = vsel %vm870_vm3, %v12637_v53, 0 }
0x1603   :  { %v9594_v10 = vpop.eup %9593 }
0x1604   :  { %v9596_v49 = vpop.eup %9595  ;;  %v4621_v23 = vmul.f32 %v9594_v10, %v12649_v41  ;;  %v4821_v41 = vsel %vm870_vm3, %v4779_v45, 0 }
0x1605   :  { %v9598_v37 = vpop.eup %9597  ;;  %v4623_v40 = vmul.f32 %v9596_v49, %v12643_v29  ;;  %v4824_v29 = vsel %vm870_vm3, %v12668_v62, 0 }
0x1606   :  { %v4622_v17 = vmul.f32 %v9598_v37, %v12652_v14  ;;  %v4785_v14 = vpop.permute.xlu1 %4784 }
0x1607   :  { %v4638_v9 = vpack.c.bf16 %v4624_v36, %v4623_v40  ;;  %v4830_v38 = vsel %vm870_vm3, %v4785_v14, 0 }
0x1608   :  { %v4637_v50 = vpack.c.bf16 %v4622_v17, %v4621_v23 }
0x160a   :  { %8622 = vmatprep.mubr.bf16.mxu0 %v4637_v50 }
0x160b   :  { %8623 = vmatmul.mubr.bf16.vlgmr.msra.gmra.mrb[160].mxu0 %v4638_v9 }
0x160c   :  { %8639 = vmatpush3.bf16.xpose.msra.mxu0 %v4815_v4 }
0x160d   :  { %8935 = vmatprep.subr.msk.bf16.mxu0 %vm870_vm3, %v12637_v53 }
0x1614   :  { %8641 = vmatpush3.bf16.xpose.msra.mxu0 %v4818_v57 }
0x1615   :  { %8936 = vmatprep.subr.msk.bf16.mxu0 %vm870_vm3, %v4779_v45 }
0x161c   :  { %8643 = vmatpush3.bf16.xpose.msra.mxu0 %v4821_v41 }
0x161d   :  { %8937 = vmatprep.subr.msk.bf16.mxu0 %vm870_vm3, %v12668_v62 }
0x1624   :  { %8645 = vmatpush3.bf16.xpose.msra.mxu0 %v4824_v29 }
0x1625   :  { %8938 = vmatprep.subr.msk.bf16.mxu0 %vm870_vm3, %v4783_v6 }
0x162c   :  { %8647 = vmatpush3.bf16.xpose.msra.mxu0 %v4827_v56 }
0x162d   :  { %8939 = vmatprep.subr.msk.bf16.mxu0 %vm870_vm3, %v4785_v14  ;;  %v4586_v53 = vpop.xlane.xlu0 %4585 }
0x162f   :  { %v4582_v63 = vpop.xlane.xlu1 %4581 }
0x1630   :  { %9599 = vrcp.f32 %v4582_v63 }
0x1631   :  { %9601 = vrcp.f32 %v4586_v53  ;;  %v4584_v45 = vpop.xlane.xlu0 %4583 }
0x1632   :  { %9603 = vrcp.f32 %v4584_v45 }
0x1633   :  { %v4588_v28 = vpop.xlane.xlu1 %4587 }
0x1634   :  { %9605 = vrcp.f32 %v4588_v28  ;;  %8649 = vmatpush3.bf16.xpose.msra.mxu0 %v4830_v38 }
0x1635   :  { %v4602_v62 = vpop.xlane.xlu0 %4601 }
0x1637   :  { %v4594_v52 = vpop.xlane.xlu1 %4593 }
0x1639   :  { %v4598_v10 = vpop.xlane.xlu0 %4597 }
0x163a   :  { %v9600_v13 = vpop.eup %9599 }
0x163b   :  { %v9602_v11 = vpop.eup %9601  ;;  %v4590_v49 = vpop.xlane.xlu1 %4589  ;;  %v4625_v36 = vmul.f32 %v9600_v13, %v12673_v21 }
0x163c   :  { %v9604_v37 = vpop.eup %9603  ;;  %v4627_v4 = vmul.f32 %v9602_v11, %v12670_v2 }
0x163d   :  { %v4626_v23 = vmul.f32 %v9604_v37, %v12676_v20 }
0x163e   :  { %v9606_v17 = vpop.eup %9605 }
0x163f   :  { %v4596_v40 = vpop.xlane.xlu1 %4595  ;;  %v4604_v50 = vpop.xlane.xlu0 %4603  ;;  %v4639_v9 = vpack.c.bf16 %v4626_v23, %v4625_v36  ;;  %v4628_v57 = vmul.f32 %v9606_v17, %v12681_v61 }
0x1640   :  { %9607 = vrcp.f32 %v4596_v40 }
0x1641   :  { %8626 = vmatprep.mubr.bf16.mxu0 %v4639_v9  ;;  %v4640_v41 = vpack.c.bf16 %v4628_v57, %v4627_v4  ;;  %9609 = vrcp.f32 %v4590_v49 }
0x1642   :  { %9611 = vrcp.f32 %v4594_v52 }
0x1643   :  { %v4592_v29 = vpop.xlane.xlu1 %4591  ;;  %8627 = vmatmul.mubr.bf16.gmra.mrb[164].mxu0 %v4640_v41  ;;  %v4787_v6 = vpop.permute.xlu0 %4786 }
0x1644   :  { %9613 = vrcp.f32 %v4592_v29  ;;  %8940 = vmatprep.subr.msk.bf16.mxu0 %vm870_vm3, %v4787_v6  ;;  %v4833_v21 = vsel %vm870_vm3, %v4787_v6, 0 }
0x1645   :  { %8651 = vmatpush3.bf16.xpose.msra.mxu0 %v4833_v21  ;;  %9615 = vrcp.f32 %v4598_v10 }
0x1647   :  { %v4600_v20 = vpop.xlane.xlu1 %4599  ;;  %v4751_v14 = vpop.permute.xlu0 %4750 }
0x1648   :  { %9617 = vrcp.f32 %v4600_v20 }
0x1649   :  { %9619 = vrcp.f32 %v4604_v50 }
0x164a   :  { %v9608_v2 = vpop.eup %9607  ;;  %9621 = vrcp.f32 %v4602_v62 }
0x164b   :  { %v4789_v61 = vpop.permute.xlu1 %4788  ;;  %v4755_v56 = vpop.permute.xlu0 %4754  ;;  %v4632_v38 = vmul.f32 %v9608_v2, %v12697_v31 }
0x164c   :  { %v9610_v53 = vpop.eup %9609  ;;  %8941 = vmatprep.subr.msk.bf16.mxu0 %vm870_vm3, %v4789_v61  ;;  %v4836_v63 = vsel %vm870_vm3, %v4789_v61, 0 }
0x164d   :  { %v9612_v45 = vpop.eup %9611  ;;  %8653 = vmatpush3.bf16.xpose.msra.mxu0 %v4836_v63  ;;  %v4629_v11 = vmul.f32 %v9610_v53, %v12694_v22 }
0x164e   :  { %v9614_v28 = vpop.eup %9613  ;;  %v4631_v62 = vmul.f32 %v9612_v45, %v12688_v51 }
0x164f   :  { %v4753_v52 = vpop.permute.xlu1 %4752  ;;  %v4759_v13 = vpop.permute.xlu0 %4758  ;;  %v4630_v10 = vmul.f32 %v9614_v28, %v12703_v39 }
0x1650   :  { %v9616_v49 = vpop.eup %9615  ;;  %v4642_v23 = vpack.c.bf16 %v4632_v38, %v4631_v62 }
0x1651   :  { %v4641_v37 = vpack.c.bf16 %v4630_v10, %v4629_v11  ;;  %v4633_v9 = vmul.f32 %v9616_v49, %v12691_v24 }
0x1652   :  { %v9618_v36 = vpop.eup %9617 }
0x1653   :  { %v9620_v17 = vpop.eup %9619  ;;  %v4757_v40 = vpop.permute.xlu1 %4756  ;;  %8630 = vmatprep.mubr.bf16.mxu0 %v4641_v37  ;;  %v4634_v31 = vmul.f32 %v9618_v36, %v12706_v18 }
0x1654   :  { %v4763_v50 = vpop.permute.xlu0 %4762  ;;  %8631 = vmatmul.mubr.bf16.gmra.mrb[168].mxu0 %v4642_v23  ;;  %v9622_v4 = vpop.eup %9621  ;;  %v4636_v22 = vmul.f32 %v9620_v17, %v12699_v8 }
0x1655   :  { %v4643_v57 = vpack.c.bf16 %v4634_v31, %v4633_v9  ;;  %v4635_v51 = vmul.f32 %v9622_v4, %v12684_v32 }
0x1657   :  { %v4761_v39 = vpop.permute.xlu1 %4760  ;;  %8634 = vmatprep.mubr.bf16.mxu0 %v4643_v57  ;;  %v4644_v29 = vpack.c.bf16 %v4636_v22, %v4635_v51 }
0x1658   :  { %v5096_v41 = vpop.permute.xlu0 %5095 }
0x1659   :  { %8670 = vmatprep.subr.bf16.mxu1 %v5096_v41 }
0x165a   :  { %8671 = vmatpush3.bf16.msra.mxu1 %v5096_v41 }
0x165b   :  { %v4765_v6 = vpop.permute.xlu1 %4764 }
0x165c   :  { %8635 = vmatmul.mubr.bf16.gmra.mrb[172].mxu0 %v4644_v29  ;;  %v5100_v18 = vpop.permute.xlu0 %5099 }
0x165d   :  { %8654 = vmatprep.mubr.msk.bf16.mxu0 %vm870_vm3, %v4751_v14 }
0x165f   :  { %v5098_v24 = vpop.permute.xlu1 %5097 }
0x1660   :  { %8672 = vmatprep.subr.bf16.mxu1 %v5098_v24  ;;  %v5104_v21 = vpop.permute.xlu0 %5103 }
0x1661   :  { %8673 = vmatpush3.bf16.msra.mxu1 %v5098_v24  ;;  %v14715_v24 = vld [vmem:[#allocation37_spill] sm:$0xff] }
0x1662   :  { %8674 = vmatprep.subr.bf16.mxu1 %v5100_v18 }
0x1663   :  { %v5102_v8 = vpop.permute.xlu1 %5101 }
0x1664   :  { %8655 = vmatmul.mubr.msk.bf16.vlgmr.msra.gmra.mrb[176].mxu0 %vm870_vm3, %v4753_v52  ;;  %v5108_v20 = vpop.permute.xlu0 %5107 }
0x1665   :  { %8658 = vmatprep.mubr.msk.bf16.mxu0 %vm870_vm3, %v4755_v56  ;;  %8675 = vmatpush3.bf16.msra.mxu1 %v5100_v18 }
0x1666   :  { %8676 = vmatprep.subr.bf16.mxu1 %v5102_v8 }
0x1667   :  { %v5106_v32 = vpop.permute.xlu1 %5105 }
0x1668   :  { %v12792_v2 = vpop.permute.xlu0 %5232 }
0x1669   :  { %8677 = vmatpush3.bf16.msra.mxu1 %v5102_v8  ;;  %v14716_v8 = vld [vmem:[#allocation41_spill] sm:$0xff] }
0x166a   :  { %8678 = vmatprep.subr.bf16.mxu1 %v5104_v21 }
0x166b   :  { %v5110_v14 = vpop.permute.xlu1 %5109 }
0x166c   :  { %8659 = vmatmul.mubr.msk.bf16.gmra.mrb[180].mxu0 %vm870_vm3, %v4757_v40 }
0x166d   :  { %8662 = vmatprep.mubr.msk.bf16.mxu0 %vm870_vm3, %v4759_v13  ;;  %8679 = vmatpush3.bf16.msra.mxu1 %v5104_v21 }
0x166e   :  { %8680 = vmatprep.subr.bf16.mxu1 %v5106_v32 }
0x1671   :  { %8681 = vmatpush3.bf16.msra.mxu1 %v5106_v32  ;;  %v14717_v32 = vld [vmem:[#allocation35_spill] sm:$0xff] }
0x1672   :  { %8682 = vmatprep.subr.bf16.mxu1 %v5108_v20 }
0x1674   :  { %8663 = vmatmul.mubr.msk.bf16.gmra.mrb[184].mxu0 %vm870_vm3, %v4761_v39 }
0x1675   :  { %8666 = vmatprep.mubr.msk.bf16.mxu0 %vm870_vm3, %v4763_v50  ;;  %8683 = vmatpush3.bf16.msra.mxu1 %v5108_v20 }
0x1676   :  { %8684 = vmatprep.subr.bf16.mxu1 %v5110_v14 }
0x1679   :  { %8685 = vmatpush3.bf16.msra.mxu1 %v5110_v14 }
0x167a   :  { %8942 = vmatprep.subr.msk.bf16.mxu1 %vm870_vm3, %v12792_v2 }
0x167c   :  { %8667 = vmatmul.mubr.msk.bf16.gmra.mrb[188].mxu0 %vm870_vm3, %v4765_v6 }
0x16de   :  { %v12797_v61 = vpop.f32.mrb[160].mxu0 }
0x16df   :  { %14699 = vst [vmem:[#allocation44_spill] sm:$0xff] %v12797_v61  ;;  %v12799_v56 = vpop.f32.mrb[161].mxu0 }
0x16e0   :  { %14700 = vst [vmem:[#allocation49_spill] sm:$0xff] %v12799_v56  ;;  %v12801_v53 = vpop.f32.mrb[162].mxu0 }
0x16e1   :  { %14701 = vst [vmem:[#allocation47_spill] sm:$0xff] %v12801_v53  ;;  %v12803_v63 = vpop.f32.mrb[163].mxu0  ;;  %v13181_v53 = vld [vmem:[%s14388_s2 + $0x48] sm:$0xff] }
0x16e2   :  { %14702 = vst [vmem:[#allocation50_spill] sm:$0xff] %v12803_v63 }
0x1716   :  { %v12805_v45 = vpop.f32.mrb[164].mxu0 }
0x1717   :  { %14703 = vst [vmem:[#allocation48_spill] sm:$0xff] %v12805_v45  ;;  %v12807_v28 = vpop.f32.mrb[165].mxu0 }
0x1718   :  { %14704 = vst [vmem:[#allocation3_spill] sm:$0xff] %v12807_v28  ;;  %v12809_v38 = vpop.f32.mrb[166].mxu0 }
0x1719   :  { %14705 = vst [vmem:[#allocation5_spill] sm:$0xff] %v12809_v38  ;;  %v12811_v52 = vpop.f32.mrb[167].mxu0 }
0x171a   :  { %14706 = vst [vmem:[#allocation4_spill] sm:$0xff] %v12811_v52 }
0x1727   :  { %v12813_v13 = vpop.f32.mrb[168].mxu0 }
0x1728   :  { %14707 = vst [vmem:[#allocation2_spill] sm:$0xff] %v12813_v13  ;;  %v12815_v11 = vpop.f32.mrb[169].mxu0 }
0x1729   :  { %14708 = vst [vmem:[#allocation7_spill] sm:$0xff] %v12815_v11  ;;  %v12817_v10 = vpop.f32.mrb[170].mxu0 }
0x172a   :  { %14709 = vst [vmem:[#allocation6_spill] sm:$0xff] %v12817_v10  ;;  %v12819_v49 = vpop.f32.mrb[171].mxu0 }
0x172b   :  { %14710 = vst [vmem:[#allocation9_spill] sm:$0xff] %v12819_v49 }
0x172f   :  { %v12821_v62 = vpop.f32.mrb[172].mxu0 }
0x1730   :  { %14711 = vst [vmem:[#allocation8_spill] sm:$0xff] %v12821_v62  ;;  %v12823_v37 = vpop.f32.mrb[173].mxu0 }
0x1731   :  { %14712 = vst [vmem:[#allocation11_spill] sm:$0xff] %v12823_v37  ;;  %v12825_v36 = vpop.f32.mrb[174].mxu0 }
0x1732   :  { %14713 = vst [vmem:[#allocation10_spill] sm:$0xff] %v12825_v36  ;;  %v12827_v23 = vpop.f32.mrb[175].mxu0 }
0x1733   :  { %14714 = vst [vmem:[#allocation13_spill] sm:$0xff] %v12827_v23 }
0x1737   :  { %v8656_v17 = vpop.f32.mrb[176].mxu0 }
0x1738   :  { %v4881_v40 = vadd.f32 %v8656_v17, %v12492_v35  ;;  %v4872_v50 = vpop.f32.mrb[177].mxu0 }
0x1739   :  { %v8657_v9 = vpop.f32.mrb[178].mxu0  ;;  %v4873_v57 = vadd.f32 %v4872_v50, %v12505_v19  ;;  %v14719_v50 = vld [vmem:[#allocation39_spill] sm:$0xff] }
0x173a   :  { %4939 = vmax.xlane.f32.xlu0 %v4881_v40  ;;  %v4875_v31 = vpop.f32.mrb[179].mxu0  ;;  %v4884_v39 = vadd.f32 %v8657_v9, %v12497_v46 }
0x173b   :  { %v4876_v4 = vadd.f32 %v4875_v31, %v12514_v30 }
0x173d   :  { %4937 = vmax.xlane.f32.xlu1 %v4876_v4 }
0x173e   :  { %4935 = vmax.xlane.f32.xlu0 %v4873_v57 }
0x173f   :  { %v8660_v22 = vpop.f32.mrb[180].mxu0 }
0x1740   :  { %v4888_v41 = vpop.f32.mrb[181].mxu0  ;;  %v12837_v6 = vadd.f32 %v8660_v22, %v12523_v59 }
0x1741   :  { %v8661_v51 = vpop.f32.mrb[182].mxu0  ;;  %v12845_v46 = vadd.f32 %v4888_v41, %v14715_v24 }
0x1742   :  { %v12834_v29 = vadd.f32 %v8661_v51, %v12532_v44  ;;  %4941 = vmax.xlane.f32.xlu0 %v4884_v39  ;;  %v4891_v35 = vpop.f32.mrb[183].mxu0  ;;  %v14720_v51 = vld [vmem:[#allocation40_spill] sm:$0xff] }
0x1743   :  { %v12841_v30 = vadd.f32 %v4891_v35, %v12550_v60  ;;  %v14718_v60 = vld [vmem:[#allocation42_spill] sm:$0xff] }
0x1744   :  { %4949 = vmax.xlane.f32.xlu1 %v12834_v29 }
0x1746   :  { %4947 = vmax.xlane.f32.xlu0 %v12837_v6 }
0x1747   :  { %v8664_v19 = vpop.f32.mrb[184].mxu0 }
0x1748   :  { %4945 = vmax.xlane.f32.xlu1 %v12841_v30  ;;  %v4904_v44 = vpop.f32.mrb[185].mxu0  ;;  %v12853_v20 = vadd.f32 %v8664_v19, %v14717_v32  ;;  %v14721_v19 = vld [vmem:[#allocation45_spill] sm:$0xff]  ;;  %v14725_v32 = vld [vmem:[#allocation46_spill] sm:$0xff] }
0x1749   :  { %v8665_v18 = vpop.f32.mrb[186].mxu0  ;;  %v12861_v9 = vadd.f32 %v4904_v44, %v14719_v50  ;;  %v14722_v44 = vld [vmem:[#allocation21_spill] sm:$0xff] }
0x174a   :  { %v12849_v21 = vadd.f32 %v8665_v18, %v14716_v8  ;;  %4943 = vmax.xlane.f32.xlu0 %v12845_v46  ;;  %v4907_v59 = vpop.f32.mrb[187].mxu0  ;;  %v14723_v18 = vld [vmem:[#allocation33_spill] sm:$0xff]  ;;  %v14724_v8 = vld [vmem:[#allocation43_spill] sm:$0xff] }
0x174b   :  { %v12857_v14 = vadd.f32 %v4907_v59, %v14718_v60 }
0x174c   :  { %4957 = vmax.xlane.f32.xlu1 %v12849_v21 }
0x174e   :  { %4955 = vmax.xlane.f32.xlu0 %v12853_v20 }
0x174f   :  { %v8668_v17 = vpop.f32.mrb[188].mxu0 }
0x1750   :  { %4953 = vmax.xlane.f32.xlu1 %v12857_v14  ;;  %v4920_v31 = vpop.f32.mrb[189].mxu0  ;;  %v12866_v35 = vadd.f32 %v8668_v17, %v14720_v51  ;;  %v12885_v17 = vpop.permute.xlu1 %5234 }
0x1751   :  { %v8669_v22 = vpop.f32.mrb[190].mxu0  ;;  %v12870_v24 = vadd.f32 %v4920_v31, %v14721_v19 }
0x1752   :  { %4951 = vmax.xlane.f32.xlu0 %v12861_v9  ;;  %v4923_v41 = vpop.f32.mrb[191].mxu0  ;;  %v12878_v59 = vadd.f32 %v8669_v22, %v14724_v8 }
0x1753   :  { %v12882_v60 = vadd.f32 %v4923_v41, %v14725_v32 }
0x1756   :  { %4963 = vmax.xlane.f32.xlu0 %v12866_v35 }
0x175a   :  { %4959 = vmax.xlane.f32.xlu0 %v12870_v24 }
0x1761   :  { %5238 = vrot.lane.b32.xlu1 %v14722_v44, %s9912_s26 }
0x1770   :  { %5236 = vrot.lane.b32.xlu0 %v14723_v18, %s9912_s26 }
0x1785   :  { %4965 = vmax.xlane.f32.xlu1 %v12878_v59 }
0x1789   :  { %4961 = vmax.xlane.f32.xlu1 %v12882_v60 }
0x17c7   :  { %v4940_v50 = vpop.xlane.xlu0 %4939 }
0x17c8   :  { %v4969_v31 = vsub.f32 %v4881_v40, %v4940_v50 }
0x17ca   :  { %v4987_v51 = vmul.f32 1.442695, %v4969_v31  ;;  %v4938_v19 = vpop.xlane.xlu1 %4937 }
0x17cb   :  { %v4968_v37 = vsub.f32 %v4876_v4, %v4938_v19  ;;  %v4936_v23 = vpop.xlane.xlu0 %4935 }
0x17cc   :  { %9623 = vpow2.f32 %v4987_v51  ;;  %v4967_v62 = vsub.f32 %v4873_v57, %v4936_v23 }
0x17cd   :  { %v4985_v36 = vmul.f32 1.442695, %v4968_v37 }
0x17ce   :  { %v4983_v22 = vmul.f32 1.442695, %v4967_v62 }
0x17cf   :  { %9625 = vpow2.f32 %v4985_v36  ;;  %v4942_v8 = vpop.xlane.xlu0 %4941  ;;  %v14727_v36 = vld [vmem:[#allocation52_spill] sm:$0xff] }
0x17d0   :  { %9627 = vpow2.f32 %v4983_v22  ;;  %v4970_v11 = vsub.f32 %v4884_v39, %v4942_v8 }
0x17d1   :  { %v4950_v4 = vpop.xlane.xlu1 %4949 }
0x17d2   :  { %v4989_v41 = vmul.f32 1.442695, %v4970_v11  ;;  %v14726_v11 = vld [vmem:[#allocation20_spill] sm:$0xff]  ;;  %v4974_v13 = vsub.f32 %v12834_v29, %v4950_v4 }
0x17d3   :  { %v4948_v62 = vpop.xlane.xlu0 %4947 }
0x17d4   :  { %9629 = vpow2.f32 %v4989_v41  ;;  %v4973_v39 = vsub.f32 %v12837_v6, %v4948_v62  ;;  %v4997_v38 = vmul.f32 1.442695, %v4974_v13 }
0x17d5   :  { %v4946_v50 = vpop.xlane.xlu1 %4945 }
0x17d6   :  { %v12887_v32 = vpop.eup %9623  ;;  %v4995_v51 = vmul.f32 1.442695, %v4973_v39  ;;  %v4972_v22 = vsub.f32 %v12841_v30, %v4946_v50 }
0x17d7   :  { %5019 = vadd.xlane.f32.xlu1 %v12887_v32  ;;  %v4944_v23 = vpop.xlane.xlu0 %4943 }
0x17d8   :  { %v4971_v19 = vsub.f32 %v12845_v46, %v4944_v23  ;;  %9631 = vpow2.f32 %v4995_v51  ;;  %v4993_v28 = vmul.f32 1.442695, %v4972_v22 }
0x17d9   :  { %v12890_v49 = vpop.eup %9625  ;;  %v4958_v8 = vpop.xlane.xlu1 %4957 }
0x17da   :  { %v12892_v40 = vpop.eup %9627  ;;  %5017 = vadd.xlane.f32.xlu0 %v12890_v49  ;;  %v4991_v10 = vmul.f32 1.442695, %v4971_v19  ;;  %v4978_v29 = vsub.f32 %v12849_v21, %v4958_v8 }
0x17db   :  { %5015 = vadd.xlane.f32.xlu1 %v12892_v40  ;;  %v4956_v57 = vpop.xlane.xlu0 %4955 }
0x17dc   :  { %v4977_v52 = vsub.f32 %v12853_v20, %v4956_v57  ;;  %9633 = vpow2.f32 %v4991_v10 }
0x17dd   :  { %v4954_v45 = vpop.xlane.xlu1 %4953  ;;  %9635 = vpow2.f32 %v4993_v28 }
0x17de   :  { %v12896_v37 = vpop.eup %9629  ;;  %v5003_v62 = vmul.f32 1.442695, %v4977_v52  ;;  %9637 = vpow2.f32 %v4997_v38  ;;  %v5005_v52 = vmul.f32 1.442695, %v4978_v29  ;;  %v4976_v10 = vsub.f32 %v12857_v14, %v4954_v45 }
0x17df   :  { %5021 = vadd.xlane.f32.xlu1 %v12896_v37  ;;  %v4952_v31 = vpop.xlane.xlu0 %4951 }
0x17e0   :  { %v4975_v46 = vsub.f32 %v12861_v9, %v4952_v31  ;;  %9639 = vpow2.f32 %v5003_v62 }
0x17e1   :  { %v12914_v13 = vpop.permute.xlu1 %5238 }
0x17e2   :  { %v4999_v4 = vmul.f32 1.442695, %v4975_v46  ;;  %v12912_v50 = vpop.eup %9631 }
0x17e3   :  { %v4964_v41 = vpop.xlane.xlu0 %4963 }
0x17e4   :  { %v4981_v6 = vsub.f32 %v12866_v35, %v4964_v41  ;;  %v5001_v35 = vmul.f32 1.442695, %v4976_v10 }
0x17e6   :  { %v5011_v30 = vmul.f32 1.442695, %v4981_v6  ;;  %v12918_v38 = vpop.eup %9633 }
0x17e7   :  { %v4960_v23 = vpop.xlane.xlu0 %4959  ;;  %v12920_v9 = vpop.eup %9635 }
0x17e8   :  { %v4979_v39 = vsub.f32 %v12870_v24, %v4960_v23  ;;  %9641 = vpow2.f32 %v5011_v30  ;;  %v12925_v57 = vpop.eup %9637 }
0x17e9   :  { %9643 = vpow2.f32 %v4999_v4 }
0x17ea   :  { %v5007_v28 = vmul.f32 1.442695, %v4979_v39  ;;  %v12927_v45 = vpop.eup %9639 }
0x17eb   :  { %v5237_v62 = vpop.permute.xlu0 %5236 }
0x17ec   :  { %9645 = vpow2.f32 %v5007_v28 }
0x17ed   :  { %9647 = vpow2.f32 %v5005_v52 }
0x17f0   :  { %5240 = vrot.lane.b32.xlu0 %v14726_v11, %s9912_s26  ;;  %5242 = vrot.lane.b32.xlu1 %v14727_v36, %s9912_s26 }
0x17f2   :  { %v12932_v51 = vpop.eup %9641 }
0x17f3   :  { %v12934_v19 = vpop.eup %9643 }
0x17f6   :  { %v12938_v22 = vpop.eup %9645 }
0x17f7   :  { %v12940_v8 = vpop.eup %9647 }
0x180f   :  { %5027 = vadd.xlane.f32.xlu0 %v12912_v50 }
0x1812   :  { %v4966_v20 = vpop.xlane.xlu1 %4965 }
0x1813   :  { %v4982_v21 = vsub.f32 %v12878_v59, %v4966_v20  ;;  %5023 = vadd.xlane.f32.xlu0 %v12918_v38 }
0x1814   :  { %5025 = vadd.xlane.f32.xlu1 %v12920_v9 }
0x1815   :  { %v5013_v24 = vmul.f32 1.442695, %v4982_v21 }
0x1816   :  { %v4962_v31 = vpop.xlane.xlu1 %4961 }
0x1817   :  { %9649 = vpow2.f32 %v5013_v24  ;;  %v4980_v14 = vsub.f32 %v12882_v60, %v4962_v31  ;;  %5029 = vadd.xlane.f32.xlu0 %v12925_v57  ;;  %v5273_v24 = vsel %vm870_vm3, %v12792_v2, 0 }
0x1818   :  { %5035 = vadd.xlane.f32.xlu1 %v12927_v45  ;;  %9651 = vpow2.f32 %v5001_v35 }
0x1819   :  { %v5009_v59 = vmul.f32 1.442695, %v4980_v14 }
0x181b   :  { %5043 = vadd.xlane.f32.xlu0 %v12932_v51  ;;  %9653 = vpow2.f32 %v5009_v59 }
0x181c   :  { %5031 = vadd.xlane.f32.xlu1 %v12934_v19 }
0x181f   :  { %5039 = vadd.xlane.f32.xlu0 %v12938_v22 }
0x1820   :  { %5037 = vadd.xlane.f32.xlu1 %v12940_v8 }
0x1821   :  { %v12944_v60 = vpop.eup %9649 }
0x1822   :  { %v12946_v41 = vpop.eup %9651 }
0x1823   :  { %5045 = vadd.xlane.f32.xlu0 %v12944_v60 }
0x1824   :  { %5033 = vadd.xlane.f32.xlu1 %v12946_v41 }
0x1825   :  { %v12950_v6 = vpop.eup %9653 }
0x1828   :  { %5041 = vadd.xlane.f32.xlu1 %v12950_v6 }
0x1839   :  { %5246 = vrot.lane.b32.xlu1 %v12422_v55, %s9912_s26  ;;  %5244 = vrot.lane.b32.xlu0 %v12426_v33, %s9912_s26 }
0x183d   :  { %5218 = vrot.lane.b32.xlu1 %v12342_v58, %s9912_s26  ;;  %5216 = vrot.lane.b32.xlu0 %v12346_v26, %s9912_s26 }
0x1841   :  { %5222 = vrot.lane.b32.xlu1 %v12370_v43, %s9912_s26  ;;  %5220 = vrot.lane.b32.xlu0 %v12374_v12, %s9912_s26 }
0x1845   :  { %5226 = vrot.lane.b32.xlu1 %v12396_v3, %s9912_s26  ;;  %5224 = vrot.lane.b32.xlu0 %v12400_v25, %s9912_s26 }
0x1849   :  { %5230 = vrot.lane.b32.xlu1 %v12420_v1, %s9912_s26  ;;  %5228 = vrot.lane.b32.xlu0 %v12424_v7, %s9912_s26 }
0x184d   :  { %5547 = vrot.lane.b32.xlu1 %v12435_v16, %s9912_s26  ;;  %5545 = vrot.lane.b32.xlu0 %v12437_v5, %s9912_s26 }
0x1851   :  { %5551 = vrot.lane.b32.xlu1 %v12446_v48, %s9912_s26  ;;  %5549 = vrot.lane.b32.xlu0 %v12449_v34, %s9912_s26 }
0x1855   :  { %5555 = vrot.lane.b32.xlu1 %v12456_v54, %s9912_s26  ;;  %5553 = vrot.lane.b32.xlu0 %v12461_v0, %s9912_s26 }
0x1859   :  { %5559 = vrot.lane.b32.xlu1 %v12468_v27, %s9912_s26  ;;  %5557 = vrot.lane.b32.xlu0 %v12473_v47, %s9912_s26 }
0x185d   :  { %5684 = vrot.lane.b32.xlu1 %v12344_v15, %s9913_s6  ;;  %5682 = vrot.lane.b32.xlu0 %v12348_v42, %s9913_s6 }
0x1864   :  { %v5020_v46 = vpop.xlane.xlu1 %5019 }
0x1867   :  { %v5018_v23 = vpop.xlane.xlu0 %5017 }
0x1868   :  { %9655 = vrcp.f32 %v5018_v23  ;;  %v5016_v30 = vpop.xlane.xlu1 %5015 }
0x1869   :  { %9657 = vrcp.f32 %v5016_v30 }
0x186a   :  { %9659 = vrcp.f32 %v5020_v46 }
0x186b   :  { %v5241_v2 = vpop.permute.xlu0 %5240 }
0x186c   :  { %v5022_v39 = vpop.xlane.xlu1 %5021 }
0x186d   :  { %9661 = vrcp.f32 %v5022_v39 }
0x1872   :  { %v9656_v29 = vpop.eup %9655 }
0x1873   :  { %v9658_v4 = vpop.eup %9657  ;;  %v5064_v28 = vmul.f32 %v9656_v29, %v12890_v49  ;;  %v5276_v49 = vsel %vm870_vm3, %v12885_v17, 0 }
0x1874   :  { %v5063_v52 = vmul.f32 %v9658_v4, %v12892_v40  ;;  %v9660_v10 = vpop.eup %9659  ;;  %v5282_v40 = vsel %vm870_vm3, %v12914_v13, 0 }
0x1875   :  { %v5065_v42 = vmul.f32 %v9660_v10, %v12887_v32  ;;  %v5279_v32 = vsel %vm870_vm3, %v5237_v62, 0 }
0x1876   :  { %v5079_v15 = vpack.c.bf16 %v5064_v28, %v5063_v52 }
0x1877   :  { %v9662_v20 = vpop.eup %9661 }
0x1878   :  { %v5066_v21 = vmul.f32 %v9662_v20, %v12896_v37  ;;  %8686 = vmatprep.mubr.bf16.mxu1 %v5079_v15  ;;  %v5285_v37 = vsel %vm870_vm3, %v5241_v2, 0 }
0x187a   :  { %v5080_v35 = vpack.c.bf16 %v5066_v21, %v5065_v42 }
0x187c   :  { %8687 = vmatmul.mubr.bf16.vlgmr.msra.gmra.mrb[160].mxu1 %v5080_v35 }
0x187d   :  { %8703 = vmatpush3.bf16.xpose.msra.mxu1 %v5273_v24 }
0x187e   :  { %8943 = vmatprep.subr.msk.bf16.mxu1 %vm870_vm3, %v12885_v17  ;;  %v5243_v17 = vpop.permute.xlu1 %5242 }
0x1885   :  { %8705 = vmatpush3.bf16.xpose.msra.mxu1 %v5276_v49 }
0x1886   :  { %8944 = vmatprep.subr.msk.bf16.mxu1 %vm870_vm3, %v5237_v62  ;;  %v5288_v62 = vsel %vm870_vm3, %v5243_v17, 0 }
0x188d   :  { %8707 = vmatpush3.bf16.xpose.msra.mxu1 %v5279_v32 }
0x188e   :  { %8945 = vmatprep.subr.msk.bf16.mxu1 %vm870_vm3, %v12914_v13 }
0x1895   :  { %8709 = vmatpush3.bf16.xpose.msra.mxu1 %v5282_v40 }
0x1896   :  { %8946 = vmatprep.subr.msk.bf16.mxu1 %vm870_vm3, %v5241_v2 }
0x189c   :  { %v5028_v31 = vpop.xlane.xlu0 %5027 }
0x189d   :  { %8711 = vmatpush3.bf16.xpose.msra.mxu1 %v5285_v37 }
0x189e   :  { %8947 = vmatprep.subr.msk.bf16.mxu1 %vm870_vm3, %v5243_v17 }
0x18a0   :  { %v5024_v14 = vpop.xlane.xlu0 %5023 }
0x18a1   :  { %9663 = vrcp.f32 %v5024_v14  ;;  %v5026_v59 = vpop.xlane.xlu1 %5025 }
0x18a2   :  { %9665 = vrcp.f32 %v5026_v59 }
0x18a3   :  { %9667 = vrcp.f32 %v5028_v31 }
0x18a4   :  { %v5030_v46 = vpop.xlane.xlu0 %5029 }
0x18a5   :  { %8713 = vmatpush3.bf16.xpose.msra.mxu1 %v5288_v62  ;;  %9669 = vrcp.f32 %v5030_v46  ;;  %v5036_v13 = vpop.xlane.xlu1 %5035 }
0x18a8   :  { %v5044_v23 = vpop.xlane.xlu0 %5043 }
0x18a9   :  { %v5032_v30 = vpop.xlane.xlu1 %5031 }
0x18ab   :  { %v9664_v39 = vpop.eup %9663 }
0x18ac   :  { %v9666_v29 = vpop.eup %9665  ;;  %v5040_v4 = vpop.xlane.xlu0 %5039  ;;  %v5067_v28 = vmul.f32 %v9664_v39, %v12918_v38 }
0x18ad   :  { %v9668_v52 = vpop.eup %9667  ;;  %v5038_v10 = vpop.xlane.xlu1 %5037  ;;  %v5068_v15 = vmul.f32 %v9666_v29, %v12920_v9 }
0x18ae   :  { %9671 = vrcp.f32 %v5038_v10  ;;  %v5069_v35 = vmul.f32 %v9668_v52, %v12912_v50 }
0x18af   :  { %v9670_v20 = vpop.eup %9669  ;;  %v5081_v42 = vpack.c.bf16 %v5068_v15, %v5067_v28  ;;  %9673 = vrcp.f32 %v5032_v30 }
0x18b0   :  { %v5046_v21 = vpop.xlane.xlu0 %5045  ;;  %v5070_v24 = vmul.f32 %v9670_v20, %v12925_v57  ;;  %9675 = vrcp.f32 %v5036_v13 }
0x18b1   :  { %v5034_v49 = vpop.xlane.xlu1 %5033  ;;  %8690 = vmatprep.mubr.bf16.mxu1 %v5081_v42 }
0x18b2   :  { %9677 = vrcp.f32 %v5034_v49  ;;  %v5082_v32 = vpack.c.bf16 %v5070_v24, %v5069_v35 }
0x18b3   :  { %9679 = vrcp.f32 %v5040_v4 }
0x18b4   :  { %8691 = vmatmul.mubr.bf16.gmra.mrb[164].mxu1 %v5082_v32  ;;  %v5245_v38 = vpop.permute.xlu0 %5244 }
0x18b5   :  { %v5042_v40 = vpop.xlane.xlu1 %5041  ;;  %8948 = vmatprep.subr.msk.bf16.mxu1 %vm870_vm3, %v5245_v38  ;;  %v5291_v9 = vsel %vm870_vm3, %v5245_v38, 0 }
0x18b6   :  { %9681 = vrcp.f32 %v5042_v40  ;;  %8715 = vmatpush3.bf16.xpose.msra.mxu1 %v5291_v9 }
0x18b7   :  { %9683 = vrcp.f32 %v5046_v21 }
0x18b8   :  { %v5217_v2 = vpop.permute.xlu0 %5216  ;;  %v9672_v50 = vpop.eup %9671  ;;  %9685 = vrcp.f32 %v5044_v23 }
0x18b9   :  { %v5247_v57 = vpop.permute.xlu1 %5246  ;;  %v9674_v37 = vpop.eup %9673  ;;  %v5074_v59 = vmul.f32 %v9672_v50, %v12940_v8 }
0x18ba   :  { %8949 = vmatprep.subr.msk.bf16.mxu1 %vm870_vm3, %v5247_v57  ;;  %v9676_v31 = vpop.eup %9675  ;;  %v5294_v46 = vsel %vm870_vm3, %v5247_v57, 0  ;;  %v5071_v13 = vmul.f32 %v9674_v37, %v12934_v19 }
0x18bb   :  { %v5073_v23 = vmul.f32 %v9676_v31, %v12927_v45 }
0x18bc   :  { %v9678_v17 = vpop.eup %9677  ;;  %v5221_v14 = vpop.permute.xlu0 %5220 }
0x18bd   :  { %v5219_v62 = vpop.permute.xlu1 %5218  ;;  %v5072_v30 = vmul.f32 %v9678_v17, %v12946_v41  ;;  %v9680_v39 = vpop.eup %9679  ;;  %v5084_v52 = vpack.c.bf16 %v5074_v59, %v5073_v23 }
0x18be   :  { %8717 = vmatpush3.bf16.xpose.msra.mxu1 %v5294_v46  ;;  %v5075_v8 = vmul.f32 %v9680_v39, %v12938_v22  ;;  %v13145_v39 = vld [vmem:[%s14388_s2 + $0x28] sm:$0xff] }
0x18bf   :  { %v5083_v29 = vpack.c.bf16 %v5072_v30, %v5071_v13 }
0x18c0   :  { %v9682_v4 = vpop.eup %9681  ;;  %v5225_v28 = vpop.permute.xlu0 %5224 }
0x18c1   :  { %v9684_v10 = vpop.eup %9683  ;;  %v5223_v15 = vpop.permute.xlu1 %5222  ;;  %8694 = vmatprep.mubr.bf16.mxu1 %v5083_v29  ;;  %v5076_v20 = vmul.f32 %v9682_v4, %v12950_v6 }
0x18c2   :  { %8695 = vmatmul.mubr.bf16.gmra.mrb[168].mxu1 %v5084_v52  ;;  %v9686_v42 = vpop.eup %9685  ;;  %v5078_v41 = vmul.f32 %v9684_v10, %v12944_v60  ;;  %v13136_v10 = vld [vmem:[%s14388_s2 + $0x30] sm:$0xff] }
0x18c3   :  { %v5085_v19 = vpack.c.bf16 %v5076_v20, %v5075_v8  ;;  %v5077_v45 = vmul.f32 %v9686_v42, %v12932_v51 }
0x18c4   :  { %v5229_v21 = vpop.permute.xlu0 %5228 }
0x18c5   :  { %v5227_v35 = vpop.permute.xlu1 %5226  ;;  %8698 = vmatprep.mubr.bf16.mxu1 %v5085_v19  ;;  %v5086_v49 = vpack.c.bf16 %v5078_v41, %v5077_v45 }
0x18c8   :  { %v5546_v24 = vpop.permute.xlu0 %5545 }
0x18c9   :  { %v5231_v32 = vpop.permute.xlu1 %5230  ;;  %8734 = vmatprep.subr.bf16.mxu0 %v5546_v24 }
0x18ca   :  { %8699 = vmatmul.mubr.bf16.gmra.mrb[172].mxu1 %v5086_v49  ;;  %8735 = vmatpush3.bf16.msra.mxu0 %v5546_v24 }
0x18cb   :  { %8718 = vmatprep.mubr.msk.bf16.mxu1 %vm870_vm3, %v5217_v2 }
0x18cc   :  { %v5550_v6 = vpop.permute.xlu0 %5549 }
0x18cd   :  { %v5548_v22 = vpop.permute.xlu1 %5547 }
0x18ce   :  { %8736 = vmatprep.subr.bf16.mxu0 %v5548_v22 }
0x18cf   :  { %8737 = vmatpush3.bf16.msra.mxu0 %v5548_v22  ;;  %v13101_v22 = vld [vmem:[%s14388_s2 + $0x8] sm:$0xff] }
0x18d0   :  { %8738 = vmatprep.subr.bf16.mxu0 %v5550_v6  ;;  %v5554_v51 = vpop.permute.xlu0 %5553 }
0x18d1   :  { %v5552_v60 = vpop.permute.xlu1 %5551 }
0x18d2   :  { %8719 = vmatmul.mubr.msk.bf16.vlgmr.msra.gmra.mrb[176].mxu1 %vm870_vm3, %v5219_v62 }
0x18d3   :  { %8722 = vmatprep.mubr.msk.bf16.mxu1 %vm870_vm3, %v5221_v14  ;;  %8739 = vmatpush3.bf16.msra.mxu0 %v5550_v6 }
0x18d4   :  { %8740 = vmatprep.subr.bf16.mxu0 %v5552_v60  ;;  %v5558_v40 = vpop.permute.xlu0 %5557 }
0x18d5   :  { %v5556_v38 = vpop.permute.xlu1 %5555 }
0x18d7   :  { %8741 = vmatpush3.bf16.msra.mxu0 %v5552_v60  ;;  %v13109_v60 = vld [vmem:[%s14388_s2] sm:$0xff] }
0x18d8   :  { %8742 = vmatprep.subr.bf16.mxu0 %v5554_v51  ;;  %v13036_v2 = vpop.permute.xlu0 %5682 }
0x18d9   :  { %v5560_v9 = vpop.permute.xlu1 %5559 }
0x18da   :  { %8723 = vmatmul.mubr.msk.bf16.gmra.mrb[180].mxu1 %vm870_vm3, %v5223_v15 }
0x18db   :  { %8726 = vmatprep.mubr.msk.bf16.mxu1 %vm870_vm3, %v5225_v28  ;;  %8743 = vmatpush3.bf16.msra.mxu0 %v5554_v51  ;;  %v13154_v28 = vld [vmem:[%s14388_s2 + $0x20] sm:$0xff] }
0x18dc   :  { %8744 = vmatprep.subr.bf16.mxu0 %v5556_v38 }
0x18df   :  { %8745 = vmatpush3.bf16.msra.mxu0 %v5556_v38 }
0x18e0   :  { %8746 = vmatprep.subr.bf16.mxu0 %v5558_v40 }
0x18e2   :  { %8727 = vmatmul.mubr.msk.bf16.gmra.mrb[184].mxu1 %vm870_vm3, %v5227_v35  ;;  %v13092_v35 = vld [vmem:[%s14388_s2 + $0x10] sm:$0xff] }
0x18e3   :  { %8730 = vmatprep.mubr.msk.bf16.mxu1 %vm870_vm3, %v5229_v21  ;;  %8747 = vmatpush3.bf16.msra.mxu0 %v5558_v40  ;;  %v13119_v40 = vld [vmem:[%s14388_s2 + $0x18] sm:$0xff] }
0x18e4   :  { %8748 = vmatprep.subr.bf16.mxu0 %v5560_v9 }
0x18e7   :  { %8749 = vmatpush3.bf16.msra.mxu0 %v5560_v9 }
0x18e8   :  { %8950 = vmatprep.subr.msk.bf16.mxu0 %vm870_vm3, %v13036_v2 }
0x18ea   :  { %8731 = vmatmul.mubr.msk.bf16.gmra.mrb[188].mxu1 %vm870_vm3, %v5231_v32 }
0x194f   :  { %v13041_v50 = vpop.f32.mrb[160].mxu1 }
0x1950   :  { %14728 = vst [vmem:[#allocation12_spill] sm:$0xff] %v13041_v50  ;;  %v13043_v57 = vpop.f32.mrb[161].mxu1 }
0x1951   :  { %14729 = vst [vmem:[#allocation15_spill] sm:$0xff] %v13043_v57  ;;  %v13045_v37 = vpop.f32.mrb[162].mxu1 }
0x1952   :  { %14730 = vst [vmem:[#allocation14_spill] sm:$0xff] %v13045_v37  ;;  %v13049_v17 = vpop.f32.mrb[163].mxu1 }
0x1953   :  { %14731 = vst [vmem:[#allocation17_spill] sm:$0xff] %v13049_v17 }
0x1987   :  { %v13053_v59 = vpop.f32.mrb[164].mxu1 }
0x1988   :  { %14732 = vst [vmem:[#allocation16_spill] sm:$0xff] %v13053_v59  ;;  %v13055_v62 = vpop.f32.mrb[165].mxu1 }
0x1989   :  { %14733 = vst [vmem:[#allocation37_spill] sm:$0xff] %v13055_v62  ;;  %v13057_v46 = vpop.f32.mrb[166].mxu1 }
0x198a   :  { %14734 = vst [vmem:[#allocation41_spill] sm:$0xff] %v13057_v46  ;;  %v13061_v30 = vpop.f32.mrb[167].mxu1 }
0x198b   :  { %14735 = vst [vmem:[#allocation35_spill] sm:$0xff] %v13061_v30 }
0x1995   :  { %v13065_v23 = vpop.f32.mrb[168].mxu1 }
0x1996   :  { %14736 = vst [vmem:[#allocation42_spill] sm:$0xff] %v13065_v23  ;;  %v13067_v29 = vpop.f32.mrb[169].mxu1 }
0x1997   :  { %14737 = vst [vmem:[#allocation39_spill] sm:$0xff] %v13067_v29  ;;  %v13069_v4 = vpop.f32.mrb[170].mxu1 }
0x1998   :  { %14738 = vst [vmem:[#allocation40_spill] sm:$0xff] %v13069_v4  ;;  %v13073_v52 = vpop.f32.mrb[171].mxu1 }
0x1999   :  { %14739 = vst [vmem:[#allocation45_spill] sm:$0xff] %v13073_v52 }
0x199d   :  { %v13077_v15 = vpop.f32.mrb[172].mxu1 }
0x199e   :  { %14740 = vst [vmem:[#allocation21_spill] sm:$0xff] %v13077_v15  ;;  %v13079_v8 = vpop.f32.mrb[173].mxu1 }
0x199f   :  { %14741 = vst [vmem:[#allocation33_spill] sm:$0xff] %v13079_v8  ;;  %v13081_v20 = vpop.f32.mrb[174].mxu1 }
0x19a0   :  { %14742 = vst [vmem:[#allocation43_spill] sm:$0xff] %v13081_v20  ;;  %v13085_v19 = vpop.f32.mrb[175].mxu1 }
0x19a1   :  { %14743 = vst [vmem:[#allocation46_spill] sm:$0xff] %v13085_v19  ;;  %v13190_v19 = vld [vmem:[%s14388_s2 + $0x40] sm:$0xff] }
0x19a5   :  { %v8720_v41 = vpop.f32.mrb[176].mxu1 }
0x19a6   :  { %v13095_v45 = vadd.f32 %v13092_v35, %v8720_v41  ;;  %v5330_v24 = vpop.f32.mrb[177].mxu1 }
0x19a7   :  { %v8721_v49 = vpop.f32.mrb[178].mxu1  ;;  %v13112_v51 = vadd.f32 %v13109_v60, %v5330_v24  ;;  %v13127_v24 = vld [vmem:[%s14388_s2 + $0x38] sm:$0xff] }
0x19a8   :  { %5397 = vmax.xlane.f32.xlu0 %v13095_v45  ;;  %v5333_v32 = vpop.f32.mrb[179].mxu1  ;;  %v13122_v9 = vadd.f32 %v13119_v40, %v8721_v49 }
0x19a9   :  { %v13104_v6 = vadd.f32 %v13101_v22, %v5333_v32 }
0x19ab   :  { %5395 = vmax.xlane.f32.xlu1 %v13104_v6 }
0x19ac   :  { %5393 = vmax.xlane.f32.xlu0 %v13112_v51 }
0x19ad   :  { %v8724_v38 = vpop.f32.mrb[180].mxu1 }
0x19ae   :  { %v5346_v41 = vpop.f32.mrb[181].mxu1  ;;  %v13139_v49 = vadd.f32 %v13136_v10, %v8724_v38 }
0x19af   :  { %v8725_v32 = vpop.f32.mrb[182].mxu1  ;;  %v13157_v38 = vadd.f32 %v13154_v28, %v5346_v41  ;;  %v13172_v41 = vld [vmem:[%s14388_s2 + $0x50] sm:$0xff] }
0x19b0   :  { %v13130_v21 = vadd.f32 %v13127_v24, %v8725_v32  ;;  %5399 = vmax.xlane.f32.xlu0 %v13122_v9  ;;  %v5349_v42 = vpop.f32.mrb[183].mxu1 }
0x19b1   :  { %v13148_v32 = vadd.f32 %v13145_v39, %v5349_v42  ;;  %v13163_v42 = vld [vmem:[%s14388_s2 + $0x58] sm:$0xff] }
0x19b2   :  { %5407 = vmax.xlane.f32.xlu1 %v13130_v21 }
0x19b4   :  { %5405 = vmax.xlane.f32.xlu0 %v13139_v49 }
0x19b5   :  { %v8728_v14 = vpop.f32.mrb[184].mxu1 }
0x19b6   :  { %5403 = vmax.xlane.f32.xlu1 %v13148_v32  ;;  %v5362_v13 = vpop.f32.mrb[185].mxu1  ;;  %v13175_v61 = vadd.f32 %v13172_v41, %v8728_v14 }
0x19b7   :  { %v8729_v31 = vpop.f32.mrb[186].mxu1  ;;  %v13193_v14 = vadd.f32 %v13190_v19, %v5362_v13  ;;  %v13209_v13 = vld [vmem:[%s14388_s2 + $0x60] sm:$0xff] }
0x19b8   :  { %v13166_v56 = vadd.f32 %v13163_v42, %v8729_v31  ;;  %5401 = vmax.xlane.f32.xlu0 %v13157_v38  ;;  %v5365_v63 = vpop.f32.mrb[187].mxu1 }
0x19b9   :  { %v13184_v31 = vadd.f32 %v13181_v53, %v5365_v63  ;;  %v13200_v63 = vld [vmem:[%s14388_s2 + $0x70] sm:$0xff] }
0x19ba   :  { %5415 = vmax.xlane.f32.xlu1 %v13166_v56 }
0x19bc   :  { %5413 = vmax.xlane.f32.xlu0 %v13175_v61 }
0x19bd   :  { %v8732_v8 = vpop.f32.mrb[188].mxu1 }
0x19be   :  { %5411 = vmax.xlane.f32.xlu1 %v13184_v31  ;;  %v5378_v15 = vpop.f32.mrb[189].mxu1  ;;  %v13203_v52 = vadd.f32 %v13200_v63, %v8732_v8  ;;  %v13222_v8 = vld [vmem:[%s14388_s2 + $0x78] sm:$0xff] }
0x19bf   :  { %v8733_v20 = vpop.f32.mrb[190].mxu1  ;;  %v13212_v62 = vadd.f32 %v13209_v13, %v5378_v15  ;;  %14744 = vst [vmem:[#allocation20_spill] sm:$0xff] %v13222_v8  ;;  %v13231_v15 = vld [vmem:[%s14388_s2 + $0x68] sm:$0xff] }
0x19c0   :  { %5409 = vmax.xlane.f32.xlu0 %v13193_v14  ;;  %v5381_v29 = vpop.f32.mrb[191].mxu1  ;;  %v13225_v30 = vadd.f32 %v13222_v8, %v8733_v20  ;;  %14745 = vst [vmem:[#allocation52_spill] sm:$0xff] %v13231_v15 }
0x19c4   :  { %5421 = vmax.xlane.f32.xlu0 %v13203_v52 }
0x19c8   :  { %5417 = vmax.xlane.f32.xlu0 %v13212_v62 }
0x19cf   :  { %5688 = vrot.lane.b32.xlu1 %v14722_v44, %s9913_s6  ;;  %v13234_v44 = vadd.f32 %v13231_v15, %v5381_v29 }
0x19de   :  { %5686 = vrot.lane.b32.xlu0 %v14723_v18, %s9913_s6  ;;  %v13237_v18 = vpop.permute.xlu1 %5684 }
0x19f3   :  { %5423 = vmax.xlane.f32.xlu1 %v13225_v30 }
0x19f7   :  { %5419 = vmax.xlane.f32.xlu1 %v13234_v44 }
0x1a35   :  { %v5398_v57 = vpop.xlane.xlu0 %5397 }
0x1a36   :  { %v5427_v17 = vsub.f32 %v13095_v45, %v5398_v57 }
0x1a38   :  { %v5445_v23 = vmul.f32 1.442695, %v5427_v17  ;;  %v5396_v20 = vpop.xlane.xlu1 %5395 }
0x1a39   :  { %v5426_v4 = vsub.f32 %v13104_v6, %v5396_v20  ;;  %v5394_v59 = vpop.xlane.xlu0 %5393 }
0x1a3a   :  { %9687 = vpow2.f32 %v5445_v23  ;;  %v5425_v46 = vsub.f32 %v13112_v51, %v5394_v59 }
0x1a3b   :  { %v5443_v47 = vmul.f32 1.442695, %v5426_v4 }
0x1a3c   :  { %v5441_v50 = vmul.f32 1.442695, %v5425_v46 }
0x1a3d   :  { %9689 = vpow2.f32 %v5443_v47  ;;  %v5400_v29 = vpop.xlane.xlu0 %5399 }
0x1a3e   :  { %9691 = vpow2.f32 %v5441_v50  ;;  %v5428_v37 = vsub.f32 %v13122_v9, %v5400_v29 }
0x1a3f   :  { %v5408_v50 = vpop.xlane.xlu1 %5407 }
0x1a40   :  { %v5447_v27 = vmul.f32 1.442695, %v5428_v37  ;;  %v5432_v29 = vsub.f32 %v13130_v21, %v5408_v50 }
0x1a41   :  { %v5406_v47 = vpop.xlane.xlu0 %5405 }
0x1a42   :  { %9693 = vpow2.f32 %v5447_v27  ;;  %v5431_v46 = vsub.f32 %v13139_v49, %v5406_v47  ;;  %v5455_v8 = vmul.f32 1.442695, %v5432_v29 }
0x1a43   :  { %v5404_v23 = vpop.xlane.xlu1 %5403 }
0x1a44   :  { %v13243_v54 = vpop.eup %9687  ;;  %v5453_v45 = vmul.f32 1.442695, %v5431_v46  ;;  %v5430_v51 = vsub.f32 %v13148_v32, %v5404_v23 }
0x1a45   :  { %5477 = vadd.xlane.f32.xlu1 %v13243_v54  ;;  %v5402_v27 = vpop.xlane.xlu0 %5401 }
0x1a46   :  { %v5429_v6 = vsub.f32 %v13157_v38, %v5402_v27  ;;  %9695 = vpow2.f32 %v5453_v45  ;;  %v5451_v15 = vmul.f32 1.442695, %v5430_v51 }
0x1a47   :  { %v13246_v57 = vpop.eup %9689  ;;  %v5416_v9 = vpop.xlane.xlu1 %5415 }
0x1a48   :  { %v13248_v17 = vpop.eup %9691  ;;  %5475 = vadd.xlane.f32.xlu0 %v13246_v57  ;;  %v5436_v21 = vsub.f32 %v13166_v56, %v5416_v9 }
0x1a49   :  { %5473 = vadd.xlane.f32.xlu1 %v13248_v17  ;;  %v5414_v37 = vpop.xlane.xlu0 %5413 }
0x1a4b   :  { %v5412_v48 = vpop.xlane.xlu1 %5411 }
0x1a4c   :  { %v13252_v59 = vpop.eup %9693 }
0x1a4d   :  { %5479 = vadd.xlane.f32.xlu1 %v13252_v59  ;;  %v5410_v4 = vpop.xlane.xlu0 %5409 }
0x1a4e   :  { %v5433_v38 = vsub.f32 %v13193_v14, %v5410_v4  ;;  %v5434_v14 = vsub.f32 %v13184_v31, %v5412_v48 }
0x1a50   :  { %v5457_v50 = vmul.f32 1.442695, %v5433_v38  ;;  %v13268_v23 = vpop.eup %9695  ;;  %v5459_v4 = vmul.f32 1.442695, %v5434_v14 }
0x1a51   :  { %v5422_v20 = vpop.xlane.xlu0 %5421 }
0x1a52   :  { %v5439_v49 = vsub.f32 %v13203_v52, %v5422_v20 }
0x1a54   :  { %v5469_v32 = vmul.f32 1.442695, %v5439_v49 }
0x1a55   :  { %v5418_v27 = vpop.xlane.xlu0 %5417 }
0x1a56   :  { %v5437_v46 = vsub.f32 %v13212_v62, %v5418_v27  ;;  %v5723_v27 = vsel %vm870_vm3, %v13036_v2, 0 }
0x1a58   :  { %v5465_v52 = vmul.f32 1.442695, %v5437_v46 }
0x1a5e   :  { %5690 = vrot.lane.b32.xlu0 %v14726_v11, %s9913_s6  ;;  %5692 = vrot.lane.b32.xlu1 %v14727_v36, %s9913_s6  ;;  %v5449_v11 = vmul.f32 1.442695, %v5429_v6  ;;  %v5435_v36 = vsub.f32 %v13175_v61, %v5414_v37  ;;  %v13270_v61 = vpop.permute.xlu1 %5688 }
0x1a60   :  { %9697 = vpow2.f32 %v5449_v11  ;;  %v5461_v47 = vmul.f32 1.442695, %v5435_v36 }
0x1a61   :  { %9699 = vpow2.f32 %v5451_v15  ;;  %v5463_v15 = vmul.f32 1.442695, %v5436_v21 }
0x1a62   :  { %9701 = vpow2.f32 %v5455_v8 }
0x1a63   :  { %9703 = vpow2.f32 %v5461_v47 }
0x1a64   :  { %9705 = vpow2.f32 %v5469_v32 }
0x1a65   :  { %9707 = vpow2.f32 %v5457_v50 }
0x1a66   :  { %9709 = vpow2.f32 %v5465_v52 }
0x1a67   :  { %9711 = vpow2.f32 %v5463_v15 }
0x1a6a   :  { %v13274_v8 = vpop.eup %9697 }
0x1a6b   :  { %v13276_v62 = vpop.eup %9699 }
0x1a6c   :  { %v13281_v6 = vpop.eup %9701 }
0x1a6d   :  { %v13283_v48 = vpop.eup %9703 }
0x1a6e   :  { %v13288_v9 = vpop.eup %9705 }
0x1a6f   :  { %v13290_v20 = vpop.eup %9707 }
0x1a70   :  { %v13294_v29 = vpop.eup %9709 }
0x1a71   :  { %v13296_v11 = vpop.eup %9711 }
0x1a7d   :  { %5485 = vadd.xlane.f32.xlu0 %v13268_v23 }
0x1a80   :  { %v5424_v37 = vpop.xlane.xlu1 %5423 }
0x1a81   :  { %v5440_v56 = vsub.f32 %v13225_v30, %v5424_v37  ;;  %5481 = vadd.xlane.f32.xlu0 %v13274_v8 }
0x1a82   :  { %5483 = vadd.xlane.f32.xlu1 %v13276_v62 }
0x1a83   :  { %v5471_v45 = vmul.f32 1.442695, %v5440_v56 }
0x1a84   :  { %v5420_v51 = vpop.xlane.xlu1 %5419 }
0x1a85   :  { %9713 = vpow2.f32 %v5471_v45  ;;  %v5438_v31 = vsub.f32 %v13234_v44, %v5420_v51  ;;  %5487 = vadd.xlane.f32.xlu0 %v13281_v6 }
0x1a86   :  { %5493 = vadd.xlane.f32.xlu1 %v13283_v48  ;;  %9715 = vpow2.f32 %v5459_v4 }
0x1a87   :  { %v5467_v30 = vmul.f32 1.442695, %v5438_v31 }
0x1a89   :  { %5501 = vadd.xlane.f32.xlu0 %v13288_v9  ;;  %9717 = vpow2.f32 %v5467_v30 }
0x1a8a   :  { %5489 = vadd.xlane.f32.xlu1 %v13290_v20 }
0x1a8d   :  { %5497 = vadd.xlane.f32.xlu0 %v13294_v29 }
0x1a8e   :  { %5495 = vadd.xlane.f32.xlu1 %v13296_v11 }
0x1a8f   :  { %v13300_v44 = vpop.eup %9713 }
0x1a90   :  { %v13302_v36 = vpop.eup %9715 }
0x1a91   :  { %5503 = vadd.xlane.f32.xlu0 %v13300_v44 }
0x1a92   :  { %5491 = vadd.xlane.f32.xlu1 %v13302_v36 }
0x1a93   :  { %v13306_v49 = vpop.eup %9717 }
0x1a96   :  { %5499 = vadd.xlane.f32.xlu1 %v13306_v49 }
0x1aa7   :  { %5696 = vrot.lane.b32.xlu1 %v12422_v55, %s9913_s6  ;;  %5694 = vrot.lane.b32.xlu0 %v12426_v33, %s9913_s6 }
0x1aab   :  { %5668 = vrot.lane.b32.xlu1 %v12342_v58, %s9913_s6  ;;  %5666 = vrot.lane.b32.xlu0 %v12346_v26, %s9913_s6  ;;  %v5687_v58 = vpop.permute.xlu0 %5686 }
0x1aaf   :  { %5672 = vrot.lane.b32.xlu1 %v12370_v43, %s9913_s6  ;;  %5670 = vrot.lane.b32.xlu0 %v12374_v12, %s9913_s6 }
0x1ab3   :  { %5676 = vrot.lane.b32.xlu1 %v12396_v3, %s9913_s6  ;;  %5674 = vrot.lane.b32.xlu0 %v12400_v25, %s9913_s6 }
0x1ab7   :  { %5680 = vrot.lane.b32.xlu1 %v12420_v1, %s9913_s6  ;;  %5678 = vrot.lane.b32.xlu0 %v12424_v7, %s9913_s6 }
0x1abb   :  { %5997 = vrot.lane.b32.xlu1 %v12435_v16, %s9913_s6  ;;  %5995 = vrot.lane.b32.xlu0 %v12437_v5, %s9913_s6 }
0x1abf   :  { %5999 = vrot.lane.b32.xlu0 %v12449_v34, %s9913_s6 }
0x1ad2   :  { %v5478_v26 = vpop.xlane.xlu1 %5477 }
0x1ad5   :  { %v5476_v43 = vpop.xlane.xlu0 %5475 }
0x1ad6   :  { %9719 = vrcp.f32 %v5476_v43  ;;  %v5474_v12 = vpop.xlane.xlu1 %5473 }
0x1ad7   :  { %9721 = vrcp.f32 %v5474_v12 }
0x1ad8   :  { %9723 = vrcp.f32 %v5478_v26 }
0x1ad9   :  { %v5691_v2 = vpop.permute.xlu0 %5690 }
0x1ada   :  { %v5480_v3 = vpop.xlane.xlu1 %5479 }
0x1adb   :  { %9725 = vrcp.f32 %v5480_v3 }
0x1ae0   :  { %v9720_v25 = vpop.eup %9719 }
0x1ae1   :  { %v9722_v1 = vpop.eup %9721  ;;  %v5522_v55 = vmul.f32 %v9720_v25, %v13246_v57  ;;  %v5726_v57 = vsel %vm870_vm3, %v13237_v18, 0 }
0x1ae2   :  { %v5521_v7 = vmul.f32 %v9722_v1, %v13248_v17  ;;  %v9724_v33 = vpop.eup %9723  ;;  %v5732_v17 = vsel %vm870_vm3, %v13270_v61, 0 }
0x1ae3   :  { %v5523_v34 = vmul.f32 %v9724_v33, %v13243_v54  ;;  %v5729_v54 = vsel %vm870_vm3, %v5687_v58, 0 }
0x1ae4   :  { %v5537_v16 = vpack.c.bf16 %v5522_v55, %v5521_v7 }
0x1ae5   :  { %v9726_v5 = vpop.eup %9725 }
0x1ae6   :  { %v5524_v47 = vmul.f32 %v9726_v5, %v13252_v59  ;;  %8750 = vmatprep.mubr.bf16.mxu0 %v5537_v16  ;;  %v5735_v59 = vsel %vm870_vm3, %v5691_v2, 0 }
0x1ae8   :  { %v5538_v38 = vpack.c.bf16 %v5524_v47, %v5523_v34 }
0x1aea   :  { %8751 = vmatmul.mubr.bf16.vlgmr.msra.gmra.mrb[192].mxu0 %v5538_v38 }
0x1aeb   :  { %8767 = vmatpush3.bf16.xpose.msra.mxu0 %v5723_v27 }
0x1aec   :  { %8951 = vmatprep.subr.msk.bf16.mxu0 %vm870_vm3, %v13237_v18  ;;  %v5693_v18 = vpop.permute.xlu1 %5692 }
0x1aed   :  { %v5738_v50 = vsel %vm870_vm3, %v5693_v18, 0 }
0x1af3   :  { %8769 = vmatpush3.bf16.xpose.msra.mxu0 %v5726_v57 }
0x1af4   :  { %8952 = vmatprep.subr.msk.bf16.mxu0 %vm870_vm3, %v5687_v58 }
0x1afb   :  { %8771 = vmatpush3.bf16.xpose.msra.mxu0 %v5729_v54 }
0x1afc   :  { %8953 = vmatprep.subr.msk.bf16.mxu0 %vm870_vm3, %v13270_v61 }
0x1b03   :  { %8773 = vmatpush3.bf16.xpose.msra.mxu0 %v5732_v17 }
0x1b04   :  { %8954 = vmatprep.subr.msk.bf16.mxu0 %vm870_vm3, %v5691_v2 }
0x1b0a   :  { %v5486_v32 = vpop.xlane.xlu0 %5485 }
0x1b0b   :  { %8775 = vmatpush3.bf16.xpose.msra.mxu0 %v5735_v59 }
0x1b0c   :  { %8955 = vmatprep.subr.msk.bf16.mxu0 %vm870_vm3, %v5693_v18 }
0x1b0e   :  { %v5482_v46 = vpop.xlane.xlu0 %5481 }
0x1b0f   :  { %9727 = vrcp.f32 %v5482_v46  ;;  %v5484_v21 = vpop.xlane.xlu1 %5483 }
0x1b10   :  { %9729 = vrcp.f32 %v5484_v21 }
0x1b11   :  { %9731 = vrcp.f32 %v5486_v32 }
0x1b12   :  { %v5488_v52 = vpop.xlane.xlu0 %5487 }
0x1b13   :  { %8777 = vmatpush3.bf16.xpose.msra.mxu0 %v5738_v50  ;;  %9733 = vrcp.f32 %v5488_v52  ;;  %v5494_v61 = vpop.xlane.xlu1 %5493 }
0x1b16   :  { %v5502_v15 = vpop.xlane.xlu0 %5501 }
0x1b17   :  { %v5490_v14 = vpop.xlane.xlu1 %5489 }
0x1b19   :  { %v9728_v37 = vpop.eup %9727 }
0x1b1a   :  { %v9730_v56 = vpop.eup %9729  ;;  %v5498_v4 = vpop.xlane.xlu0 %5497  ;;  %v5525_v45 = vmul.f32 %v9728_v37, %v13274_v8 }
0x1b1b   :  { %v9732_v51 = vpop.eup %9731  ;;  %v5496_v31 = vpop.xlane.xlu1 %5495  ;;  %v5526_v30 = vmul.f32 %v9730_v56, %v13276_v62 }
0x1b1c   :  { %9735 = vrcp.f32 %v5496_v31  ;;  %v5527_v12 = vmul.f32 %v9732_v51, %v13268_v23 }
0x1b1d   :  { %v9734_v58 = vpop.eup %9733  ;;  %v5539_v26 = vpack.c.bf16 %v5526_v30, %v5525_v45  ;;  %9737 = vrcp.f32 %v5490_v14 }
0x1b1e   :  { %v5504_v43 = vpop.xlane.xlu0 %5503  ;;  %v5528_v3 = vmul.f32 %v9734_v58, %v13281_v6  ;;  %9739 = vrcp.f32 %v5494_v61 }
0x1b1f   :  { %v5492_v25 = vpop.xlane.xlu1 %5491  ;;  %8754 = vmatprep.mubr.bf16.mxu0 %v5539_v26 }
0x1b20   :  { %9741 = vrcp.f32 %v5492_v25  ;;  %v5540_v1 = vpack.c.bf16 %v5528_v3, %v5527_v12 }
0x1b21   :  { %9743 = vrcp.f32 %v5498_v4 }
0x1b22   :  { %8755 = vmatmul.mubr.bf16.gmra.mrb[196].mxu0 %v5540_v1  ;;  %v5695_v8 = vpop.permute.xlu0 %5694 }
0x1b23   :  { %v5500_v55 = vpop.xlane.xlu1 %5499  ;;  %8956 = vmatprep.subr.msk.bf16.mxu0 %vm870_vm3, %v5695_v8  ;;  %v5741_v62 = vsel %vm870_vm3, %v5695_v8, 0 }
0x1b24   :  { %9745 = vrcp.f32 %v5500_v55  ;;  %8779 = vmatpush3.bf16.xpose.msra.mxu0 %v5741_v62 }
0x1b25   :  { %9747 = vrcp.f32 %v5504_v43 }
0x1b26   :  { %v5667_v7 = vpop.permute.xlu0 %5666  ;;  %v9736_v23 = vpop.eup %9735  ;;  %9749 = vrcp.f32 %v5502_v15 }
0x1b27   :  { %v5697_v6 = vpop.permute.xlu1 %5696  ;;  %v9738_v33 = vpop.eup %9737  ;;  %v5532_v47 = vmul.f32 %v9736_v23, %v13296_v11 }
0x1b28   :  { %8957 = vmatprep.subr.msk.bf16.mxu0 %vm870_vm3, %v5697_v6  ;;  %v9740_v16 = vpop.eup %9739  ;;  %v5744_v27 = vsel %vm870_vm3, %v5697_v6, 0  ;;  %v5529_v57 = vmul.f32 %v9738_v33, %v13290_v20 }
0x1b29   :  { %v5531_v2 = vmul.f32 %v9740_v16, %v13283_v48 }
0x1b2a   :  { %v9742_v5 = vpop.eup %9741  ;;  %v5671_v34 = vpop.permute.xlu0 %5670 }
0x1b2b   :  { %v5669_v38 = vpop.permute.xlu1 %5668  ;;  %v5530_v54 = vmul.f32 %v9742_v5, %v13302_v36  ;;  %v9744_v17 = vpop.eup %9743  ;;  %v5542_v46 = vpack.c.bf16 %v5532_v47, %v5531_v2 }
0x1b2c   :  { %8781 = vmatpush3.bf16.xpose.msra.mxu0 %v5744_v27  ;;  %v5533_v11 = vmul.f32 %v9744_v17, %v13294_v29 }
0x1b2d   :  { %v5541_v59 = vpack.c.bf16 %v5530_v54, %v5529_v57 }
0x1b2e   :  { %v9746_v32 = vpop.eup %9745  ;;  %v5675_v18 = vpop.permute.xlu0 %5674 }
0x1b2f   :  { %v9748_v21 = vpop.eup %9747  ;;  %v5673_v50 = vpop.permute.xlu1 %5672  ;;  %8758 = vmatprep.mubr.bf16.mxu0 %v5541_v59  ;;  %v5534_v52 = vmul.f32 %v9746_v32, %v13306_v49 }
0x1b30   :  { %8759 = vmatmul.mubr.bf16.gmra.mrb[200].mxu0 %v5542_v46  ;;  %v9750_v61 = vpop.eup %9749  ;;  %v5536_v36 = vmul.f32 %v9748_v21, %v13300_v44 }
0x1b31   :  { %v5543_v20 = vpack.c.bf16 %v5534_v52, %v5533_v11  ;;  %v5535_v48 = vmul.f32 %v9750_v61, %v13288_v9 }
0x1b32   :  { %v5679_v15 = vpop.permute.xlu0 %5678 }
0x1b33   :  { %v5677_v14 = vpop.permute.xlu1 %5676  ;;  %8762 = vmatprep.mubr.bf16.mxu0 %v5543_v20  ;;  %v5544_v56 = vpack.c.bf16 %v5536_v36, %v5535_v48 }
0x1b36   :  { %v5996_v37 = vpop.permute.xlu0 %5995 }
0x1b37   :  { %v5681_v4 = vpop.permute.xlu1 %5680  ;;  %8798 = vmatprep.subr.bf16.mxu1 %v5996_v37 }
0x1b38   :  { %8763 = vmatmul.mubr.bf16.gmra.mrb[204].mxu0 %v5544_v56  ;;  %8799 = vmatpush3.bf16.msra.mxu1 %v5996_v37 }
0x1b39   :  { %8782 = vmatprep.mubr.msk.bf16.mxu0 %vm870_vm3, %v5667_v7 }
0x1b3a   :  { %v6000_v49 = vpop.permute.xlu0 %5999 }
0x1b3b   :  { %v5998_v29 = vpop.permute.xlu1 %5997 }
0x1b3c   :  { %8800 = vmatprep.subr.bf16.mxu1 %v5998_v29 }
0x1b3d   :  { %8801 = vmatpush3.bf16.msra.mxu1 %v5998_v29 }
0x1b3e   :  { %8802 = vmatprep.subr.bf16.mxu1 %v6000_v49 }
0x1b40   :  { %8783 = vmatmul.mubr.msk.bf16.vlgmr.msra.gmra.mrb[208].mxu0 %vm870_vm3, %v5669_v38 }
0x1b41   :  { %8786 = vmatprep.mubr.msk.bf16.mxu0 %vm870_vm3, %v5671_v34  ;;  %8803 = vmatpush3.bf16.msra.mxu1 %v6000_v49 }
0x1b48   :  { %8787 = vmatmul.mubr.msk.bf16.gmra.mrb[212].mxu0 %vm870_vm3, %v5673_v50 }
0x1b49   :  { %8790 = vmatprep.mubr.msk.bf16.mxu0 %vm870_vm3, %v5675_v18 }
0x1b50   :  { %8791 = vmatmul.mubr.msk.bf16.gmra.mrb[216].mxu0 %vm870_vm3, %v5677_v14 }
0x1b51   :  { %8794 = vmatprep.mubr.msk.bf16.mxu0 %vm870_vm3, %v5679_v15 }
0x1b58   :  { %8795 = vmatmul.mubr.msk.bf16.gmra.mrb[220].mxu0 %vm870_vm3, %v5681_v4 }
0x1bbd   :  { %v13379_v9 = vpop.f32.mrb[192].mxu0 }
0x1bbe   :  { %v13381_v44 = vpop.f32.mrb[193].mxu0 }
0x1bbf   :  { %v13383_v45 = vpop.f32.mrb[194].mxu0 }
0x1bc0   :  { %v9099_v51 = vpack.i.bf16 %v13383_v45, %v13379_v9  ;;  %v13387_v31 = vpop.f32.mrb[195].mxu0  ;;  %v14758_v45 = vld [vmem:[#allocation40_spill] sm:$0xff] }
0x1bc1   :  { %v9094_v30 = vpack.i.bf16 %v13387_v31, %v13381_v44 }
0x1bf5   :  { %v13391_v58 = vpop.f32.mrb[196].mxu0 }
0x1bf6   :  { %v13393_v26 = vpop.f32.mrb[197].mxu0 }
0x1bf7   :  { %v13395_v43 = vpop.f32.mrb[198].mxu0 }
0x1bf8   :  { %v9119_v12 = vpack.i.bf16 %v13395_v43, %v13391_v58  ;;  %v13399_v3 = vpop.f32.mrb[199].mxu0  ;;  %v14761_v58 = vld [vmem:[#allocation17_spill] sm:$0xff]  ;;  %v14762_v43 = vld [vmem:[#allocation15_spill] sm:$0xff] }
0x1bf9   :  { %v9114_v25 = vpack.i.bf16 %v13399_v3, %v13393_v26 }
0x1c03   :  { %v13403_v1 = vpop.f32.mrb[200].mxu0 }
0x1c04   :  { %v13405_v8 = vpop.f32.mrb[201].mxu0 }
0x1c05   :  { %v13407_v55 = vpop.f32.mrb[202].mxu0 }
0x1c06   :  { %v9149_v62 = vpack.i.bf16 %v13407_v55, %v13403_v1  ;;  %v13411_v7 = vpop.f32.mrb[203].mxu0 }
0x1c07   :  { %v9144_v23 = vpack.i.bf16 %v13411_v7, %v13405_v8 }
0x1c0b   :  { %v13415_v6 = vpop.f32.mrb[204].mxu0 }
0x1c0c   :  { %v13417_v33 = vpop.f32.mrb[205].mxu0 }
0x1c0d   :  { %v13419_v16 = vpop.f32.mrb[206].mxu0 }
0x1c0e   :  { %v9189_v5 = vpack.i.bf16 %v13419_v16, %v13415_v6  ;;  %v13423_v34 = vpop.f32.mrb[207].mxu0 }
0x1c0f   :  { %v9184_v47 = vpack.i.bf16 %v13423_v34, %v13417_v33 }
0x1c13   :  { %v8784_v38 = vpop.f32.mrb[208].mxu0 }
0x1c14   :  { %v5789_v27 = vadd.f32 %v13092_v35, %v8784_v38  ;;  %v5780_v57 = vpop.f32.mrb[209].mxu0 }
0x1c15   :  { %v8785_v54 = vpop.f32.mrb[210].mxu0  ;;  %v5781_v59 = vadd.f32 %v13109_v60, %v5780_v57 }
0x1c16   :  { %5847 = vmax.xlane.f32.xlu0 %v5789_v27  ;;  %v5783_v17 = vpop.f32.mrb[211].mxu0  ;;  %v5792_v18 = vadd.f32 %v13119_v40, %v8785_v54 }
0x1c17   :  { %v5784_v2 = vadd.f32 %v13101_v22, %v5783_v17 }
0x1c19   :  { %5845 = vmax.xlane.f32.xlu1 %v5784_v2 }
0x1c1a   :  { %5843 = vmax.xlane.f32.xlu0 %v5781_v59 }
0x1c1b   :  { %v8788_v32 = vpop.f32.mrb[212].mxu0 }
0x1c1c   :  { %v5796_v46 = vpop.f32.mrb[213].mxu0  ;;  %v5805_v11 = vadd.f32 %v13136_v10, %v8788_v32 }
0x1c1d   :  { %v8789_v21 = vpop.f32.mrb[214].mxu0  ;;  %v5797_v52 = vadd.f32 %v13154_v28, %v5796_v46 }
0x1c1e   :  { %v13432_v50 = vadd.f32 %v13127_v24, %v8789_v21  ;;  %5849 = vmax.xlane.f32.xlu0 %v5792_v18  ;;  %v5799_v35 = vpop.f32.mrb[215].mxu0 }
0x1c1f   :  { %v5800_v22 = vadd.f32 %v13145_v39, %v5799_v35 }
0x1c20   :  { %5857 = vmax.xlane.f32.xlu1 %v13432_v50 }
0x1c22   :  { %5855 = vmax.xlane.f32.xlu0 %v5805_v11 }
0x1c23   :  { %v8792_v60 = vpop.f32.mrb[216].mxu0 }
0x1c24   :  { %5853 = vmax.xlane.f32.xlu1 %v5800_v22  ;;  %v5812_v61 = vpop.f32.mrb[217].mxu0  ;;  %v5821_v15 = vadd.f32 %v13172_v41, %v8792_v60  ;;  %v14747_v41 = vld [vmem:[#allocation20_spill] sm:$0xff] }
0x1c25   :  { %v8793_v40 = vpop.f32.mrb[218].mxu0  ;;  %v13447_v36 = vadd.f32 %v13190_v19, %v5812_v61  ;;  %v14746_v19 = vld [vmem:[#allocation53_spill] sm:$0xff] }
0x1c26   :  { %v13439_v20 = vadd.f32 %v13163_v42, %v8793_v40  ;;  %5851 = vmax.xlane.f32.xlu0 %v5797_v52  ;;  %v5815_v24 = vpop.f32.mrb[219].mxu0 }
0x1c27   :  { %v13444_v10 = vadd.f32 %v13181_v53, %v5815_v24 }
0x1c28   :  { %5865 = vmax.xlane.f32.xlu1 %v13439_v20 }
0x1c2a   :  { %5863 = vmax.xlane.f32.xlu0 %v5821_v15 }
0x1c2b   :  { %v8796_v39 = vpop.f32.mrb[220].mxu0 }
0x1c2c   :  { %5861 = vmax.xlane.f32.xlu1 %v13444_v10  ;;  %v5828_v28 = vpop.f32.mrb[221].mxu0  ;;  %v13452_v48 = vadd.f32 %v13200_v63, %v8796_v39  ;;  %v14748_v63 = vld [vmem:[#allocation52_spill] sm:$0xff] }
0x1c2d   :  { %v8797_v14 = vpop.f32.mrb[222].mxu0  ;;  %v13456_v53 = vadd.f32 %v13209_v13, %v5828_v28  ;;  %v14749_v13 = vld [vmem:[#allocation51_spill] sm:$0xff] }
0x1c2e   :  { %5859 = vmax.xlane.f32.xlu0 %v13447_v36  ;;  %v5831_v42 = vpop.f32.mrb[223].mxu0  ;;  %v13464_v37 = vadd.f32 %v14747_v41, %v8797_v14 }
0x1c2f   :  { %v13468_v56 = vadd.f32 %v14748_v63, %v5831_v42 }
0x1c32   :  { %5871 = vmax.xlane.f32.xlu0 %v13452_v48 }
0x1c36   :  { %5867 = vmax.xlane.f32.xlu0 %v13456_v53 }
0x1c3d   :  { %6003 = vrot.lane.b32.xlu1 %v12461_v0, %s9913_s6 }
0x1c4c   :  { %6001 = vrot.lane.b32.xlu0 %v14746_v19, %s9913_s6 }
0x1c61   :  { %5873 = vmax.xlane.f32.xlu1 %v13464_v37 }
0x1c65   :  { %5869 = vmax.xlane.f32.xlu1 %v13468_v56 }
0x1c76   :  { %6005 = vrot.lane.b32.xlu1 %v14749_v13, %s9913_s6 }
0x1ca3   :  { %v5848_v4 = vpop.xlane.xlu0 %5847 }
0x1ca4   :  { %v5877_v29 = vsub.f32 %v5789_v27, %v5848_v4 }
0x1ca6   :  { %v5895_v49 = vmul.f32 1.442695, %v5877_v29  ;;  %v5846_v38 = vpop.xlane.xlu1 %5845 }
0x1ca7   :  { %v5844_v0 = vpop.xlane.xlu0 %5843  ;;  %v5876_v17 = vsub.f32 %v5784_v2, %v5846_v38 }
0x1ca8   :  { %9751 = vpow2.f32 %v5895_v49  ;;  %v5875_v57 = vsub.f32 %v5781_v59, %v5844_v0 }
0x1ca9   :  { %v5893_v60 = vmul.f32 1.442695, %v5876_v17 }
0x1caa   :  { %v5891_v54 = vmul.f32 1.442695, %v5875_v57 }
0x1cab   :  { %v5850_v32 = vpop.xlane.xlu0 %5849 }
0x1cac   :  { %9753 = vpow2.f32 %v5891_v54  ;;  %v5878_v46 = vsub.f32 %v5792_v18, %v5850_v32 }
0x1cad   :  { %v5858_v21 = vpop.xlane.xlu1 %5857 }
0x1cae   :  { %v5897_v35 = vmul.f32 1.442695, %v5878_v46  ;;  %v5882_v2 = vsub.f32 %v13432_v50, %v5858_v21 }
0x1caf   :  { %v5856_v61 = vpop.xlane.xlu0 %5855 }
0x1cb0   :  { %9755 = vpow2.f32 %v5897_v35  ;;  %v5881_v40 = vsub.f32 %v5805_v11, %v5856_v61  ;;  %v5905_v63 = vmul.f32 1.442695, %v5882_v2 }
0x1cb1   :  { %v5854_v24 = vpop.xlane.xlu1 %5853  ;;  %9757 = vpow2.f32 %v5893_v60 }
0x1cb2   :  { %v13473_v39 = vpop.eup %9751  ;;  %v5903_v27 = vmul.f32 1.442695, %v5881_v40  ;;  %v5880_v28 = vsub.f32 %v5800_v22, %v5854_v24 }
0x1cb3   :  { %5927 = vadd.xlane.f32.xlu1 %v13473_v39  ;;  %v5852_v59 = vpop.xlane.xlu0 %5851 }
0x1cb4   :  { %9759 = vpow2.f32 %v5903_v27  ;;  %v5901_v14 = vmul.f32 1.442695, %v5880_v28  ;;  %v5879_v18 = vsub.f32 %v5797_v52, %v5852_v59 }
0x1cb5   :  { %v5866_v41 = vpop.xlane.xlu1 %5865 }
0x1cb6   :  { %v13477_v42 = vpop.eup %9753  ;;  %v5899_v19 = vmul.f32 1.442695, %v5879_v18  ;;  %9761 = vpow2.f32 %v5901_v14  ;;  %v5886_v4 = vsub.f32 %v13439_v20, %v5866_v41  ;;  %v14750_v14 = vld [vmem:[#allocation38_spill] sm:$0xff] }
0x1cb7   :  { %5923 = vadd.xlane.f32.xlu1 %v13477_v42  ;;  %v5864_v11 = vpop.xlane.xlu0 %5863  ;;  %v14751_v18 = vld [vmem:[#allocation14_spill] sm:$0xff] }
0x1cb8   :  { %9763 = vpow2.f32 %v5899_v19  ;;  %v5885_v22 = vsub.f32 %v5821_v15, %v5864_v11  ;;  %v5913_v54 = vmul.f32 1.442695, %v5886_v4  ;;  %v14752_v19 = vld [vmem:[#allocation12_spill] sm:$0xff]  ;;  %v14755_v4 = vld [vmem:[#allocation41_spill] sm:$0xff] }
0x1cb9   :  { %9765 = vpow2.f32 %v5905_v63  ;;  %v5862_v52 = vpop.xlane.xlu1 %5861  ;;  %v14753_v41 = vpack.i.bf16 %v14751_v18, %v14752_v19  ;;  %v14754_v11 = vld [vmem:[#allocation36_spill] sm:$0xff] }
0x1cba   :  { %v13480_v13 = vpop.eup %9755  ;;  %v5911_v29 = vmul.f32 1.442695, %v5885_v22  ;;  %v5884_v15 = vsub.f32 %v13444_v10, %v5862_v52 }
0x1cbb   :  { %5929 = vadd.xlane.f32.xlu1 %v13480_v13  ;;  %v5860_v50 = vpop.xlane.xlu0 %5859  ;;  %v13485_v0 = vpop.eup %9757 }
0x1cbc   :  { %v5883_v49 = vsub.f32 %v13447_v36, %v5860_v50  ;;  %9767 = vpow2.f32 %v5911_v29  ;;  %v5909_v21 = vmul.f32 1.442695, %v5884_v15  ;;  %v14756_v29 = vld [vmem:[#allocation16_spill] sm:$0xff] }
0x1cbd   :  { %v6004_v24 = vpop.permute.xlu1 %6003  ;;  %v14757_v50 = vpack.i.bf16 %v14755_v4, %v14756_v29 }
0x1cbe   :  { %v13487_v38 = vpop.eup %9759  ;;  %v5907_v57 = vmul.f32 1.442695, %v5883_v49 }
0x1cbf   :  { %5925 = vadd.xlane.f32.xlu1 %v13485_v0  ;;  %5935 = vadd.xlane.f32.xlu0 %v13487_v38  ;;  %v5872_v20 = vpop.xlane.xlu0 %5871 }
0x1cc0   :  { %9769 = vpow2.f32 %v5907_v57  ;;  %v5889_v17 = vsub.f32 %v13452_v48, %v5872_v20  ;;  %v13493_v32 = vpop.eup %9761  ;;  %v14767_v20 = vld [vmem:[#allocation45_spill] sm:$0xff] }
0x1cc1   :  { %9771 = vpow2.f32 %v5913_v54  ;;  %v14765_v54 = vld [vmem:[#allocation37_spill] sm:$0xff] }
0x1cc2   :  { %v13495_v36 = vpop.eup %9763  ;;  %v5919_v46 = vmul.f32 1.442695, %v5889_v17  ;;  %v14768_v17 = vld [vmem:[#allocation39_spill] sm:$0xff] }
0x1cc3   :  { %5933 = vadd.xlane.f32.xlu1 %v13493_v32  ;;  %5931 = vadd.xlane.f32.xlu0 %v13495_v36  ;;  %v5868_v10 = vpop.xlane.xlu0 %5867  ;;  %v13500_v60 = vpop.eup %9765 }
0x1cc4   :  { %9773 = vpow2.f32 %v5919_v46  ;;  %v5887_v35 = vsub.f32 %v13456_v53, %v5868_v10  ;;  %v14769_v46 = vpack.i.bf16 %v14767_v20, %v14768_v17 }
0x1cc5   :  { %9775 = vpow2.f32 %v5909_v21 }
0x1cc6   :  { %v5915_v61 = vmul.f32 1.442695, %v5887_v35  ;;  %v13503_v40 = vpop.eup %9767 }
0x1cc7   :  { %5937 = vadd.xlane.f32.xlu0 %v13500_v60  ;;  %v6002_v48 = vpop.permute.xlu0 %6001 }
0x1cc8   :  { %9777 = vpow2.f32 %v5915_v61  ;;  %8804 = vmatprep.subr.bf16.mxu1 %v6002_v48 }
0x1cc9   :  { %8805 = vmatpush3.bf16.msra.mxu1 %v6002_v48 }
0x1cca   :  { %v13505_v27 = vpop.eup %9769  ;;  %8806 = vmatprep.subr.bf16.mxu1 %v6004_v24 }
0x1ccb   :  { %5943 = vadd.xlane.f32.xlu0 %v13503_v40  ;;  %5939 = vadd.xlane.f32.xlu1 %v13505_v27  ;;  %v13509_v53 = vpop.eup %9771 }
0x1ccd   :  { %8807 = vmatpush3.bf16.msra.mxu1 %v6004_v24 }
0x1cce   :  { %v13511_v28 = vpop.eup %9773 }
0x1ccf   :  { %5945 = vadd.xlane.f32.xlu0 %v13509_v53  ;;  %5951 = vadd.xlane.f32.xlu1 %v13511_v28  ;;  %v13515_v59 = vpop.eup %9775 }
0x1cd2   :  { %v13517_v2 = vpop.eup %9777 }
0x1cd3   :  { %5941 = vadd.xlane.f32.xlu0 %v13515_v59  ;;  %5947 = vadd.xlane.f32.xlu1 %v13517_v2 }
0x1ce4   :  { %6009 = vrot.lane.b32.xlu1 %v14750_v14, %s9913_s6 }
0x1ce8   :  { %9090 = vrot.lane.b32.xlu1 %v14753_v41, %s9914_s1 }
0x1ce9   :  { %6007 = vrot.lane.b32.xlu0 %v14754_v11, %s9913_s6 }
0x1cec   :  { %9095 = vrot.lane.b32.xlu1 %v9094_v30, %s9915_s4 }
0x1cee   :  { %v5874_v63 = vpop.xlane.xlu1 %5873 }
0x1cef   :  { %v5890_v44 = vsub.f32 %v13464_v37, %v5874_v63  ;;  %v14764_v37 = vld [vmem:[#allocation35_spill] sm:$0xff] }
0x1cf0   :  { %9100 = vrot.lane.b32.xlu1 %v9099_v51, %s9915_s4  ;;  %v14759_v51 = vld [vmem:[#allocation42_spill] sm:$0xff]  ;;  %v14766_v15 = vpack.i.bf16 %v14764_v37, %v14765_v54 }
0x1cf1   :  { %v14760_v31 = vpack.i.bf16 %v14758_v45, %v14759_v51  ;;  %v5921_v30 = vmul.f32 1.442695, %v5890_v44 }
0x1cf2   :  { %v5870_v22 = vpop.xlane.xlu1 %5869 }
0x1cf3   :  { %v5888_v52 = vsub.f32 %v13468_v56, %v5870_v22 }
0x1cf4   :  { %9110 = vrot.lane.b32.xlu1 %v14757_v50, %s9914_s1 }
0x1cf5   :  { %v5917_v9 = vmul.f32 1.442695, %v5888_v52 }
0x1cf6   :  { %v6006_v49 = vpop.permute.xlu1 %6005 }
0x1cf7   :  { %8808 = vmatprep.subr.bf16.mxu1 %v6006_v49  ;;  %9779 = vpow2.f32 %v5917_v9 }
0x1cf8   :  { %9120 = vrot.lane.b32.xlu1 %v9119_v12, %s9915_s4  ;;  %8809 = vmatpush3.bf16.msra.mxu1 %v6006_v49  ;;  %9781 = vpow2.f32 %v5921_v30  ;;  %v14763_v12 = vpack.i.bf16 %v14761_v58, %v14762_v43 }
0x1cfc   :  { %9130 = vrot.lane.b32.xlu1 %v14760_v31, %s9914_s1 }
0x1d01   :  { %v13551_v56 = vpop.eup %9779 }
0x1d02   :  { %v13554_v57 = vpop.eup %9781 }
0x1d08   :  { %5949 = vadd.xlane.f32.xlu0 %v13551_v56 }
0x1d0c   :  { %5953 = vadd.xlane.f32.xlu0 %v13554_v57 }
0x1d22   :  { %9085 = vrot.lane.b32.xlu0 %v14763_v12, %s9914_s1 }
0x1d26   :  { %9105 = vrot.lane.b32.xlu0 %v14766_v15, %s9914_s1 }
0x1d2a   :  { %9115 = vrot.lane.b32.xlu0 %v9114_v25, %s9915_s4 }
0x1d2e   :  { %9125 = vrot.lane.b32.xlu0 %v14769_v46, %s9914_s1 }
0x1d40   :  { %v5928_v21 = vpop.xlane.xlu1 %5927 }
0x1d44   :  { %v5924_v10 = vpop.xlane.xlu1 %5923 }
0x1d45   :  { %9783 = vrcp.f32 %v5924_v10 }
0x1d48   :  { %v5930_v35 = vpop.xlane.xlu1 %5929 }
0x1d4c   :  { %v5926_v61 = vpop.xlane.xlu1 %5925  ;;  %v5936_v48 = vpop.xlane.xlu0 %5935 }
0x1d4d   :  { %9785 = vrcp.f32 %v5926_v61 }
0x1d4e   :  { %9787 = vrcp.f32 %v5930_v35 }
0x1d4f   :  { %v9784_v19 = vpop.eup %9783 }
0x1d50   :  { %v5932_v24 = vpop.xlane.xlu0 %5931  ;;  %v5934_v14 = vpop.xlane.xlu1 %5933  ;;  %v5971_v3 = vmul.f32 %v9784_v19, %v13477_v42 }
0x1d51   :  { %9789 = vrcp.f32 %v5934_v14 }
0x1d52   :  { %9791 = vrcp.f32 %v5932_v24 }
0x1d53   :  { %9793 = vrcp.f32 %v5928_v21 }
0x1d54   :  { %v5938_v18 = vpop.xlane.xlu0 %5937 }
0x1d55   :  { %9795 = vrcp.f32 %v5938_v18 }
0x1d57   :  { %v9786_v41 = vpop.eup %9785 }
0x1d58   :  { %v5940_v11 = vpop.xlane.xlu1 %5939  ;;  %v5944_v26 = vpop.xlane.xlu0 %5943  ;;  %v5972_v25 = vmul.f32 %v9786_v41, %v13485_v0 }
0x1d59   :  { %v9788_v52 = vpop.eup %9787 }
0x1d5a   :  { %v5987_v63 = vpack.c.bf16 %v5972_v25, %v5971_v3  ;;  %v5974_v45 = vmul.f32 %v9788_v52, %v13480_v13 }
0x1d5b   :  { %v9790_v49 = vpop.eup %9789 }
0x1d5c   :  { %8814 = vmatprep.mubr.bf16.mxu1 %v5987_v63  ;;  %v5952_v22 = vpop.xlane.xlu1 %5951  ;;  %v5946_v4 = vpop.xlane.xlu0 %5945  ;;  %v5976_v31 = vmul.f32 %v9790_v49, %v13493_v32 }
0x1d5d   :  { %v9792_v9 = vpop.eup %9791 }
0x1d5e   :  { %v9794_v42 = vpop.eup %9793  ;;  %v5975_v51 = vmul.f32 %v9792_v9, %v13495_v36  ;;  %v14772_v9 = vld [vmem:[#allocation21_spill] sm:$0xff] }
0x1d5f   :  { %v5973_v30 = vmul.f32 %v9794_v42, %v13473_v39  ;;  %v9796_v43 = vpop.eup %9795  ;;  %v14775_v42 = vld [vmem:[#allocation33_spill] sm:$0xff] }
0x1d60   :  { %v5948_v29 = vpop.xlane.xlu1 %5947  ;;  %v5942_v50 = vpop.xlane.xlu0 %5941  ;;  %v5989_v12 = vpack.c.bf16 %v5976_v31, %v5975_v51  ;;  %v5978_v13 = vmul.f32 %v9796_v43, %v13500_v60 }
0x1d61   :  { %9797 = vrcp.f32 %v5942_v50  ;;  %v5988_v58 = vpack.c.bf16 %v5974_v45, %v5973_v30 }
0x1d62   :  { %9799 = vrcp.f32 %v5936_v48 }
0x1d63   :  { %9801 = vrcp.f32 %v5940_v11  ;;  %v9231_v11 = vld [vmem:[%s14378_s13 + $0x10] sm:$0xff]  }
0x1d64   :  { %v6008_v44 = vpop.permute.xlu0 %6007  ;;  %v6010_v0 = vpop.permute.xlu1 %6009  ;;  %9803 = vrcp.f32 %v5946_v4 }
0x1d65   :  { %8810 = vmatprep.subr.bf16.mxu1 %v6008_v44  ;;  %9805 = vrcp.f32 %v5944_v26 }
0x1d66   :  { %8811 = vmatpush3.bf16.msra.mxu1 %v6008_v44  ;;  %9807 = vrcp.f32 %v5948_v29  ;;  %v14771_v44 = vld [vmem:[#allocation43_spill] sm:$0xff] }
0x1d67   :  { %8812 = vmatprep.subr.bf16.mxu1 %v6010_v0  ;;  %v14773_v1 = vpack.i.bf16 %v14771_v44, %v14772_v9 }
0x1d6a   :  { %8813 = vmatpush3.bf16.msra.mxu1 %v6010_v0 }
0x1d6b   :  { %v9798_v37 = vpop.eup %9797  ;;  %8830 = vmatprep.subr.bf16.mxu1 %v9231_v11 }
0x1d6c   :  { %v9800_v54 = vpop.eup %9799  ;;  %v5980_v20 = vmul.f32 %v9798_v37, %v13515_v59  ;;  %v9091_v37 = vpop.permute.xlu1 %9090 }
0x1d6d   :  { %8815 = vmatmul.mubr.bf16.vlgmr.msra.gmra.mrb[192].mxu1 %v5988_v58  ;;  %v9802_v15 = vpop.eup %9801  ;;  %v5977_v36 = vmul.f32 %v9800_v54, %v13487_v38  ;;  %v9093_v33 = vunpack.i.h.bf16 %v9091_v37  ;;  %v9092_v34 = vunpack.i.l.bf16 %v9091_v37 }
0x1d6e   :  { %8818 = vmatprep.mubr.bf16.mxu1 %v5989_v12  ;;  %v5979_v32 = vmul.f32 %v9802_v15, %v13505_v27  ;;  %v9804_v17 = vpop.eup %9803  ;;  %8831 = vmatpush3.bf16.msra.mxu1 %v9231_v11 }
0x1d6f   :  { %v5990_v39 = vpack.c.bf16 %v5978_v13, %v5977_v36  ;;  %v9806_v21 = vpop.eup %9805  ;;  %v5982_v10 = vmul.f32 %v9804_v17, %v13509_v53 }
0x1d70   :  { %v5991_v46 = vpack.c.bf16 %v5980_v20, %v5979_v32  ;;  %v5981_v35 = vmul.f32 %v9806_v21, %v13503_v40  ;;  %v9808_v38 = vpop.eup %9807  ;;  %v9096_v54 = vpop.permute.xlu1 %9095  ;;  %v14777_v21 = vld [vmem:[#allocation47_spill] sm:$0xff] }
0x1d71   :  { %v5983_v48 = vmul.f32 %v9808_v38, %v13517_v2  ;;  %v9232_v2 = vld [vmem:[%s14378_s13 + $0x18] sm:$0xff]   ;;  %v14779_v38 = vld [vmem:[#allocation50_spill] sm:$0xff] }
0x1d72   :  { %v5992_v61 = vpack.c.bf16 %v5982_v10, %v5981_v35  ;;  %8832 = vmatprep.subr.bf16.mxu1 %v9232_v2  ;;  %v6311_v10 = vsel %vm870_vm3, %v14777_v21, %v9093_v33  ;;  %v14778_v35 = vld [vmem:[#allocation44_spill] sm:$0xff] }
0x1d73   :  { %8833 = vmatpush3.bf16.msra.mxu1 %v9232_v2 }
0x1d74   :  { %v9101_v15 = vpop.permute.xlu1 %9100 }
0x1d75   :  { %8819 = vmatmul.mubr.bf16.gmra.mrb[196].mxu1 %v5990_v39  ;;  %v9103_v39 = vunpack.i.h.bf16 %v9101_v15  ;;  %v9102_v17 = vunpack.i.l.bf16 %v9101_v15 }
0x1d76   :  { %8822 = vmatprep.mubr.bf16.mxu1 %v5991_v46 }
0x1d78   :  { %v9111_v16 = vpop.permute.xlu1 %9110 }
0x1d79   :  { %v9113_v11 = vunpack.i.h.bf16 %v9111_v16  ;;  %v9112_v2 = vunpack.i.l.bf16 %v9111_v16 }
0x1d7c   :  { %v9121_v13 = vpop.permute.xlu1 %9120 }
0x1d7d   :  { %8823 = vmatmul.mubr.bf16.gmra.mrb[200].mxu1 %v5992_v61  ;;  %v6310_v61 = vsel %vm870_vm3, %v14778_v35, %v9092_v34 }
0x1d95   :  { %v5950_v60 = vpop.xlane.xlu0 %5949 }
0x1d96   :  { %9809 = vrcp.f32 %v5950_v60  ;;  %v9098_v60 = vunpack.i.h.bf16 %v9096_v54 }
0x1d97   :  { %9811 = vrcp.f32 %v5952_v22 }
0x1d99   :  { %v5954_v59 = vpop.xlane.xlu0 %5953 }
0x1d9a   :  { %9813 = vrcp.f32 %v5954_v59  ;;  %v9097_v59 = vunpack.i.l.bf16 %v9096_v54  ;;  %v14784_v54 = vld [vmem:[#allocation3_spill] sm:$0xff] }
0x1d9d   :  { %v9086_v6 = vpop.permute.xlu0 %9085 }
0x1d9e   :  { %v9088_v36 = vunpack.i.h.bf16 %v9086_v6  ;;  %v9087_v32 = vunpack.i.l.bf16 %v9086_v6 }
0x1da0   :  { %v9810_v27 = vpop.eup %9809 }
0x1da1   :  { %v5984_v24 = vmul.f32 %v9810_v27, %v13551_v56  ;;  %v9812_v14 = vpop.eup %9811  ;;  %v6309_v27 = vsel %vm870_vm3, %v14779_v38, %v9088_v36 }
0x1da2   :  { %v5985_v40 = vmul.f32 %v9812_v14, %v13511_v28 }
0x1da3   :  { %v5993_v18 = vpack.c.bf16 %v5984_v24, %v5983_v48  ;;  %v14780_v48 = vld [vmem:[#allocation49_spill] sm:$0xff] }
0x1da4   :  { %v9814_v19 = vpop.eup %9813  ;;  %v6308_v24 = vsel %vm870_vm3, %v14780_v48, %v9087_v32  ;;  %v14785_v48 = vld [vmem:[#allocation6_spill] sm:$0xff] }
0x1da5   :  { %8826 = vmatprep.mubr.bf16.mxu1 %v5993_v18  ;;  %v5986_v53 = vmul.f32 %v9814_v19, %v13554_v57  ;;  %v6326_v18 = vsel %vm2847_vm4, %v6310_v61, %v9102_v17  ;;  %v6327_v19 = vsel %vm2847_vm4, %v6311_v10, %v9103_v39 }
0x1da7   :  { %v5994_v41 = vpack.c.bf16 %v5986_v53, %v5985_v40 }
0x1da9   :  { %8827 = vmatmul.mubr.bf16.gmra.mrb[204].mxu1 %v5994_v41 }
0x1e40   :  { %v8816_v56 = vpop.f32.mrb[192].mxu1 }
0x1e41   :  { %v6053_v26 = vpop.f32.mrb[193].mxu1 }
0x1e42   :  { %v8817_v3 = vpop.f32.mrb[194].mxu1 }
0x1e43   :  { %v9134_v28 = vpack.i.bf16 %v8817_v3, %v8816_v56  ;;  %v6056_v25 = vpop.f32.mrb[195].mxu1 }
0x1e44   :  { %v9139_v57 = vpack.i.bf16 %v6056_v25, %v6053_v26  ;;  %v6324_v25 = vsel %vm2847_vm4, %v6308_v24, %v9097_v59  ;;  %v14786_v24 = vld [vmem:[#allocation2_spill] sm:$0xff] }
0x1e45   :  { %9135 = vrot.lane.b32.xlu1 %v9134_v28, %s14770_s3 }
0x1e46   :  { %9140 = vrot.lane.b32.xlu0 %v9139_v57, %s14770_s3  ;;  %v6325_v57 = vsel %vm2847_vm4, %v6309_v27, %v9098_v60 }
0x1e48   :  { %v8820_v63 = vpop.f32.mrb[196].mxu1 }
0x1e49   :  { %9150 = vrot.lane.b32.xlu1 %v9149_v62, %s9915_s4  ;;  %v6069_v22 = vpop.f32.mrb[197].mxu1  ;;  %v14774_v62 = vld [vmem:[#allocation46_spill] sm:$0xff] }
0x1e4a   :  { %9145 = vrot.lane.b32.xlu0 %v9144_v23, %s9915_s4  ;;  %v8821_v4 = vpop.f32.mrb[198].mxu1  ;;  %v14776_v8 = vpack.i.bf16 %v14774_v62, %v14775_v42 }
0x1e4b   :  { %v9154_v29 = vpack.i.bf16 %v8821_v4, %v8820_v63  ;;  %v6072_v50 = vpop.f32.mrb[199].mxu1  ;;  %v9122_v63 = vunpack.i.l.bf16 %v9121_v13 }
0x1e4c   :  { %v9159_v52 = vpack.i.bf16 %v6072_v50, %v6069_v22 }
0x1e4d   :  { %9155 = vrot.lane.b32.xlu1 %v9154_v29, %s14770_s3 }
0x1e4e   :  { %9160 = vrot.lane.b32.xlu0 %v9159_v52, %s14770_s3  ;;  %v9123_v52 = vunpack.i.h.bf16 %v9121_v13 }
0x1e50   :  { %v8824_v49 = vpop.f32.mrb[200].mxu1 }
0x1e51   :  { %9170 = vrot.lane.b32.xlu1 %v14773_v1, %s9914_s1  ;;  %v6085_v55 = vpop.f32.mrb[201].mxu1 }
0x1e52   :  { %9165 = vrot.lane.b32.xlu0 %v14776_v8, %s9914_s1  ;;  %v8825_v7 = vpop.f32.mrb[202].mxu1 }
0x1e53   :  { %v9174_v23 = vpack.i.bf16 %v8825_v7, %v8824_v49  ;;  %v6088_v0 = vpop.f32.mrb[203].mxu1  ;;  %v14782_v7 = vld [vmem:[#allocation5_spill] sm:$0xff] }
0x1e54   :  { %v9179_v45 = vpack.i.bf16 %v6088_v0, %v6085_v55  ;;  %v14781_v55 = vld [vmem:[#allocation48_spill] sm:$0xff] }
0x1e55   :  { %9175 = vrot.lane.b32.xlu1 %v9174_v23, %s14770_s3  ;;  %v6314_v62 = vsel %vm870_vm3, %v14781_v55, %v9112_v2  ;;  %v6315_v23 = vsel %vm870_vm3, %v14782_v7, %v9113_v11 }
0x1e56   :  { %9180 = vrot.lane.b32.xlu0 %v9179_v45, %s14770_s3  ;;  %v6330_v0 = vsel %vm2847_vm4, %v6314_v62, %v9122_v63 }
0x1e59   :  { %9190 = vrot.lane.b32.xlu1 %v9189_v5, %s9915_s4  ;;  %v9106_v5 = vpop.permute.xlu0 %9105 }
0x1e5a   :  { %9185 = vrot.lane.b32.xlu0 %v9184_v47, %s9915_s4  ;;  %v13627_v47 = vpop.permute.xlu1 %9130  ;;  %v9108_v9 = vunpack.i.h.bf16 %v9106_v5  ;;  %v9107_v1 = vunpack.i.l.bf16 %v9106_v5 }
0x1e5b   :  { %v9132_v34 = vunpack.i.l.bf16 %v13627_v47 }
0x1e5c   :  { %v6312_v15 = vsel %vm870_vm3, %v14784_v54, %v9107_v1 }
0x1e5d   :  { %v9116_v20 = vpop.permute.xlu0 %9115 }
0x1e5e   :  { %v9118_v42 = vunpack.i.h.bf16 %v9116_v20  ;;  %v9117_v8 = vunpack.i.l.bf16 %v9116_v20 }
0x1e60   :  { %v6328_v5 = vsel %vm2847_vm4, %v6312_v15, %v9117_v8 }
0x1e61   :  { %v13629_v46 = vpop.permute.xlu0 %9125 }
0x1e62   :  { %v9128_v21 = vunpack.i.h.bf16 %v13629_v46  ;;  %v9127_v10 = vunpack.i.l.bf16 %v13629_v46 }
0x1e7c   :  { %v8828_v51 = vpop.f32.mrb[204].mxu1 }
0x1e7d   :  { %v6101_v31 = vpop.f32.mrb[205].mxu1 }
0x1e7e   :  { %v8829_v30 = vpop.f32.mrb[206].mxu1 }
0x1e7f   :  { %v9199_v58 = vpack.i.bf16 %v8829_v30, %v8828_v51  ;;  %v6104_v43 = vpop.f32.mrb[207].mxu1  ;;  %v6331_v51 = vsel %vm2847_vm4, %v6315_v23, %v9123_v52 }
0x1e80   :  { %v9194_v12 = vpack.i.bf16 %v6104_v43, %v6101_v31  ;;  %v9133_v31 = vunpack.i.h.bf16 %v13627_v47 }
0x1e81   :  { %9200 = vrot.lane.b32.xlu1 %v9199_v58, %s14770_s3 }
0x1e82   :  { %9195 = vrot.lane.b32.xlu0 %v9194_v12, %s14770_s3  ;;  %v14783_v12 = vld [vmem:[#allocation4_spill] sm:$0xff]  ;;  %v6319_v47 = vsel %vm870_vm3, %v14785_v48, %v9133_v31 }
0x1e83   :  { %v6313_v37 = vsel %vm870_vm3, %v14783_v12, %v9108_v9  ;;  %v14792_v12 = vld [vmem:[#allocation11_spill] sm:$0xff] }
0x1e84   :  { %v6329_v13 = vsel %vm2847_vm4, %v6313_v37, %v9118_v42 }
0x1eb7   :  { %v9136_v14 = vpop.permute.xlu1 %9135 }
0x1eb8   :  { %v9138_v40 = vunpack.i.h.bf16 %v9136_v14  ;;  %v9137_v53 = vunpack.i.l.bf16 %v9136_v14  ;;  %v9141_v41 = vpop.permute.xlu0 %9140  ;;  %v6318_v14 = vsel %vm870_vm3, %v14786_v24, %v9132_v34 }
0x1eb9   :  { %v9143_v56 = vunpack.i.h.bf16 %v9141_v41  ;;  %v9142_v26 = vunpack.i.l.bf16 %v9141_v41 }
0x1eba   :  { %v6343_v3 = vsel %vm2864_vm5, %v6327_v19, %v9138_v40  ;;  %v6342_v28 = vsel %vm2864_vm5, %v6326_v18, %v9137_v53  ;;  %v14787_v19 = vld [vmem:[#allocation9_spill] sm:$0xff]  ;;  %v14788_v40 = vld [vmem:[#allocation7_spill] sm:$0xff] }
0x1ebb   :  { %v6357_v22 = vpack.c.bf16 %v6343_v3, %v6342_v28  ;;  %v6340_v4 = vsel %vm2864_vm5, %v6324_v25, %v9142_v26  ;;  %v6341_v29 = vsel %vm2864_vm5, %v6325_v57, %v9143_v56  ;;  %v9151_v50 = vpop.permute.xlu1 %9150  ;;  %v6317_v46 = vsel %vm870_vm3, %v14787_v19, %v9128_v21 }
0x1ebc   :  { %v6356_v49 = vpack.c.bf16 %v6341_v29, %v6340_v4  ;;  %v9146_v44 = vpop.permute.xlu0 %9145  ;;  %v9153_v60 = vunpack.i.h.bf16 %v9151_v50  ;;  %v9152_v59 = vunpack.i.l.bf16 %v9151_v50  ;;  %v6316_v53 = vsel %vm870_vm3, %v14788_v40, %v9127_v10  ;;  %v14795_v40 = vld [vmem:[#allocation23_spill] sm:$0xff] }
0x1ebd   :  { %v9148_v38 = vunpack.i.h.bf16 %v9146_v44  ;;  %v9147_v27 = vunpack.i.l.bf16 %v9146_v44 }
0x1ebe   :  { %8834 = vmatprep.mubr.msk.bf16.mxu1 %vm484_vm2, %v6356_v49  ;;  %v6335_v56 = vsel %vm2847_vm4, %v6319_v47, %v9153_v60  ;;  %v6334_v26 = vsel %vm2847_vm4, %v6318_v14, %v9152_v59  ;;  %v14793_v47 = vld [vmem:[#allocation22_spill] sm:$0xff] }
0x1ebf   :  { %v9156_v45 = vpop.permute.xlu1 %9155  ;;  %8835 = vmatmul.mubr.msk.bf16.vlgmr.msra.gmra.mrb[208].mxu1 %vm484_vm2, %v6357_v22  ;;  %v6332_v25 = vsel %vm2847_vm4, %v6316_v53, %v9147_v27  ;;  %v6333_v57 = vsel %vm2847_vm4, %v6317_v46, %v9148_v38 }
0x1ec0   :  { %v9158_v30 = vunpack.i.h.bf16 %v9156_v45  ;;  %v9157_v58 = vunpack.i.l.bf16 %v9156_v45  ;;  %v9161_v43 = vpop.permute.xlu0 %9160 }
0x1ec1   :  { %v9163_v6 = vunpack.i.h.bf16 %v9161_v43  ;;  %v9162_v16 = vunpack.i.l.bf16 %v9161_v43 }
0x1ec2   :  { %v6347_v20 = vsel %vm2864_vm5, %v6331_v51, %v9158_v30  ;;  %v6346_v33 = vsel %vm2864_vm5, %v6330_v0, %v9157_v58  ;;  %v14789_v0 = vld [vmem:[#allocation10_spill] sm:$0xff]  ;;  %v14790_v51 = vld [vmem:[#allocation8_spill] sm:$0xff]  ;;  %v14791_v58 = vld [vmem:[#allocation13_spill] sm:$0xff] }
0x1ec3   :  { %v6359_v36 = vpack.c.bf16 %v6347_v20, %v6346_v33  ;;  %v6344_v32 = vsel %vm2864_vm5, %v6328_v5, %v9162_v16  ;;  %v6345_v39 = vsel %vm2864_vm5, %v6329_v13, %v9163_v6  ;;  %v9171_v17 = vpop.permute.xlu1 %9170 }
0x1ec4   :  { %v6358_v35 = vpack.c.bf16 %v6345_v39, %v6344_v32  ;;  %v9166_v61 = vpop.permute.xlu0 %9165  ;;  %v9173_v44 = vunpack.i.h.bf16 %v9171_v17  ;;  %v9172_v9 = vunpack.i.l.bf16 %v9171_v17 }
0x1ec5   :  { %v9168_v55 = vunpack.i.h.bf16 %v9166_v61  ;;  %v9167_v62 = vunpack.i.l.bf16 %v9166_v61 }
0x1ec6   :  { %8838 = vmatprep.mubr.msk.bf16.mxu1 %vm484_vm2, %v6358_v35  ;;  %v6323_v45 = vsel %vm870_vm3, %v14789_v0, %v9173_v44  ;;  %v6322_v31 = vsel %vm870_vm3, %v14790_v51, %v9172_v9  ;;  %v13710_v35 = vld [vmem:[%s14379_s14 + $0x1] ss:$0 sm:$0xff] }
0x1ec7   :  { %v9176_v18 = vpop.permute.xlu1 %9175  ;;  %8839 = vmatmul.mubr.msk.bf16.gmra.mrb[212].mxu1 %vm484_vm2, %v6359_v36  ;;  %v6321_v43 = vsel %vm870_vm3, %v14791_v58, %v9168_v55  ;;  %v6320_v37 = vsel %vm870_vm3, %v14792_v12, %v9167_v62 }
0x1ec8   :  { %v9178_v41 = vunpack.i.h.bf16 %v9176_v18  ;;  %v9177_v11 = vunpack.i.l.bf16 %v9176_v18  ;;  %v9181_v2 = vpop.permute.xlu0 %9180  ;;  %v14794_v18 = vld [vmem:[#allocation54_spill] sm:$0xff] }
0x1ec9   :  { %v9183_v3 = vunpack.i.h.bf16 %v9181_v2  ;;  %v9182_v28 = vunpack.i.l.bf16 %v9181_v2 }
0x1eca   :  { %v6351_v63 = vsel %vm2864_vm5, %v6335_v56, %v9178_v41  ;;  %v6350_v22 = vsel %vm2864_vm5, %v6334_v26, %v9177_v11  ;;  %v14796_v26 = vld [vmem:[#allocation55_spill] sm:$0xff] }
0x1ecb   :  { %v6361_v4 = vpack.c.bf16 %v6351_v63, %v6350_v22  ;;  %v6348_v29 = vsel %vm2864_vm5, %v6332_v25, %v9182_v28  ;;  %v6349_v50 = vsel %vm2864_vm5, %v6333_v57, %v9183_v3  ;;  %v9191_v49 = vpop.permute.xlu1 %9190 }
0x1ecc   :  { %v6360_v52 = vpack.c.bf16 %v6349_v50, %v6348_v29  ;;  %v9186_v1 = vpop.permute.xlu0 %9185  ;;  %v9193_v42 = vunpack.i.h.bf16 %v9191_v49  ;;  %v9192_v8 = vunpack.i.l.bf16 %v9191_v49  ;;  %v14797_v50 = vld [vmem:[#allocation24_spill] sm:$0xff]  ;;  %v14798_v49 = vld [vmem:[#allocation25_spill] sm:$0xff] }
0x1ecd   :  { %v9188_v7 = vunpack.i.h.bf16 %v9186_v1  ;;  %v9187_v23 = vunpack.i.l.bf16 %v9186_v1  ;;  %v14799_v1 = vld [vmem:[#allocation26_spill] sm:$0xff] }
0x1ece   :  { %8842 = vmatprep.mubr.msk.bf16.mxu1 %vm484_vm2, %v6360_v52  ;;  %v6339_v16 = vsel %vm2847_vm4, %v6323_v45, %v9193_v42  ;;  %v6338_v5 = vsel %vm2847_vm4, %v6322_v31, %v9192_v8 }
0x1ecf   :  { %8843 = vmatmul.mubr.msk.bf16.gmra.mrb[216].mxu1 %vm484_vm2, %v6361_v4  ;;  %v6336_v33 = vsel %vm2847_vm4, %v6320_v37, %v9187_v23  ;;  %v6337_v34 = vsel %vm2847_vm4, %v6321_v43, %v9188_v7  ;;  %v14800_v7 = vld [vmem:[#allocation27_spill] sm:$0xff]  ;;  %v14801_v37 = vld [vmem:[#allocation30_spill] sm:$0xff] }
0x1ef3   :  { %v9201_v30 = vpop.permute.xlu1 %9200 }
0x1ef4   :  { %v9203_v54 = vunpack.i.h.bf16 %v9201_v30  ;;  %v9202_v15 = vunpack.i.l.bf16 %v9201_v30  ;;  %v9196_v6 = vpop.permute.xlu0 %9195 }
0x1ef5   :  { %v9198_v13 = vunpack.i.h.bf16 %v9196_v6  ;;  %v9197_v20 = vunpack.i.l.bf16 %v9196_v6 }
0x1ef6   :  { %v6355_v36 = vsel %vm2864_vm5, %v6339_v16, %v9203_v54  ;;  %v6354_v32 = vsel %vm2864_vm5, %v6338_v5, %v9202_v15  ;;  %v14802_v15 = vld [vmem:[#allocation28_spill] sm:$0xff]  ;;  %v14803_v5 = vld [vmem:[#allocation29_spill] sm:$0xff] }
0x1ef7   :  { %v6363_v39 = vpack.c.bf16 %v6355_v36, %v6354_v32  ;;  %v6352_v17 = vsel %vm2864_vm5, %v6336_v33, %v9197_v20  ;;  %v6353_v21 = vsel %vm2864_vm5, %v6337_v34, %v9198_v13  ;;  %v14804_v33 = vld [vmem:[#allocation32_spill] sm:$0xff] }
0x1ef8   :  { %v6362_v10 = vpack.c.bf16 %v6353_v21, %v6352_v17 }
0x1efa   :  { %8846 = vmatprep.mubr.msk.bf16.mxu1 %vm484_vm2, %v6362_v10 }
0x1efb   :  { %8847 = vmatmul.mubr.msk.bf16.gmra.mrb[220].mxu1 %vm484_vm2, %v6363_v39 }
0x1f92   :  { %v8836_v61 = vpop.f32.mrb[208].mxu1 }
0x1f93   :  { %v6447_v60 = vpop.f32.mrb[209].mxu1  ;;  %v6456_v59 = vadd.f32 %v8836_v61, %v13710_v35 }
0x1f94   :  { %v6448_v38 = vadd.f32 %v13710_v35, %v6447_v60  ;;  %v8837_v27 = vpop.f32.mrb[210].mxu1 }
0x1f95   :  { %v6450_v48 = vpop.f32.mrb[211].mxu1  ;;  %v13719_v19 = vadd.f32 %v6456_v59, %v14794_v18  ;;  %v6459_v46 = vadd.f32 %v8837_v27, %v13710_v35  ;;  %v14805_v27 = vld [vmem:[#allocation18_spill] sm:$0xff] }
0x1f96   :  { %v13715_v24 = vadd.f32 %v6448_v38, %v14793_v47  ;;  %v6451_v14 = vadd.f32 %v13710_v35, %v6450_v48 }
0x1f97   :  { %v13730_v3 = vadd.f32 %v6459_v46, %v14796_v26  ;;  %v6536_v57 = vsel %vm484_vm2, %v13719_v19, 0.0  ;;  %v14807_v46 = vld [vmem:[#allocation31_spill] sm:$0xff] }
0x1f98   :  { %v13723_v53 = vadd.f32 %v6451_v14, %v14795_v40  ;;  %v6530_v41 = vsel %vm484_vm2, %v13715_v24, 0.0  ;;  %v14806_v14 = vld [vmem:[#allocation34_spill] sm:$0xff] }
0x1f99   :  { %6531 = vadd.xlane.f32.xlu0 %v6530_v41  ;;  %v6539_v9 = vsel %vm484_vm2, %v13730_v3, 0.0 }
0x1f9a   :  { %v8840_v11 = vpop.f32.mrb[212].mxu1  ;;  %v6533_v2 = vsel %vm484_vm2, %v13723_v53, 0.0 }
0x1f9b   :  { %v6463_v56 = vpop.f32.mrb[213].mxu1  ;;  %6534 = vadd.xlane.f32.xlu1 %v6533_v2  ;;  %v6472_v29 = vadd.f32 %v8840_v11, %v13710_v35  ;;  %v14808_v11 = vld [vmem:[#allocation19_spill] sm:$0xff] }
0x1f9c   :  { %v6464_v28 = vadd.f32 %v13710_v35, %v6463_v56  ;;  %v8841_v25 = vpop.f32.mrb[214].mxu1 }
0x1f9d   :  { %v6466_v63 = vpop.f32.mrb[215].mxu1  ;;  %6537 = vadd.xlane.f32.xlu0 %v6536_v57  ;;  %v6475_v22 = vadd.f32 %v8841_v25, %v13710_v35  ;;  %v13752_v23 = vadd.f32 %v6472_v29, %v14800_v7 }
0x1f9e   :  { %v6467_v4 = vadd.f32 %v13710_v35, %v6466_v63  ;;  %v13739_v52 = vadd.f32 %v6464_v28, %v14797_v50 }
0x1f9f   :  { %v13747_v55 = vadd.f32 %v6475_v22, %v14799_v1  ;;  %v6548_v16 = vsel %vm484_vm2, %v13752_v23, 0.0 }
0x1fa0   :  { %v13742_v44 = vadd.f32 %v6467_v4, %v14798_v49  ;;  %v6542_v51 = vsel %vm484_vm2, %v13739_v52, 0.0 }
0x1fa1   :  { %6540 = vadd.xlane.f32.xlu0 %v6539_v9  ;;  %v6551_v43 = vsel %vm484_vm2, %v13747_v55, 0.0 }
0x1fa2   :  { %v8844_v62 = vpop.f32.mrb[216].mxu1  ;;  %v6545_v42 = vsel %vm484_vm2, %v13742_v44, 0.0 }
0x1fa3   :  { %v6479_v8 = vpop.f32.mrb[217].mxu1  ;;  %6546 = vadd.xlane.f32.xlu1 %v6545_v42  ;;  %v6488_v12 = vadd.f32 %v8844_v62, %v13710_v35 }
0x1fa4   :  { %v6480_v0 = vadd.f32 %v13710_v35, %v6479_v8  ;;  %v8845_v45 = vpop.f32.mrb[218].mxu1 }
0x1fa5   :  { %v6482_v31 = vpop.f32.mrb[219].mxu1  ;;  %6543 = vadd.xlane.f32.xlu0 %v6542_v51  ;;  %v6491_v30 = vadd.f32 %v8845_v45, %v13710_v35  ;;  %v13776_v34 = vadd.f32 %v6488_v12, %v14804_v33 }
0x1fa6   :  { %v6483_v58 = vadd.f32 %v13710_v35, %v6482_v31  ;;  %v13763_v54 = vadd.f32 %v6480_v0, %v14801_v37 }
0x1fa7   :  { %6552 = vadd.xlane.f32.xlu1 %v6551_v43  ;;  %v13771_v13 = vadd.f32 %v6491_v30, %v14803_v5  ;;  %v6560_v39 = vsel %vm484_vm2, %v13776_v34, 0.0 }
0x1fa8   :  { %v13766_v6 = vadd.f32 %v6483_v58, %v14802_v15  ;;  %v6554_v36 = vsel %vm484_vm2, %v13763_v54, 0.0 }
0x1fa9   :  { %6549 = vadd.xlane.f32.xlu0 %v6548_v16  ;;  %v6563_v32 = vsel %vm484_vm2, %v13771_v13, 0.0 }
0x1faa   :  { %v6557_v20 = vsel %vm484_vm2, %v13766_v6, 0.0 }
0x1fab   :  { %6558 = vadd.xlane.f32.xlu1 %v6557_v20 }
0x1fad   :  { %6555 = vadd.xlane.f32.xlu0 %v6554_v36 }
0x1faf   :  { %6564 = vadd.xlane.f32.xlu1 %v6563_v32 }
0x1fb1   :  { %6561 = vadd.xlane.f32.xlu0 %v6560_v39 }
0x1fce   :  { %v8848_v17 = vpop.f32.mrb[220].mxu1 }
0x1fcf   :  { %v6504_v21 = vadd.f32 %v8848_v17, %v13710_v35  ;;  %v6495_v10 = vpop.f32.mrb[221].mxu1 }
0x1fd0   :  { %v6496_v61 = vadd.f32 %v13710_v35, %v6495_v10  ;;  %v8849_v60 = vpop.f32.mrb[222].mxu1 }
0x1fd1   :  { %v6507_v59 = vadd.f32 %v8849_v60, %v13710_v35  ;;  %v6498_v38 = vpop.f32.mrb[223].mxu1  ;;  %v13792_v18 = vadd.f32 %v6504_v21, %v14806_v14 }
0x1fd2   :  { %v13788_v48 = vadd.f32 %v6496_v61, %v14805_v27  ;;  %v6499_v47 = vadd.f32 %v13710_v35, %v6498_v38 }
0x1fd3   :  { %v13800_v2 = vadd.f32 %v6507_v59, %v14808_v11  ;;  %v6572_v35 = vsel %vm484_vm2, %v13792_v18, 0.0 }
0x1fd4   :  { %v13795_v40 = vadd.f32 %v6499_v47, %v14807_v46  ;;  %v6566_v41 = vsel %vm484_vm2, %v13788_v48, 0.0 }
0x1fd5   :  { %6567 = vadd.xlane.f32.xlu0 %v6566_v41  ;;  %v6575_v26 = vsel %vm484_vm2, %v13800_v2, 0.0 }
0x1fd6   :  { %v6569_v56 = vsel %vm484_vm2, %v13795_v40, 0.0 }
0x1fd7   :  { %6570 = vadd.xlane.f32.xlu1 %v6569_v56 }
0x1fd9   :  { %6573 = vadd.xlane.f32.xlu0 %v6572_v35 }
0x1fdb   :  { %6576 = vadd.xlane.f32.xlu1 %v6575_v26 }
0x2026   :  { %v6532_v28 = vpop.xlane.xlu0 %6531 }
0x2027   :  { %v6578_v25 = vmul.f32 0.03125, %v6532_v28 }
0x2028   :  { %v6535_v57 = vpop.xlane.xlu1 %6534 }
0x2029   :  { %v13809_v63 = vsub.f32 %v13715_v24, %v6578_v25  ;;  %v6579_v22 = vmul.f32 0.03125, %v6535_v57  ;;  %v9234_v25 = vld [vmem:[%s14380_s17 + $0x18] sm:$0xff]  }
0x202a   :  { %v6538_v4 = vpop.xlane.xlu0 %6537 }
0x202b   :  { %v13812_v29 = vsub.f32 %v13723_v53, %v6579_v22  ;;  %v6580_v50 = vmul.f32 0.03125, %v6538_v4  ;;  %v6610_v49 = vmul.f32 %v13809_v63, %v13809_v63 }
0x202d   :  { %v13817_v9 = vsub.f32 %v13719_v19, %v6580_v50  ;;  %v6626_v1 = vsel %vm484_vm2, %v6610_v49, 0.0  ;;  %v6611_v62 = vmul.f32 %v13812_v29, %v13812_v29 }
0x202e   :  { %6627 = vadd.xlane.f32.xlu0 %v6626_v1  ;;  %v6541_v24 = vpop.xlane.xlu0 %6540 }
0x202f   :  { %v6581_v42 = vmul.f32 0.03125, %v6541_v24  ;;  %v6629_v8 = vsel %vm484_vm2, %v6611_v62, 0.0  ;;  %v6612_v53 = vmul.f32 %v13817_v9, %v13817_v9 }
0x2030   :  { %6630 = vadd.xlane.f32.xlu1 %v6629_v8  ;;  %v6547_v7 = vpop.xlane.xlu1 %6546 }
0x2031   :  { %v13826_v0 = vsub.f32 %v13730_v3, %v6581_v42  ;;  %v6583_v19 = vmul.f32 0.03125, %v6547_v7  ;;  %v6632_v45 = vsel %vm484_vm2, %v6612_v53, 0.0 }
0x2032   :  { %6633 = vadd.xlane.f32.xlu0 %v6632_v45  ;;  %v6544_v51 = vpop.xlane.xlu0 %6543 }
0x2033   :  { %v13830_v31 = vsub.f32 %v13742_v44, %v6583_v19  ;;  %v6582_v30 = vmul.f32 0.03125, %v6544_v51  ;;  %v6613_v58 = vmul.f32 %v13826_v0, %v13826_v0 }
0x2034   :  { %v6553_v43 = vpop.xlane.xlu1 %6552 }
0x2035   :  { %v13835_v12 = vsub.f32 %v13739_v52, %v6582_v30  ;;  %v6585_v37 = vmul.f32 0.03125, %v6553_v43  ;;  %v6635_v3 = vsel %vm484_vm2, %v6613_v58, 0.0  ;;  %v6615_v15 = vmul.f32 %v13830_v31, %v13830_v31  ;;  %v9236_v43 = vld [vmem:[%s14381_s19 + $0x28] sm:$0xff]  }
0x2036   :  { %6636 = vadd.xlane.f32.xlu1 %v6635_v3  ;;  %v6550_v16 = vpop.xlane.xlu0 %6549 }
0x2037   :  { %v13841_v5 = vsub.f32 %v13747_v55, %v6585_v37  ;;  %v6584_v44 = vmul.f32 0.03125, %v6550_v16  ;;  %v6614_v20 = vmul.f32 %v13835_v12, %v13835_v12  ;;  %v6641_v36 = vsel %vm484_vm2, %v6615_v15, 0.0 }
0x2038   :  { %v6559_v33 = vpop.xlane.xlu1 %6558 }
0x2039   :  { %v13847_v52 = vsub.f32 %v13752_v23, %v6584_v44  ;;  %v6587_v32 = vmul.f32 0.03125, %v6559_v33  ;;  %v6638_v39 = vsel %vm484_vm2, %v6614_v20, 0.0  ;;  %v6617_v17 = vmul.f32 %v13841_v5, %v13841_v5 }
0x203a   :  { %6642 = vadd.xlane.f32.xlu1 %v6641_v36  ;;  %6639 = vadd.xlane.f32.xlu0 %v6638_v39  ;;  %v6556_v55 = vpop.xlane.xlu0 %6555 }
0x203b   :  { %v13853_v21 = vsub.f32 %v13766_v6, %v6587_v32  ;;  %v6586_v10 = vmul.f32 0.03125, %v6556_v55  ;;  %v6616_v61 = vmul.f32 %v13847_v52, %v13847_v52  ;;  %v6647_v23 = vsel %vm484_vm2, %v6617_v17, 0.0 }
0x203c   :  { %v6565_v60 = vpop.xlane.xlu1 %6564 }
0x203d   :  { %v13859_v59 = vsub.f32 %v13763_v54, %v6586_v10  ;;  %v6589_v38 = vmul.f32 0.03125, %v6565_v60  ;;  %v6644_v27 = vsel %vm484_vm2, %v6616_v61, 0.0  ;;  %v6619_v47 = vmul.f32 %v13853_v21, %v13853_v21 }
0x203e   :  { %6648 = vadd.xlane.f32.xlu1 %v6647_v23  ;;  %6645 = vadd.xlane.f32.xlu0 %v6644_v27  ;;  %v6562_v6 = vpop.xlane.xlu0 %6561  ;;  %v13919_v27 = vld [vmem:[%s14382_s15 + $0x1] ss:$0 sm:$0xff] }
0x203f   :  { %v13865_v14 = vsub.f32 %v13771_v13, %v6589_v38  ;;  %v6588_v46 = vmul.f32 0.03125, %v6562_v6  ;;  %v6618_v41 = vmul.f32 %v13859_v59, %v13859_v59  ;;  %v6653_v54 = vsel %vm484_vm2, %v6619_v47, 0.0 }
0x2041   :  { %v13870_v11 = vsub.f32 %v13776_v34, %v6588_v46  ;;  %v6650_v56 = vsel %vm484_vm2, %v6618_v41, 0.0  ;;  %v6621_v35 = vmul.f32 %v13865_v14, %v13865_v14  ;;  %v9233_v34 = vld [vmem:[%s14380_s17 + $0x10] sm:$0xff]  }
0x2042   :  { %6654 = vadd.xlane.f32.xlu1 %v6653_v54  ;;  %6651 = vadd.xlane.f32.xlu0 %v6650_v56 }
0x2043   :  { %v6620_v13 = vmul.f32 %v13870_v11, %v13870_v11  ;;  %v6659_v26 = vsel %vm484_vm2, %v6621_v35, 0.0  ;;  %8850 = vmatprep.subr.bf16.mxu0 %v9233_v34 }
0x2044   :  { %8851 = vmatpush3.bf16.msra.mxu0 %v9233_v34 }
0x2045   :  { %v6656_v28 = vsel %vm484_vm2, %v6620_v13, 0.0  ;;  %8852 = vmatprep.subr.bf16.mxu0 %v9234_v25 }
0x2046   :  { %6660 = vadd.xlane.f32.xlu1 %v6659_v26  ;;  %6657 = vadd.xlane.f32.xlu0 %v6656_v28 }
0x2048   :  { %8853 = vmatpush3.bf16.msra.mxu0 %v9234_v25  ;;  %v13927_v25 = vld [vmem:[%s14383_s16 + $0x1] ss:$0 sm:$0xff] }
0x2062   :  { %v6568_v57 = vpop.xlane.xlu0 %6567 }
0x2063   :  { %v6590_v22 = vmul.f32 0.03125, %v6568_v57 }
0x2064   :  { %v6571_v4 = vpop.xlane.xlu1 %6570 }
0x2065   :  { %v13887_v50 = vsub.f32 %v13788_v48, %v6590_v22  ;;  %v6591_v49 = vmul.f32 0.03125, %v6571_v4 }
0x2066   :  { %v6574_v1 = vpop.xlane.xlu0 %6573 }
0x2067   :  { %v13890_v62 = vsub.f32 %v13795_v40, %v6591_v49  ;;  %v6592_v24 = vmul.f32 0.03125, %v6574_v1  ;;  %v6622_v42 = vmul.f32 %v13887_v50, %v13887_v50 }
0x2068   :  { %v6577_v8 = vpop.xlane.xlu1 %6576 }
0x2069   :  { %v13895_v53 = vsub.f32 %v13792_v18, %v6592_v24  ;;  %v6593_v7 = vmul.f32 0.03125, %v6577_v8  ;;  %v6662_v19 = vsel %vm484_vm2, %v6622_v42, 0.0  ;;  %v6623_v48 = vmul.f32 %v13890_v62, %v13890_v62 }
0x206a   :  { %6663 = vadd.xlane.f32.xlu0 %v6662_v19 }
0x206b   :  { %v13901_v45 = vsub.f32 %v13800_v2, %v6593_v7  ;;  %v6665_v40 = vsel %vm484_vm2, %v6623_v48, 0.0  ;;  %v6624_v51 = vmul.f32 %v13895_v53, %v13895_v53  ;;  %v9235_v2 = vld [vmem:[%s14381_s19 + $0x20] sm:$0xff]  }
0x206c   :  { %6666 = vadd.xlane.f32.xlu1 %v6665_v40  ;;  %8870 = vmatprep.subr.bf16.mxu1 %v9235_v2 }
0x206d   :  { %v6668_v30 = vsel %vm484_vm2, %v6624_v51, 0.0  ;;  %v6625_v18 = vmul.f32 %v13901_v45, %v13901_v45  ;;  %8871 = vmatpush3.bf16.msra.mxu1 %v9235_v2 }
0x206e   :  { %6669 = vadd.xlane.f32.xlu0 %v6668_v30  ;;  %8872 = vmatprep.subr.bf16.mxu1 %v9236_v43 }
0x206f   :  { %v6671_v58 = vsel %vm484_vm2, %v6625_v18, 0.0 }
0x2070   :  { %6672 = vadd.xlane.f32.xlu1 %v6671_v58 }
0x2071   :  { %8873 = vmatpush3.bf16.msra.mxu1 %v9236_v43 }
0x20bb   :  { %v6628_v37 = vpop.xlane.xlu0 %6627 }
0x20bc   :  { %v6674_v3 = vmul.f32 0.03125, %v6628_v37 }
0x20bd   :  { %v6631_v15 = vpop.xlane.xlu1 %6630 }
0x20be   :  { %v6690_v16 = vadd.f32 1e-05, %v6674_v3  ;;  %v6675_v44 = vmul.f32 0.03125, %v6631_v15 }
0x20bf   :  { %v6634_v20 = vpop.xlane.xlu0 %6633 }
0x20c0   :  { %9815 = vrsqrt.f32 %v6690_v16  ;;  %v6691_v33 = vadd.f32 1e-05, %v6675_v44  ;;  %v6676_v36 = vmul.f32 0.03125, %v6634_v20 }
0x20c2   :  { %9817 = vrsqrt.f32 %v6691_v33  ;;  %v6692_v32 = vadd.f32 1e-05, %v6676_v36 }
0x20c3   :  { %v6637_v39 = vpop.xlane.xlu1 %6636 }
0x20c4   :  { %9819 = vrsqrt.f32 %v6692_v32  ;;  %v6677_v17 = vmul.f32 0.03125, %v6637_v39 }
0x20c6   :  { %v6693_v55 = vadd.f32 1e-05, %v6677_v17 }
0x20c7   :  { %v6643_v10 = vpop.xlane.xlu1 %6642  ;;  %v6640_v61 = vpop.xlane.xlu0 %6639 }
0x20c8   :  { %9821 = vrsqrt.f32 %v6693_v55  ;;  %v6679_v60 = vmul.f32 0.03125, %v6643_v10  ;;  %v6678_v23 = vmul.f32 0.03125, %v6640_v61 }
0x20ca   :  { %v9816_v38 = vpop.eup %9815  ;;  %v6695_v47 = vadd.f32 1e-05, %v6679_v60  ;;  %v6694_v6 = vadd.f32 1e-05, %v6678_v23 }
0x20cb   :  { %v6722_v46 = vmul.f32 %v9816_v38, %v13809_v63  ;;  %v6649_v41 = vpop.xlane.xlu1 %6648  ;;  %v6646_v54 = vpop.xlane.xlu0 %6645 }
0x20cc   :  { %v9818_v56 = vpop.eup %9817  ;;  %9823 = vrsqrt.f32 %v6695_v47  ;;  %v6681_v35 = vmul.f32 0.03125, %v6649_v41  ;;  %v6680_v13 = vmul.f32 0.03125, %v6646_v54 }
0x20cd   :  { %v6723_v26 = vmul.f32 %v9818_v56, %v13812_v29  ;;  %9825 = vrsqrt.f32 %v6694_v6  ;;  %v6744_v28 = vmul.f32 %v13919_v27, %v6722_v46 }
0x20ce   :  { %v9820_v34 = vpop.eup %9819  ;;  %v6697_v57 = vadd.f32 1e-05, %v6681_v35  ;;  %v6696_v22 = vadd.f32 1e-05, %v6680_v13 }
0x20cf   :  { %v6724_v63 = vmul.f32 %v9820_v34, %v13817_v9  ;;  %v6655_v4 = vpop.xlane.xlu1 %6654  ;;  %v6652_v49 = vpop.xlane.xlu0 %6651  ;;  %v6745_v1 = vmul.f32 %v13919_v27, %v6723_v26  ;;  %v13932_v42 = vadd.f32 %v13927_v25, %v6744_v28 }
0x20d0   :  { %9827 = vrsqrt.f32 %v6697_v57  ;;  %v6683_v24 = vmul.f32 0.03125, %v6655_v4  ;;  %v6682_v29 = vmul.f32 0.03125, %v6652_v49 }
0x20d1   :  { %9829 = vrsqrt.f32 %v6696_v22  ;;  %v13935_v8 = vadd.f32 %v13927_v25, %v6745_v1  ;;  %v6746_v40 = vmul.f32 %v13919_v27, %v6724_v63 }
0x20d2   :  { %v9822_v7 = vpop.eup %9821  ;;  %v6699_v19 = vadd.f32 1e-05, %v6683_v24  ;;  %v6698_v48 = vadd.f32 1e-05, %v6682_v29 }
0x20d3   :  { %v6725_v9 = vmul.f32 %v9822_v7, %v13826_v0  ;;  %v6661_v51 = vpop.xlane.xlu1 %6660  ;;  %v6658_v30 = vpop.xlane.xlu0 %6657  ;;  %v6782_v18 = vpack.c.bf16 %v13935_v8, %v13932_v42  ;;  %v13944_v44 = vadd.f32 %v13927_v25, %v6746_v40 }
0x20d4   :  { %9831 = vrsqrt.f32 %v6699_v19  ;;  %v6685_v58 = vmul.f32 0.03125, %v6661_v51  ;;  %v6684_v2 = vmul.f32 0.03125, %v6658_v30 }
0x20d5   :  { %v6747_v43 = vmul.f32 %v13919_v27, %v6725_v9  ;;  %9833 = vrsqrt.f32 %v6698_v48  ;;  %8854 = vmatprep.mubr.msk.bf16.mxu0 %vm484_vm2, %v6782_v18 }
0x20d6   :  { %v9824_v37 = vpop.eup %9823  ;;  %v6701_v3 = vadd.f32 1e-05, %v6685_v58  ;;  %v6700_v15 = vadd.f32 1e-05, %v6684_v2 }
0x20d7   :  { %v9826_v16 = vpop.eup %9825  ;;  %v13947_v0 = vadd.f32 %v13927_v25, %v6747_v43  ;;  %v6727_v20 = vmul.f32 %v9824_v37, %v13830_v31 }
0x20d8   :  { %v6726_v33 = vmul.f32 %v9826_v16, %v13835_v12  ;;  %9835 = vrsqrt.f32 %v6701_v3 }
0x20d9   :  { %9837 = vrsqrt.f32 %v6700_v15  ;;  %v6783_v36 = vpack.c.bf16 %v13947_v0, %v13944_v44  ;;  %v6749_v32 = vmul.f32 %v13919_v27, %v6727_v20 }
0x20da   :  { %v9828_v39 = vpop.eup %9827  ;;  %v6748_v17 = vmul.f32 %v13919_v27, %v6726_v33 }
0x20db   :  { %v9830_v55 = vpop.eup %9829  ;;  %v6729_v10 = vmul.f32 %v9828_v39, %v13841_v5  ;;  %8855 = vmatmul.mubr.msk.bf16.vlgmr.msra.gmra.mrb[224].mxu0 %vm484_vm2, %v6783_v36  ;;  %v13958_v61 = vadd.f32 %v13927_v25, %v6749_v32 }
0x20dc   :  { %v6728_v31 = vmul.f32 %v9830_v55, %v13847_v52  ;;  %v13962_v12 = vadd.f32 %v13927_v25, %v6748_v17 }
0x20dd   :  { %v6751_v60 = vmul.f32 %v13919_v27, %v6729_v10  ;;  %v9237_v10 = vld [vmem:[%s14381_s19 + $0x30] sm:$0xff]  }
0x20de   :  { %v9832_v23 = vpop.eup %9831  ;;  %v6784_v38 = vpack.c.bf16 %v13958_v61, %v13962_v12  ;;  %v6750_v47 = vmul.f32 %v13919_v27, %v6728_v31  ;;  %8874 = vmatprep.subr.bf16.mxu1 %v9237_v10 }
0x20df   :  { %v9834_v6 = vpop.eup %9833  ;;  %v6731_v5 = vmul.f32 %v9832_v23, %v13853_v21  ;;  %v13970_v46 = vadd.f32 %v13927_v25, %v6751_v60  ;;  %8875 = vmatpush3.bf16.msra.mxu1 %v9237_v10 }
0x20e0   :  { %v6730_v41 = vmul.f32 %v9834_v6, %v13859_v59  ;;  %8858 = vmatprep.mubr.msk.bf16.mxu0 %vm484_vm2, %v6784_v38  ;;  %v13975_v52 = vadd.f32 %v13927_v25, %v6750_v47 }
0x20e1   :  { %v6753_v54 = vmul.f32 %v13919_v27, %v6731_v5 }
0x20e2   :  { %v9836_v56 = vpop.eup %9835  ;;  %v6785_v35 = vpack.c.bf16 %v13970_v46, %v13975_v52  ;;  %v6752_v13 = vmul.f32 %v13919_v27, %v6730_v41 }
0x20e3   :  { %v9838_v26 = vpop.eup %9837  ;;  %v6733_v21 = vmul.f32 %v9836_v56, %v13865_v14  ;;  %v13983_v28 = vadd.f32 %v13927_v25, %v6753_v54 }
0x20e4   :  { %v6732_v59 = vmul.f32 %v9838_v26, %v13870_v11  ;;  %8859 = vmatmul.mubr.msk.bf16.gmra.mrb[228].mxu0 %vm484_vm2, %v6785_v35  ;;  %v13988_v34 = vadd.f32 %v13927_v25, %v6752_v13 }
0x20e5   :  { %v6755_v57 = vmul.f32 %v13919_v27, %v6733_v21 }
0x20e6   :  { %v6786_v22 = vpack.c.bf16 %v13983_v28, %v13988_v34  ;;  %v6754_v63 = vmul.f32 %v13919_v27, %v6732_v59 }
0x20e7   :  { %v13995_v4 = vadd.f32 %v13927_v25, %v6755_v57 }
0x20e8   :  { %8862 = vmatprep.mubr.msk.bf16.mxu0 %vm484_vm2, %v6786_v22  ;;  %v13999_v14 = vadd.f32 %v13927_v25, %v6754_v63 }
0x20ea   :  { %v6787_v11 = vpack.c.bf16 %v13995_v4, %v13999_v14 }
0x20ec   :  { %8863 = vmatmul.mubr.msk.bf16.gmra.mrb[232].mxu0 %vm484_vm2, %v6787_v11 }
0x20f7   :  { %v6664_v49 = vpop.xlane.xlu0 %6663 }
0x20f8   :  { %v6686_v1 = vmul.f32 0.03125, %v6664_v49 }
0x20f9   :  { %v6667_v24 = vpop.xlane.xlu1 %6666 }
0x20fa   :  { %v6702_v29 = vadd.f32 1e-05, %v6686_v1  ;;  %v6687_v7 = vmul.f32 0.03125, %v6667_v24 }
0x20fb   :  { %v6670_v19 = vpop.xlane.xlu0 %6669 }
0x20fc   :  { %9839 = vrsqrt.f32 %v6702_v29  ;;  %v6703_v48 = vadd.f32 1e-05, %v6687_v7  ;;  %v6688_v40 = vmul.f32 0.03125, %v6670_v19 }
0x20fd   :  { %v6673_v9 = vpop.xlane.xlu1 %6672 }
0x20fe   :  { %9841 = vrsqrt.f32 %v6703_v48  ;;  %v6704_v51 = vadd.f32 1e-05, %v6688_v40  ;;  %v6689_v30 = vmul.f32 0.03125, %v6673_v9 }
0x2100   :  { %9843 = vrsqrt.f32 %v6704_v51  ;;  %v6705_v18 = vadd.f32 1e-05, %v6689_v30 }
0x2102   :  { %9845 = vrsqrt.f32 %v6705_v18 }
0x2106   :  { %v9840_v58 = vpop.eup %9839 }
0x2107   :  { %v6734_v2 = vmul.f32 %v9840_v58, %v13887_v50 }
0x2108   :  { %v9842_v43 = vpop.eup %9841 }
0x2109   :  { %v6735_v37 = vmul.f32 %v9842_v43, %v13890_v62  ;;  %v6756_v3 = vmul.f32 %v13919_v27, %v6734_v2 }
0x210a   :  { %v9844_v15 = vpop.eup %9843 }
0x210b   :  { %v6736_v16 = vmul.f32 %v9844_v15, %v13895_v53  ;;  %v6757_v20 = vmul.f32 %v13919_v27, %v6735_v37  ;;  %v14011_v32 = vadd.f32 %v13927_v25, %v6756_v3 }
0x210c   :  { %v9846_v33 = vpop.eup %9845 }
0x210d   :  { %v6737_v36 = vmul.f32 %v9846_v33, %v13901_v45  ;;  %v14014_v39 = vadd.f32 %v13927_v25, %v6757_v20  ;;  %v6758_v50 = vmul.f32 %v13919_v27, %v6736_v16 }
0x210f   :  { %v6788_v62 = vpack.c.bf16 %v14014_v39, %v14011_v32  ;;  %v6759_v17 = vmul.f32 %v13919_v27, %v6737_v36  ;;  %v14021_v53 = vadd.f32 %v13927_v25, %v6758_v50  ;;  %v9238_v27 = vld [vmem:[%s14381_s19 + $0x38] sm:$0xff]  }
0x2110   :  { %8876 = vmatprep.subr.bf16.mxu1 %v9238_v27 }
0x2111   :  { %8866 = vmatprep.mubr.msk.bf16.mxu0 %vm484_vm2, %v6788_v62  ;;  %v14025_v45 = vadd.f32 %v13927_v25, %v6759_v17  ;;  %8877 = vmatpush3.bf16.msra.mxu1 %v9238_v27  ;;  %v7648_v25 = vld [vmem:[%s14384_s18 + $0x1] ss:$0 sm:$0xff] }
0x2113   :  { %v6789_v55 = vpack.c.bf16 %v14025_v45, %v14021_v53 }
0x2115   :  { %8867 = vmatmul.mubr.msk.bf16.gmra.mrb[236].mxu0 %vm484_vm2, %v6789_v55 }
0x21ae   :  { %v8856_v31 = vpop.f32.mrb[224].mxu0 }
0x21af   :  { %v6882_v60 = vadd.f32 %v8856_v31, %v7648_v25  ;;  %v6873_v23 = vpop.f32.mrb[225].mxu0 }
0x21b0   :  { %v6874_v38 = vadd.f32 %v7648_v25, %v6873_v23  ;;  %v8857_v47 = vpop.f32.mrb[226].mxu0 }
0x21b1   :  { %v6885_v6 = vadd.f32 %v8857_v47, %v7648_v25  ;;  %v6876_v5 = vpop.f32.mrb[227].mxu0  ;;  %v6938_v54 = vmax.f32 %v6882_v60, 0.0 }
0x21b2   :  { %v6877_v41 = vadd.f32 %v7648_v25, %v6876_v5  ;;  %v6936_v35 = vmax.f32 %v6874_v38, 0.0 }
0x21b3   :  { %v6939_v56 = vmax.f32 %v6885_v6, 0.0 }
0x21b4   :  { %v6937_v13 = vmax.f32 %v6877_v41, 0.0 }
0x21b5   :  { %v6953_v26 = vpack.c.bf16 %v6939_v56, %v6938_v54  ;;  %v14050_v56 = vld [vmem:[%s14385_s20 + $0x1] ss:$0 sm:$0xff] }
0x21b6   :  { %v6952_v21 = vpack.c.bf16 %v6937_v13, %v6936_v35 }
0x21b7   :  { %v8860_v59 = vpop.f32.mrb[228].mxu0 }
0x21b8   :  { %v6898_v57 = vadd.f32 %v8860_v59, %v7648_v25  ;;  %v6889_v22 = vpop.f32.mrb[229].mxu0  ;;  %8878 = vmatprep.mubr.msk.bf16.mxu1 %vm315_vm1, %v6952_v21 }
0x21b9   :  { %v6890_v63 = vadd.f32 %v7648_v25, %v6889_v22  ;;  %v8861_v11 = vpop.f32.mrb[230].mxu0  ;;  %8879 = vmatmul.mubr.msk.bf16.vlgmr.msra.gmra.mrb[224].mxu1 %vm315_vm1, %v6953_v26 }
0x21ba   :  { %v6901_v49 = vadd.f32 %v8861_v11, %v7648_v25  ;;  %v6892_v1 = vpop.f32.mrb[231].mxu0  ;;  %v6942_v29 = vmax.f32 %v6898_v57, 0.0 }
0x21bb   :  { %v6893_v24 = vadd.f32 %v7648_v25, %v6892_v1  ;;  %v6940_v19 = vmax.f32 %v6890_v63, 0.0 }
0x21bc   :  { %v6943_v7 = vmax.f32 %v6901_v49, 0.0 }
0x21bd   :  { %v6941_v48 = vmax.f32 %v6893_v24, 0.0 }
0x21be   :  { %v6955_v40 = vpack.c.bf16 %v6943_v7, %v6942_v29 }
0x21bf   :  { %v6954_v9 = vpack.c.bf16 %v6941_v48, %v6940_v19  ;;  %v8864_v51 = vpop.f32.mrb[232].mxu0 }
0x21c0   :  { %v6914_v30 = vadd.f32 %v8864_v51, %v7648_v25  ;;  %v6905_v18 = vpop.f32.mrb[233].mxu0 }
0x21c1   :  { %v6906_v58 = vadd.f32 %v7648_v25, %v6905_v18  ;;  %v8865_v2 = vpop.f32.mrb[234].mxu0  ;;  %8882 = vmatprep.mubr.msk.bf16.mxu1 %vm315_vm1, %v6954_v9 }
0x21c2   :  { %v6917_v43 = vadd.f32 %v8865_v2, %v7648_v25  ;;  %v6908_v37 = vpop.f32.mrb[235].mxu0  ;;  %8883 = vmatmul.mubr.msk.bf16.gmra.mrb[228].mxu1 %vm315_vm1, %v6955_v40  ;;  %v6946_v15 = vmax.f32 %v6914_v30, 0.0 }
0x21c3   :  { %v6909_v3 = vadd.f32 %v7648_v25, %v6908_v37  ;;  %v6944_v20 = vmax.f32 %v6906_v58, 0.0 }
0x21c4   :  { %v6947_v16 = vmax.f32 %v6917_v43, 0.0 }
0x21c5   :  { %v6945_v33 = vmax.f32 %v6909_v3, 0.0 }
0x21c6   :  { %v6957_v36 = vpack.c.bf16 %v6947_v16, %v6946_v15 }
0x21c7   :  { %v6956_v50 = vpack.c.bf16 %v6945_v33, %v6944_v20 }
0x21c9   :  { %8886 = vmatprep.mubr.msk.bf16.mxu1 %vm315_vm1, %v6956_v50 }
0x21ca   :  { %8887 = vmatmul.mubr.msk.bf16.gmra.mrb[232].mxu1 %vm315_vm1, %v6957_v36 }
0x21e8   :  { %v8868_v62 = vpop.f32.mrb[236].mxu0 }
0x21e9   :  { %v6930_v17 = vadd.f32 %v8868_v62, %v7648_v25  ;;  %v6921_v55 = vpop.f32.mrb[237].mxu0 }
0x21ea   :  { %v6922_v10 = vadd.f32 %v7648_v25, %v6921_v55  ;;  %v8869_v27 = vpop.f32.mrb[238].mxu0 }
0x21eb   :  { %v6933_v31 = vadd.f32 %v8869_v27, %v7648_v25  ;;  %v6924_v60 = vpop.f32.mrb[239].mxu0  ;;  %v6950_v38 = vmax.f32 %v6930_v17, 0.0 }
0x21ec   :  { %v6925_v23 = vadd.f32 %v7648_v25, %v6924_v60  ;;  %v6948_v6 = vmax.f32 %v6922_v10, 0.0 }
0x21ed   :  { %v6951_v47 = vmax.f32 %v6933_v31, 0.0 }
0x21ee   :  { %v6949_v5 = vmax.f32 %v6925_v23, 0.0 }
0x21ef   :  { %v6959_v41 = vpack.c.bf16 %v6951_v47, %v6950_v38 }
0x21f0   :  { %v6958_v54 = vpack.c.bf16 %v6949_v5, %v6948_v6 }
0x21f2   :  { %8890 = vmatprep.mubr.msk.bf16.mxu1 %vm315_vm1, %v6958_v54 }
0x21f3   :  { %8891 = vmatmul.mubr.msk.bf16.gmra.mrb[236].mxu1 %vm315_vm1, %v6959_v41 }
0x228c   :  { %v8880_v35 = vpop.f32.mrb[224].mxu1 }
0x228d   :  { %v7068_v13 = vadd.f32 %v8880_v35, %v14050_v56  ;;  %v7059_v26 = vpop.f32.mrb[225].mxu1 }
0x228e   :  { %v7060_v25 = vadd.f32 %v14050_v56, %v7059_v26  ;;  %v8881_v21 = vpop.f32.mrb[226].mxu1 }
0x228f   :  { %v14055_v59 = vadd.f32 %v7068_v13, %v13944_v44  ;;  %v7071_v57 = vadd.f32 %v8881_v21, %v14050_v56  ;;  %v7062_v22 = vpop.f32.mrb[227].mxu1 }
0x2290   :  { %v7063_v63 = vadd.f32 %v14050_v56, %v7062_v22  ;;  %v14060_v11 = vadd.f32 %v7060_v25, %v13932_v42 }
0x2291   :  { %v14063_v49 = vadd.f32 %v7071_v57, %v13947_v0  ;;  %v7148_v1 = vsel %vm484_vm2, %v14055_v59, 0.0 }
0x2292   :  { %7149 = vadd.xlane.f32.xlu0 %v7148_v1  ;;  %v14068_v24 = vadd.f32 %v7063_v63, %v13935_v8  ;;  %v7142_v7 = vsel %vm484_vm2, %v14060_v11, 0.0 }
0x2293   :  { %v7151_v44 = vsel %vm484_vm2, %v14063_v49, 0.0 }
0x2294   :  { %7152 = vadd.xlane.f32.xlu1 %v7151_v44  ;;  %v7145_v40 = vsel %vm484_vm2, %v14068_v24, 0.0 }
0x2295   :  { %v8884_v29 = vpop.f32.mrb[228].mxu1 }
0x2296   :  { %v7084_v42 = vadd.f32 %v8884_v29, %v14050_v56  ;;  %v7075_v19 = vpop.f32.mrb[229].mxu1  ;;  %7143 = vadd.xlane.f32.xlu0 %v7142_v7 }
0x2297   :  { %v7076_v0 = vadd.f32 %v14050_v56, %v7075_v19  ;;  %v8885_v48 = vpop.f32.mrb[230].mxu1 }
0x2298   :  { %v14079_v8 = vadd.f32 %v7084_v42, %v13975_v52  ;;  %v7087_v9 = vadd.f32 %v8885_v48, %v14050_v56  ;;  %v7078_v51 = vpop.f32.mrb[231].mxu1  ;;  %7146 = vadd.xlane.f32.xlu1 %v7145_v40 }
0x2299   :  { %v7079_v30 = vadd.f32 %v14050_v56, %v7078_v51  ;;  %v14084_v18 = vadd.f32 %v7076_v0, %v13962_v12 }
0x229a   :  { %v14087_v58 = vadd.f32 %v7087_v9, %v13970_v46  ;;  %v7160_v2 = vsel %vm484_vm2, %v14079_v8, 0.0 }
0x229b   :  { %7161 = vadd.xlane.f32.xlu0 %v7160_v2  ;;  %v14092_v43 = vadd.f32 %v7079_v30, %v13958_v61  ;;  %v7154_v12 = vsel %vm484_vm2, %v14084_v18, 0.0 }
0x229c   :  { %v7163_v52 = vsel %vm484_vm2, %v14087_v58, 0.0 }
0x229d   :  { %7164 = vadd.xlane.f32.xlu1 %v7163_v52  ;;  %v8888_v37 = vpop.f32.mrb[232].mxu1  ;;  %v7157_v36 = vsel %vm484_vm2, %v14092_v43, 0.0 }
0x229e   :  { %v7100_v3 = vadd.f32 %v8888_v37, %v14050_v56  ;;  %v7091_v15 = vpop.f32.mrb[233].mxu1 }
0x229f   :  { %v7092_v46 = vadd.f32 %v14050_v56, %v7091_v15  ;;  %7155 = vadd.xlane.f32.xlu0 %v7154_v12  ;;  %v8889_v16 = vpop.f32.mrb[234].mxu1 }
0x22a0   :  { %v14101_v20 = vadd.f32 %v7100_v3, %v13999_v14  ;;  %v7103_v61 = vadd.f32 %v8889_v16, %v14050_v56  ;;  %v7094_v33 = vpop.f32.mrb[235].mxu1 }
0x22a1   :  { %v7095_v50 = vadd.f32 %v14050_v56, %v7094_v33  ;;  %7158 = vadd.xlane.f32.xlu1 %v7157_v36  ;;  %v14108_v62 = vadd.f32 %v7092_v46, %v13988_v34 }
0x22a2   :  { %v14111_v17 = vadd.f32 %v7103_v61, %v13995_v4  ;;  %v7172_v55 = vsel %vm484_vm2, %v14101_v20, 0.0 }
0x22a3   :  { %7173 = vadd.xlane.f32.xlu0 %v7172_v55  ;;  %v14116_v14 = vadd.f32 %v7095_v50, %v13983_v28  ;;  %v7166_v27 = vsel %vm484_vm2, %v14108_v62, 0.0 }
0x22a4   :  { %v7175_v10 = vsel %vm484_vm2, %v14111_v17, 0.0 }
0x22a5   :  { %7176 = vadd.xlane.f32.xlu1 %v7175_v10  ;;  %v7169_v34 = vsel %vm484_vm2, %v14116_v14, 0.0 }
0x22a7   :  { %7167 = vadd.xlane.f32.xlu0 %v7166_v27 }
0x22a9   :  { %7170 = vadd.xlane.f32.xlu1 %v7169_v34 }
0x22c6   :  { %v8892_v4 = vpop.f32.mrb[236].mxu1 }
0x22c7   :  { %v7107_v31 = vpop.f32.mrb[237].mxu1  ;;  %v7116_v60 = vadd.f32 %v8892_v4, %v14050_v56 }
0x22c8   :  { %v7108_v23 = vadd.f32 %v14050_v56, %v7107_v31  ;;  %v8893_v28 = vpop.f32.mrb[238].mxu1 }
0x22c9   :  { %v7119_v38 = vadd.f32 %v8893_v28, %v14050_v56  ;;  %v7110_v47 = vpop.f32.mrb[239].mxu1  ;;  %v14132_v41 = vadd.f32 %v7116_v60, %v14021_v53 }
0x22ca   :  { %v14128_v6 = vadd.f32 %v7108_v23, %v14011_v32  ;;  %v7111_v5 = vadd.f32 %v14050_v56, %v7110_v47 }
0x22cb   :  { %v14140_v13 = vadd.f32 %v7119_v38, %v14025_v45  ;;  %v7184_v32 = vsel %vm484_vm2, %v14132_v41, 0.0 }
0x22cc   :  { %v14135_v54 = vadd.f32 %v7111_v5, %v14014_v39  ;;  %v7178_v35 = vsel %vm484_vm2, %v14128_v6, 0.0 }
0x22cd   :  { %7179 = vadd.xlane.f32.xlu0 %v7178_v35  ;;  %v7187_v53 = vsel %vm484_vm2, %v14140_v13, 0.0 }
0x22ce   :  { %v7181_v26 = vsel %vm484_vm2, %v14135_v54, 0.0 }
0x22cf   :  { %7182 = vadd.xlane.f32.xlu1 %v7181_v26 }
0x22d1   :  { %7185 = vadd.xlane.f32.xlu0 %v7184_v32 }
0x22d3   :  { %7188 = vadd.xlane.f32.xlu1 %v7187_v53 }
0x231f   :  { %v7150_v39 = vpop.xlane.xlu0 %7149 }
0x2320   :  { %v7192_v56 = vmul.f32 0.03125, %v7150_v39 }
0x2321   :  { %v7153_v25 = vpop.xlane.xlu1 %7152 }
0x2322   :  { %v14149_v21 = vsub.f32 %v14055_v59, %v7192_v56  ;;  %v7193_v45 = vmul.f32 0.03125, %v7153_v25 }
0x2323   :  { %v7144_v57 = vpop.xlane.xlu0 %7143 }
0x2324   :  { %v14152_v22 = vsub.f32 %v14063_v49, %v7193_v45  ;;  %v7190_v63 = vmul.f32 0.03125, %v7144_v57  ;;  %v7224_v1 = vmul.f32 %v14149_v21, %v14149_v21 }
0x2325   :  { %v7147_v44 = vpop.xlane.xlu1 %7146 }
0x2326   :  { %v14157_v29 = vsub.f32 %v14060_v11, %v7190_v63  ;;  %v7191_v7 = vmul.f32 0.03125, %v7147_v44  ;;  %v7244_v42 = vsel %vm484_vm2, %v7224_v1, 0.0  ;;  %v7225_v59 = vmul.f32 %v14152_v22, %v14152_v22 }
0x2327   :  { %7245 = vadd.xlane.f32.xlu0 %v7244_v42 }
0x2328   :  { %v14163_v19 = vsub.f32 %v14068_v24, %v7191_v7  ;;  %v7162_v49 = vpop.xlane.xlu0 %7161  ;;  %v7247_v0 = vsel %vm484_vm2, %v7225_v59, 0.0  ;;  %v7222_v48 = vmul.f32 %v14157_v29, %v14157_v29 }
0x2329   :  { %v7196_v40 = vmul.f32 0.03125, %v7162_v49  ;;  %7248 = vadd.xlane.f32.xlu1 %v7247_v0 }
0x232a   :  { %v7165_v11 = vpop.xlane.xlu1 %7164  ;;  %v7238_v9 = vsel %vm484_vm2, %v7222_v48, 0.0  ;;  %v7223_v51 = vmul.f32 %v14163_v19, %v14163_v19 }
0x232b   :  { %v14172_v30 = vsub.f32 %v14079_v8, %v7196_v40  ;;  %v7197_v2 = vmul.f32 0.03125, %v7165_v11  ;;  %7239 = vadd.xlane.f32.xlu0 %v7238_v9 }
0x232c   :  { %v7156_v24 = vpop.xlane.xlu0 %7155  ;;  %v7241_v52 = vsel %vm484_vm2, %v7223_v51, 0.0 }
0x232d   :  { %v14176_v37 = vsub.f32 %v14087_v58, %v7197_v2  ;;  %v7194_v3 = vmul.f32 0.03125, %v7156_v24  ;;  %7242 = vadd.xlane.f32.xlu1 %v7241_v52  ;;  %v7228_v15 = vmul.f32 %v14172_v30, %v14172_v30 }
0x232e   :  { %v7159_v12 = vpop.xlane.xlu1 %7158 }
0x232f   :  { %v14181_v46 = vsub.f32 %v14084_v18, %v7194_v3  ;;  %v7195_v16 = vmul.f32 0.03125, %v7159_v12  ;;  %v7256_v8 = vsel %vm484_vm2, %v7228_v15, 0.0  ;;  %v7229_v61 = vmul.f32 %v14176_v37, %v14176_v37 }
0x2330   :  { %7257 = vadd.xlane.f32.xlu0 %v7256_v8  ;;  %v7174_v33 = vpop.xlane.xlu0 %7173 }
0x2331   :  { %v14187_v58 = vsub.f32 %v14092_v43, %v7195_v16  ;;  %v7200_v36 = vmul.f32 0.03125, %v7174_v33  ;;  %v7259_v50 = vsel %vm484_vm2, %v7229_v61, 0.0  ;;  %v7226_v55 = vmul.f32 %v14181_v46, %v14181_v46 }
0x2332   :  { %v7177_v10 = vpop.xlane.xlu1 %7176  ;;  %7260 = vadd.xlane.f32.xlu1 %v7259_v50 }
0x2333   :  { %v14193_v18 = vsub.f32 %v14101_v20, %v7200_v36  ;;  %v7201_v27 = vmul.f32 0.03125, %v7177_v10  ;;  %v7250_v34 = vsel %vm484_vm2, %v7226_v55, 0.0  ;;  %v7227_v4 = vmul.f32 %v14187_v58, %v14187_v58 }
0x2334   :  { %7251 = vadd.xlane.f32.xlu0 %v7250_v34  ;;  %v7168_v43 = vpop.xlane.xlu0 %7167 }
0x2335   :  { %v14199_v31 = vsub.f32 %v14111_v17, %v7201_v27  ;;  %v7198_v60 = vmul.f32 0.03125, %v7168_v43  ;;  %v7253_v23 = vsel %vm484_vm2, %v7227_v4, 0.0  ;;  %v7232_v28 = vmul.f32 %v14193_v18, %v14193_v18 }
0x2336   :  { %v7171_v38 = vpop.xlane.xlu1 %7170  ;;  %7254 = vadd.xlane.f32.xlu1 %v7253_v23  ;;  %v14247_v23 = vld [vmem:[%s14386_s21 + $0x1] ss:$0 sm:$0xff] }
0x2337   :  { %v14205_v20 = vsub.f32 %v14108_v62, %v7198_v60  ;;  %v7199_v47 = vmul.f32 0.03125, %v7171_v38  ;;  %v7268_v5 = vsel %vm484_vm2, %v7232_v28, 0.0  ;;  %v7233_v35 = vmul.f32 %v14199_v31, %v14199_v31 }
0x2338   :  { %7269 = vadd.xlane.f32.xlu0 %v7268_v5 }
0x2339   :  { %v14211_v17 = vsub.f32 %v14116_v14, %v7199_v47  ;;  %v7271_v26 = vsel %vm484_vm2, %v7233_v35, 0.0  ;;  %v7230_v32 = vmul.f32 %v14205_v20, %v14205_v20 }
0x233a   :  { %7272 = vadd.xlane.f32.xlu1 %v7271_v26  ;;  %v14253_v26 = vld [vmem:[%s14387_s22 + $0x1] ss:$0 sm:$0xff] }
0x233b   :  { %v7262_v53 = vsel %vm484_vm2, %v7230_v32, 0.0  ;;  %v7231_v62 = vmul.f32 %v14211_v17, %v14211_v17 }
0x233c   :  { %7263 = vadd.xlane.f32.xlu0 %v7262_v53 }
0x233d   :  { %v7265_v39 = vsel %vm484_vm2, %v7231_v62, 0.0 }
0x233e   :  { %7266 = vadd.xlane.f32.xlu1 %v7265_v39 }
0x235a   :  { %v7180_v56 = vpop.xlane.xlu0 %7179 }
0x235b   :  { %v7202_v25 = vmul.f32 0.03125, %v7180_v56 }
0x235c   :  { %v7183_v45 = vpop.xlane.xlu1 %7182 }
0x235d   :  { %v14221_v14 = vsub.f32 %v14128_v6, %v7202_v25  ;;  %v7203_v57 = vmul.f32 0.03125, %v7183_v45 }
0x235e   :  { %v7186_v63 = vpop.xlane.xlu0 %7185 }
0x235f   :  { %v14224_v1 = vsub.f32 %v14135_v54, %v7203_v57  ;;  %v7204_v44 = vmul.f32 0.03125, %v7186_v63  ;;  %v7234_v7 = vmul.f32 %v14221_v14, %v14221_v14 }
0x2360   :  { %v7189_v42 = vpop.xlane.xlu1 %7188 }
0x2361   :  { %v14229_v59 = vsub.f32 %v14132_v41, %v7204_v44  ;;  %v7205_v49 = vmul.f32 0.03125, %v7189_v42  ;;  %v7274_v0 = vsel %vm484_vm2, %v7234_v7, 0.0  ;;  %v7235_v6 = vmul.f32 %v14224_v1, %v14224_v1 }
0x2362   :  { %7275 = vadd.xlane.f32.xlu0 %v7274_v0 }
0x2363   :  { %v14235_v48 = vsub.f32 %v14140_v13, %v7205_v49  ;;  %v7277_v54 = vsel %vm484_vm2, %v7235_v6, 0.0  ;;  %v7236_v40 = vmul.f32 %v14229_v59, %v14229_v59 }
0x2364   :  { %7278 = vadd.xlane.f32.xlu1 %v7277_v54 }
0x2365   :  { %v7280_v11 = vsel %vm484_vm2, %v7236_v40, 0.0  ;;  %v7237_v41 = vmul.f32 %v14235_v48, %v14235_v48 }
0x2366   :  { %7281 = vadd.xlane.f32.xlu0 %v7280_v11 }
0x2367   :  { %v7283_v9 = vsel %vm484_vm2, %v7237_v41, 0.0 }
0x2368   :  { %7284 = vadd.xlane.f32.xlu1 %v7283_v9 }
0x23b4   :  { %v7246_v51 = vpop.xlane.xlu0 %7245 }
0x23b5   :  { %v7288_v2 = vmul.f32 0.03125, %v7246_v51 }
0x23b6   :  { %v7249_v24 = vpop.xlane.xlu1 %7248 }
0x23b7   :  { %v7304_v13 = vadd.f32 1e-05, %v7288_v2  ;;  %v7289_v52 = vmul.f32 0.03125, %v7249_v24 }
0x23b8   :  { %v7240_v3 = vpop.xlane.xlu0 %7239 }
0x23b9   :  { %9847 = vrsqrt.f32 %v7304_v13  ;;  %v7305_v15 = vadd.f32 1e-05, %v7289_v52  ;;  %v7286_v12 = vmul.f32 0.03125, %v7240_v3 }
0x23ba   :  { %v7243_v16 = vpop.xlane.xlu1 %7242 }
0x23bb   :  { %9849 = vrsqrt.f32 %v7305_v15  ;;  %v7302_v8 = vadd.f32 1e-05, %v7286_v12  ;;  %v7287_v61 = vmul.f32 0.03125, %v7243_v16 }
0x23bd   :  { %9851 = vrsqrt.f32 %v7302_v8  ;;  %v7303_v33 = vadd.f32 1e-05, %v7287_v61  ;;  %v7258_v36 = vpop.xlane.xlu0 %7257 }
0x23be   :  { %v7292_v50 = vmul.f32 0.03125, %v7258_v36 }
0x23bf   :  { %9853 = vrsqrt.f32 %v7303_v33  ;;  %v7261_v55 = vpop.xlane.xlu1 %7260 }
0x23c0   :  { %v7308_v10 = vadd.f32 1e-05, %v7292_v50  ;;  %v7293_v27 = vmul.f32 0.03125, %v7261_v55 }
0x23c1   :  { %v7252_v34 = vpop.xlane.xlu0 %7251 }
0x23c2   :  { %9855 = vrsqrt.f32 %v7308_v10  ;;  %v7309_v4 = vadd.f32 1e-05, %v7293_v27  ;;  %v7290_v43 = vmul.f32 0.03125, %v7252_v34 }
0x23c3   :  { %v9848_v60 = vpop.eup %9847  ;;  %v7255_v28 = vpop.xlane.xlu1 %7254 }
0x23c4   :  { %v7336_v38 = vmul.f32 %v9848_v60, %v14149_v21  ;;  %9857 = vrsqrt.f32 %v7309_v4  ;;  %v7306_v47 = vadd.f32 1e-05, %v7290_v43  ;;  %v7291_v5 = vmul.f32 0.03125, %v7255_v28 }
0x23c5   :  { %v9850_v35 = vpop.eup %9849  ;;  %v7270_v32 = vpop.xlane.xlu0 %7269 }
0x23c6   :  { %v7358_v53 = vmul.f32 %v14247_v23, %v7336_v38  ;;  %v7337_v62 = vmul.f32 %v9850_v35, %v14152_v22  ;;  %9859 = vrsqrt.f32 %v7306_v47  ;;  %v7307_v39 = vadd.f32 1e-05, %v7291_v5 }
0x23c7   :  { %v9852_v56 = vpop.eup %9851  ;;  %v7296_v25 = vmul.f32 0.03125, %v7270_v32  ;;  %v7273_v45 = vpop.xlane.xlu1 %7272 }
0x23c8   :  { %v7380_v21 = vadd.f32 %v14253_v26, %v7358_v53  ;;  %v7359_v57 = vmul.f32 %v14247_v23, %v7337_v62  ;;  %v7334_v63 = vmul.f32 %v9852_v56, %v14157_v29  ;;  %9861 = vrsqrt.f32 %v7307_v39 }
0x23c9   :  { %v9854_v44 = vpop.eup %9853  ;;  %v7312_v7 = vadd.f32 1e-05, %v7296_v25  ;;  %v7297_v42 = vmul.f32 0.03125, %v7273_v45  ;;  %v7264_v49 = vpop.xlane.xlu0 %7263 }
0x23ca   :  { %7396 = vst.msk [vmem:[%s14389_s23 + $0x10] sm:$0xff] %vm484_vm2, %v7380_v21  ;;  %v7381_v22 = vadd.f32 %v14253_v26, %v7359_v57  ;;  %v7356_v0 = vmul.f32 %v14247_v23, %v7334_v63  ;;  %v7335_v6 = vmul.f32 %v9854_v44, %v14163_v19  ;;  %v7294_v54 = vmul.f32 0.03125, %v7264_v49 }
0x23cb   :  { %9863 = vrsqrt.f32 %v7312_v7  ;;  %v7313_v40 = vadd.f32 1e-05, %v7297_v42  ;;  %v7267_v29 = vpop.xlane.xlu1 %7266 }
0x23cc   :  { %v9856_v11 = vpop.eup %9855  ;;  %7397 = vst.msk [vmem:[%s14389_s23 + $0x18] sm:$0xff] %vm484_vm2, %v7381_v22  ;;  %v7378_v41 = vadd.f32 %v14253_v26, %v7356_v0  ;;  %v7357_v9 = vmul.f32 %v14247_v23, %v7335_v6  ;;  %v7310_v51 = vadd.f32 1e-05, %v7294_v54  ;;  %v7295_v2 = vmul.f32 0.03125, %v7267_v29 }
0x23cd   :  { %v7340_v24 = vmul.f32 %v9856_v11, %v14172_v30  ;;  %9865 = vrsqrt.f32 %v7313_v40 }
0x23ce   :  { %v9858_v19 = vpop.eup %9857  ;;  %7394 = vst.msk [vmem:[%s14389_s23] sm:$0xff] %vm484_vm2, %v7378_v41  ;;  %v7379_v13 = vadd.f32 %v14253_v26, %v7357_v9  ;;  %9867 = vrsqrt.f32 %v7310_v51  ;;  %v7311_v52 = vadd.f32 1e-05, %v7295_v2 }
0x23cf   :  { %v7362_v3 = vmul.f32 %v14247_v23, %v7340_v24  ;;  %v7341_v15 = vmul.f32 %v9858_v19, %v14176_v37 }
0x23d0   :  { %v9860_v12 = vpop.eup %9859  ;;  %7395 = vst.msk [vmem:[%s14389_s23 + $0x8] sm:$0xff] %vm484_vm2, %v7379_v13  ;;  %9869 = vrsqrt.f32 %v7311_v52 }
0x23d1   :  { %v7384_v30 = vadd.f32 %v14253_v26, %v7362_v3  ;;  %v7363_v16 = vmul.f32 %v14247_v23, %v7341_v15  ;;  %v7338_v8 = vmul.f32 %v9860_v12, %v14181_v46 }
0x23d2   :  { %v9862_v61 = vpop.eup %9861 }
0x23d3   :  { %7400 = vst.msk [vmem:[%s14389_s23 + $0x30] sm:$0xff] %vm484_vm2, %v7384_v30  ;;  %v7385_v37 = vadd.f32 %v14253_v26, %v7363_v16  ;;  %v7360_v33 = vmul.f32 %v14247_v23, %v7338_v8  ;;  %v7339_v36 = vmul.f32 %v9862_v61, %v14187_v58 }
0x23d5   :  { %v9864_v50 = vpop.eup %9863  ;;  %7401 = vst.msk [vmem:[%s14389_s23 + $0x38] sm:$0xff] %vm484_vm2, %v7385_v37  ;;  %v7382_v46 = vadd.f32 %v14253_v26, %v7360_v33  ;;  %v7361_v55 = vmul.f32 %v14247_v23, %v7339_v36 }
0x23d6   :  { %v7344_v10 = vmul.f32 %v9864_v50, %v14193_v18 }
0x23d7   :  { %v9866_v27 = vpop.eup %9865  ;;  %7398 = vst.msk [vmem:[%s14389_s23 + $0x20] sm:$0xff] %vm484_vm2, %v7382_v46  ;;  %v7383_v58 = vadd.f32 %v14253_v26, %v7361_v55 }
0x23d8   :  { %v9868_v34 = vpop.eup %9867  ;;  %v7366_v4 = vmul.f32 %v14247_v23, %v7344_v10  ;;  %v7345_v43 = vmul.f32 %v9866_v27, %v14199_v31 }
0x23d9   :  { %7399 = vst.msk [vmem:[%s14389_s23 + $0x28] sm:$0xff] %vm484_vm2, %v7383_v58  ;;  %v7342_v18 = vmul.f32 %v9868_v34, %v14205_v20 }
0x23da   :  { %v9870_v60 = vpop.eup %9869  ;;  %v7388_v28 = vadd.f32 %v14253_v26, %v7366_v4  ;;  %v7367_v38 = vmul.f32 %v14247_v23, %v7345_v43 }
0x23db   :  { %v7364_v47 = vmul.f32 %v14247_v23, %v7342_v18  ;;  %v7343_v5 = vmul.f32 %v9870_v60, %v14211_v17 }
0x23dc   :  { %7404 = vst.msk [vmem:[%s14389_s23 + $0x50] sm:$0xff] %vm484_vm2, %v7388_v28  ;;  %v7389_v31 = vadd.f32 %v14253_v26, %v7367_v38 }
0x23dd   :  { %v7386_v35 = vadd.f32 %v14253_v26, %v7364_v47  ;;  %v7365_v20 = vmul.f32 %v14247_v23, %v7343_v5 }
0x23de   :  { %7405 = vst.msk [vmem:[%s14389_s23 + $0x58] sm:$0xff] %vm484_vm2, %v7389_v31 }
0x23df   :  { %7402 = vst.msk [vmem:[%s14389_s23 + $0x40] sm:$0xff] %vm484_vm2, %v7386_v35  ;;  %v7387_v17 = vadd.f32 %v14253_v26, %v7365_v20 }
0x23e1   :  { %7403 = vst.msk [vmem:[%s14389_s23 + $0x48] sm:$0xff] %vm484_vm2, %v7387_v17 }
0x23ef   :  { %v7276_v32 = vpop.xlane.xlu0 %7275 }
0x23f0   :  { %v7298_v53 = vmul.f32 0.03125, %v7276_v32 }
0x23f1   :  { %v7279_v62 = vpop.xlane.xlu1 %7278 }
0x23f2   :  { %v7314_v39 = vadd.f32 1e-05, %v7298_v53  ;;  %v7299_v56 = vmul.f32 0.03125, %v7279_v62 }
0x23f3   :  { %v7282_v25 = vpop.xlane.xlu0 %7281 }
0x23f4   :  { %9871 = vrsqrt.f32 %v7314_v39  ;;  %v7315_v45 = vadd.f32 1e-05, %v7299_v56  ;;  %v7300_v21 = vmul.f32 0.03125, %v7282_v25 }
0x23f5   :  { %v7285_v57 = vpop.xlane.xlu1 %7284 }
0x23f6   :  { %9873 = vrsqrt.f32 %v7315_v45  ;;  %v7316_v63 = vadd.f32 1e-05, %v7300_v21  ;;  %v7301_v44 = vmul.f32 0.03125, %v7285_v57 }
0x23f8   :  { %9875 = vrsqrt.f32 %v7316_v63  ;;  %v7317_v7 = vadd.f32 1e-05, %v7301_v44 }
0x23fa   :  { %9877 = vrsqrt.f32 %v7317_v7 }
0x23fe   :  { %v9872_v42 = vpop.eup %9871 }
0x23ff   :  { %v7346_v49 = vmul.f32 %v9872_v42, %v14221_v14 }
0x2400   :  { %v9874_v22 = vpop.eup %9873 }
0x2401   :  { %v7368_v0 = vmul.f32 %v14247_v23, %v7346_v49  ;;  %v7347_v6 = vmul.f32 %v9874_v22, %v14224_v1 }
0x2402   :  { %v9876_v54 = vpop.eup %9875 }
0x2403   :  { %v7390_v40 = vadd.f32 %v14253_v26, %v7368_v0  ;;  %v7369_v29 = vmul.f32 %v14247_v23, %v7347_v6  ;;  %v7348_v11 = vmul.f32 %v9876_v54, %v14229_v59 }
0x2404   :  { %v9878_v41 = vpop.eup %9877 }
0x2405   :  { %7406 = vst.msk [vmem:[%s14389_s23 + $0x60] sm:$0xff] %vm484_vm2, %v7390_v40  ;;  %v7391_v14 = vadd.f32 %v14253_v26, %v7369_v29  ;;  %v7370_v9 = vmul.f32 %v14247_v23, %v7348_v11  ;;  %v7349_v51 = vmul.f32 %v9878_v41, %v14235_v48 }
0x2407   :  { %7407 = vst.msk [vmem:[%s14389_s23 + $0x68] sm:$0xff] %vm484_vm2, %v7391_v14  ;;  %v7392_v1 = vadd.f32 %v14253_v26, %v7370_v9  ;;  %v7371_v59 = vmul.f32 %v14247_v23, %v7349_v51 }
0x2409   :  { %7408 = vst.msk [vmem:[%s14389_s23 + $0x70] sm:$0xff] %vm484_vm2, %v7392_v1  ;;  %v7393_v2 = vadd.f32 %v14253_v26, %v7371_v59 }
0x240b   :  { %7409 = vst.msk [vmem:[%s14389_s23 + $0x78] sm:$0xff] %vm484_vm2, %v7393_v2 }

</bundles_post_ra>
